<compile_context>
chip_gen: v6e
topology: v6e:2x2x1
jax: 0.10.0
libtpu: 0.0.40
codegen_flags: <defaults>
</compile_context>

<pallas_src>
import functools

import jax
import jax.numpy as jnp
from jax.experimental import pallas as pl
from jax.experimental.pallas import tpu as pltpu

_VMEM_LIMIT = 32 * 1024 * 1024


def _round_up(x, m):
    return (x + m - 1) // m * m


# ---------------------------------------------------------------------------
# Pallas kernels
# ---------------------------------------------------------------------------
def _conv3x3_kernel(x_ref, w_ref, b_ref, o_ref, *, row_stride, cinp, mout):
    """One (image, Cout-block) step of Conv2d(3x3, stride=1, pad=1) + ReLU.

    x_ref : (Pp, Cinp)       f32  flattened zero-padded image rows
    w_ref : (9*Cinp, TCout)  bf16 tap-major weights
    b_ref : (1, TCout)       f32
    o_ref : (Mout, TCout)    f32  Mout = H*(W+2); last 2 columns per row are junk
    """
    acc = jnp.zeros(o_ref.shape, jnp.float32)
    for t in range(9):
        kh, kw = divmod(t, 3)
        off = kh * row_stride + kw                       # static shift of this tap
        a = x_ref[off:off + mout, :].astype(jnp.bfloat16)
        wt = w_ref[t * cinp:(t + 1) * cinp, :]
        acc = acc + jnp.dot(a, wt, preferred_element_type=jnp.float32)
    r = jnp.maximum(acc + b_ref[...], 0.0)               # f32 bias + ReLU epilogue
    o_ref[...] = r.astype(o_ref.dtype)


def _fc_kernel(a_ref, w_ref, b_ref, o_ref, acc_ref, *, relu):
    k = pl.program_id(1)

    @pl.when(k == 0)
    def _():
        acc_ref[...] = jnp.zeros_like(acc_ref)

    acc_ref[...] += jnp.dot(a_ref[...], w_ref[...],
                            preferred_element_type=jnp.float32)

    @pl.when(k == pl.num_programs(1) - 1)
    def _():
        r = acc_ref[...] + b_ref[...]
        if relu:
            r = jnp.maximum(r, 0.0)
        o_ref[...] = r.astype(o_ref.dtype)


def _max4_kernel(a_ref, b_ref, c_ref, d_ref, o_ref):
    o_ref[...] = jnp.maximum(jnp.maximum(a_ref[...], b_ref[...]),
                             jnp.maximum(c_ref[...], d_ref[...]))


# ---------------------------------------------------------------------------
# Layer wrappers
# ---------------------------------------------------------------------------
def conv3x3_relu(x, w_flat, b_row):
    """x: (N,H,W,Cin) f32; w_flat: (9*Cinp,Cout) bf16; b_row: (1,Cout) f32 -> (N,H,W,Cout)."""
    N, H, W, Cin = x.shape
    Cout = w_flat.shape[1]
    cinp = w_flat.shape[0] // 9
    wp2 = W + 2
    mout = H * wp2
    assert mout % 8 == 0  # TODO(synk): pad Mout to a sublane multiple for odd spatial sizes.
    p_rows = (H + 2) * wp2
    pp = _round_up(p_rows + 2, 8)      # +2 rows keep the (2,2) tap window in bounds

    xp = jnp.pad(x, ((0, 0), (1, 1), (1, 1), (0, cinp - Cin)))     # spatial + channel pad
    xf = xp.reshape(N, p_rows, cinp)
    xf = jnp.pad(xf, ((0, 0), (0, pp - p_rows), (0, 0))).reshape(N * pp, cinp)

    tc = min(Cout, 256)
    out = pl.pallas_call(
        functools.partial(_conv3x3_kernel, row_stride=wp2, cinp=cinp, mout=mout),
        out_shape=jax.ShapeDtypeStruct((N * mout, Cout), jnp.float32),
        grid_spec=pltpu.PrefetchScalarGridSpec(
            num_scalar_prefetch=0,
            grid=(N, Cout // tc),
            in_specs=[
                pl.BlockSpec((pp, cinp), lambda n, j: (n, 0)),
                pl.BlockSpec((9 * cinp, tc), lambda n, j: (0, j)),
                pl.BlockSpec((1, tc), lambda n, j: (0, j)),
            ],
            out_specs=pl.BlockSpec((mout, tc), lambda n, j: (n, j)),
        ),
        compiler_params=pltpu.CompilerParams(
            dimension_semantics=("parallel", "parallel"),
            vmem_limit_bytes=_VMEM_LIMIT),
    )(xf, w_flat, b_row)
    return out.reshape(N, H, wp2, Cout)[:, :, :W, :]


def linear_fc(a, w_kn, b_row, *, relu, out_dtype, tk, tn):
    """a: (M,K); w_kn: (Kp,Np) bf16 pre-transposed/padded; b_row: (1,Np) f32."""
    M, K = a.shape
    Kp, Np = w_kn.shape
    assert K <= Kp and Kp % tk == 0 and Np % tn == 0
    Mp = 8                                                # small batch -> pad to 8, not 128
    a_p = jnp.pad(a.astype(jnp.bfloat16), ((0, Mp - M), (0, Kp - K)))
    out = pl.pallas_call(
        functools.partial(_fc_kernel, relu=relu),
        out_shape=jax.ShapeDtypeStruct((Mp, Np), out_dtype),
        grid_spec=pltpu.PrefetchScalarGridSpec(
            num_scalar_prefetch=0,
            grid=(Np // tn, Kp // tk),                    # K is the innermost (reduction) axis
            in_specs=[
                pl.BlockSpec((Mp, tk), lambda j, k: (0, k)),
                pl.BlockSpec((tk, tn), lambda j, k: (k, j)),
                pl.BlockSpec((1, tn), lambda j, k: (0, j)),
            ],
            out_specs=pl.BlockSpec((Mp, tn), lambda j, k: (0, j)),
            scratch_shapes=[pltpu.VMEM((Mp, tn), jnp.float32)],
        ),
        compiler_params=pltpu.CompilerParams(
            dimension_semantics=("parallel", "arbitrary"),
            vmem_limit_bytes=_VMEM_LIMIT),
    )(a_p, w_kn, b_row)
    return out[:M]


def maxpool2x2(x):
    """nn.MaxPool2d(2, 2) on NHWC (C stays the lane dim)."""
    N, H, W, C = x.shape
    Ho, Wo = H // 2, W // 2
    views = [x[:, 0::2, 0::2, :], x[:, 0::2, 1::2, :],
             x[:, 1::2, 0::2, :], x[:, 1::2, 1::2, :]]
    views = [v.reshape(N, Ho * Wo, C) for v in views]
    spec = pl.BlockSpec((1, Ho * Wo, C), lambda n: (n, 0, 0))
    out = pl.pallas_call(
        _max4_kernel,
        out_shape=jax.ShapeDtypeStruct((N, Ho * Wo, C), x.dtype),
        grid_spec=pltpu.PrefetchScalarGridSpec(
            num_scalar_prefetch=0, grid=(N,),
            in_specs=[spec] * 4, out_specs=spec),
        compiler_params=pltpu.CompilerParams(
            dimension_semantics=("parallel",),
            vmem_limit_bytes=_VMEM_LIMIT),
    )(*views)
    return out.reshape(N, Ho, Wo, C)


# ---------------------------------------------------------------------------
# VGG16 definition, deterministic init, one-time weight prep, forward
# ---------------------------------------------------------------------------
VGG16_CFG = [64, 64, "M", 128, 128, "M", 256, 256, 256, "M",
             512, 512, 512, "M", 512, 512, 512, "M"]
_FC_DIMS = [(512 * 7 * 7, 4096), (4096, 4096), (4096, 1000)]
_FC_TILES = [(1792, 1024), (2048, 1024), (2048, 1024)]   # (TK, TN); 25088 % 1792 == 0


def init_params(key):
    """Deterministic VGG16 params in the PyTorch layout: conv (Cout,Cin,3,3), fc (dout,din)."""
    params = {"convs": [], "fcs": []}
    cin = 3
    for v in VGG16_CFG:
        if v == "M":
            continue
        key, wk = jax.random.split(key)
        w = jax.random.normal(wk, (v, cin, 3, 3), jnp.float32) * jnp.sqrt(2.0 / (cin * 9))
        params["convs"].append((w, jnp.zeros((v,), jnp.float32)))
        cin = v
    for din, dout in _FC_DIMS:
        key, wk = jax.random.split(key)
        w = jax.random.normal(wk, (dout, din), jnp.float32) * jnp.sqrt(2.0 / din)
        params["fcs"].append((w, jnp.zeros((dout,), jnp.float32)))
    return params


def prepare_params(params):
    """One-time layout prep hoisted out of the forward: transpose, pad, cast to bf16."""
    convs = []
    for w, b in params["convs"]:
        cout, cin = w.shape[0], w.shape[1]
        cinp = _round_up(cin, 128)                                   # lane-align Cin (3,64 -> 128)
        wt = jnp.transpose(w, (2, 3, 1, 0))                          # (kh, kw, cin, cout)
        wt = jnp.pad(wt, ((0, 0), (0, 0), (0, cinp - cin), (0, 0)))
        convs.append((wt.reshape(9 * cinp, cout).astype(jnp.bfloat16),
                      b.reshape(1, cout).astype(jnp.float32)))
    fcs = []
    for (w, b), (tk, tn) in zip(params["fcs"], _FC_TILES):
        dout, din = w.shape
        kp, np_ = _round_up(din, tk), _round_up(dout, tn)
        wt = jnp.pad(jnp.transpose(w), ((0, kp - din), (0, np_ - dout))).astype(jnp.bfloat16)
        bp = jnp.pad(b, (0, np_ - dout)).reshape(1, np_).astype(jnp.float32)
        fcs.append((wt, bp, dout, tk, tn))
    return {"convs": convs, "fcs": fcs}


def vgg16_forward(x_nchw, prepped):
    x = jnp.transpose(x_nchw, (0, 2, 3, 1)).astype(jnp.float32)      # NHWC once, at entry
    ci = 0
    for v in VGG16_CFG:
        if v == "M":
            x = maxpool2x2(x)
        else:
            w_flat, b_row = prepped["convs"][ci]
            x = conv3x3_relu(x, w_flat, b_row)
            ci += 1

    # nn.AdaptiveAvgPool2d((7, 7))
    N, H, W, C = x.shape
    if (H, W) == (7, 7):
        pass                                       # identity when features are already 7x7
    elif (H, W) == (1, 1):
        x = jnp.broadcast_to(x, (N, 7, 7, C))      # exact: every 7x7 bin averages one pixel
    else:
        # TODO(synk): general AdaptiveAvgPool2d bin arithmetic not needed for these sizes.
        raise NotImplementedError("AdaptiveAvgPool2d handled only for 1x1 / 7x7 features")

    # torch.flatten(x, 1) in NCHW order (Dropout layers are identity at inference)
    x = jnp.transpose(x, (0, 3, 1, 2)).reshape(N, C * 49)

    (w1, b1, d1, k1, n1), (w2, b2, d2, k2, n2), (w3, b3, d3, k3, n3) = prepped["fcs"]
    x = linear_fc(x, w1, b1, relu=True, out_dtype=jnp.bfloat16, tk=k1, tn=n1)[:, :d1]
    x = linear_fc(x, w2, b2, relu=True, out_dtype=jnp.bfloat16, tk=k2, tn=n2)[:, :d2]
    x = linear_fc(x, w3, b3, relu=False, out_dtype=jnp.float32, tk=k3, tn=n3)[:, :d3]
    return x


if __name__ == "__main__":
    key = jax.random.PRNGKey(0)
    pkey, xkey = jax.random.split(key)
    params = init_params(pkey)
    prepped = prepare_params(params)

    # Small-but-valid input: batch=2, 3 channels, 32x32 spatial (NCHW, like PyTorch).
    x = jax.random.normal(xkey, (2, 3, 32, 32), jnp.float32)

    out = vgg16_forward(x, prepped)
    out = jax.block_until_ready(out)
    assert out.shape == (2, 1000) and out.dtype == jnp.float32
    assert bool(jnp.all(jnp.isfinite(out)))
    print("KERNEL_OK")
</pallas_src>

<mosaic_0001>
module attributes {stable_mosaic.version = 11 : i64} {
  func.func @_conv3x3_kernel(%arg0: i32, %arg1: i32, %arg2: memref<1160x128xf32, #tpu.memory_space<vmem>>, %arg3: memref<1152x64xbf16, #tpu.memory_space<vmem>>, %arg4: memref<1x64xf32, #tpu.memory_space<vmem>>, %arg5: memref<1088x64xf32, #tpu.memory_space<vmem>>) attributes {dimension_semantics = [#tpu.dimension_semantics<parallel>, #tpu.dimension_semantics<parallel>], iteration_bounds = array<i64: 2, 1>, scalar_prefetch = 0 : i64, scratch_operands = 0 : i64, tpu.core_type = #tpu.core_type<tc>, window_params = [{transform_indices = @transform_0, window_bounds = array<i64: 1160, 128>}, {transform_indices = @transform_1, window_bounds = array<i64: 1152, 64>}, {transform_indices = @transform_2, window_bounds = array<i64: 1, 64>}, {transform_indices = @transform_3, window_bounds = array<i64: 1088, 64>}]} {
    %cst = arith.constant 0.000000e+00 : f32
    %0 = vector.broadcast %cst : f32 to vector<1088x64xf32>
    %c0 = arith.constant 0 : index
    %c0_0 = arith.constant 0 : index
    %1 = vector.load %arg2[%c0, %c0_0] : memref<1160x128xf32, #tpu.memory_space<vmem>>, vector<1088x128xf32>
    %2 = arith.truncf %1 : vector<1088x128xf32> to vector<1088x128xbf16>
    %c0_1 = arith.constant 0 : index
    %c0_2 = arith.constant 0 : index
    %3 = vector.load %arg3[%c0_1, %c0_2] : memref<1152x64xbf16, #tpu.memory_space<vmem>>, vector<128x64xbf16>
    %cst_3 = arith.constant dense<0.000000e+00> : vector<1088x64xf32>
    %4 = tpu.matmul %2, %3, %cst_3 {dimension_numbers = #tpu.dot_dimension_numbers<[1], [0], [0], [1], [0, 0, 1, 1], [], []>} : vector<1088x128xbf16>, vector<128x64xbf16>, vector<1088x64xf32> -> vector<1088x64xf32>
    %5 = arith.addf %0, %4 : vector<1088x64xf32>
    %c1 = arith.constant 1 : index
    %c0_4 = arith.constant 0 : index
    %6 = vector.load %arg2[%c1, %c0_4] : memref<1160x128xf32, #tpu.memory_space<vmem>>, vector<1088x128xf32>
    %7 = arith.truncf %6 : vector<1088x128xf32> to vector<1088x128xbf16>
    %c128 = arith.constant 128 : index
    %c0_5 = arith.constant 0 : index
    %8 = vector.load %arg3[%c128, %c0_5] : memref<1152x64xbf16, #tpu.memory_space<vmem>>, vector<128x64xbf16>
    %cst_6 = arith.constant dense<0.000000e+00> : vector<1088x64xf32>
    %9 = tpu.matmul %7, %8, %cst_6 {dimension_numbers = #tpu.dot_dimension_numbers<[1], [0], [0], [1], [0, 0, 1, 1], [], []>} : vector<1088x128xbf16>, vector<128x64xbf16>, vector<1088x64xf32> -> vector<1088x64xf32>
    %10 = arith.addf %5, %9 : vector<1088x64xf32>
    %c2 = arith.constant 2 : index
    %c0_7 = arith.constant 0 : index
    %11 = vector.load %arg2[%c2, %c0_7] : memref<1160x128xf32, #tpu.memory_space<vmem>>, vector<1088x128xf32>
    %12 = arith.truncf %11 : vector<1088x128xf32> to vector<1088x128xbf16>
    %c256 = arith.constant 256 : index
    %c0_8 = arith.constant 0 : index
    %13 = vector.load %arg3[%c256, %c0_8] : memref<1152x64xbf16, #tpu.memory_space<vmem>>, vector<128x64xbf16>
    %cst_9 = arith.constant dense<0.000000e+00> : vector<1088x64xf32>
    %14 = tpu.matmul %12, %13, %cst_9 {dimension_numbers = #tpu.dot_dimension_numbers<[1], [0], [0], [1], [0, 0, 1, 1], [], []>} : vector<1088x128xbf16>, vector<128x64xbf16>, vector<1088x64xf32> -> vector<1088x64xf32>
    %15 = arith.addf %10, %14 : vector<1088x64xf32>
    %c34 = arith.constant 34 : index
    %c0_10 = arith.constant 0 : index
    %16 = vector.load %arg2[%c34, %c0_10] : memref<1160x128xf32, #tpu.memory_space<vmem>>, vector<1088x128xf32>
    %17 = arith.truncf %16 : vector<1088x128xf32> to vector<1088x128xbf16>
    %c384 = arith.constant 384 : index
    %c0_11 = arith.constant 0 : index
    %18 = vector.load %arg3[%c384, %c0_11] : memref<1152x64xbf16, #tpu.memory_space<vmem>>, vector<128x64xbf16>
    %cst_12 = arith.constant dense<0.000000e+00> : vector<1088x64xf32>
    %19 = tpu.matmul %17, %18, %cst_12 {dimension_numbers = #tpu.dot_dimension_numbers<[1], [0], [0], [1], [0, 0, 1, 1], [], []>} : vector<1088x128xbf16>, vector<128x64xbf16>, vector<1088x64xf32> -> vector<1088x64xf32>
    %20 = arith.addf %15, %19 : vector<1088x64xf32>
    %c35 = arith.constant 35 : index
    %c0_13 = arith.constant 0 : index
    %21 = vector.load %arg2[%c35, %c0_13] : memref<1160x128xf32, #tpu.memory_space<vmem>>, vector<1088x128xf32>
    %22 = arith.truncf %21 : vector<1088x128xf32> to vector<1088x128xbf16>
    %c512 = arith.constant 512 : index
    %c0_14 = arith.constant 0 : index
    %23 = vector.load %arg3[%c512, %c0_14] : memref<1152x64xbf16, #tpu.memory_space<vmem>>, vector<128x64xbf16>
    %cst_15 = arith.constant dense<0.000000e+00> : vector<1088x64xf32>
    %24 = tpu.matmul %22, %23, %cst_15 {dimension_numbers = #tpu.dot_dimension_numbers<[1], [0], [0], [1], [0, 0, 1, 1], [], []>} : vector<1088x128xbf16>, vector<128x64xbf16>, vector<1088x64xf32> -> vector<1088x64xf32>
    %25 = arith.addf %20, %24 : vector<1088x64xf32>
    %c36 = arith.constant 36 : index
    %c0_16 = arith.constant 0 : index
    %26 = vector.load %arg2[%c36, %c0_16] : memref<1160x128xf32, #tpu.memory_space<vmem>>, vector<1088x128xf32>
    %27 = arith.truncf %26 : vector<1088x128xf32> to vector<1088x128xbf16>
    %c640 = arith.constant 640 : index
    %c0_17 = arith.constant 0 : index
    %28 = vector.load %arg3[%c640, %c0_17] : memref<1152x64xbf16, #tpu.memory_space<vmem>>, vector<128x64xbf16>
    %cst_18 = arith.constant dense<0.000000e+00> : vector<1088x64xf32>
    %29 = tpu.matmul %27, %28, %cst_18 {dimension_numbers = #tpu.dot_dimension_numbers<[1], [0], [0], [1], [0, 0, 1, 1], [], []>} : vector<1088x128xbf16>, vector<128x64xbf16>, vector<1088x64xf32> -> vector<1088x64xf32>
    %30 = arith.addf %25, %29 : vector<1088x64xf32>
    %c68 = arith.constant 68 : index
    %c0_19 = arith.constant 0 : index
    %31 = vector.load %arg2[%c68, %c0_19] : memref<1160x128xf32, #tpu.memory_space<vmem>>, vector<1088x128xf32>
    %32 = arith.truncf %31 : vector<1088x128xf32> to vector<1088x128xbf16>
    %c768 = arith.constant 768 : index
    %c0_20 = arith.constant 0 : index
    %33 = vector.load %arg3[%c768, %c0_20] : memref<1152x64xbf16, #tpu.memory_space<vmem>>, vector<128x64xbf16>
    %cst_21 = arith.constant dense<0.000000e+00> : vector<1088x64xf32>
    %34 = tpu.matmul %32, %33, %cst_21 {dimension_numbers = #tpu.dot_dimension_numbers<[1], [0], [0], [1], [0, 0, 1, 1], [], []>} : vector<1088x128xbf16>, vector<128x64xbf16>, vector<1088x64xf32> -> vector<1088x64xf32>
    %35 = arith.addf %30, %34 : vector<1088x64xf32>
    %c69 = arith.constant 69 : index
    %c0_22 = arith.constant 0 : index
    %36 = vector.load %arg2[%c69, %c0_22] : memref<1160x128xf32, #tpu.memory_space<vmem>>, vector<1088x128xf32>
    %37 = arith.truncf %36 : vector<1088x128xf32> to vector<1088x128xbf16>
    %c896 = arith.constant 896 : index
    %c0_23 = arith.constant 0 : index
    %38 = vector.load %arg3[%c896, %c0_23] : memref<1152x64xbf16, #tpu.memory_space<vmem>>, vector<128x64xbf16>
    %cst_24 = arith.constant dense<0.000000e+00> : vector<1088x64xf32>
    %39 = tpu.matmul %37, %38, %cst_24 {dimension_numbers = #tpu.dot_dimension_numbers<[1], [0], [0], [1], [0, 0, 1, 1], [], []>} : vector<1088x128xbf16>, vector<128x64xbf16>, vector<1088x64xf32> -> vector<1088x64xf32>
    %40 = arith.addf %35, %39 : vector<1088x64xf32>
    %c70 = arith.constant 70 : index
    %c0_25 = arith.constant 0 : index
    %41 = vector.load %arg2[%c70, %c0_25] : memref<1160x128xf32, #tpu.memory_space<vmem>>, vector<1088x128xf32>
    %42 = arith.truncf %41 : vector<1088x128xf32> to vector<1088x128xbf16>
    %c1024 = arith.constant 1024 : index
    %c0_26 = arith.constant 0 : index
    %43 = vector.load %arg3[%c1024, %c0_26] : memref<1152x64xbf16, #tpu.memory_space<vmem>>, vector<128x64xbf16>
    %cst_27 = arith.constant dense<0.000000e+00> : vector<1088x64xf32>
    %44 = tpu.matmul %42, %43, %cst_27 {dimension_numbers = #tpu.dot_dimension_numbers<[1], [0], [0], [1], [0, 0, 1, 1], [], []>} : vector<1088x128xbf16>, vector<128x64xbf16>, vector<1088x64xf32> -> vector<1088x64xf32>
    %45 = arith.addf %40, %44 : vector<1088x64xf32>
    %c0_28 = arith.constant 0 : index
    %c0_29 = arith.constant 0 : index
    %46 = vector.load %arg4[%c0_28, %c0_29] : memref<1x64xf32, #tpu.memory_space<vmem>>, vector<1x64xf32>
    %47 = vector.broadcast %46 : vector<1x64xf32> to vector<1088x64xf32>
    %48 = arith.addf %45, %47 : vector<1088x64xf32>
    %cst_30 = arith.constant 0.000000e+00 : f32
    %49 = vector.broadcast %cst_30 : f32 to vector<1088x64xf32>
    %50 = arith.maximumf %48, %49 : vector<1088x64xf32>
    %c0_31 = arith.constant 0 : index
    %c0_32 = arith.constant 0 : index
    %51 = vector.load %arg5[%c0_31, %c0_32] : memref<1088x64xf32, #tpu.memory_space<vmem>>, vector<1088x64xf32>
    tpu.vector_store %arg5[%c0_31, %c0_32], %50 {strides = array<i32>} : memref<1088x64xf32, #tpu.memory_space<vmem>>, vector<1088x64xf32>,
    return
  }
  func.func @transform_0(%arg0: i32, %arg1: i32) -> (i32, i32) {
    %c0_i32 = arith.constant 0 : i32
    %c0_i32_0 = arith.constant 0 : i32
    return %arg0, %c0_i32 : i32, i32
  }
  func.func @transform_1(%arg0: i32, %arg1: i32) -> (i32, i32) {
    %c0_i32 = arith.constant 0 : i32
    %c0_i32_0 = arith.constant 0 : i32
    return %c0_i32, %arg1 : i32, i32
  }
  func.func @transform_2(%arg0: i32, %arg1: i32) -> (i32, i32) {
    %c0_i32 = arith.constant 0 : i32
    %c0_i32_0 = arith.constant 0 : i32
    return %c0_i32, %arg1 : i32, i32
  }
  func.func @transform_3(%arg0: i32, %arg1: i32) -> (i32, i32) {
    %c0_i32 = arith.constant 0 : i32
    return %arg0, %arg1 : i32, i32
  }
}

</mosaic_0001>

<bundles_post_ra>
// kernel: tpu_custom_call.1
= control target key start
LH: loop header
LB: loop body
LE: loop exit
PB: predicated region body
PF: predicated region fallthrough
CT: control target
= control target key end

     0   :  { %8 = vsyncpa [#allocation3], 0  ;;  %s15268_s0 = inlined_call_operand.hbm [shape: f32[2320,128], index: 0, kind: input, shape index: {}]   ;;  %s15269_s1 = inlined_call_operand.vmem [shape: bf16[1152,64], index: 1, kind: input, shape index: {}]   ;;  %s15270_s2 = inlined_call_operand.hbm [shape: f32[1,64], index: 2, kind: input, shape index: {}]   ;;  %s15271_s3 = inlined_call_operand.vmem [shape: f32[2176,64], index: 3, kind: output, shape index: {}]  }
   0x1   :  { %10 = vsyncpa [#allocation3 + $0x1], 0 }
   0x2   :  { %11 = vsyncpa [#allocation5], 0  ;;  %s11769_s12 = smov 0   ;;  %s11771_s13 = smov 0  }
   0x3   :  { %s11773_s14 = smov 0   ;;  %s11775_s15 = smov 0  }
   0x4   :  { %s11777_s16 = smov 0   ;;  %s11779_s17 = smov 0  }
   0x5 LB: > { %s9337_s18 = sadd.s32 4294967295, %s11743_s17   ;;  %s36_s19 = sadd.s32 1, %s11731_s14  ;;  %s11743_s17 = sphi %s11779_s17, %s17_s17   ;;  %s11739_s16 = sphi %s11777_s16, %s16044_s16   ;;  %s11735_s15 = sphi %s11775_s15, %s16043_s15   ;;  %s11731_s14 = sphi %s11773_s14, %s16042_s14   ;;  %s11727_s13 = sphi %s11771_s13, %s16041_s13   ;;  %s11723_s12 = sphi %s11769_s12, %s16040_s12  }
   0x6   : > { %p43_p0 = scmp.ne.s32.totalorder %s11731_s14, %s11727_s13  ;;  %p44_p1 = scmp.eq.s32.totalorder %s11743_s17, 0 }
   0x7   : > { %p49_p2 = scmp.ne.s32.totalorder %s11727_s13, %s11723_s12  ;;  %p11803_p3 = scmp.eq.s32.totalorder %s9337_s18, 0 }
   0x8   : > { %p45_p4 = por %p44_p1, %p43_p0  ;;  %p9339_p5 = scmp.ge.s32.totalorder %s11743_s17, 1 }
   0x9   : > { %p11810_p6 = por %p11803_p3, %p49_p2  ;;  %p140_p7 = scmp.lt.s32.totalorder %s11743_s17, 3 }
   0xa   : > { %s11745_s23 = smov [#allocation4]   ;;  %p11508_p10 = scmp.lt.s32.totalorder %s11743_s17, 2 }
   0xb   : > { %s15276_s21 = scalar_select %p11810_p6, 1, 0 }
   0xc   : > { %p11815_p8 = pnand %p9339_p5, %p140_p7  ;;  %s162_s24 = sshll.u32 %s11745_s23, 4  ;;  %s163_s24 = int_to_ptr.vmem [resolvable:$true] %s162_s24 }
   0xd   : > { %s173_s25 = sand.u32 1, %s11731_s14   ;;  %p11825_p12 = pnand %p11508_p10, %p45_p4 }
   0xe   : > { %s15277_s22 = scalar_select %p11815_p8, 1, 0 }
   0xf   : > { %p11499_p9 = pneg %p11815_p8  ;;  %s11646_s27 = scalar_lea.vmem %s163_s24, 16 }
  0x10   : > { %p11647_p0 = scmp.ne.s32.totalorder %s163_s24, %s11646_s27  ;;  %s11653_s28 = scalar_lea.vmem %s163_s24, 32 }
  0x11   : > { %p11500_p11 = pnand %p11499_p9, %p11803_p3  ;;  %p11654_p5 = scmp.lt.s32.totalorder %s163_s24, %s163_s24 }
  0x12   : > { %p11655_p7 = scmp.lt.s32.totalorder %s11653_s28, %s11646_s27 }
  0x13   : > { %p11637_p13 = pneg %p11500_p11 }
  0x14   : > { %p11656_p6 = por %p11655_p7, %p11654_p5 }
  0x15   : > { %p11649_p1 = pnand %p11647_p0, %p11637_p13 }
  0x17   : > { %p11650_p2 = pneg %p11649_p1 }
  0x19   : > { %p11657_p8 = pnand %p11656_p6, %p11650_p2 }
  0x1b   : > { %11660 = shalt.err (!%p11657_p8)
}
  0x1c   : > { %11502 = dma.hbm_to_vmem [thread:$0]  (!%p11500_p11), %s15270_s2, 16, %s163_s24, [#allocation5]  }
  0x1d   : > { %s29_s4 = sadd.s32 1, %s11739_s16  ;;  %s11491_s5 = smul.u32 1160, %s173_s25 }
  0x1e   : > { %p31_p4 = scmp.ge.s32.totalorder %s29_s4, 2  ;;  %s9422_s6 = smul.u32 18560, %s11739_s16 }
  0x1f   : > { %s177_s10 = scalar_lea.vmem [#allocation2], %s11491_s5  ;;  %s174_s23 = scalar_lea.sflag [#allocation3], %s173_s25 }
  0x20   : > { %s16046_s4 = smov (%p31_p4, %s29_s4), 0  ;;  %s183_s9 = scalar_lea.hbm %s15268_s0, %s9422_s6 }
  0x21   : > { %s184_s11 = sshll.u32 %s177_s10, 4  ;;  %s33_s12 = ssub.s32 %s11739_s16, %s16046_s4  ;;  %s185_s11 = int_to_ptr.vmem [resolvable:$true] %s184_s11 }
  0x22   : > { %p11841_p6 = scmp.eq.s32.totalorder %s33_s12, 0  ;;  %p11663_p8 = pneg %p11825_p12 }
  0x23   : > { %s11674_s24 = scalar_lea.vmem %s185_s11, 18560  ;;  %s11746_s27 = smov [#allocation2]  }
  0x24   : > { %p11675_p9 = scmp.ne.s32.totalorder %s185_s11, %s11674_s24  ;;  %s11679_s28 = sshll.u32 %s11746_s27, 4  ;;  %s11680_s28 = int_to_ptr.vmem [resolvable:$false] %s11679_s28 }
  0x25   : > { %s11681_s29 = scalar_lea.vmem %s11680_s28, 37120  ;;  %p11682_p13 = scmp.lt.s32.totalorder %s185_s11, %s11680_s28 }
  0x26   : > { %p11677_p10 = pnand %p11675_p9, %p11663_p8  ;;  %p11683_p0 = scmp.lt.s32.totalorder %s11681_s29, %s11674_s24 }
  0x28   : > { %p11678_p11 = pneg %p11677_p10  ;;  %p11684_p1 = por %p11683_p0, %p11682_p13 }
  0x2a   : > { %p11685_p2 = pnand %p11684_p1, %p11678_p11 }
  0x2c   : > { %11688 = shalt.err (!%p11685_p2)
}
  0x2d   : > { %s11747_s30 = smov 128   ;;  %s11748_s25 = smov 8  }
  0x2e   : > { %11506 = dma.hbm_to_vmem [thread:$0]  (!%p11825_p12), %s183_s9, 18560, %s185_s11, %s174_s23, %s11747_s30, %s11747_s30, %s11748_s25  }
  0x2f   : > { %s11854_s5 = scalar_select %p11841_p6, %s11731_s14, %s36_s19  }
  0x30   : > { %p15280_p5 = scmp.ne.s32.totalorder %s15277_s22, 0 }
  0x32   : > { %196 = sbr.rel (%p15280_p5) target bundleno = 1519 (0x5ef), region = 32 }
  0x37   : > { %s198_s6 = sand.u32 1, %s11727_s13   ;;  %p15281_p7 = scmp.ne.s32.totalorder %s15276_s21, 0 }
  0x38   : > { %s11492_s7 = smul.u32 1160, %s198_s6  ;;  %s199_s8 = scalar_lea.sflag [#allocation3], %s198_s6 }
  0x3a   : > { %s11859_s10 = scalar_lea.vmem [#allocation2], %s11492_s7 }
  0x3b   : > { %11714 = dma.done.wait (%p15281_p7), %s199_s8, 18560  }
  0x3c   : > { %11716 = vsyncadd (%p15281_p7), %s199_s8, 4294948736 }
  0x3d   : > { %11718 = dma.done.wait (%p11803_p3), [#allocation5], 16  }
  0x3e   : > { %11720 = vsyncadd (%p11803_p3), [#allocation5], 4294967280  ;;  %v11561_v0 = vld [vmem:[%s15269_s1 + $0x78] sm:$0xff]   ;;  %v11562_v1 = vld [vmem:[%s15269_s1 + $0x70] sm:$0xff]   ;;  %s241_s27 = smul.u32 136, %s11735_s15  ;;  %vm9087_vm0 = vcmask 523264  }
  0x3f   : > { %10107 = vmatprep.subr.bf16.mxu0 %v11561_v0  ;;  %11475 = vmatprep.subr.bf16.mxu1 %v11561_v0  ;;  %v11563_v2 = vld [vmem:[%s15269_s1 + $0x68] sm:$0xff]   ;;  %v11564_v3 = vld [vmem:[%s15269_s1 + $0x60] sm:$0xff]   ;;  %v11565_v10 = vld [vmem:[%s15269_s1 + $0x58] sm:$0xff]  }
  0x40   : > { %10108 = vmatpush3.bf16.msra.mxu0 %v11561_v0  ;;  %11483 = vmatpush3.bf16.msra.mxu1 %v11561_v0  ;;  %v471_v4 = vld [vmem:[%s11859_s10 + $0x1] sm:$0xff]  ;;  %v472_v5 = vld [vmem:[%s11859_s10 + $0x9] sm:$0xff]  ;;  %v473_v14 = vld [vmem:[%s11859_s10 + $0x11] sm:$0xff]  ;;  %p242_p3 = scmp.lt.s32.totalorder %s241_s27, 271 }
  0x41   : > { %10109 = vmatprep.subr.bf16.mxu0 %v11562_v1  ;;  %11476 = vmatprep.subr.bf16.mxu1 %v11562_v1  ;;  %v539_v6 = vld [vmem:[%s11859_s10 + $0x221] sm:$0xff]  ;;  %v607_v7 = vpack.c.bf16 %v472_v5, %v471_v4  ;;  %v540_v8 = vld [vmem:[%s11859_s10 + $0x229] sm:$0xff]  ;;  %v474_v15 = vld [vmem:[%s11859_s10 + $0x19] sm:$0xff] }
  0x42   : > { %v641_v9 = vpack.c.bf16 %v540_v8, %v539_v6  ;;  %v11566_v11 = vld [vmem:[%s15269_s1 + $0x50] sm:$0xff]   ;;  %v11567_v12 = vld [vmem:[%s15269_s1 + $0x48] sm:$0xff]   ;;  %v11568_v13 = vld [vmem:[%s15269_s1 + $0x40] sm:$0xff]   ;;  %v608_v24 = vpack.c.bf16 %v474_v15, %v473_v14  ;;  %s16048_s27 = smov (!%p242_p3, %s241_s27), 271 }
  0x43   : > { %10123 = vmatprep.mubr.bf16.mxu0 %v607_v7  ;;  %v541_v16 = vld [vmem:[%s11859_s10 + $0x231] sm:$0xff]  ;;  %v542_v17 = vld [vmem:[%s11859_s10 + $0x239] sm:$0xff]  ;;  %v475_v20 = vld [vmem:[%s11859_s10 + $0x21] sm:$0xff]  ;;  %s9346_s15 = sshll.u32 %s16048_s27, 3 }
  0x44   : > { %10110 = vmatpush3.bf16.msra.mxu0 %v11562_v1  ;;  %11484 = vmatpush3.bf16.msra.mxu1 %v11562_v1  ;;  %v11569_v18 = vld [vmem:[%s15269_s1 + $0x38] sm:$0xff]   ;;  %v543_v22 = vld [vmem:[%s11859_s10 + $0x241] sm:$0xff]  ;;  %v642_v25 = vpack.c.bf16 %v542_v17, %v541_v16  ;;  %s14654_s30 = scalar_lea.vmem %s15271_s3, %s9346_s15 }
  0x45   : > { %10111 = vmatprep.subr.bf16.mxu0 %v11563_v2  ;;  %11477 = vmatprep.subr.bf16.mxu1 %v11563_v2  ;;  %v11570_v19 = vld [vmem:[%s15269_s1 + $0xb8] sm:$0xff]   ;;  %v11571_v28 = vld [vmem:[%s15269_s1 + $0x30] sm:$0xff]   ;;  %v11573_v38 = vld [vmem:[%s15269_s1 + $0x28] sm:$0xff]  }
  0x46   : > { %10191 = vmatprep.mubr.bf16.mxu1 %v641_v9  ;;  %v476_v21 = vld [vmem:[%s11859_s10 + $0x29] sm:$0xff]  ;;  %v477_v29 = vld [vmem:[%s11859_s10 + $0x31] sm:$0xff]  ;;  %v478_v30 = vld [vmem:[%s11859_s10 + $0x39] sm:$0xff] }
  0x47   : > { %v544_v23 = vld [vmem:[%s11859_s10 + $0x249] sm:$0xff]  ;;  %v609_v26 = vpack.c.bf16 %v476_v21, %v475_v20  ;;  %v545_v32 = vld [vmem:[%s11859_s10 + $0x251] sm:$0xff]  ;;  %v546_v33 = vld [vmem:[%s11859_s10 + $0x259] sm:$0xff]  ;;  %v610_v40 = vpack.c.bf16 %v478_v30, %v477_v29 }
  0x48   : > { %10112 = vmatpush3.bf16.msra.mxu0 %v11563_v2  ;;  %11485 = vmatpush3.bf16.msra.mxu1 %v11563_v2  ;;  %v643_v27 = vpack.c.bf16 %v544_v23, %v543_v22  ;;  %v11572_v31 = vld [vmem:[%s15269_s1 + $0xb0] sm:$0xff]   ;;  %v11574_v39 = vld [vmem:[%s15269_s1 + $0xa8] sm:$0xff]   ;;  %v644_v41 = vpack.c.bf16 %v546_v33, %v545_v32  ;;  %v11575_v44 = vld [vmem:[%s15269_s1 + $0x20] sm:$0xff]  }
  0x49   : > { %10113 = vmatprep.subr.bf16.mxu0 %v11564_v3  ;;  %11478 = vmatprep.subr.bf16.mxu1 %v11564_v3  ;;  %v479_v34 = vld [vmem:[%s11859_s10 + $0x41] sm:$0xff]  ;;  %v480_v35 = vld [vmem:[%s11859_s10 + $0x49] sm:$0xff]  ;;  %v481_v46 = vld [vmem:[%s11859_s10 + $0x51] sm:$0xff] }
  0x4a   : > { %v547_v36 = vld [vmem:[%s11859_s10 + $0x261] sm:$0xff]  ;;  %v548_v37 = vld [vmem:[%s11859_s10 + $0x269] sm:$0xff]  ;;  %v611_v42 = vpack.c.bf16 %v480_v35, %v479_v34  ;;  %v482_v47 = vld [vmem:[%s11859_s10 + $0x59] sm:$0xff] }
  0x4b   : > { %v645_v43 = vpack.c.bf16 %v548_v37, %v547_v36  ;;  %v11576_v45 = vld [vmem:[%s15269_s1 + $0xa0] sm:$0xff]   ;;  %v484_v51 = vld [vmem:[%s11859_s10 + $0x69] sm:$0xff]  ;;  %v612_v56 = vpack.c.bf16 %v482_v47, %v481_v46 }
  0x4c   : > { %10114 = vmatpush3.bf16.msra.mxu0 %v11564_v3  ;;  %11486 = vmatpush3.bf16.msra.mxu1 %v11564_v3  ;;  %v549_v48 = vld [vmem:[%s11859_s10 + $0x271] sm:$0xff]  ;;  %v550_v49 = vld [vmem:[%s11859_s10 + $0x279] sm:$0xff]  ;;  %v483_v50 = vld [vmem:[%s11859_s10 + $0x61] sm:$0xff] }
  0x4d   : > { %10115 = vmatprep.subr.bf16.mxu0 %v11565_v10  ;;  %11479 = vmatprep.subr.bf16.mxu1 %v11565_v10  ;;  %v551_v52 = vld [vmem:[%s11859_s10 + $0x281] sm:$0xff]  ;;  %v552_v53 = vld [vmem:[%s11859_s10 + $0x289] sm:$0xff]  ;;  %v646_v57 = vpack.c.bf16 %v550_v49, %v549_v48  ;;  %v613_v58 = vpack.c.bf16 %v484_v51, %v483_v50  ;;  %v485_v60 = vld [vmem:[%s11859_s10 + $0x71] sm:$0xff] }
  0x4e   : > { %v11577_v54 = vld [vmem:[%s15269_s1 + $0x18] sm:$0xff]   ;;  %v647_v59 = vpack.c.bf16 %v552_v53, %v551_v52  ;;  %v11579_v61 = vld [vmem:[%s15269_s1 + $0x10] sm:$0xff]   ;;  %v11582_v16 = vld [vmem:[%s15269_s1 + $0x88] sm:$0xff]  }
  0x4f   : > { %v11578_v55 = vld [vmem:[%s15269_s1 + $0x98] sm:$0xff]   ;;  %v11580_v63 = vld [vmem:[%s15269_s1 + $0x90] sm:$0xff]  }
  0x50   : > { %10116 = vmatpush3.bf16.msra.mxu0 %v11565_v10  ;;  %11487 = vmatpush3.bf16.msra.mxu1 %v11565_v10  ;;  %v486_v62 = vld [vmem:[%s11859_s10 + $0x79] sm:$0xff]  ;;  %v553_v0 = vld [vmem:[%s11859_s10 + $0x291] sm:$0xff]  ;;  %v487_v2 = vld [vmem:[%s11859_s10 + $0x81] sm:$0xff] }
  0x51   : > { %10117 = vmatprep.subr.bf16.mxu0 %v11566_v11  ;;  %11480 = vmatprep.subr.bf16.mxu1 %v11566_v11  ;;  %v554_v1 = vld [vmem:[%s11859_s10 + $0x299] sm:$0xff]  ;;  %v488_v3 = vld [vmem:[%s11859_s10 + $0x89] sm:$0xff]  ;;  %v555_v4 = vld [vmem:[%s11859_s10 + $0x2a1] sm:$0xff]  ;;  %v614_v6 = vpack.c.bf16 %v486_v62, %v485_v60 }
  0x52   : > { %v556_v5 = vld [vmem:[%s11859_s10 + $0x2a9] sm:$0xff]  ;;  %v648_v7 = vpack.c.bf16 %v554_v1, %v553_v0  ;;  %v615_v8 = vpack.c.bf16 %v488_v3, %v487_v2  ;;  %v558_v14 = vld [vmem:[%s11859_s10 + $0x2b9] sm:$0xff]  ;;  %v491_v15 = vld [vmem:[%s11859_s10 + $0xa1] sm:$0xff] }
  0x53   : > { %v649_v9 = vpack.c.bf16 %v556_v5, %v555_v4  ;;  %v11581_v10 = vld [vmem:[%s15269_s1 + $0x8] sm:$0xff]   ;;  %v501_v52 = vld [vmem:[%s11859_s10 + $0xf1] sm:$0xff] }
  0x54   : > { %10118 = vmatpush3.bf16.msra.mxu0 %v11566_v11  ;;  %11488 = vmatpush3.bf16.msra.mxu1 %v11566_v11  ;;  %v489_v11 = vld [vmem:[%s11859_s10 + $0x91] sm:$0xff]  ;;  %v492_v17 = vld [vmem:[%s11859_s10 + $0xa9] sm:$0xff]  ;;  %v562_v29 = vld [vmem:[%s11859_s10 + $0x2d9] sm:$0xff] }
  0x55   : > { %10119 = vmatprep.subr.bf16.mxu0 %v11567_v12  ;;  %11481 = vmatprep.subr.bf16.mxu1 %v11567_v12  ;;  %v617_v22 = vpack.c.bf16 %v492_v17, %v491_v15  ;;  %v495_v30 = vld [vmem:[%s11859_s10 + $0xc1] sm:$0xff]  ;;  %v564_v33 = vld [vmem:[%s11859_s10 + $0x2e9] sm:$0xff]  ;;  %v502_v53 = vld [vmem:[%s11859_s10 + $0xf9] sm:$0xff] }
  0x56   : > { %v563_v32 = vld [vmem:[%s11859_s10 + $0x2e1] sm:$0xff]  ;;  %v568_v47 = vld [vmem:[%s11859_s10 + $0x309] sm:$0xff]  ;;  %v622_v60 = vpack.c.bf16 %v502_v53, %v501_v52  ;;  %v505_v0 = vld [vmem:[%s11859_s10 + $0x111] sm:$0xff] }
  0x57   : > { %v653_v37 = vpack.c.bf16 %v564_v33, %v563_v32  ;;  %v567_v46 = vld [vmem:[%s11859_s10 + $0x301] sm:$0xff]  ;;  %v506_v1 = vld [vmem:[%s11859_s10 + $0x119] sm:$0xff]  ;;  %v573_v2 = vld [vmem:[%s11859_s10 + $0x331] sm:$0xff] }
  0x58   : > { %10120 = vmatpush3.bf16.msra.mxu0 %v11567_v12  ;;  %11489 = vmatpush3.bf16.msra.mxu1 %v11567_v12  ;;  %v490_v12 = vld [vmem:[%s11859_s10 + $0x99] sm:$0xff]  ;;  %v655_v51 = vpack.c.bf16 %v568_v47, %v567_v46  ;;  %v507_v4 = vld [vmem:[%s11859_s10 + $0x121] sm:$0xff]  ;;  %v508_v5 = vld [vmem:[%s11859_s10 + $0x129] sm:$0xff] }
  0x59   : > { %10121 = vmatprep.subr.bf16.mxu0 %v11568_v13  ;;  %11482 = vmatprep.subr.bf16.mxu1 %v11568_v13  ;;  %v616_v20 = vpack.c.bf16 %v490_v12, %v489_v11  ;;  %v574_v3 = vld [vmem:[%s11859_s10 + $0x339] sm:$0xff]  ;;  %v509_v12 = vld [vmem:[%s11859_s10 + $0x131] sm:$0xff]  ;;  %v512_v17 = vld [vmem:[%s11859_s10 + $0x149] sm:$0xff] }
  0x5a   : > { %v578_v15 = vld [vmem:[%s11859_s10 + $0x359] sm:$0xff]  ;;  %v589_v52 = vld [vmem:[%s11859_s10 + $0x3b1] sm:$0xff] }
  0x5b   : > { %v590_v53 = vld [vmem:[%s11859_s10 + $0x3b9] sm:$0xff] }
  0x5c   : > { %10122 = vmatpush3.bf16.msra.mxu0 %v11568_v13  ;;  %11490 = vmatpush3.bf16.msra.mxu1 %v11568_v13  ;;  %v557_v13 = vld [vmem:[%s11859_s10 + $0x2b1] sm:$0xff] }
  0x5d   : > { %10259 = vmatprep.subr.bf16.mxu1 %v11569_v18  ;;  %10411 = vmatprep.subr.bf16.mxu0 %v11570_v19  ;;  %v650_v21 = vpack.c.bf16 %v558_v14, %v557_v13  ;;  %v510_v13 = vld [vmem:[%s11859_s10 + $0x139] sm:$0xff]  ;;  %v577_v14 = vld [vmem:[%s11859_s10 + $0x351] sm:$0xff] }
  0x5f   : > { %10124 = vmatmul.mubr.bf16.vlgmr.msra.gmra.mxu0 %v608_v24  ;;  %10192 = vmatmul.mubr.bf16.vlgmr.msra.gmra.mxu1 %v642_v25  ;;  %v11583_v24 = vld [vmem:[%s15269_s1] sm:$0xff]  }
  0x60   : > { %10260 = vmatpush3.bf16.msra.mxu1 %v11569_v18  ;;  %10412 = vmatpush3.bf16.msra.mxu0 %v11570_v19  ;;  %v559_v18 = vld [vmem:[%s11859_s10 + $0x2c1] sm:$0xff]  ;;  %v560_v19 = vld [vmem:[%s11859_s10 + $0x2c9] sm:$0xff]  ;;  %v493_v25 = vld [vmem:[%s11859_s10 + $0xb1] sm:$0xff] }
  0x61   : > { %10127 = vmatprep.mubr.bf16.mxu0 %v609_v26  ;;  %10195 = vmatprep.mubr.bf16.mxu1 %v643_v27  ;;  %v651_v23 = vpack.c.bf16 %v560_v19, %v559_v18  ;;  %v494_v26 = vld [vmem:[%s11859_s10 + $0xb9] sm:$0xff]  ;;  %v579_v18 = vld [vmem:[%s11859_s10 + $0x361] sm:$0xff]  ;;  %v580_v19 = vld [vmem:[%s11859_s10 + $0x369] sm:$0xff] }
  0x62   : > { %10261 = vmatprep.subr.bf16.mxu1 %v11571_v28  ;;  %10413 = vmatprep.subr.bf16.mxu0 %v11572_v31  ;;  %v11584_v27 = vld [vmem:[%s15269_s1 + $0x80] sm:$0xff]   ;;  %v618_v34 = vpack.c.bf16 %v494_v26, %v493_v25 }
  0x63   : > { %v514_v25 = vld [vmem:[%s11859_s10 + $0x159] sm:$0xff]  ;;  %v581_v26 = vld [vmem:[%s11859_s10 + $0x371] sm:$0xff] }
  0x64   : > { %10262 = vmatpush3.bf16.msra.mxu1 %v11571_v28  ;;  %10414 = vmatpush3.bf16.msra.mxu0 %v11572_v31  ;;  %v561_v28 = vld [vmem:[%s11859_s10 + $0x2d1] sm:$0xff]  ;;  %v496_v31 = vld [vmem:[%s11859_s10 + $0xc9] sm:$0xff] }
  0x65   : > { %10263 = vmatprep.subr.bf16.mxu1 %v11573_v38  ;;  %10415 = vmatprep.subr.bf16.mxu0 %v11574_v39  ;;  %v652_v35 = vpack.c.bf16 %v562_v29, %v561_v28  ;;  %v619_v36 = vpack.c.bf16 %v496_v31, %v495_v30  ;;  %v515_v28 = vld [vmem:[%s11859_s10 + $0x161] sm:$0xff]  ;;  %v516_v29 = vld [vmem:[%s11859_s10 + $0x169] sm:$0xff] }
  0x66   : > { %v583_v30 = vld [vmem:[%s11859_s10 + $0x381] sm:$0xff]  ;;  %v584_v31 = vld [vmem:[%s11859_s10 + $0x389] sm:$0xff] }
  0x67   : > { %10128 = vmatmul.mubr.bf16.gmra.mxu0 %v610_v40  ;;  %10196 = vmatmul.mubr.bf16.gmra.mxu1 %v644_v41  ;;  %v497_v40 = vld [vmem:[%s11859_s10 + $0xd1] sm:$0xff]  ;;  %v498_v41 = vld [vmem:[%s11859_s10 + $0xd9] sm:$0xff] }
  0x68   : > { %10131 = vmatprep.mubr.bf16.mxu0 %v611_v42  ;;  %10199 = vmatprep.mubr.bf16.mxu1 %v645_v43  ;;  %v565_v42 = vld [vmem:[%s11859_s10 + $0x2f1] sm:$0xff]  ;;  %v566_v43 = vld [vmem:[%s11859_s10 + $0x2f9] sm:$0xff]  ;;  %v620_v48 = vpack.c.bf16 %v498_v41, %v497_v40 }
  0x69   : > { %10264 = vmatpush3.bf16.msra.mxu1 %v11573_v38  ;;  %10416 = vmatpush3.bf16.msra.mxu0 %v11574_v39  ;;  %v11996_v38 = vld [vmem:[%s15269_s1 + $0xf8] sm:$0xff]   ;;  %v654_v49 = vpack.c.bf16 %v566_v43, %v565_v42  ;;  %v519_v42 = vld [vmem:[%s11859_s10 + $0x181] sm:$0xff] }
  0x6a   : > { %10265 = vmatprep.subr.bf16.mxu1 %v11575_v44  ;;  %10417 = vmatprep.subr.bf16.mxu0 %v11576_v45  ;;  %v12001_v39 = vld [vmem:[%s15269_s1 + $0x138] sm:$0xff]  }
  0x6b   : > { %v585_v40 = vld [vmem:[%s11859_s10 + $0x391] sm:$0xff]  ;;  %v586_v41 = vld [vmem:[%s11859_s10 + $0x399] sm:$0xff]  ;;  %v520_v43 = vld [vmem:[%s11859_s10 + $0x189] sm:$0xff] }
  0x6c   : > { %v664_v47 = vpack.c.bf16 %v586_v41, %v585_v40  ;;  %v251_v40 = vld [vmem:[%s11859_s10] sm:$0xff]  ;;  %v252_v41 = vld [vmem:[%s11859_s10 + $0x8] sm:$0xff] }
  0x6d   : > { %10266 = vmatpush3.bf16.msra.mxu1 %v11575_v44  ;;  %10418 = vmatpush3.bf16.msra.mxu0 %v11576_v45  ;;  %v499_v44 = vld [vmem:[%s11859_s10 + $0xe1] sm:$0xff]  ;;  %v500_v45 = vld [vmem:[%s11859_s10 + $0xe9] sm:$0xff] }
  0x6e   : > { %10267 = vmatprep.subr.bf16.mxu1 %v11577_v54  ;;  %10419 = vmatprep.subr.bf16.mxu0 %v11578_v55  ;;  %v621_v50 = vpack.c.bf16 %v500_v45, %v499_v44  ;;  %v587_v44 = vld [vmem:[%s11859_s10 + $0x3a1] sm:$0xff]  ;;  %v588_v45 = vld [vmem:[%s11859_s10 + $0x3a9] sm:$0xff] }
  0x6f   : > { %10132 = vmatmul.mubr.bf16.gmra.mxu0 %v612_v56  ;;  %10200 = vmatmul.mubr.bf16.gmra.mxu1 %v646_v57  ;;  %v503_v56 = vld [vmem:[%s11859_s10 + $0x101] sm:$0xff]  ;;  %v504_v57 = vld [vmem:[%s11859_s10 + $0x109] sm:$0xff] }
  0x70   : > { %10135 = vmatprep.mubr.bf16.mxu0 %v613_v58  ;;  %10203 = vmatprep.mubr.bf16.mxu1 %v647_v59  ;;  %v571_v58 = vld [vmem:[%s11859_s10 + $0x321] sm:$0xff]  ;;  %v572_v59 = vld [vmem:[%s11859_s10 + $0x329] sm:$0xff]  ;;  %v623_v62 = vpack.c.bf16 %v504_v57, %v503_v56 }
  0x71   : > { %10268 = vmatpush3.bf16.msra.mxu1 %v11577_v54  ;;  %10420 = vmatpush3.bf16.msra.mxu0 %v11578_v55  ;;  %v569_v54 = vld [vmem:[%s11859_s10 + $0x311] sm:$0xff]  ;;  %v570_v55 = vld [vmem:[%s11859_s10 + $0x319] sm:$0xff]  ;;  %v591_v56 = vld [vmem:[%s11859_s10 + $0x3c1] sm:$0xff] }
  0x72   : > { %10269 = vmatprep.subr.bf16.mxu1 %v11579_v61  ;;  %10421 = vmatprep.subr.bf16.mxu0 %v11580_v63  ;;  %v592_v57 = vld [vmem:[%s11859_s10 + $0x3c9] sm:$0xff] }
  0x75   : > { %10270 = vmatpush3.bf16.msra.mxu1 %v11579_v61  ;;  %10422 = vmatpush3.bf16.msra.mxu0 %v11580_v63  ;;  %v656_v61 = vpack.c.bf16 %v570_v55, %v569_v54  ;;  %v657_v63 = vpack.c.bf16 %v572_v59, %v571_v58  ;;  %v523_v54 = vld [vmem:[%s11859_s10 + $0x1a1] sm:$0xff]  ;;  %v524_v55 = vld [vmem:[%s11859_s10 + $0x1a9] sm:$0xff]  ;;  %v666_v59 = vpack.c.bf16 %v590_v53, %v589_v52 }
  0x76   : > { %10271 = vmatprep.subr.bf16.mxu1 %v11581_v10  ;;  %10423 = vmatprep.subr.bf16.mxu0 %v11582_v16  ;;  %v255_v52 = vld [vmem:[%s11859_s10 + $0x20] sm:$0xff]  ;;  %v256_v53 = vld [vmem:[%s11859_s10 + $0x28] sm:$0xff] }
  0x77   : > { %10136 = vmatmul.mubr.bf16.gmra.mxu0 %v614_v6  ;;  %10204 = vmatmul.mubr.bf16.gmra.mxu1 %v648_v7  ;;  %v575_v6 = vld [vmem:[%s11859_s10 + $0x341] sm:$0xff]  ;;  %v576_v7 = vld [vmem:[%s11859_s10 + $0x349] sm:$0xff] }
  0x78   : > { %10139 = vmatprep.mubr.bf16.mxu0 %v615_v8  ;;  %10207 = vmatprep.mubr.bf16.mxu1 %v649_v9  ;;  %v624_v8 = vpack.c.bf16 %v506_v1, %v505_v0  ;;  %v658_v9 = vpack.c.bf16 %v574_v3, %v573_v2  ;;  %v659_v11 = vpack.c.bf16 %v576_v7, %v575_v6  ;;  %v593_v0 = vld [vmem:[%s11859_s10 + $0x3d1] sm:$0xff]  ;;  %v594_v1 = vld [vmem:[%s11859_s10 + $0x3d9] sm:$0xff]  ;;  %v527_v2 = vld [vmem:[%s11859_s10 + $0x1c1] sm:$0xff] }
  0x79   : > { %10272 = vmatpush3.bf16.msra.mxu1 %v11581_v10  ;;  %10424 = vmatpush3.bf16.msra.mxu0 %v11582_v16  ;;  %v625_v10 = vpack.c.bf16 %v508_v5, %v507_v4  ;;  %v511_v16 = vld [vmem:[%s11859_s10 + $0x141] sm:$0xff]  ;;  %v528_v3 = vld [vmem:[%s11859_s10 + $0x1c9] sm:$0xff]  ;;  %v668_v7 = vpack.c.bf16 %v594_v1, %v593_v0  ;;  %v1947_v0 = vld [vmem:[%s11859_s10 + $0x32] sm:$0xff] }
  0x7a   : > { %10273 = vmatprep.subr.bf16.mxu1 %v11583_v24  ;;  %10425 = vmatprep.subr.bf16.mxu0 %v11584_v27  ;;  %v595_v4 = vld [vmem:[%s11859_s10 + $0x3e1] sm:$0xff]  ;;  %v596_v5 = vld [vmem:[%s11859_s10 + $0x3e9] sm:$0xff] }
  0x7b   : > { %v1948_v1 = vld [vmem:[%s11859_s10 + $0x3a] sm:$0xff] }
  0x7d   : > { %10274 = vmatpush3.bf16.msra.mxu1 %v11583_v24  ;;  %10426 = vmatpush3.bf16.msra.mxu0 %v11584_v27  ;;  %v513_v24 = vld [vmem:[%s11859_s10 + $0x151] sm:$0xff]  ;;  %v582_v27 = vld [vmem:[%s11859_s10 + $0x379] sm:$0xff] }
  0x7e   : > { %10563 = vmatprep.subr.bf16.mxu1 %v11996_v38  ;;  %10715 = vmatprep.subr.bf16.mxu0 %v12001_v39  ;;  %v628_v32 = vpack.c.bf16 %v514_v25, %v513_v24  ;;  %v662_v33 = vpack.c.bf16 %v582_v27, %v581_v26  ;;  %v601_v24 = vld [vmem:[%s11859_s10 + $0x411] sm:$0xff]  ;;  %v602_v25 = vld [vmem:[%s11859_s10 + $0x419] sm:$0xff]  ;;  %v535_v26 = vld [vmem:[%s11859_s10 + $0x201] sm:$0xff] }
  0x7f   : > { %10140 = vmatmul.mubr.bf16.gmra.mxu0 %v616_v20  ;;  %10208 = vmatmul.mubr.bf16.gmra.mxu1 %v650_v21  ;;  %v626_v20 = vpack.c.bf16 %v510_v13, %v509_v12  ;;  %v660_v21 = vpack.c.bf16 %v578_v15, %v577_v14  ;;  %v597_v12 = vld [vmem:[%s11859_s10 + $0x3f1] sm:$0xff]  ;;  %v598_v13 = vld [vmem:[%s11859_s10 + $0x3f9] sm:$0xff]  ;;  %v531_v14 = vld [vmem:[%s11859_s10 + $0x1e1] sm:$0xff] }
  0x80   : > { %10143 = vmatprep.mubr.bf16.mxu0 %v617_v22  ;;  %10211 = vmatprep.mubr.bf16.mxu1 %v651_v23  ;;  %v627_v22 = vpack.c.bf16 %v512_v17, %v511_v16  ;;  %v661_v23 = vpack.c.bf16 %v580_v19, %v579_v18  ;;  %v532_v15 = vld [vmem:[%s11859_s10 + $0x1e9] sm:$0xff]  ;;  %v599_v16 = vld [vmem:[%s11859_s10 + $0x401] sm:$0xff]  ;;  %v670_v19 = vpack.c.bf16 %v598_v13, %v597_v12  ;;  %v262_v13 = vld [vmem:[%s11859_s10 + $0x58] sm:$0xff] }
  0x81   : > { %v600_v17 = vld [vmem:[%s11859_s10 + $0x409] sm:$0xff] }
  0x82   : > { %v536_v27 = vld [vmem:[%s11859_s10 + $0x209] sm:$0xff] }
  0x83   : > { %v261_v12 = vld [vmem:[%s11859_s10 + $0x50] sm:$0xff] }
  0x87   : > { %10144 = vmatmul.mubr.bf16.gmra.mxu0 %v618_v34  ;;  %10212 = vmatmul.mubr.bf16.gmra.mxu1 %v652_v35  ;;  %v629_v34 = vpack.c.bf16 %v516_v29, %v515_v28  ;;  %v663_v35 = vpack.c.bf16 %v584_v31, %v583_v30  ;;  %v603_v28 = vld [vmem:[%s11859_s10 + $0x421] sm:$0xff]  ;;  %v604_v29 = vld [vmem:[%s11859_s10 + $0x429] sm:$0xff]  ;;  %v672_v31 = vpack.c.bf16 %v602_v25, %v601_v24 }
  0x88   : > { %10147 = vmatprep.mubr.bf16.mxu0 %v619_v36  ;;  %10215 = vmatprep.mubr.bf16.mxu1 %v653_v37  ;;  %v517_v36 = vld [vmem:[%s11859_s10 + $0x171] sm:$0xff]  ;;  %v518_v37 = vld [vmem:[%s11859_s10 + $0x179] sm:$0xff] }
  0x89   : > { %v630_v46 = vpack.c.bf16 %v518_v37, %v517_v36  ;;  %v605_v36 = vld [vmem:[%s11859_s10 + $0x431] sm:$0xff]  ;;  %v606_v37 = vld [vmem:[%s11859_s10 + $0x439] sm:$0xff] }
  0x8f   : > { %10148 = vmatmul.mubr.bf16.gmra.mxu0 %v620_v48  ;;  %10216 = vmatmul.mubr.bf16.gmra.mxu1 %v654_v49  ;;  %v631_v48 = vpack.c.bf16 %v520_v43, %v519_v42  ;;  %v665_v49 = vpack.c.bf16 %v588_v45, %v587_v44  ;;  %v1941_v42 = vld [vmem:[%s11859_s10 + $0x2] sm:$0xff]  ;;  %v1942_v43 = vld [vmem:[%s11859_s10 + $0xa] sm:$0xff]  ;;  %v674_v45 = vpack.c.bf16 %v606_v37, %v605_v36 }
  0x90   : > { %10151 = vmatprep.mubr.bf16.mxu0 %v621_v50  ;;  %10219 = vmatprep.mubr.bf16.mxu1 %v655_v51  ;;  %v521_v50 = vld [vmem:[%s11859_s10 + $0x191] sm:$0xff]  ;;  %v522_v51 = vld [vmem:[%s11859_s10 + $0x199] sm:$0xff] }
  0x91   : > { %v632_v58 = vpack.c.bf16 %v522_v51, %v521_v50  ;;  %v1943_v50 = vld [vmem:[%s11859_s10 + $0x12] sm:$0xff]  ;;  %v1944_v51 = vld [vmem:[%s11859_s10 + $0x1a] sm:$0xff] }
  0x97   : > { %10152 = vmatmul.mubr.bf16.gmra.mxu0 %v622_v60  ;;  %10220 = vmatmul.mubr.bf16.gmra.mxu1 %v656_v61  ;;  %v633_v60 = vpack.c.bf16 %v524_v55, %v523_v54  ;;  %v667_v61 = vpack.c.bf16 %v592_v57, %v591_v56  ;;  %v1945_v54 = vld [vmem:[%s11859_s10 + $0x22] sm:$0xff]  ;;  %v1946_v55 = vld [vmem:[%s11859_s10 + $0x2a] sm:$0xff]  ;;  %v2078_v57 = vpack.c.bf16 %v1944_v51, %v1943_v50 }
  0x98   : > { %10155 = vmatprep.mubr.bf16.mxu0 %v623_v62  ;;  %10223 = vmatprep.mubr.bf16.mxu1 %v657_v63  ;;  %v525_v62 = vld [vmem:[%s11859_s10 + $0x1b1] sm:$0xff]  ;;  %v526_v63 = vld [vmem:[%s11859_s10 + $0x1b9] sm:$0xff] }
  0x99   : > { %v634_v6 = vpack.c.bf16 %v526_v63, %v525_v62  ;;  %v11588_v62 = vld [vmem:[%s15269_s1 + $0x130] sm:$0xff]   ;;  %v258_v63 = vld [vmem:[%s11859_s10 + $0x38] sm:$0xff] }
  0x9f   : > { %10156 = vmatmul.mubr.bf16.gmra.mxu0 %v624_v8  ;;  %10224 = vmatmul.mubr.bf16.gmra.mxu1 %v658_v9  ;;  %v635_v8 = vpack.c.bf16 %v528_v3, %v527_v2  ;;  %v669_v9 = vpack.c.bf16 %v596_v5, %v595_v4  ;;  %v259_v2 = vld [vmem:[%s11859_s10 + $0x40] sm:$0xff]  ;;  %v260_v3 = vld [vmem:[%s11859_s10 + $0x48] sm:$0xff] }
  0xa0   : > { %10159 = vmatprep.mubr.bf16.mxu0 %v625_v10  ;;  %10227 = vmatprep.mubr.bf16.mxu1 %v659_v11  ;;  %v529_v10 = vld [vmem:[%s11859_s10 + $0x1d1] sm:$0xff]  ;;  %v530_v11 = vld [vmem:[%s11859_s10 + $0x1d9] sm:$0xff]  ;;  %v1949_v4 = vld [vmem:[%s11859_s10 + $0x42] sm:$0xff] }
  0xa1   : > { %v636_v18 = vpack.c.bf16 %v530_v11, %v529_v10  ;;  %v1950_v5 = vld [vmem:[%s11859_s10 + $0x4a] sm:$0xff]  ;;  %v11591_v10 = vld [vmem:[%s15269_s1 + $0xe0] sm:$0xff]  }
  0xa2   : > { %v11592_v11 = vld [vmem:[%s15269_s1 + $0x120] sm:$0xff]  }
  0xa7   : > { %10160 = vmatmul.mubr.bf16.gmra.mxu0 %v626_v20  ;;  %10228 = vmatmul.mubr.bf16.gmra.mxu1 %v660_v21  ;;  %v637_v20 = vpack.c.bf16 %v532_v15, %v531_v14  ;;  %v671_v21 = vpack.c.bf16 %v600_v17, %v599_v16  ;;  %v1951_v14 = vld [vmem:[%s11859_s10 + $0x52] sm:$0xff]  ;;  %v1952_v15 = vld [vmem:[%s11859_s10 + $0x5a] sm:$0xff]  ;;  %v264_v17 = vld [vmem:[%s11859_s10 + $0x68] sm:$0xff] }
  0xa8   : > { %10163 = vmatprep.mubr.bf16.mxu0 %v627_v22  ;;  %10231 = vmatprep.mubr.bf16.mxu1 %v661_v23  ;;  %v533_v22 = vld [vmem:[%s11859_s10 + $0x1f1] sm:$0xff]  ;;  %v534_v23 = vld [vmem:[%s11859_s10 + $0x1f9] sm:$0xff] }
  0xa9   : > { %v638_v30 = vpack.c.bf16 %v534_v23, %v533_v22  ;;  %v263_v16 = vld [vmem:[%s11859_s10 + $0x60] sm:$0xff]  ;;  %v392_v22 = vpack.c.bf16 %v262_v13, %v261_v12  ;;  %v2082_v23 = vpack.c.bf16 %v1952_v15, %v1951_v14  ;;  %v281_v12 = vld [vmem:[%s11859_s10 + $0xf0] sm:$0xff]  ;;  %v282_v13 = vld [vmem:[%s11859_s10 + $0xf8] sm:$0xff] }
  0xaa   : > { %v393_v24 = vpack.c.bf16 %v264_v17, %v263_v16  ;;  %v1971_v14 = vld [vmem:[%s11859_s10 + $0xf2] sm:$0xff]  ;;  %v1972_v15 = vld [vmem:[%s11859_s10 + $0xfa] sm:$0xff]  ;;  %v284_v17 = vld [vmem:[%s11859_s10 + $0x108] sm:$0xff] }
  0xab   : > { %v283_v16 = vld [vmem:[%s11859_s10 + $0x100] sm:$0xff] }
  0xaf   : > { %10164 = vmatmul.mubr.bf16.gmra.mxu0 %v628_v32  ;;  %10232 = vmatmul.mubr.bf16.gmra.mxu1 %v662_v33  ;;  %v639_v32 = vpack.c.bf16 %v536_v27, %v535_v26  ;;  %v673_v33 = vpack.c.bf16 %v604_v29, %v603_v28  ;;  %v265_v26 = vld [vmem:[%s11859_s10 + $0x70] sm:$0xff]  ;;  %v266_v27 = vld [vmem:[%s11859_s10 + $0x78] sm:$0xff] }
  0xb0   : > { %10167 = vmatprep.mubr.bf16.mxu0 %v629_v34  ;;  %10235 = vmatprep.mubr.bf16.mxu1 %v663_v35  ;;  %v537_v34 = vld [vmem:[%s11859_s10 + $0x211] sm:$0xff]  ;;  %v538_v35 = vld [vmem:[%s11859_s10 + $0x219] sm:$0xff] }
  0xb1   : > { %v640_v44 = vpack.c.bf16 %v538_v35, %v537_v34  ;;  %v1955_v28 = vld [vmem:[%s11859_s10 + $0x72] sm:$0xff]  ;;  %v1956_v29 = vld [vmem:[%s11859_s10 + $0x7a] sm:$0xff]  ;;  %v394_v34 = vpack.c.bf16 %v266_v27, %v265_v26 }
  0xb2   : > { %v2084_v35 = vpack.c.bf16 %v1956_v29, %v1955_v28  ;;  %v285_v26 = vld [vmem:[%s11859_s10 + $0x110] sm:$0xff]  ;;  %v286_v27 = vld [vmem:[%s11859_s10 + $0x118] sm:$0xff] }
  0xb3   : > { %v1975_v28 = vld [vmem:[%s11859_s10 + $0x112] sm:$0xff]  ;;  %v1976_v29 = vld [vmem:[%s11859_s10 + $0x11a] sm:$0xff] }
  0xb7   : > { %10168 = vmatmul.mubr.bf16.gmra.mxu0 %v630_v46  ;;  %10236 = vmatmul.mubr.bf16.gmra.mxu1 %v664_v47  ;;  %v387_v46 = vpack.c.bf16 %v252_v41, %v251_v40  ;;  %v2077_v47 = vpack.c.bf16 %v1942_v43, %v1941_v42  ;;  %v269_v40 = vld [vmem:[%s11859_s10 + $0x90] sm:$0xff]  ;;  %v270_v41 = vld [vmem:[%s11859_s10 + $0x98] sm:$0xff] }
  0xb8   : > { %10171 = vmatprep.mubr.bf16.mxu0 %v631_v48  ;;  %10239 = vmatprep.mubr.bf16.mxu1 %v665_v49  ;;  %v253_v48 = vld [vmem:[%s11859_s10 + $0x10] sm:$0xff]  ;;  %v254_v49 = vld [vmem:[%s11859_s10 + $0x18] sm:$0xff] }
  0xb9   : > { %v388_v56 = vpack.c.bf16 %v254_v49, %v253_v48  ;;  %v1959_v42 = vld [vmem:[%s11859_s10 + $0x92] sm:$0xff]  ;;  %v1960_v43 = vld [vmem:[%s11859_s10 + $0x9a] sm:$0xff]  ;;  %v396_v48 = vpack.c.bf16 %v270_v41, %v269_v40  ;;  %v404_v40 = vpack.c.bf16 %v286_v27, %v285_v26  ;;  %v2094_v41 = vpack.c.bf16 %v1976_v29, %v1975_v28 }
  0xba   : > { %v2086_v49 = vpack.c.bf16 %v1960_v43, %v1959_v42  ;;  %v298_v26 = vld [vmem:[%s11859_s10 + $0x178] sm:$0xff]  ;;  %v299_v29 = vld [vmem:[%s11859_s10 + $0x180] sm:$0xff] }
  0xbb   : > { %v1987_v27 = vld [vmem:[%s11859_s10 + $0x172] sm:$0xff]  ;;  %v1988_v28 = vld [vmem:[%s11859_s10 + $0x17a] sm:$0xff] }
  0xbf   : > { %10172 = vmatmul.mubr.bf16.gmra.mxu0 %v632_v58  ;;  %10240 = vmatmul.mubr.bf16.gmra.mxu1 %v666_v59  ;;  %v389_v58 = vpack.c.bf16 %v256_v53, %v255_v52  ;;  %v2079_v59 = vpack.c.bf16 %v1946_v55, %v1945_v54  ;;  %v273_v52 = vld [vmem:[%s11859_s10 + $0xb0] sm:$0xff]  ;;  %v274_v53 = vld [vmem:[%s11859_s10 + $0xb8] sm:$0xff] }
  0xc0   : > { %10175 = vmatprep.mubr.bf16.mxu0 %v633_v60  ;;  %10243 = vmatprep.mubr.bf16.mxu1 %v667_v61  ;;  %v257_v60 = vld [vmem:[%s11859_s10 + $0x30] sm:$0xff]  ;;  %v1964_v55 = vld [vmem:[%s11859_s10 + $0xba] sm:$0xff] }
  0xc1   : > { %v11587_v61 = vld [vmem:[%s15269_s1 + $0xf0] sm:$0xff]  }
  0xc2   : > { %v1963_v54 = vld [vmem:[%s11859_s10 + $0xb2] sm:$0xff] }
  0xc7   : > { %10176 = vmatmul.mubr.bf16.gmra.mxu0 %v634_v6  ;;  %10244 = vmatmul.mubr.bf16.gmra.mxu1 %v668_v7  ;;  %v11589_v6 = vld [vmem:[%s15269_s1 + $0xe8] sm:$0xff]  }
  0xc8   : > { %10179 = vmatprep.mubr.bf16.mxu0 %v635_v8  ;;  %10247 = vmatprep.mubr.bf16.mxu1 %v669_v9  ;;  %v11590_v7 = vld [vmem:[%s15269_s1 + $0x128] sm:$0xff]   ;;  %v391_v8 = vpack.c.bf16 %v260_v3, %v259_v2  ;;  %v2081_v9 = vpack.c.bf16 %v1950_v5, %v1949_v4  ;;  %v1967_v2 = vld [vmem:[%s11859_s10 + $0xd2] sm:$0xff] }
  0xc9   : > { %v1968_v3 = vld [vmem:[%s11859_s10 + $0xda] sm:$0xff]  ;;  %v280_v5 = vld [vmem:[%s11859_s10 + $0xe8] sm:$0xff] }
  0xca   : > { %v279_v4 = vld [vmem:[%s11859_s10 + $0xe0] sm:$0xff] }
  0xcf   : > { %10180 = vmatmul.mubr.bf16.gmra.mxu0 %v636_v18  ;;  %10248 = vmatmul.mubr.bf16.gmra.mxu1 %v670_v19  ;;  %v1953_v18 = vld [vmem:[%s11859_s10 + $0x62] sm:$0xff]  ;;  %v1954_v19 = vld [vmem:[%s11859_s10 + $0x6a] sm:$0xff] }
  0xd0   : > { %10183 = vmatprep.mubr.bf16.mxu0 %v637_v20  ;;  %10251 = vmatprep.mubr.bf16.mxu1 %v671_v21  ;;  %v11593_v20 = vld [vmem:[%s15269_s1 + $0xd8] sm:$0xff]   ;;  %v2083_v25 = vpack.c.bf16 %v1954_v19, %v1953_v18  ;;  %v1973_v18 = vld [vmem:[%s11859_s10 + $0x102] sm:$0xff] }
  0xd1   : > { %v11594_v21 = vld [vmem:[%s15269_s1 + $0x118] sm:$0xff]  }
  0xd2   : > { %v1974_v19 = vld [vmem:[%s11859_s10 + $0x10a] sm:$0xff] }
  0xd7   : > { %10184 = vmatmul.mubr.bf16.gmra.mxu0 %v638_v30  ;;  %10252 = vmatmul.mubr.bf16.gmra.mxu1 %v672_v31  ;;  %v267_v30 = vld [vmem:[%s11859_s10 + $0x80] sm:$0xff]  ;;  %v268_v31 = vld [vmem:[%s11859_s10 + $0x88] sm:$0xff] }
  0xd8   : > { %10187 = vmatprep.mubr.bf16.mxu0 %v639_v32  ;;  %10255 = vmatprep.mubr.bf16.mxu1 %v673_v33  ;;  %v1957_v32 = vld [vmem:[%s11859_s10 + $0x82] sm:$0xff]  ;;  %v1958_v33 = vld [vmem:[%s11859_s10 + $0x8a] sm:$0xff]  ;;  %v395_v36 = vpack.c.bf16 %v268_v31, %v267_v30 }
  0xd9   : > { %v2085_v37 = vpack.c.bf16 %v1958_v33, %v1957_v32  ;;  %v287_v30 = vld [vmem:[%s11859_s10 + $0x120] sm:$0xff]  ;;  %v288_v33 = vld [vmem:[%s11859_s10 + $0x128] sm:$0xff] }
  0xda   : > { %v405_v42 = vpack.c.bf16 %v288_v33, %v287_v30  ;;  %v11598_v30 = vld [vmem:[%s15269_s1 + $0x108] sm:$0xff]  }
  0xdf   : > { %10188 = vmatmul.mubr.bf16.gmra.mxu0 %v640_v44  ;;  %10256 = vmatmul.mubr.bf16.gmra.mxu1 %v674_v45  ;;  %v271_v44 = vld [vmem:[%s11859_s10 + $0xa0] sm:$0xff]  ;;  %v272_v45 = vld [vmem:[%s11859_s10 + $0xa8] sm:$0xff] }
  0xe0   : > { %10275 = vmatprep.mubr.bf16.mxu1 %v387_v46  ;;  %10427 = vmatprep.mubr.bf16.mxu0 %v2077_v47  ;;  %v1961_v46 = vld [vmem:[%s11859_s10 + $0xa2] sm:$0xff]  ;;  %v1962_v47 = vld [vmem:[%s11859_s10 + $0xaa] sm:$0xff]  ;;  %v397_v50 = vpack.c.bf16 %v272_v45, %v271_v44 }
  0xe1   : > { %v2087_v51 = vpack.c.bf16 %v1962_v47, %v1961_v46 }
  0xe7   : > { %10276 = vmatmul.mubr.bf16.vlgmr.msra.gmra.mxu1 %v388_v56  ;;  %10428 = vmatmul.mubr.bf16.vlgmr.msra.gmra.mxu0 %v2078_v57  ;;  %v275_v56 = vld [vmem:[%s11859_s10 + $0xc0] sm:$0xff]  ;;  %v276_v57 = vld [vmem:[%s11859_s10 + $0xc8] sm:$0xff] }
  0xe8   : > { %10564 = vmatpush3.bf16.msra.mxu1 %v11996_v38  ;;  %10716 = vmatpush3.bf16.msra.mxu0 %v12001_v39  ;;  %v390_v38 = vpack.c.bf16 %v258_v63, %v257_v60  ;;  %v2080_v39 = vpack.c.bf16 %v1948_v1, %v1947_v0  ;;  %v398_v60 = vpack.c.bf16 %v274_v53, %v273_v52  ;;  %v277_v0 = vld [vmem:[%s11859_s10 + $0xd0] sm:$0xff]  ;;  %v278_v1 = vld [vmem:[%s11859_s10 + $0xd8] sm:$0xff]  ;;  %v291_v52 = vld [vmem:[%s11859_s10 + $0x140] sm:$0xff] }
  0xe9   : > { %10279 = vmatprep.mubr.bf16.mxu1 %v389_v58  ;;  %10431 = vmatprep.mubr.bf16.mxu0 %v2079_v59  ;;  %v1965_v58 = vld [vmem:[%s11859_s10 + $0xc2] sm:$0xff]  ;;  %v1966_v59 = vld [vmem:[%s11859_s10 + $0xca] sm:$0xff] }
  0xea   : > { %10565 = vmatprep.subr.bf16.mxu1 %v11587_v61  ;;  %10717 = vmatprep.subr.bf16.mxu0 %v11588_v62  ;;  %v2089_v63 = vpack.c.bf16 %v1966_v59, %v1965_v58 }
  0xec   : > { %10566 = vmatpush3.bf16.msra.mxu1 %v11587_v61  ;;  %10718 = vmatpush3.bf16.msra.mxu0 %v11588_v62  ;;  %v2088_v61 = vpack.c.bf16 %v1964_v55, %v1963_v54  ;;  %v399_v62 = vpack.c.bf16 %v276_v57, %v275_v56  ;;  %v292_v55 = vld [vmem:[%s11859_s10 + $0x148] sm:$0xff] }
  0xed   : > { %10567 = vmatprep.subr.bf16.mxu1 %v11589_v6  ;;  %10719 = vmatprep.subr.bf16.mxu0 %v11590_v7  ;;  %v1981_v56 = vld [vmem:[%s11859_s10 + $0x142] sm:$0xff]  ;;  %v1982_v57 = vld [vmem:[%s11859_s10 + $0x14a] sm:$0xff] }
  0xef   : > { %10280 = vmatmul.mubr.bf16.gmra.mxu1 %v390_v38  ;;  %10432 = vmatmul.mubr.bf16.gmra.mxu0 %v2080_v39  ;;  %v11595_v38 = vld [vmem:[%s15269_s1 + $0xd0] sm:$0xff]   ;;  %v400_v39 = vpack.c.bf16 %v278_v1, %v277_v0 }
  0xf0   : > { %10283 = vmatprep.mubr.bf16.mxu1 %v391_v8  ;;  %10435 = vmatprep.mubr.bf16.mxu0 %v2081_v9  ;;  %v2090_v8 = vpack.c.bf16 %v1968_v3, %v1967_v2  ;;  %v11596_v9 = vld [vmem:[%s15269_s1 + $0x110] sm:$0xff]  }
  0xf1   : > { %10568 = vmatpush3.bf16.msra.mxu1 %v11589_v6  ;;  %10720 = vmatpush3.bf16.msra.mxu0 %v11590_v7  ;;  %v1969_v6 = vld [vmem:[%s11859_s10 + $0xe2] sm:$0xff]  ;;  %v1970_v7 = vld [vmem:[%s11859_s10 + $0xea] sm:$0xff] }
  0xf2   : > { %10569 = vmatprep.subr.bf16.mxu1 %v11591_v10  ;;  %10721 = vmatprep.subr.bf16.mxu0 %v11592_v11 }
  0xf5   : > { %10570 = vmatpush3.bf16.msra.mxu1 %v11591_v10  ;;  %10722 = vmatpush3.bf16.msra.mxu0 %v11592_v11  ;;  %v401_v10 = vpack.c.bf16 %v280_v5, %v279_v4  ;;  %v2091_v11 = vpack.c.bf16 %v1970_v7, %v1969_v6  ;;  %v293_v4 = vld [vmem:[%s11859_s10 + $0x150] sm:$0xff]  ;;  %v294_v5 = vld [vmem:[%s11859_s10 + $0x158] sm:$0xff] }
  0xf6   : > { %10571 = vmatprep.subr.bf16.mxu1 %v11593_v20  ;;  %10723 = vmatprep.subr.bf16.mxu0 %v11594_v21  ;;  %v1983_v6 = vld [vmem:[%s11859_s10 + $0x152] sm:$0xff]  ;;  %v1984_v7 = vld [vmem:[%s11859_s10 + $0x15a] sm:$0xff] }
  0xf7   : > { %10284 = vmatmul.mubr.bf16.gmra.mxu1 %v392_v22  ;;  %10436 = vmatmul.mubr.bf16.gmra.mxu0 %v2082_v23  ;;  %v403_v22 = vpack.c.bf16 %v284_v17, %v283_v16  ;;  %v2093_v23 = vpack.c.bf16 %v1974_v19, %v1973_v18 }
  0xf8   : > { %10287 = vmatprep.mubr.bf16.mxu1 %v393_v24  ;;  %10439 = vmatprep.mubr.bf16.mxu0 %v2083_v25 }
  0xf9   : > { %10572 = vmatpush3.bf16.msra.mxu1 %v11593_v20  ;;  %10724 = vmatpush3.bf16.msra.mxu0 %v11594_v21  ;;  %v402_v20 = vpack.c.bf16 %v282_v13, %v281_v12  ;;  %v2092_v21 = vpack.c.bf16 %v1972_v15, %v1971_v14  ;;  %v408_v14 = vpack.c.bf16 %v294_v5, %v293_v4  ;;  %v303_v4 = vld [vmem:[%s11859_s10 + $0x1a0] sm:$0xff] }
  0xfa   : > { %10573 = vmatprep.subr.bf16.mxu1 %v11595_v38  ;;  %10725 = vmatprep.subr.bf16.mxu0 %v11596_v9  ;;  %v2098_v15 = vpack.c.bf16 %v1984_v7, %v1983_v6  ;;  %v304_v7 = vld [vmem:[%s11859_s10 + $0x1a8] sm:$0xff] }
  0xfd   : > { %10574 = vmatpush3.bf16.msra.mxu1 %v11595_v38  ;;  %10726 = vmatpush3.bf16.msra.mxu0 %v11596_v9  ;;  %v295_v38 = vld [vmem:[%s11859_s10 + $0x160] sm:$0xff]  ;;  %v296_v9 = vld [vmem:[%s11859_s10 + $0x168] sm:$0xff] }
  0xfe   : > { %v409_v16 = vpack.c.bf16 %v296_v9, %v295_v38  ;;  %10727 = vmatprep.subr.bf16.mxu0 %v11598_v30  ;;  %v1993_v38 = vld [vmem:[%s11859_s10 + $0x1a2] sm:$0xff]  ;;  %v1994_v9 = vld [vmem:[%s11859_s10 + $0x1aa] sm:$0xff] }
  0xff   : > { %10288 = vmatmul.mubr.bf16.gmra.mxu1 %v394_v34  ;;  %10440 = vmatmul.mubr.bf16.gmra.mxu0 %v2084_v35  ;;  %v1977_v34 = vld [vmem:[%s11859_s10 + $0x122] sm:$0xff]  ;;  %v1978_v35 = vld [vmem:[%s11859_s10 + $0x12a] sm:$0xff] }
 0x100   : > { %10291 = vmatprep.mubr.bf16.mxu1 %v395_v36  ;;  %10443 = vmatprep.mubr.bf16.mxu0 %v2085_v37  ;;  %v2095_v43 = vpack.c.bf16 %v1978_v35, %v1977_v34  ;;  %v300_v35 = vld [vmem:[%s11859_s10 + $0x188] sm:$0xff] }
 0x101   : > { %10728 = vmatpush3.bf16.msra.mxu0 %v11598_v30  ;;  %v1995_v30 = vld [vmem:[%s11859_s10 + $0x1b2] sm:$0xff] }
 0x107   : > { %10292 = vmatmul.mubr.bf16.gmra.mxu1 %v396_v48  ;;  %10444 = vmatmul.mubr.bf16.gmra.mxu0 %v2086_v49  ;;  %v289_v48 = vld [vmem:[%s11859_s10 + $0x130] sm:$0xff]  ;;  %v290_v49 = vld [vmem:[%s11859_s10 + $0x138] sm:$0xff] }
 0x108   : > { %10295 = vmatprep.mubr.bf16.mxu1 %v397_v50  ;;  %10447 = vmatprep.mubr.bf16.mxu0 %v2087_v51  ;;  %v1979_v50 = vld [vmem:[%s11859_s10 + $0x132] sm:$0xff]  ;;  %v1980_v51 = vld [vmem:[%s11859_s10 + $0x13a] sm:$0xff] }
 0x10f   : > { %10296 = vmatmul.mubr.bf16.gmra.mxu1 %v398_v60  ;;  %10448 = vmatmul.mubr.bf16.gmra.mxu0 %v2088_v61  ;;  %v406_v60 = vpack.c.bf16 %v290_v49, %v289_v48  ;;  %v2096_v61 = vpack.c.bf16 %v1980_v51, %v1979_v50  ;;  %v2100_v49 = vpack.c.bf16 %v1988_v28, %v1987_v27  ;;  %v305_v28 = vld [vmem:[%s11859_s10 + $0x1b0] sm:$0xff] }
 0x110   : > { %10299 = vmatprep.mubr.bf16.mxu1 %v399_v62  ;;  %10451 = vmatprep.mubr.bf16.mxu0 %v2089_v63  ;;  %v407_v62 = vpack.c.bf16 %v292_v55, %v291_v52  ;;  %v2097_v63 = vpack.c.bf16 %v1982_v57, %v1981_v56  ;;  %v411_v50 = vpack.c.bf16 %v300_v35, %v299_v29  ;;  %v306_v29 = vld [vmem:[%s11859_s10 + $0x1b8] sm:$0xff] }
 0x111   : > { %v1996_v35 = vld [vmem:[%s11859_s10 + $0x1ba] sm:$0xff] }
 0x117   : > { %10300 = vmatmul.mubr.bf16.gmra.mxu1 %v400_v39  ;;  %10452 = vmatmul.mubr.bf16.gmra.mxu0 %v2090_v8 }
 0x118   : > { %10303 = vmatprep.mubr.bf16.mxu1 %v401_v10  ;;  %10455 = vmatprep.mubr.bf16.mxu0 %v2091_v11  ;;  %v1985_v10 = vld [vmem:[%s11859_s10 + $0x162] sm:$0xff]  ;;  %v1986_v11 = vld [vmem:[%s11859_s10 + $0x16a] sm:$0xff] }
 0x119   : > { %v2099_v17 = vpack.c.bf16 %v1986_v11, %v1985_v10 }
 0x11f   : > { %v12189_v24 = vpop.f32.mrf.mxu0  ;;  %v12191_v25 = vpop.f32.mrf.mxu1  ;;  %10304 = vmatmul.mubr.bf16.gmra.mxu1 %v402_v20  ;;  %10456 = vmatmul.mubr.bf16.gmra.mxu0 %v2092_v21  ;;  %v11597_v20 = vld [vmem:[%s15269_s1 + $0xc8] sm:$0xff]  }
 0x120   : > { %15282 = vst [vmem:[#allocation8_spill] sm:$0xff] %v12191_v25  ;;  %10307 = vmatprep.mubr.bf16.mxu1 %v403_v22  ;;  %10459 = vmatprep.mubr.bf16.mxu0 %v2093_v23  ;;  %v297_v23 = vld [vmem:[%s11859_s10 + $0x170] sm:$0xff] }
 0x121   : > { %v12198_v31 = vpop.f32.mrf.mxu0  ;;  %v12200_v32 = vpop.f32.mrf.mxu1  ;;  %10575 = vmatprep.subr.bf16.mxu1 %v11597_v20  ;;  %v410_v48 = vpack.c.bf16 %v298_v26, %v297_v23 }
 0x122   : > { %15283 = vst [vmem:[#allocation9_spill] sm:$0xff] %v12200_v32  ;;  %10576 = vmatpush3.bf16.msra.mxu1 %v11597_v20 }
 0x123   : > { %v12205_v36 = vpop.f32.mrf.mxu0  ;;  %v12207_v37 = vpop.f32.mrf.mxu1 }
 0x124   : > { %15284 = vst [vmem:[#allocation10_spill] sm:$0xff] %v12207_v37  ;;  %v12494_v37 = vld [vmem:[%s15269_s1 + $0x1b8] sm:$0xff]  }
 0x125   : > { %v12209_v44 = vpop.f32.mrf.mxu0  ;;  %v12211_v45 = vpop.f32.mrf.mxu1  ;;  %15335 = vst [vmem:[#allocation61_spill] sm:$0xff] %v12494_v37 }
 0x126   : > { %15285 = vst [vmem:[#allocation11_spill] sm:$0xff] %v12211_v45  ;;  %v330_v45 = vld [vmem:[%s11859_s10 + $0x278] sm:$0xff] }
 0x127   : > { %v12213_v46 = vpop.f32.mrf.mxu0  ;;  %v12215_v47 = vpop.f32.mrf.mxu1  ;;  %10308 = vmatmul.mubr.bf16.gmra.mxu1 %v404_v40  ;;  %10460 = vmatmul.mubr.bf16.gmra.mxu0 %v2094_v41  ;;  %v1989_v40 = vld [vmem:[%s11859_s10 + $0x182] sm:$0xff]  ;;  %v1990_v41 = vld [vmem:[%s11859_s10 + $0x18a] sm:$0xff] }
 0x128   : > { %15286 = vst [vmem:[#allocation12_spill] sm:$0xff] %v12215_v47  ;;  %10311 = vmatprep.mubr.bf16.mxu1 %v405_v42  ;;  %10463 = vmatprep.mubr.bf16.mxu0 %v2095_v43  ;;  %v2101_v51 = vpack.c.bf16 %v1990_v41, %v1989_v40  ;;  %v307_v40 = vld [vmem:[%s11859_s10 + $0x1c0] sm:$0xff] }
 0x129   : > { %v12222_v53 = vpop.f32.mrf.mxu0  ;;  %v12224_v54 = vpop.f32.mrf.mxu1 }
 0x12a   : > { %15287 = vst [vmem:[#allocation13_spill] sm:$0xff] %v12224_v54 }
 0x12b   : > { %v12229_v58 = vpop.f32.mrf.mxu0  ;;  %v12231_v59 = vpop.f32.mrf.mxu1 }
 0x12c   : > { %15288 = vst [vmem:[#allocation14_spill] sm:$0xff] %v12231_v59 }
 0x12d   : > { %v12233_v0 = vpop.f32.mrf.mxu0  ;;  %v12235_v1 = vpop.f32.mrf.mxu1 }
 0x12e   : > { %15289 = vst [vmem:[#allocation15_spill] sm:$0xff] %v12235_v1  ;;  %v326_v1 = vld [vmem:[%s11859_s10 + $0x258] sm:$0xff] }
 0x12f   : > { %v12237_v2 = vpop.f32.mrf.mxu0  ;;  %v12239_v3 = vpop.f32.mrf.mxu1  ;;  %10312 = vmatmul.mubr.bf16.gmra.mxu1 %v406_v60  ;;  %10464 = vmatmul.mubr.bf16.gmra.mxu0 %v2096_v61  ;;  %v301_v60 = vld [vmem:[%s11859_s10 + $0x190] sm:$0xff]  ;;  %v302_v61 = vld [vmem:[%s11859_s10 + $0x198] sm:$0xff] }
 0x130   : > { %15290 = vst [vmem:[#allocation16_spill] sm:$0xff] %v12239_v3  ;;  %10315 = vmatprep.mubr.bf16.mxu1 %v407_v62  ;;  %10467 = vmatprep.mubr.bf16.mxu0 %v2097_v63  ;;  %v1991_v62 = vld [vmem:[%s11859_s10 + $0x192] sm:$0xff]  ;;  %v1992_v63 = vld [vmem:[%s11859_s10 + $0x19a] sm:$0xff] }
 0x131   : > { %v12246_v39 = vpop.f32.mrf.mxu0  ;;  %v12248_v8 = vpop.f32.mrf.mxu1 }
 0x132   : > { %15291 = vst [vmem:[#allocation17_spill] sm:$0xff] %v12248_v8 }
 0x133   : > { %v12253_v12 = vpop.f32.mrf.mxu0  ;;  %v12255_v13 = vpop.f32.mrf.mxu1 }
 0x134   : > { %15292 = vst [vmem:[#allocation18_spill] sm:$0xff] %v12255_v13 }
 0x135   : > { %v12257_v18 = vpop.f32.mrf.mxu0  ;;  %v12259_v19 = vpop.f32.mrf.mxu1 }
 0x136   : > { %15293 = vst [vmem:[#allocation19_spill] sm:$0xff] %v12259_v19  ;;  %v322_v19 = vld [vmem:[%s11859_s10 + $0x238] sm:$0xff] }
 0x137   : > { %v12264_v21 = vpop.f32.mrf.mxu0  ;;  %v12266_v22 = vpop.f32.mrf.mxu1  ;;  %10316 = vmatmul.mubr.bf16.gmra.mxu1 %v408_v14  ;;  %10468 = vmatmul.mubr.bf16.gmra.mxu0 %v2098_v15  ;;  %v412_v14 = vpack.c.bf16 %v302_v61, %v301_v60  ;;  %v2102_v15 = vpack.c.bf16 %v1992_v63, %v1991_v62  ;;  %v414_v62 = vpack.c.bf16 %v306_v29, %v305_v28  ;;  %v1999_v28 = vld [vmem:[%s11859_s10 + $0x1d2] sm:$0xff]  ;;  %v2000_v29 = vld [vmem:[%s11859_s10 + $0x1da] sm:$0xff] }
 0x138   : > { %15294 = vst [vmem:[#allocation20_spill] sm:$0xff] %v12266_v22  ;;  %10319 = vmatprep.mubr.bf16.mxu1 %v409_v16  ;;  %10471 = vmatprep.mubr.bf16.mxu0 %v2099_v17  ;;  %v413_v16 = vpack.c.bf16 %v304_v7, %v303_v4  ;;  %v2103_v17 = vpack.c.bf16 %v1994_v9, %v1993_v38 }
 0x139   : > { %v12276_v33 = vpop.f32.mrf.mxu0  ;;  %v12278_v34 = vpop.f32.mrf.mxu1  ;;  %v2104_v63 = vpack.c.bf16 %v1996_v35, %v1995_v30  ;;  %v311_v30 = vld [vmem:[%s11859_s10 + $0x1e0] sm:$0xff] }
 0x13a   : > { %15295 = vst [vmem:[#allocation21_spill] sm:$0xff] %v12278_v34 }
 0x13b   : > { %v12283_v42 = vpop.f32.mrf.mxu0  ;;  %v12285_v43 = vpop.f32.mrf.mxu1 }
 0x13c   : > { %15296 = vst [vmem:[#allocation22_spill] sm:$0xff] %v12285_v43 }
 0x13d   : > { %v12287_v52 = vpop.f32.mrf.mxu0  ;;  %v12289_v55 = vpop.f32.mrf.mxu1 }
 0x13e   : > { %15297 = vst [vmem:[#allocation23_spill] sm:$0xff] %v12289_v55 }
 0x13f   : > { %v12291_v56 = vpop.f32.mrf.mxu0  ;;  %v12293_v57 = vpop.f32.mrf.mxu1  ;;  %10320 = vmatmul.mubr.bf16.gmra.mxu1 %v410_v48  ;;  %10472 = vmatmul.mubr.bf16.gmra.mxu0 %v2100_v49  ;;  %v308_v49 = vld [vmem:[%s11859_s10 + $0x1c8] sm:$0xff] }
 0x140   : > { %15298 = vst [vmem:[#allocation24_spill] sm:$0xff] %v12293_v57  ;;  %10323 = vmatprep.mubr.bf16.mxu1 %v411_v50  ;;  %10475 = vmatprep.mubr.bf16.mxu0 %v2101_v51  ;;  %v1997_v50 = vld [vmem:[%s11859_s10 + $0x1c2] sm:$0xff]  ;;  %v1998_v51 = vld [vmem:[%s11859_s10 + $0x1ca] sm:$0xff]  ;;  %v415_v4 = vpack.c.bf16 %v308_v49, %v307_v40 }
 0x141   : > { %v12300_v5 = vpop.f32.mrf.mxu0  ;;  %v12302_v6 = vpop.f32.mrf.mxu1  ;;  %v2105_v7 = vpack.c.bf16 %v1998_v51, %v1997_v50  ;;  %v312_v49 = vld [vmem:[%s11859_s10 + $0x1e8] sm:$0xff] }
 0x142   : > { %15299 = vst [vmem:[#allocation25_spill] sm:$0xff] %v12302_v6  ;;  %v2001_v50 = vld [vmem:[%s11859_s10 + $0x1e2] sm:$0xff]  ;;  %v2002_v51 = vld [vmem:[%s11859_s10 + $0x1ea] sm:$0xff] }
 0x143   : > { %v12307_v10 = vpop.f32.mrf.mxu0  ;;  %v12309_v11 = vpop.f32.mrf.mxu1 }
 0x144   : > { %15300 = vst [vmem:[#allocation26_spill] sm:$0xff] %v12309_v11 }
 0x145   : > { %v12311_v20 = vpop.f32.mrf.mxu0  ;;  %v12313_v23 = vpop.f32.mrf.mxu1 }
 0x146   : > { %15301 = vst [vmem:[#allocation27_spill] sm:$0xff] %v12313_v23  ;;  %v314_v23 = vld [vmem:[%s11859_s10 + $0x1f8] sm:$0xff] }
 0x147   : > { %v12315_v26 = vpop.f32.mrf.mxu0  ;;  %v12317_v27 = vpop.f32.mrf.mxu1  ;;  %10324 = vmatmul.mubr.bf16.gmra.mxu1 %v412_v14  ;;  %10476 = vmatmul.mubr.bf16.gmra.mxu0 %v2102_v15 }
 0x148   : > { %15302 = vst [vmem:[#allocation28_spill] sm:$0xff] %v12317_v27  ;;  %10327 = vmatprep.mubr.bf16.mxu1 %v413_v16  ;;  %10479 = vmatprep.mubr.bf16.mxu0 %v2103_v17  ;;  %v309_v16 = vld [vmem:[%s11859_s10 + $0x1d0] sm:$0xff]  ;;  %v310_v17 = vld [vmem:[%s11859_s10 + $0x1d8] sm:$0xff] }
 0x149   : > { %v12324_v41 = vpop.f32.mrf.mxu0  ;;  %v12326_v48 = vpop.f32.mrf.mxu1 }
 0x14a   : > { %15303 = vst [vmem:[#allocation29_spill] sm:$0xff] %v12326_v48 }
 0x14b   : > { %v12331_v60 = vpop.f32.mrf.mxu0  ;;  %v12333_v61 = vpop.f32.mrf.mxu1 }
 0x14c   : > { %15304 = vst [vmem:[#allocation30_spill] sm:$0xff] %v12333_v61 }
 0x14d   : > { %v12335_v38 = vpop.f32.mrf.mxu0  ;;  %v12337_v9 = vpop.f32.mrf.mxu1 }
 0x14e   : > { %15305 = vst [vmem:[#allocation31_spill] sm:$0xff] %v12337_v9  ;;  %v2107_v9 = vpack.c.bf16 %v2002_v51, %v2001_v50  ;;  %v316_v50 = vld [vmem:[%s11859_s10 + $0x208] sm:$0xff] }
 0x14f   : > { %v12339_v14 = vpop.f32.mrf.mxu0  ;;  %v12341_v15 = vpop.f32.mrf.mxu1  ;;  %10328 = vmatmul.mubr.bf16.gmra.mxu1 %v414_v62  ;;  %10480 = vmatmul.mubr.bf16.gmra.mxu0 %v2104_v63  ;;  %v416_v63 = vpack.c.bf16 %v310_v17, %v309_v16  ;;  %v2003_v16 = vld [vmem:[%s11859_s10 + $0x1f2] sm:$0xff]  ;;  %v2004_v17 = vld [vmem:[%s11859_s10 + $0x1fa] sm:$0xff]  ;;  %v2005_v51 = vld [vmem:[%s11859_s10 + $0x202] sm:$0xff] }
 0x150   : > { %15306 = vst [vmem:[#allocation32_spill] sm:$0xff] %v12341_v15  ;;  %10331 = vmatprep.mubr.bf16.mxu1 %v415_v4  ;;  %10483 = vmatprep.mubr.bf16.mxu0 %v2105_v7  ;;  %v2106_v4 = vpack.c.bf16 %v2000_v29, %v1999_v28  ;;  %v417_v7 = vpack.c.bf16 %v312_v49, %v311_v30  ;;  %v315_v28 = vld [vmem:[%s11859_s10 + $0x200] sm:$0xff] }
 0x151   : > { %v12348_v35 = vpop.f32.mrf.mxu0  ;;  %v12350_v40 = vpop.f32.mrf.mxu1  ;;  %v11599_v29 = vld [vmem:[%s15269_s1 + $0xc0] sm:$0xff]  }
 0x152   : > { %15307 = vst [vmem:[#allocation33_spill] sm:$0xff] %v12350_v40  ;;  %10577 = vmatprep.subr.bf16.mxu1 %v11599_v29 }
 0x153   : > { %v12355_v15 = vpop.f32.mrf.mxu0  ;;  %v12357_v62 = vpop.f32.mrf.mxu1  ;;  %10578 = vmatpush3.bf16.msra.mxu1 %v11599_v29 }
 0x154   : > { %15308 = vst [vmem:[#allocation34_spill] sm:$0xff] %v12357_v62  ;;  %v313_v62 = vld [vmem:[%s11859_s10 + $0x1f0] sm:$0xff] }
 0x155   : > { %v12359_v61 = vpop.f32.mrf.mxu0  ;;  %v12361_v40 = vpop.f32.mrf.mxu1 }
 0x156   : > { %15309 = vst [vmem:[#allocation35_spill] sm:$0xff] %v12361_v40  ;;  %v2108_v40 = vpack.c.bf16 %v2004_v17, %v2003_v16  ;;  %v2008_v16 = vld [vmem:[%s11859_s10 + $0x21a] sm:$0xff] }
 0x157   : > { %v12363_v48 = vpop.f32.mrf.mxu0  ;;  %v12365_v27 = vpop.f32.mrf.mxu1  ;;  %10332 = vmatmul.mubr.bf16.gmra.mxu1 %v416_v63  ;;  %10484 = vmatmul.mubr.bf16.gmra.mxu0 %v2106_v4  ;;  %v11600_v63 = vld [vmem:[%s15269_s1 + $0x100] sm:$0xff]  }
 0x158   : > { %15310 = vst [vmem:[#allocation36_spill] sm:$0xff] %v12365_v27  ;;  %10335 = vmatprep.mubr.bf16.mxu1 %v417_v7  ;;  %10487 = vmatprep.mubr.bf16.mxu0 %v2107_v9  ;;  %v2006_v27 = vld [vmem:[%s11859_s10 + $0x20a] sm:$0xff]  ;;  %v418_v7 = vpack.c.bf16 %v314_v23, %v313_v62  ;;  %v318_v62 = vld [vmem:[%s11859_s10 + $0x218] sm:$0xff]  ;;  %v319_v17 = vld [vmem:[%s11859_s10 + $0x220] sm:$0xff] }
 0x159   : > { %v12375_v30 = vpop.f32.mrf.mxu0  ;;  %v12377_v49 = vpop.f32.mrf.mxu1  ;;  %v2109_v11 = vpack.c.bf16 %v2006_v27, %v2005_v51  ;;  %10729 = vmatprep.subr.bf16.mxu0 %v11600_v63  ;;  %v317_v23 = vld [vmem:[%s11859_s10 + $0x210] sm:$0xff]  ;;  %v2009_v51 = vld [vmem:[%s11859_s10 + $0x222] sm:$0xff] }
 0x15a   : > { %15311 = vst [vmem:[#allocation37_spill] sm:$0xff] %v12377_v49  ;;  %v419_v49 = vpack.c.bf16 %v316_v50, %v315_v28  ;;  %10730 = vmatpush3.bf16.msra.mxu0 %v11600_v63  ;;  %v2007_v27 = vld [vmem:[%s11859_s10 + $0x212] sm:$0xff]  ;;  %v320_v50 = vld [vmem:[%s11859_s10 + $0x228] sm:$0xff] }
 0x15b   : > { %v12385_v9 = vpop.f32.mrf.mxu0  ;;  %v12387_v4 = vpop.f32.mrf.mxu1  ;;  %v2010_v63 = vld [vmem:[%s11859_s10 + $0x22a] sm:$0xff]  ;;  %11019 = vmatprep.subr.bf16.mxu0 %v12494_v37 }
 0x15c   : > { %15312 = vst [vmem:[#allocation38_spill] sm:$0xff] %v12387_v4 }
 0x15d   : > { %v12389_v6 = vpop.f32.mrf.mxu0  ;;  %v12391_v57 = vpop.f32.mrf.mxu1 }
 0x15e   : > { %15313 = vst [vmem:[#allocation39_spill] sm:$0xff] %v12391_v57 }
 0x15f   : > { %v12393_v55 = vpop.f32.mrf.mxu0  ;;  %v12395_v4 = vpop.f32.mrf.mxu1  ;;  %10336 = vmatmul.mubr.bf16.gmra.mxu1 %v418_v7  ;;  %10488 = vmatmul.mubr.bf16.gmra.mxu0 %v2108_v40  ;;  %v421_v7 = vpack.c.bf16 %v320_v50, %v319_v17  ;;  %v324_v50 = vld [vmem:[%s11859_s10 + $0x248] sm:$0xff] }
 0x160   : > { %15314 = vst [vmem:[#allocation40_spill] sm:$0xff] %v12395_v4  ;;  %10339 = vmatprep.mubr.bf16.mxu1 %v419_v49  ;;  %10491 = vmatprep.mubr.bf16.mxu0 %v2109_v11  ;;  %v420_v49 = vpack.c.bf16 %v318_v62, %v317_v23  ;;  %v2110_v11 = vpack.c.bf16 %v2008_v16, %v2007_v27  ;;  %v2011_v23 = vld [vmem:[%s11859_s10 + $0x232] sm:$0xff]  ;;  %v2012_v62 = vld [vmem:[%s11859_s10 + $0x23a] sm:$0xff] }
 0x161   : > { %v12402_v28 = vpop.f32.mrf.mxu0  ;;  %v12404_v29 = vpop.f32.mrf.mxu1  ;;  %v2111_v4 = vpack.c.bf16 %v2010_v63, %v2009_v51  ;;  %v323_v27 = vld [vmem:[%s11859_s10 + $0x240] sm:$0xff]  ;;  %v2014_v63 = vld [vmem:[%s11859_s10 + $0x24a] sm:$0xff] }
 0x162   : > { %15315 = vst [vmem:[#allocation41_spill] sm:$0xff] %v12404_v29  ;;  %v2013_v51 = vld [vmem:[%s11859_s10 + $0x242] sm:$0xff] }
 0x163   : > { %v12409_v57 = vpop.f32.mrf.mxu0  ;;  %v12411_v40 = vpop.f32.mrf.mxu1 }
 0x164   : > { %15316 = vst [vmem:[#allocation42_spill] sm:$0xff] %v12411_v40  ;;  %v321_v40 = vld [vmem:[%s11859_s10 + $0x230] sm:$0xff] }
 0x165   : > { %v12413_v43 = vpop.f32.mrf.mxu0  ;;  %v12415_v29 = vpop.f32.mrf.mxu1 }
 0x166   : > { %15317 = vst [vmem:[#allocation43_spill] sm:$0xff] %v12415_v29 }
 0x167   : > { %v12417_v34 = vpop.f32.mrf.mxu0  ;;  %v12419_v22 = vpop.f32.mrf.mxu1  ;;  %10340 = vmatmul.mubr.bf16.gmra.mxu1 %v420_v49  ;;  %10492 = vmatmul.mubr.bf16.gmra.mxu0 %v2110_v11  ;;  %v422_v11 = vpack.c.bf16 %v322_v19, %v321_v40  ;;  %v2015_v19 = vld [vmem:[%s11859_s10 + $0x252] sm:$0xff]  ;;  %v2016_v40 = vld [vmem:[%s11859_s10 + $0x25a] sm:$0xff] }
 0x168   : > { %15318 = vst [vmem:[#allocation44_spill] sm:$0xff] %v12419_v22  ;;  %10343 = vmatprep.mubr.bf16.mxu1 %v421_v7  ;;  %10495 = vmatprep.mubr.bf16.mxu0 %v2111_v4  ;;  %v2112_v4 = vpack.c.bf16 %v2012_v62, %v2011_v23  ;;  %v423_v7 = vpack.c.bf16 %v324_v50, %v323_v27  ;;  %v327_v23 = vld [vmem:[%s11859_s10 + $0x260] sm:$0xff]  ;;  %v328_v50 = vld [vmem:[%s11859_s10 + $0x268] sm:$0xff] }
 0x169   : > { %v12426_v16 = vpop.f32.mrf.mxu0  ;;  %v12428_v17 = vpop.f32.mrf.mxu1  ;;  %v2113_v22 = vpack.c.bf16 %v2014_v63, %v2013_v51  ;;  %v2017_v51 = vld [vmem:[%s11859_s10 + $0x262] sm:$0xff]  ;;  %v2018_v63 = vld [vmem:[%s11859_s10 + $0x26a] sm:$0xff] }
 0x16a   : > { %15319 = vst [vmem:[#allocation45_spill] sm:$0xff] %v12428_v17 }
 0x16b   : > { %v12433_v29 = vpop.f32.mrf.mxu0  ;;  %v12435_v49 = vpop.f32.mrf.mxu1 }
 0x16c   : > { %15320 = vst [vmem:[#allocation46_spill] sm:$0xff] %v12435_v49  ;;  %v325_v49 = vld [vmem:[%s11859_s10 + $0x250] sm:$0xff] }
 0x16d   : > { %v12437_v13 = vpop.f32.mrf.mxu0  ;;  %v12439_v17 = vpop.f32.mrf.mxu1 }
 0x16e   : > { %15321 = vst [vmem:[#allocation47_spill] sm:$0xff] %v12439_v17 }
 0x16f   : > { %v12441_v8 = vpop.f32.mrf.mxu0  ;;  %v12443_v3 = vpop.f32.mrf.mxu1  ;;  %10344 = vmatmul.mubr.bf16.gmra.mxu1 %v422_v11  ;;  %10496 = vmatmul.mubr.bf16.gmra.mxu0 %v2112_v4  ;;  %v424_v4 = vpack.c.bf16 %v326_v1, %v325_v49  ;;  %v2019_v1 = vld [vmem:[%s11859_s10 + $0x272] sm:$0xff]  ;;  %v2020_v49 = vld [vmem:[%s11859_s10 + $0x27a] sm:$0xff] }
 0x170   : > { %15322 = vst [vmem:[#allocation48_spill] sm:$0xff] %v12443_v3  ;;  %10347 = vmatprep.mubr.bf16.mxu1 %v423_v7  ;;  %10499 = vmatprep.mubr.bf16.mxu0 %v2113_v22  ;;  %v2114_v22 = vpack.c.bf16 %v2016_v40, %v2015_v19  ;;  %v425_v7 = vpack.c.bf16 %v328_v50, %v327_v23  ;;  %v331_v19 = vld [vmem:[%s11859_s10 + $0x280] sm:$0xff]  ;;  %v332_v50 = vld [vmem:[%s11859_s10 + $0x288] sm:$0xff] }
 0x171   : > { %v12450_v62 = vpop.f32.mrf.mxu0  ;;  %v12452_v27 = vpop.f32.mrf.mxu1  ;;  %v2115_v3 = vpack.c.bf16 %v2018_v63, %v2017_v51  ;;  %v2021_v51 = vld [vmem:[%s11859_s10 + $0x282] sm:$0xff]  ;;  %v2022_v63 = vld [vmem:[%s11859_s10 + $0x28a] sm:$0xff] }
 0x172   : > { %15323 = vst [vmem:[#allocation49_spill] sm:$0xff] %v12450_v62  ;;  %15324 = vst [vmem:[#allocation50_spill] sm:$0xff] %v12452_v27 }
 0x173   : > { %v12457_v17 = vpop.f32.mrf.mxu0  ;;  %v12459_v11 = vpop.f32.mrf.mxu1 }
 0x174   : > { %15325 = vst [vmem:[#allocation51_spill] sm:$0xff] %v12457_v17  ;;  %15326 = vst [vmem:[#allocation52_spill] sm:$0xff] %v12459_v11  ;;  %v329_v11 = vld [vmem:[%s11859_s10 + $0x270] sm:$0xff] }
 0x175   : > { %v12461_v59 = vpop.f32.mrf.mxu0  ;;  %v12463_v27 = vpop.f32.mrf.mxu1 }
 0x176   : > { %15327 = vst [vmem:[#allocation53_spill] sm:$0xff] %v12461_v59  ;;  %15328 = vst [vmem:[#allocation54_spill] sm:$0xff] %v12463_v27  ;;  %v427_v27 = vpack.c.bf16 %v332_v50, %v331_v19  ;;  %v2023_v19 = vld [vmem:[%s11859_s10 + $0x292] sm:$0xff]  ;;  %v2024_v50 = vld [vmem:[%s11859_s10 + $0x29a] sm:$0xff] }
 0x177   : > { %v12465_v54 = vpop.f32.mrf.mxu0  ;;  %v12467_v47 = vpop.f32.mrf.mxu1  ;;  %10348 = vmatmul.mubr.bf16.gmra.mxu1 %v424_v4  ;;  %10500 = vmatmul.mubr.bf16.gmra.mxu0 %v2114_v22  ;;  %v426_v22 = vpack.c.bf16 %v330_v45, %v329_v11 }
 0x178   : > { %15329 = vst [vmem:[#allocation55_spill] sm:$0xff] %v12465_v54  ;;  %15330 = vst [vmem:[#allocation56_spill] sm:$0xff] %v12467_v47  ;;  %10351 = vmatprep.mubr.bf16.mxu1 %v425_v7  ;;  %10503 = vmatprep.mubr.bf16.mxu0 %v2115_v3  ;;  %v12484_v47 = vld [vmem:[%s15269_s1 + $0x178] sm:$0xff]   ;;  %v2116_v7 = vpack.c.bf16 %v2020_v49, %v2019_v1 }
 0x179   : > { %v12474_v40 = vpop.f32.mrf.mxu0  ;;  %v12476_v23 = vpop.f32.mrf.mxu1  ;;  %10867 = vmatprep.subr.bf16.mxu1 %v12484_v47  ;;  %v333_v1 = vld [vmem:[%s11859_s10 + $0x290] sm:$0xff]  ;;  %v334_v49 = vld [vmem:[%s11859_s10 + $0x298] sm:$0xff] }
 0x17a   : > { %15331 = vst [vmem:[#allocation57_spill] sm:$0xff] %v12474_v40  ;;  %15332 = vst [vmem:[#allocation58_spill] sm:$0xff] %v12476_v23  ;;  %v2117_v23 = vpack.c.bf16 %v2022_v63, %v2021_v51  ;;  %v335_v51 = vld [vmem:[%s11859_s10 + $0x2a0] sm:$0xff] }
 0x17b   : > { %v12486_v4 = vpop.f32.mrf.mxu0  ;;  %v12488_v3 = vpop.f32.mrf.mxu1 }
 0x17c   : > { %15333 = vst [vmem:[#allocation59_spill] sm:$0xff] %v12486_v4  ;;  %15334 = vst [vmem:[#allocation60_spill] sm:$0xff] %v12488_v3  ;;  %v336_v3 = vld [vmem:[%s11859_s10 + $0x2a8] sm:$0xff] }
 0x17d   : > { %v12496_v32 = vpop.f32.mrf.mxu0  ;;  %v12498_v25 = vpop.f32.mrf.mxu1 }
 0x17e   : > { %15336 = vst [vmem:[#allocation62_spill] sm:$0xff] %v12496_v32  ;;  %15337 = vst [vmem:[#allocation63_spill] sm:$0xff] %v12498_v25  ;;  %v2025_v32 = vld [vmem:[%s11859_s10 + $0x2a2] sm:$0xff] }
 0x17f   : > { %v12501_v45 = vpop.f32.mrf.mxu0  ;;  %v12503_v11 = vpop.f32.mrf.mxu1  ;;  %10352 = vmatmul.mubr.bf16.gmra.mxu1 %v426_v22  ;;  %10504 = vmatmul.mubr.bf16.gmra.mxu0 %v2116_v7  ;;  %v429_v7 = vpack.c.bf16 %v336_v3, %v335_v51  ;;  %v2028_v3 = vld [vmem:[%s11859_s10 + $0x2ba] sm:$0xff]  ;;  %v2030_v51 = vld [vmem:[%s11859_s10 + $0x2ca] sm:$0xff] }
 0x180   : > { %15338 = vst [vmem:[#allocation64_spill] sm:$0xff] %v12501_v45  ;;  %15339 = vst [vmem:[#allocation65_spill] sm:$0xff] %v12503_v11  ;;  %10355 = vmatprep.mubr.bf16.mxu1 %v427_v27  ;;  %10507 = vmatprep.mubr.bf16.mxu0 %v2117_v23  ;;  %v2026_v45 = vld [vmem:[%s11859_s10 + $0x2aa] sm:$0xff]  ;;  %v428_v27 = vpack.c.bf16 %v334_v49, %v333_v1  ;;  %v2118_v23 = vpack.c.bf16 %v2024_v50, %v2023_v19  ;;  %v2027_v1 = vld [vmem:[%s11859_s10 + $0x2b2] sm:$0xff] }
 0x181   : > { %v12510_v63 = vpop.f32.mrf.mxu0  ;;  %v12512_v25 = vpop.f32.mrf.mxu1  ;;  %v2119_v11 = vpack.c.bf16 %v2026_v45, %v2025_v32  ;;  %v339_v32 = vld [vmem:[%s11859_s10 + $0x2c0] sm:$0xff]  ;;  %v340_v19 = vld [vmem:[%s11859_s10 + $0x2c8] sm:$0xff] }
 0x182   : > { %15340 = vst [vmem:[#allocation66_spill] sm:$0xff] %v12510_v63  ;;  %15341 = vst [vmem:[#allocation67_spill] sm:$0xff] %v12512_v25  ;;  %v2029_v50 = vld [vmem:[%s11859_s10 + $0x2c2] sm:$0xff] }
 0x183   : > { %v12517_v4 = vpop.f32.mrf.mxu0  ;;  %v12519_v22 = vpop.f32.mrf.mxu1 }
 0x184   : > { %15342 = vst [vmem:[#allocation68_spill] sm:$0xff] %v12517_v4  ;;  %15343 = vst [vmem:[#allocation69_spill] sm:$0xff] %v12519_v22  ;;  %v337_v22 = vld [vmem:[%s11859_s10 + $0x2b0] sm:$0xff]  ;;  %v338_v4 = vld [vmem:[%s11859_s10 + $0x2b8] sm:$0xff] }
 0x185   : > { %v12521_v63 = vpop.f32.mrf.mxu0  ;;  %v12523_v25 = vpop.f32.mrf.mxu1 }
 0x186   : > { %15344 = vst [vmem:[#allocation70_spill] sm:$0xff] %v12521_v63  ;;  %15345 = vst [vmem:[#allocation71_spill] sm:$0xff] %v12523_v25 }
 0x187   : > { %v12525_v40 = vpop.f32.mrf.mxu0  ;;  %v12527_v54 = vpop.f32.mrf.mxu1  ;;  %10356 = vmatmul.mubr.bf16.gmra.mxu1 %v428_v27  ;;  %10508 = vmatmul.mubr.bf16.gmra.mxu0 %v2118_v23  ;;  %v430_v23 = vpack.c.bf16 %v338_v4, %v337_v22  ;;  %v2031_v4 = vld [vmem:[%s11859_s10 + $0x2d2] sm:$0xff]  ;;  %v2032_v22 = vld [vmem:[%s11859_s10 + $0x2da] sm:$0xff] }
 0x188   : > { %15346 = vst [vmem:[#allocation72_spill] sm:$0xff] %v12525_v40  ;;  %15347 = vst [vmem:[#allocation73_spill] sm:$0xff] %v12527_v54  ;;  %10359 = vmatprep.mubr.bf16.mxu1 %v429_v7  ;;  %10511 = vmatprep.mubr.bf16.mxu0 %v2119_v11  ;;  %v2120_v11 = vpack.c.bf16 %v2028_v3, %v2027_v1  ;;  %v431_v7 = vpack.c.bf16 %v340_v19, %v339_v32  ;;  %v343_v1 = vld [vmem:[%s11859_s10 + $0x2e0] sm:$0xff]  ;;  %v344_v19 = vld [vmem:[%s11859_s10 + $0x2e8] sm:$0xff] }
 0x189   : > { %v12534_v45 = vpop.f32.mrf.mxu0  ;;  %v12536_v49 = vpop.f32.mrf.mxu1  ;;  %v2121_v54 = vpack.c.bf16 %v2030_v51, %v2029_v50  ;;  %v2033_v50 = vld [vmem:[%s11859_s10 + $0x2e2] sm:$0xff]  ;;  %v2034_v51 = vld [vmem:[%s11859_s10 + $0x2ea] sm:$0xff] }
 0x18a   : > { %15348 = vst [vmem:[#allocation74_spill] sm:$0xff] %v12534_v45  ;;  %15349 = vst [vmem:[#allocation75_spill] sm:$0xff] %v12536_v49 }
 0x18b   : > { %v12541_v25 = vpop.f32.mrf.mxu0  ;;  %v12543_v27 = vpop.f32.mrf.mxu1 }
 0x18c   : > { %15350 = vst [vmem:[#allocation76_spill] sm:$0xff] %v12541_v25  ;;  %15351 = vst [vmem:[#allocation77_spill] sm:$0xff] %v12543_v27  ;;  %v341_v27 = vld [vmem:[%s11859_s10 + $0x2d0] sm:$0xff]  ;;  %v342_v25 = vld [vmem:[%s11859_s10 + $0x2d8] sm:$0xff] }
 0x18d   : > { %v12545_v45 = vpop.f32.mrf.mxu0  ;;  %v12547_v49 = vpop.f32.mrf.mxu1 }
 0x18e   : > { %15352 = vst [vmem:[#allocation78_spill] sm:$0xff] %v12545_v45  ;;  %15353 = vst [vmem:[#allocation79_spill] sm:$0xff] %v12547_v49 }
 0x18f   : > { %v12549_v40 = vpop.f32.mrf.mxu0  ;;  %v12551_v63 = vpop.f32.mrf.mxu1  ;;  %10360 = vmatmul.mubr.bf16.gmra.mxu1 %v430_v23  ;;  %10512 = vmatmul.mubr.bf16.gmra.mxu0 %v2120_v11  ;;  %v432_v11 = vpack.c.bf16 %v342_v25, %v341_v27  ;;  %v2035_v25 = vld [vmem:[%s11859_s10 + $0x2f2] sm:$0xff]  ;;  %v2036_v27 = vld [vmem:[%s11859_s10 + $0x2fa] sm:$0xff] }
 0x190   : > { %15354 = vst [vmem:[#allocation80_spill] sm:$0xff] %v12549_v40  ;;  %15355 = vst [vmem:[#allocation81_spill] sm:$0xff] %v12551_v63  ;;  %10363 = vmatprep.mubr.bf16.mxu1 %v431_v7  ;;  %10515 = vmatprep.mubr.bf16.mxu0 %v2121_v54  ;;  %v2122_v54 = vpack.c.bf16 %v2032_v22, %v2031_v4  ;;  %v433_v7 = vpack.c.bf16 %v344_v19, %v343_v1  ;;  %v347_v4 = vld [vmem:[%s11859_s10 + $0x300] sm:$0xff]  ;;  %v348_v19 = vld [vmem:[%s11859_s10 + $0x308] sm:$0xff] }
 0x191   : > { %v12558_v3 = vpop.f32.mrf.mxu0  ;;  %v12560_v32 = vpop.f32.mrf.mxu1  ;;  %v2123_v63 = vpack.c.bf16 %v2034_v51, %v2033_v50  ;;  %v2037_v50 = vld [vmem:[%s11859_s10 + $0x302] sm:$0xff]  ;;  %v2038_v51 = vld [vmem:[%s11859_s10 + $0x30a] sm:$0xff] }
 0x192   : > { %15356 = vst [vmem:[#allocation82_spill] sm:$0xff] %v12558_v3  ;;  %15357 = vst [vmem:[#allocation83_spill] sm:$0xff] %v12560_v32 }
 0x193   : > { %v12565_v49 = vpop.f32.mrf.mxu0  ;;  %v12567_v23 = vpop.f32.mrf.mxu1 }
 0x194   : > { %15358 = vst [vmem:[#allocation84_spill] sm:$0xff] %v12565_v49  ;;  %15359 = vst [vmem:[#allocation85_spill] sm:$0xff] %v12567_v23  ;;  %v345_v23 = vld [vmem:[%s11859_s10 + $0x2f0] sm:$0xff]  ;;  %v346_v49 = vld [vmem:[%s11859_s10 + $0x2f8] sm:$0xff] }
 0x195   : > { %v12569_v3 = vpop.f32.mrf.mxu0  ;;  %v12571_v32 = vpop.f32.mrf.mxu1 }
 0x196   : > { %15360 = vst [vmem:[#allocation86_spill] sm:$0xff] %v12569_v3  ;;  %15361 = vst [vmem:[#allocation87_spill] sm:$0xff] %v12571_v32 }
 0x197   : > { %v12573_v40 = vpop.f32.mrf.mxu0  ;;  %v12575_v45 = vpop.f32.mrf.mxu1  ;;  %10364 = vmatmul.mubr.bf16.gmra.mxu1 %v432_v11  ;;  %10516 = vmatmul.mubr.bf16.gmra.mxu0 %v2122_v54  ;;  %v434_v54 = vpack.c.bf16 %v346_v49, %v345_v23  ;;  %v2039_v49 = vld [vmem:[%s11859_s10 + $0x312] sm:$0xff]  ;;  %v2040_v23 = vld [vmem:[%s11859_s10 + $0x31a] sm:$0xff] }
 0x198   : > { %15362 = vst [vmem:[#allocation88_spill] sm:$0xff] %v12573_v40  ;;  %15363 = vst [vmem:[#allocation89_spill] sm:$0xff] %v12575_v45  ;;  %10367 = vmatprep.mubr.bf16.mxu1 %v433_v7  ;;  %10519 = vmatprep.mubr.bf16.mxu0 %v2123_v63  ;;  %v2124_v63 = vpack.c.bf16 %v2036_v27, %v2035_v25  ;;  %v435_v7 = vpack.c.bf16 %v348_v19, %v347_v4  ;;  %v351_v25 = vld [vmem:[%s11859_s10 + $0x320] sm:$0xff]  ;;  %v352_v19 = vld [vmem:[%s11859_s10 + $0x328] sm:$0xff] }
 0x199   : > { %v12582_v22 = vpop.f32.mrf.mxu0  ;;  %v12584_v1 = vpop.f32.mrf.mxu1  ;;  %v2125_v45 = vpack.c.bf16 %v2038_v51, %v2037_v50  ;;  %v2041_v50 = vld [vmem:[%s11859_s10 + $0x322] sm:$0xff]  ;;  %v2042_v51 = vld [vmem:[%s11859_s10 + $0x32a] sm:$0xff] }
 0x19a   : > { %15364 = vst [vmem:[#allocation90_spill] sm:$0xff] %v12582_v22  ;;  %15365 = vst [vmem:[#allocation91_spill] sm:$0xff] %v12584_v1 }
 0x19b   : > { %v12589_v32 = vpop.f32.mrf.mxu0  ;;  %v12591_v11 = vpop.f32.mrf.mxu1 }
 0x19c   : > { %15366 = vst [vmem:[#allocation92_spill] sm:$0xff] %v12589_v32  ;;  %15367 = vst [vmem:[#allocation93_spill] sm:$0xff] %v12591_v11  ;;  %v349_v11 = vld [vmem:[%s11859_s10 + $0x310] sm:$0xff]  ;;  %v350_v32 = vld [vmem:[%s11859_s10 + $0x318] sm:$0xff] }
 0x19d   : > { %v12593_v22 = vpop.f32.mrf.mxu0  ;;  %v12595_v1 = vpop.f32.mrf.mxu1 }
 0x19e   : > { %15368 = vst [vmem:[#allocation94_spill] sm:$0xff] %v12593_v22  ;;  %15369 = vst [vmem:[#allocation95_spill] sm:$0xff] %v12595_v1 }
 0x19f   : > { %v12597_v40 = vpop.f32.mrf.mxu0  ;;  %v12599_v3 = vpop.f32.mrf.mxu1  ;;  %10368 = vmatmul.mubr.bf16.gmra.mxu1 %v434_v54  ;;  %10520 = vmatmul.mubr.bf16.gmra.mxu0 %v2124_v63  ;;  %v436_v63 = vpack.c.bf16 %v350_v32, %v349_v11  ;;  %v2043_v11 = vld [vmem:[%s11859_s10 + $0x332] sm:$0xff] }
 0x1a0   : > { %15370 = vst [vmem:[#allocation96_spill] sm:$0xff] %v12597_v40  ;;  %15371 = vst [vmem:[#allocation97_spill] sm:$0xff] %v12599_v3  ;;  %10371 = vmatprep.mubr.bf16.mxu1 %v435_v7  ;;  %10523 = vmatprep.mubr.bf16.mxu0 %v2125_v45  ;;  %v2126_v45 = vpack.c.bf16 %v2040_v23, %v2039_v49  ;;  %v437_v7 = vpack.c.bf16 %v352_v19, %v351_v25  ;;  %v2044_v49 = vld [vmem:[%s11859_s10 + $0x33a] sm:$0xff] }
 0x1a1   : > { %v12606_v27 = vpop.f32.mrf.mxu0  ;;  %v12608_v4 = vpop.f32.mrf.mxu1  ;;  %v2127_v3 = vpack.c.bf16 %v2042_v51, %v2041_v50  ;;  %v355_v23 = vld [vmem:[%s11859_s10 + $0x340] sm:$0xff]  ;;  %v356_v50 = vld [vmem:[%s11859_s10 + $0x348] sm:$0xff] }
 0x1a2   : > { %15372 = vst [vmem:[#allocation98_spill] sm:$0xff] %v12606_v27  ;;  %15373 = vst [vmem:[#allocation99_spill] sm:$0xff] %v12608_v4  ;;  %v2045_v51 = vld [vmem:[%s11859_s10 + $0x342] sm:$0xff] }
 0x1a3   : > { %v12613_v1 = vpop.f32.mrf.mxu0  ;;  %v12615_v54 = vpop.f32.mrf.mxu1 }
 0x1a4   : > { %15374 = vst [vmem:[#allocation100_spill] sm:$0xff] %v12613_v1  ;;  %15375 = vst [vmem:[#allocation101_spill] sm:$0xff] %v12615_v54  ;;  %v353_v1 = vld [vmem:[%s11859_s10 + $0x330] sm:$0xff]  ;;  %v354_v54 = vld [vmem:[%s11859_s10 + $0x338] sm:$0xff] }
 0x1a5   : > { %v12617_v40 = vpop.f32.mrf.mxu0  ;;  %v12619_v4 = vpop.f32.mrf.mxu1  ;;  %v438_v17 = vpack.c.bf16 %v354_v54, %v353_v1  ;;  %v357_v54 = vld [vmem:[%s11859_s10 + $0x350] sm:$0xff] }
 0x1a6   : > { %15376 = vst [vmem:[#allocation102_spill] sm:$0xff] %v12617_v40  ;;  %15377 = vst [vmem:[#allocation103_spill] sm:$0xff] %v12619_v4  ;;  %v2046_v4 = vld [vmem:[%s11859_s10 + $0x34a] sm:$0xff] }
 0x1a7   : > { %v10277_v27 = vpop.f32.mrf.mxu1  ;;  %10372 = vmatmul.mubr.bf16.gmra.mxu1 %v436_v63  ;;  %v10429_v22 = vpop.f32.mrf.mxu0  ;;  %10524 = vmatmul.mubr.bf16.gmra.mxu0 %v2126_v45  ;;  %v2129_v62 = vpack.c.bf16 %v2046_v4, %v2045_v51  ;;  %v2050_v51 = vld [vmem:[%s11859_s10 + $0x36a] sm:$0xff] }
 0x1a8   : > { %v1407_v32 = vadd.f32 %v10277_v27, %v12189_v24  ;;  %10375 = vmatprep.mubr.bf16.mxu1 %v437_v7  ;;  %10527 = vmatprep.mubr.bf16.mxu0 %v2127_v3  ;;  %v2128_v24 = vpack.c.bf16 %v2044_v49, %v2043_v11  ;;  %v439_v7 = vpack.c.bf16 %v356_v50, %v355_v23  ;;  %v2047_v11 = vld [vmem:[%s11859_s10 + $0x352] sm:$0xff]  ;;  %v2048_v49 = vld [vmem:[%s11859_s10 + $0x35a] sm:$0xff]  ;;  %v2049_v50 = vld [vmem:[%s11859_s10 + $0x362] sm:$0xff] }
 0x1a9   : > { %v1398_v25 = vpop.f32.mrf.mxu1  ;;  %v2243_v19 = vpop.f32.mrf.mxu0  ;;  %v359_v23 = vld [vmem:[%s11859_s10 + $0x360] sm:$0xff] }
 0x1aa   : > { %v12630_v40 = vadd.f32 %v10429_v22, %v1407_v32  ;;  %v1399_v63 = vadd.f32 %v1398_v25, %v12198_v31 }
 0x1ab   : > { %v10278_v59 = vpop.f32.mrf.mxu1  ;;  %v10430_v45 = vpop.f32.mrf.mxu0 }
 0x1ac   : > { %v12633_v27 = vadd.f32 %v2243_v19, %v1399_v63  ;;  %v1410_v3 = vadd.f32 %v10278_v59, %v12205_v36  ;;  %v358_v36 = vld [vmem:[%s11859_s10 + $0x358] sm:$0xff] }
 0x1ad   : > { %v1401_v37 = vpop.f32.mrf.mxu1  ;;  %v2246_v22 = vpop.f32.mrf.mxu0 }
 0x1ae   : > { %v12636_v32 = vadd.f32 %v10430_v45, %v1410_v3  ;;  %v1402_v31 = vadd.f32 %v1401_v37, %v12209_v44  ;;  %v360_v44 = vld [vmem:[%s11859_s10 + $0x368] sm:$0xff]  ;;  %v440_v3 = vpack.c.bf16 %v358_v36, %v357_v54  ;;  %v361_v36 = vld [vmem:[%s11859_s10 + $0x370] sm:$0xff] }
 0x1af   : > { %v10281_v25 = vpop.f32.mrf.mxu1  ;;  %10376 = vmatmul.mubr.bf16.gmra.mxu1 %v438_v17  ;;  %v10433_v1 = vpop.f32.mrf.mxu0  ;;  %10528 = vmatmul.mubr.bf16.gmra.mxu0 %v2128_v24 }
 0x1b0   : > { %v12641_v59 = vadd.f32 %v2246_v22, %v1402_v31  ;;  %v1423_v4 = vadd.f32 %v10281_v25, %v12213_v46  ;;  %10379 = vmatprep.mubr.bf16.mxu1 %v439_v7  ;;  %10531 = vmatprep.mubr.bf16.mxu0 %v2129_v62  ;;  %v2130_v46 = vpack.c.bf16 %v2048_v49, %v2047_v11 }
 0x1b1   : > { %v1414_v19 = vpop.f32.mrf.mxu1  ;;  %v2259_v37 = vpop.f32.mrf.mxu0  ;;  %v441_v22 = vpack.c.bf16 %v360_v44, %v359_v23  ;;  %v2131_v31 = vpack.c.bf16 %v2050_v51, %v2049_v50  ;;  %v2051_v23 = vld [vmem:[%s11859_s10 + $0x372] sm:$0xff]  ;;  %v363_v44 = vld [vmem:[%s11859_s10 + $0x380] sm:$0xff]  ;;  %v364_v51 = vld [vmem:[%s11859_s10 + $0x388] sm:$0xff] }
 0x1b2   : > { %v12650_v17 = vadd.f32 %v10433_v1, %v1423_v4  ;;  %v1415_v63 = vadd.f32 %v1414_v19, %v12222_v53 }
 0x1b3   : > { %v10282_v45 = vpop.f32.mrf.mxu1  ;;  %v10434_v24 = vpop.f32.mrf.mxu0 }
 0x1b4   : > { %v12653_v7 = vadd.f32 %v2259_v37, %v1415_v63  ;;  %v1426_v62 = vadd.f32 %v10282_v45, %v12229_v58  ;;  %v362_v58 = vld [vmem:[%s11859_s10 + $0x378] sm:$0xff]  ;;  %v2053_v63 = vld [vmem:[%s11859_s10 + $0x382] sm:$0xff]  ;;  %v2054_v45 = vld [vmem:[%s11859_s10 + $0x38a] sm:$0xff] }
 0x1b5   : > { %v1417_v25 = vpop.f32.mrf.mxu1  ;;  %v2262_v1 = vpop.f32.mrf.mxu0  ;;  %v2052_v37 = vld [vmem:[%s11859_s10 + $0x37a] sm:$0xff] }
 0x1b6   : > { %v12656_v4 = vadd.f32 %v10434_v24, %v1426_v62  ;;  %v1418_v53 = vadd.f32 %v1417_v25, %v12233_v0  ;;  %v442_v25 = vpack.c.bf16 %v362_v58, %v361_v36  ;;  %v365_v58 = vld [vmem:[%s11859_s10 + $0x390] sm:$0xff] }
 0x1b7   : > { %v10285_v19 = vpop.f32.mrf.mxu1  ;;  %10380 = vmatmul.mubr.bf16.gmra.mxu1 %v440_v3  ;;  %v10437_v54 = vpop.f32.mrf.mxu0  ;;  %10532 = vmatmul.mubr.bf16.gmra.mxu0 %v2130_v46 }
 0x1b8   : > { %v12661_v11 = vadd.f32 %v2262_v1, %v1418_v53  ;;  %v1439_v49 = vadd.f32 %v10285_v19, %v12237_v2  ;;  %10383 = vmatprep.mubr.bf16.mxu1 %v441_v22  ;;  %10535 = vmatprep.mubr.bf16.mxu0 %v2131_v31  ;;  %v2132_v2 = vpack.c.bf16 %v2052_v37, %v2051_v23 }
 0x1b9   : > { %v1430_v50 = vpop.f32.mrf.mxu1  ;;  %v2275_v0 = vpop.f32.mrf.mxu0  ;;  %v443_v1 = vpack.c.bf16 %v364_v51, %v363_v44  ;;  %v2133_v53 = vpack.c.bf16 %v2054_v45, %v2053_v63  ;;  %v2055_v44 = vld [vmem:[%s11859_s10 + $0x392] sm:$0xff]  ;;  %v367_v51 = vld [vmem:[%s11859_s10 + $0x3a0] sm:$0xff]  ;;  %v368_v45 = vld [vmem:[%s11859_s10 + $0x3a8] sm:$0xff] }
 0x1ba   : > { %v12670_v24 = vadd.f32 %v10437_v54, %v1439_v49  ;;  %v1431_v3 = vadd.f32 %v1430_v50, %v12246_v39 }
 0x1bb   : > { %v10286_v46 = vpop.f32.mrf.mxu1  ;;  %v10438_v62 = vpop.f32.mrf.mxu0 }
 0x1bc   : > { %v12673_v22 = vadd.f32 %v2275_v0, %v1431_v3  ;;  %v1442_v31 = vadd.f32 %v10286_v46, %v12253_v12  ;;  %v366_v12 = vld [vmem:[%s11859_s10 + $0x398] sm:$0xff]  ;;  %v2057_v3 = vld [vmem:[%s11859_s10 + $0x3a2] sm:$0xff]  ;;  %v2058_v46 = vld [vmem:[%s11859_s10 + $0x3aa] sm:$0xff] }
 0x1bd   : > { %v1433_v19 = vpop.f32.mrf.mxu1  ;;  %v2278_v54 = vpop.f32.mrf.mxu0  ;;  %v2056_v0 = vld [vmem:[%s11859_s10 + $0x39a] sm:$0xff] }
 0x1be   : > { %v12676_v49 = vadd.f32 %v10438_v62, %v1442_v31  ;;  %v1434_v39 = vadd.f32 %v1433_v19, %v12257_v18  ;;  %v444_v19 = vpack.c.bf16 %v366_v12, %v365_v58  ;;  %v369_v12 = vld [vmem:[%s11859_s10 + $0x3b0] sm:$0xff] }
 0x1bf   : > { %v10289_v50 = vpop.f32.mrf.mxu1  ;;  %10384 = vmatmul.mubr.bf16.gmra.mxu1 %v442_v25  ;;  %v10441_v36 = vpop.f32.mrf.mxu0  ;;  %10536 = vmatmul.mubr.bf16.gmra.mxu0 %v2132_v2 }
 0x1c0   : > { %v12681_v23 = vadd.f32 %v2278_v54, %v1434_v39  ;;  %v1455_v37 = vadd.f32 %v10289_v50, %v12264_v21  ;;  %10387 = vmatprep.mubr.bf16.mxu1 %v443_v1  ;;  %10539 = vmatprep.mubr.bf16.mxu0 %v2133_v53  ;;  %v2134_v21 = vpack.c.bf16 %v2056_v0, %v2055_v44 }
 0x1c1   : > { %v1446_v63 = vpop.f32.mrf.mxu1  ;;  %v2291_v18 = vpop.f32.mrf.mxu0  ;;  %v445_v54 = vpack.c.bf16 %v368_v45, %v367_v51  ;;  %v2135_v39 = vpack.c.bf16 %v2058_v46, %v2057_v3  ;;  %v2059_v51 = vld [vmem:[%s11859_s10 + $0x3b2] sm:$0xff]  ;;  %v371_v45 = vld [vmem:[%s11859_s10 + $0x3c0] sm:$0xff]  ;;  %v372_v46 = vld [vmem:[%s11859_s10 + $0x3c8] sm:$0xff] }
 0x1c2   : > { %v12690_v62 = vadd.f32 %v10441_v36, %v1455_v37  ;;  %v1447_v25 = vadd.f32 %v1446_v63, %v12276_v33 }
 0x1c3   : > { %v10290_v2 = vpop.f32.mrf.mxu1  ;;  %v10442_v31 = vpop.f32.mrf.mxu0 }
 0x1c4   : > { %v12693_v1 = vadd.f32 %v2291_v18, %v1447_v25  ;;  %v1458_v53 = vadd.f32 %v10290_v2, %v12283_v42  ;;  %v370_v42 = vld [vmem:[%s11859_s10 + $0x3b8] sm:$0xff]  ;;  %v2061_v25 = vld [vmem:[%s11859_s10 + $0x3c2] sm:$0xff]  ;;  %v2062_v2 = vld [vmem:[%s11859_s10 + $0x3ca] sm:$0xff] }
 0x1c5   : > { %v1449_v50 = vpop.f32.mrf.mxu1  ;;  %v2294_v36 = vpop.f32.mrf.mxu0  ;;  %v2060_v18 = vld [vmem:[%s11859_s10 + $0x3ba] sm:$0xff] }
 0x1c6   : > { %v12696_v37 = vadd.f32 %v10442_v31, %v1458_v53  ;;  %v1450_v33 = vadd.f32 %v1449_v50, %v12287_v52  ;;  %v446_v50 = vpack.c.bf16 %v370_v42, %v369_v12  ;;  %v373_v42 = vld [vmem:[%s11859_s10 + $0x3d0] sm:$0xff] }
 0x1c7   : > { %v10293_v63 = vpop.f32.mrf.mxu1  ;;  %10388 = vmatmul.mubr.bf16.gmra.mxu1 %v444_v19  ;;  %v10445_v58 = vpop.f32.mrf.mxu0  ;;  %10540 = vmatmul.mubr.bf16.gmra.mxu0 %v2134_v21 }
 0x1c8   : > { %v12701_v44 = vadd.f32 %v2294_v36, %v1450_v33  ;;  %v1471_v0 = vadd.f32 %v10293_v63, %v12291_v56  ;;  %10391 = vmatprep.mubr.bf16.mxu1 %v445_v54  ;;  %10543 = vmatprep.mubr.bf16.mxu0 %v2135_v39  ;;  %v2136_v56 = vpack.c.bf16 %v2060_v18, %v2059_v51 }
 0x1c9   : > { %v1462_v3 = vpop.f32.mrf.mxu1  ;;  %v2307_v52 = vpop.f32.mrf.mxu0  ;;  %v447_v36 = vpack.c.bf16 %v372_v46, %v371_v45  ;;  %v2137_v33 = vpack.c.bf16 %v2062_v2, %v2061_v25  ;;  %v2063_v45 = vld [vmem:[%s11859_s10 + $0x3d2] sm:$0xff]  ;;  %v375_v46 = vld [vmem:[%s11859_s10 + $0x3e0] sm:$0xff]  ;;  %v376_v2 = vld [vmem:[%s11859_s10 + $0x3e8] sm:$0xff] }
 0x1ca   : > { %v12710_v31 = vadd.f32 %v10445_v58, %v1471_v0  ;;  %v1463_v19 = vadd.f32 %v1462_v3, %v12300_v5 }
 0x1cb   : > { %v10294_v21 = vpop.f32.mrf.mxu1  ;;  %v10446_v53 = vpop.f32.mrf.mxu0 }
 0x1cc   : > { %v12713_v54 = vadd.f32 %v2307_v52, %v1463_v19  ;;  %v1474_v39 = vadd.f32 %v10294_v21, %v12307_v10  ;;  %v374_v10 = vld [vmem:[%s11859_s10 + $0x3d8] sm:$0xff]  ;;  %v2065_v19 = vld [vmem:[%s11859_s10 + $0x3e2] sm:$0xff]  ;;  %v2066_v21 = vld [vmem:[%s11859_s10 + $0x3ea] sm:$0xff] }
 0x1cd   : > { %v1465_v63 = vpop.f32.mrf.mxu1  ;;  %v2310_v58 = vpop.f32.mrf.mxu0  ;;  %v2064_v52 = vld [vmem:[%s11859_s10 + $0x3da] sm:$0xff] }
 0x1ce   : > { %v12716_v0 = vadd.f32 %v10446_v53, %v1474_v39  ;;  %v1466_v5 = vadd.f32 %v1465_v63, %v12311_v20  ;;  %v448_v63 = vpack.c.bf16 %v374_v10, %v373_v42  ;;  %v377_v10 = vld [vmem:[%s11859_s10 + $0x3f0] sm:$0xff] }
 0x1cf   : > { %v10297_v3 = vpop.f32.mrf.mxu1  ;;  %10392 = vmatmul.mubr.bf16.gmra.mxu1 %v446_v50  ;;  %v10449_v12 = vpop.f32.mrf.mxu0  ;;  %10544 = vmatmul.mubr.bf16.gmra.mxu0 %v2136_v56 }
 0x1d0   : > { %v12721_v51 = vadd.f32 %v2310_v58, %v1466_v5  ;;  %v1487_v18 = vadd.f32 %v10297_v3, %v12315_v26  ;;  %10395 = vmatprep.mubr.bf16.mxu1 %v447_v36  ;;  %10547 = vmatprep.mubr.bf16.mxu0 %v2137_v33  ;;  %v2138_v26 = vpack.c.bf16 %v2064_v52, %v2063_v45 }
 0x1d1   : > { %v1478_v25 = vpop.f32.mrf.mxu1  ;;  %v2323_v20 = vpop.f32.mrf.mxu0  ;;  %v449_v58 = vpack.c.bf16 %v376_v2, %v375_v46  ;;  %v2139_v5 = vpack.c.bf16 %v2066_v21, %v2065_v19  ;;  %v2067_v46 = vld [vmem:[%s11859_s10 + $0x3f2] sm:$0xff]  ;;  %v379_v2 = vld [vmem:[%s11859_s10 + $0x400] sm:$0xff]  ;;  %v380_v21 = vld [vmem:[%s11859_s10 + $0x408] sm:$0xff] }
 0x1d2   : > { %v12730_v53 = vadd.f32 %v10449_v12, %v1487_v18  ;;  %v1479_v50 = vadd.f32 %v1478_v25, %v12324_v41 }
 0x1d3   : > { %v10298_v56 = vpop.f32.mrf.mxu1  ;;  %v10450_v39 = vpop.f32.mrf.mxu0 }
 0x1d4   : > { %v12733_v36 = vadd.f32 %v2323_v20, %v1479_v50  ;;  %v1490_v33 = vadd.f32 %v10298_v56, %v12331_v60  ;;  %v378_v60 = vld [vmem:[%s11859_s10 + $0x3f8] sm:$0xff]  ;;  %v2069_v50 = vld [vmem:[%s11859_s10 + $0x402] sm:$0xff]  ;;  %v2070_v56 = vld [vmem:[%s11859_s10 + $0x40a] sm:$0xff] }
 0x1d5   : > { %v1481_v3 = vpop.f32.mrf.mxu1  ;;  %v2326_v12 = vpop.f32.mrf.mxu0  ;;  %v2068_v20 = vld [vmem:[%s11859_s10 + $0x3fa] sm:$0xff] }
 0x1d6   : > { %v12736_v18 = vadd.f32 %v10450_v39, %v1490_v33  ;;  %v1482_v41 = vadd.f32 %v1481_v3, %v12335_v38  ;;  %v450_v3 = vpack.c.bf16 %v378_v60, %v377_v10  ;;  %v381_v60 = vld [vmem:[%s11859_s10 + $0x410] sm:$0xff] }
 0x1d7   : > { %v10301_v25 = vpop.f32.mrf.mxu1  ;;  %10396 = vmatmul.mubr.bf16.gmra.mxu1 %v448_v63  ;;  %v10453_v42 = vpop.f32.mrf.mxu0  ;;  %10548 = vmatmul.mubr.bf16.gmra.mxu0 %v2138_v26 }
 0x1d8   : > { %v12741_v45 = vadd.f32 %v2326_v12, %v1482_v41  ;;  %v1503_v52 = vadd.f32 %v10301_v25, %v12339_v14  ;;  %10399 = vmatprep.mubr.bf16.mxu1 %v449_v58  ;;  %10551 = vmatprep.mubr.bf16.mxu0 %v2139_v5  ;;  %v2140_v14 = vpack.c.bf16 %v2068_v20, %v2067_v46 }
 0x1d9   : > { %v1494_v19 = vpop.f32.mrf.mxu1  ;;  %v2339_v38 = vpop.f32.mrf.mxu0  ;;  %v451_v12 = vpack.c.bf16 %v380_v21, %v379_v2  ;;  %v2141_v41 = vpack.c.bf16 %v2070_v56, %v2069_v50  ;;  %v2071_v2 = vld [vmem:[%s11859_s10 + $0x412] sm:$0xff]  ;;  %v383_v21 = vld [vmem:[%s11859_s10 + $0x420] sm:$0xff]  ;;  %v384_v56 = vld [vmem:[%s11859_s10 + $0x428] sm:$0xff] }
 0x1da   : > { %v12750_v39 = vadd.f32 %v10453_v42, %v1503_v52  ;;  %v1495_v63 = vadd.f32 %v1494_v19, %v12348_v35 }
 0x1db   : > { %v10302_v26 = vpop.f32.mrf.mxu1  ;;  %v10454_v33 = vpop.f32.mrf.mxu0 }
 0x1dc   : > { %v12753_v58 = vadd.f32 %v2339_v38, %v1495_v63  ;;  %v1506_v5 = vadd.f32 %v10302_v26, %v12355_v15  ;;  %v382_v15 = vld [vmem:[%s11859_s10 + $0x418] sm:$0xff]  ;;  %v2073_v63 = vld [vmem:[%s11859_s10 + $0x422] sm:$0xff]  ;;  %v2074_v26 = vld [vmem:[%s11859_s10 + $0x42a] sm:$0xff] }
 0x1dd   : > { %v1497_v25 = vpop.f32.mrf.mxu1  ;;  %v2342_v42 = vpop.f32.mrf.mxu0  ;;  %v2072_v38 = vld [vmem:[%s11859_s10 + $0x41a] sm:$0xff] }
 0x1de   : > { %v12756_v52 = vadd.f32 %v10454_v33, %v1506_v5  ;;  %v1498_v35 = vadd.f32 %v1497_v25, %v12359_v61  ;;  %v452_v25 = vpack.c.bf16 %v382_v15, %v381_v60  ;;  %v385_v15 = vld [vmem:[%s11859_s10 + $0x430] sm:$0xff] }
 0x1df   : > { %v10305_v19 = vpop.f32.mrf.mxu1  ;;  %10400 = vmatmul.mubr.bf16.gmra.mxu1 %v450_v3  ;;  %v10457_v10 = vpop.f32.mrf.mxu0  ;;  %10552 = vmatmul.mubr.bf16.gmra.mxu0 %v2140_v14 }
 0x1e0   : > { %v12761_v46 = vadd.f32 %v2342_v42, %v1498_v35  ;;  %v1519_v20 = vadd.f32 %v10305_v19, %v12363_v48  ;;  %10403 = vmatprep.mubr.bf16.mxu1 %v451_v12  ;;  %10555 = vmatprep.mubr.bf16.mxu0 %v2141_v41  ;;  %v2142_v48 = vpack.c.bf16 %v2072_v38, %v2071_v2 }
 0x1e1   : > { %v1510_v50 = vpop.f32.mrf.mxu1  ;;  %v2355_v61 = vpop.f32.mrf.mxu0  ;;  %v453_v42 = vpack.c.bf16 %v384_v56, %v383_v21  ;;  %v2143_v35 = vpack.c.bf16 %v2074_v26, %v2073_v63  ;;  %v2075_v21 = vld [vmem:[%s11859_s10 + $0x432] sm:$0xff]  ;;  %v2922_v56 = vld [vmem:[%s11859_s10 + $0x22] sm:$0xff]  ;;  %v2923_v26 = vld [vmem:[%s11859_s10 + $0x2a] sm:$0xff] }
 0x1e2   : > { %v12770_v33 = vadd.f32 %v10457_v10, %v1519_v20  ;;  %v1511_v3 = vadd.f32 %v1510_v50, %v12375_v30 }
 0x1e3   : > { %v10306_v14 = vpop.f32.mrf.mxu1  ;;  %v10458_v5 = vpop.f32.mrf.mxu0 }
 0x1e4   : > { %v12773_v12 = vadd.f32 %v2355_v61, %v1511_v3  ;;  %v1522_v41 = vadd.f32 %v10306_v14, %v12385_v9  ;;  %v386_v9 = vld [vmem:[%s11859_s10 + $0x438] sm:$0xff]  ;;  %v3903_v3 = vld [vmem:[%s11859_s10 + $0x23] sm:$0xff]  ;;  %v3904_v14 = vld [vmem:[%s11859_s10 + $0x2b] sm:$0xff] }
 0x1e5   : > { %v1513_v19 = vpop.f32.mrf.mxu1  ;;  %v2358_v10 = vpop.f32.mrf.mxu0  ;;  %v2076_v61 = vld [vmem:[%s11859_s10 + $0x43a] sm:$0xff] }
 0x1e6   : > { %v12776_v20 = vadd.f32 %v10458_v5, %v1522_v41  ;;  %v1514_v30 = vadd.f32 %v1513_v19, %v12389_v6  ;;  %v454_v19 = vpack.c.bf16 %v386_v9, %v385_v15 }
 0x1e7   : > { %v10309_v50 = vpop.f32.mrf.mxu1  ;;  %10404 = vmatmul.mubr.bf16.gmra.mxu1 %v452_v25  ;;  %v10461_v60 = vpop.f32.mrf.mxu0  ;;  %10556 = vmatmul.mubr.bf16.gmra.mxu0 %v2142_v48 }
 0x1e8   : > { %v12781_v2 = vadd.f32 %v2358_v10, %v1514_v30  ;;  %v1535_v38 = vadd.f32 %v10309_v50, %v12393_v55  ;;  %10407 = vmatprep.mubr.bf16.mxu1 %v453_v42  ;;  %10559 = vmatprep.mubr.bf16.mxu0 %v2143_v35  ;;  %v2144_v10 = vpack.c.bf16 %v2076_v61, %v2075_v21  ;;  %v2925_v61 = vld [vmem:[%s11859_s10 + $0x3a] sm:$0xff] }
 0x1e9   : > { %v1526_v63 = vpop.f32.mrf.mxu1  ;;  %v2371_v6 = vpop.f32.mrf.mxu0  ;;  %v3058_v35 = vpack.c.bf16 %v2923_v26, %v2922_v56  ;;  %v4039_v30 = vpack.c.bf16 %v3904_v14, %v3903_v3  ;;  %v3905_v56 = vld [vmem:[%s11859_s10 + $0x33] sm:$0xff] }
 0x1ea   : > { %15378 = vst [vmem:[#allocation104_spill] sm:$0xff] %v12781_v2  ;;  %v12790_v5 = vadd.f32 %v10461_v60, %v1535_v38  ;;  %v1527_v25 = vadd.f32 %v1526_v63, %v12402_v28  ;;  %v3906_v63 = vld [vmem:[%s11859_s10 + $0x3b] sm:$0xff] }
 0x1eb   : > { %v10310_v48 = vpop.f32.mrf.mxu1  ;;  %v10462_v41 = vpop.f32.mrf.mxu0 }
 0x1ec   : > { %v12793_v55 = vadd.f32 %v2371_v6, %v1527_v25  ;;  %v1538_v42 = vadd.f32 %v10310_v48, %v12409_v57  ;;  %v2924_v57 = vld [vmem:[%s11859_s10 + $0x32] sm:$0xff]  ;;  %v2927_v25 = vld [vmem:[%s11859_s10 + $0x4a] sm:$0xff] }
 0x1ed   : > { %v1529_v50 = vpop.f32.mrf.mxu1  ;;  %v2374_v2 = vpop.f32.mrf.mxu0  ;;  %v3907_v48 = vld [vmem:[%s11859_s10 + $0x43] sm:$0xff] }
 0x1ee   : > { %v12796_v60 = vadd.f32 %v10462_v41, %v1538_v42  ;;  %v1530_v28 = vadd.f32 %v1529_v50, %v12413_v43  ;;  %v2926_v43 = vld [vmem:[%s11859_s10 + $0x42] sm:$0xff]  ;;  %v3908_v41 = vld [vmem:[%s11859_s10 + $0x4b] sm:$0xff] }
 0x1ef   : > { %v10313_v38 = vpop.f32.mrf.mxu1  ;;  %10408 = vmatmul.mubr.bf16.gmra.mxu1 %v454_v19  ;;  %v10465_v15 = vpop.f32.mrf.mxu0  ;;  %10560 = vmatmul.mubr.bf16.gmra.mxu0 %v2144_v10  ;;  %v3059_v10 = vpack.c.bf16 %v2925_v61, %v2924_v57  ;;  %v11603_v57 = vld [vmem:[%s15269_s1 + $0x170] sm:$0xff]  }
 0x1f0   : > { %v12800_v9 = vadd.f32 %v2374_v2, %v1530_v28  ;;  %v1551_v21 = vadd.f32 %v10313_v38, %v12417_v34  ;;  %10579 = vmatprep.mubr.bf16.mxu1 %v3058_v35  ;;  %10731 = vmatprep.mubr.bf16.mxu0 %v4039_v30  ;;  %v4040_v34 = vpack.c.bf16 %v3906_v63, %v3905_v56  ;;  %v2929_v63 = vld [vmem:[%s11859_s10 + $0x5a] sm:$0xff] }
 0x1f1   : > { %v1542_v6 = vpop.f32.mrf.mxu1  ;;  %v2387_v26 = vpop.f32.mrf.mxu0  ;;  %v3060_v28 = vpack.c.bf16 %v2927_v25, %v2926_v43  ;;  %v4041_v38 = vpack.c.bf16 %v3908_v41, %v3907_v48  ;;  %v2930_v25 = vld [vmem:[%s11859_s10 + $0x62] sm:$0xff]  ;;  %v2931_v48 = vld [vmem:[%s11859_s10 + $0x6a] sm:$0xff] }
 0x1f2   : > { %v12807_v3 = vadd.f32 %v10465_v15, %v1551_v21  ;;  %v1543_v14 = vadd.f32 %v1542_v6, %v12426_v16  ;;  %v2928_v21 = vld [vmem:[%s11859_s10 + $0x52] sm:$0xff]  ;;  %v3911_v41 = vld [vmem:[%s11859_s10 + $0x63] sm:$0xff] }
 0x1f3   : > { %v10314_v2 = vpop.f32.mrf.mxu1  ;;  %v10466_v19 = vpop.f32.mrf.mxu0  ;;  %v3909_v6 = vld [vmem:[%s11859_s10 + $0x53] sm:$0xff] }
 0x1f4   : > { %v12813_v42 = vadd.f32 %v2387_v26, %v1543_v14  ;;  %v1554_v35 = vadd.f32 %v10314_v2, %v12433_v29  ;;  %v11604_v29 = vld [vmem:[%s15269_s1 + $0x1b0] sm:$0xff]   ;;  %v3910_v26 = vld [vmem:[%s11859_s10 + $0x5b] sm:$0xff] }
 0x1f5   : > { %v1545_v30 = vpop.f32.mrf.mxu1  ;;  %v2390_v50 = vpop.f32.mrf.mxu0  ;;  %v15382_v14 = vld [vmem:[#allocation61_spill] sm:$0xff] }
 0x1f6   : > { %15379 = vst [vmem:[#allocation105_spill] sm:$0xff] %v12813_v42  ;;  %v12816_v16 = vadd.f32 %v10466_v19, %v1554_v35  ;;  %v1546_v15 = vadd.f32 %v1545_v30, %v12437_v13 }
 0x1f7   : > { %v10317_v61 = vpop.f32.mrf.mxu1  ;;  %v10469_v56 = vpop.f32.mrf.mxu0  ;;  %10580 = vmatmul.mubr.bf16.vlgmr.msra.gmra.mxu1 %v3059_v10  ;;  %10732 = vmatmul.mubr.bf16.vlgmr.msra.gmra.mxu0 %v4040_v34  ;;  %v3912_v10 = vld [vmem:[%s11859_s10 + $0x6b] sm:$0xff] }
 0x1f8   : > { %15380 = vst [vmem:[#allocation106_spill] sm:$0xff] %v12816_v16  ;;  %v12829_v13 = vadd.f32 %v2390_v50, %v1546_v15  ;;  %v1567_v43 = vadd.f32 %v10317_v61, %v12441_v8  ;;  %10868 = vmatpush3.bf16.msra.mxu1 %v12484_v47  ;;  %11020 = vmatpush3.bf16.msra.mxu0 %v15382_v14  ;;  %v11605_v34 = vld [vmem:[%s15269_s1 + $0x168] sm:$0xff]   ;;  %v15383_v47 = vld [vmem:[#allocation49_spill] sm:$0xff] }
 0x1f9   : > { %v1558_v2 = vpop.f32.mrf.mxu1  ;;  %v2403_v19 = vpop.f32.mrf.mxu0  ;;  %10583 = vmatprep.mubr.bf16.mxu1 %v3060_v28  ;;  %10735 = vmatprep.mubr.bf16.mxu0 %v4041_v38  ;;  %v11606_v8 = vld [vmem:[%s15269_s1 + $0x1a8] sm:$0xff]   ;;  %v3061_v61 = vpack.c.bf16 %v2929_v63, %v2928_v21  ;;  %v4042_v28 = vpack.c.bf16 %v3910_v26, %v3909_v6  ;;  %v3062_v38 = vpack.c.bf16 %v2931_v48, %v2930_v25  ;;  %v15387_v21 = vld [vmem:[#allocation53_spill] sm:$0xff] }
 0x1fa   : > { %15381 = vst [vmem:[#allocation107_spill] sm:$0xff] %v12829_v13  ;;  %v12844_v35 = vadd.f32 %v10469_v56, %v1567_v43  ;;  %v1559_v30 = vadd.f32 %v1558_v2, %v15383_v47  ;;  %10869 = vmatprep.subr.bf16.mxu1 %v11603_v57  ;;  %11021 = vmatprep.subr.bf16.mxu0 %v11604_v29  ;;  %v15385_v13 = vld [vmem:[#allocation51_spill] sm:$0xff]  ;;  %v11607_v6 = vld [vmem:[%s15269_s1 + $0x160] sm:$0xff]  }
 0x1fb   : > { %v10318_v50 = vpop.f32.mrf.mxu1  ;;  %v10470_v15 = vpop.f32.mrf.mxu0  ;;  %v4043_v42 = vpack.c.bf16 %v3912_v10, %v3911_v41  ;;  %v15389_v48 = vld [vmem:[#allocation55_spill] sm:$0xff] }
 0x1fc   : > { %v12847_v14 = vadd.f32 %v2403_v19, %v1559_v30  ;;  %v1570_v16 = vadd.f32 %v10318_v50, %v15385_v13  ;;  %10870 = vmatpush3.bf16.msra.mxu1 %v11603_v57  ;;  %11022 = vmatpush3.bf16.msra.mxu0 %v11604_v29  ;;  %v11608_v57 = vld [vmem:[%s15269_s1 + $0x1a0] sm:$0xff]  }
 0x1fd   : > { %v1561_v56 = vpop.f32.mrf.mxu1  ;;  %v2406_v43 = vpop.f32.mrf.mxu0  ;;  %10871 = vmatprep.subr.bf16.mxu1 %v11605_v34  ;;  %11023 = vmatprep.subr.bf16.mxu0 %v11606_v8  ;;  %v2933_v13 = vld [vmem:[%s11859_s10 + $0x7a] sm:$0xff]  ;;  %v2934_v47 = vld [vmem:[%s11859_s10 + $0x82] sm:$0xff] }
 0x1fe   : > { %15384 = vst [vmem:[#allocation61_spill] sm:$0xff] %v12847_v14  ;;  %v12850_v2 = vadd.f32 %v10470_v15, %v1570_v16  ;;  %v1562_v63 = vadd.f32 %v1561_v56, %v15387_v21  ;;  %v2932_v16 = vld [vmem:[%s11859_s10 + $0x72] sm:$0xff]  ;;  %v3914_v10 = vld [vmem:[%s11859_s10 + $0x7b] sm:$0xff]  ;;  %v2935_v15 = vld [vmem:[%s11859_s10 + $0x8a] sm:$0xff] }
 0x1ff   : > { %v10321_v29 = vpop.f32.mrf.mxu1  ;;  %v10473_v26 = vpop.f32.mrf.mxu0  ;;  %10584 = vmatmul.mubr.bf16.gmra.mxu1 %v3061_v61  ;;  %10736 = vmatmul.mubr.bf16.gmra.mxu0 %v4042_v28  ;;  %v3913_v19 = vld [vmem:[%s11859_s10 + $0x73] sm:$0xff]  ;;  %v3915_v56 = vld [vmem:[%s11859_s10 + $0x83] sm:$0xff]  ;;  %v3916_v21 = vld [vmem:[%s11859_s10 + $0x8b] sm:$0xff] }
 0x200   : > { %15386 = vst [vmem:[#allocation49_spill] sm:$0xff] %v12850_v2  ;;  %v12861_v25 = vadd.f32 %v2406_v43, %v1562_v63  ;;  %v1583_v41 = vadd.f32 %v10321_v29, %v15389_v48  ;;  %10587 = vmatprep.mubr.bf16.mxu1 %v3062_v38  ;;  %10739 = vmatprep.mubr.bf16.mxu0 %v4043_v42  ;;  %v15391_v28 = vld [vmem:[#allocation57_spill] sm:$0xff] }
 0x201   : > { %v1574_v30 = vpop.f32.mrf.mxu1  ;;  %v2419_v50 = vpop.f32.mrf.mxu0  ;;  %10872 = vmatpush3.bf16.msra.mxu1 %v11605_v34  ;;  %11024 = vmatpush3.bf16.msra.mxu0 %v11606_v8  ;;  %v11609_v42 = vld [vmem:[%s15269_s1 + $0x158] sm:$0xff]   ;;  %v3063_v63 = vpack.c.bf16 %v2933_v13, %v2932_v16  ;;  %v4044_v29 = vpack.c.bf16 %v3914_v10, %v3913_v19  ;;  %v3064_v34 = vpack.c.bf16 %v2935_v15, %v2934_v47 }
 0x202   : > { %15388 = vst [vmem:[#allocation51_spill] sm:$0xff] %v12861_v25  ;;  %v12870_v61 = vadd.f32 %v10473_v26, %v1583_v41  ;;  %v1575_v2 = vadd.f32 %v1574_v30, %v15391_v28  ;;  %10873 = vmatprep.subr.bf16.mxu1 %v11607_v6  ;;  %11025 = vmatprep.subr.bf16.mxu0 %v11608_v57  ;;  %v15393_v25 = vld [vmem:[#allocation59_spill] sm:$0xff]  ;;  %v11610_v26 = vld [vmem:[%s15269_s1 + $0x198] sm:$0xff]  }
 0x203   : > { %v10322_v38 = vpop.f32.mrf.mxu1  ;;  %v10474_v43 = vpop.f32.mrf.mxu0  ;;  %v4045_v8 = vpack.c.bf16 %v3916_v21, %v3915_v56  ;;  %v2936_v10 = vld [vmem:[%s11859_s10 + $0x92] sm:$0xff]  ;;  %v2937_v47 = vld [vmem:[%s11859_s10 + $0x9a] sm:$0xff]  ;;  %v2938_v56 = vld [vmem:[%s11859_s10 + $0xa2] sm:$0xff] }
 0x204   : > { %15390 = vst [vmem:[#allocation53_spill] sm:$0xff] %v12870_v61  ;;  %v12876_v48 = vadd.f32 %v2419_v50, %v1575_v2  ;;  %v1586_v14 = vadd.f32 %v10322_v38, %v15393_v25  ;;  %v15395_v2 = vld [vmem:[#allocation62_spill] sm:$0xff]  ;;  %v2939_v38 = vld [vmem:[%s11859_s10 + $0xaa] sm:$0xff] }
 0x205   : > { %v1577_v41 = vpop.f32.mrf.mxu1  ;;  %v2422_v30 = vpop.f32.mrf.mxu0  ;;  %10874 = vmatpush3.bf16.msra.mxu1 %v11607_v6  ;;  %11026 = vmatpush3.bf16.msra.mxu0 %v11608_v57  ;;  %v15397_v57 = vld [vmem:[#allocation64_spill] sm:$0xff]  ;;  %v3918_v15 = vld [vmem:[%s11859_s10 + $0x9b] sm:$0xff] }
 0x206   : > { %15392 = vst [vmem:[#allocation55_spill] sm:$0xff] %v12876_v48  ;;  %v12882_v16 = vadd.f32 %v10474_v43, %v1586_v14  ;;  %v1578_v13 = vadd.f32 %v1577_v41, %v15395_v2  ;;  %10875 = vmatprep.subr.bf16.mxu1 %v11609_v42  ;;  %11027 = vmatprep.subr.bf16.mxu0 %v11610_v26  ;;  %v3917_v14 = vld [vmem:[%s11859_s10 + $0x93] sm:$0xff]  ;;  %v3919_v43 = vld [vmem:[%s11859_s10 + $0xa3] sm:$0xff]  ;;  %v3920_v41 = vld [vmem:[%s11859_s10 + $0xab] sm:$0xff] }
 0x207   : > { %v10325_v25 = vpop.f32.mrf.mxu1  ;;  %v10477_v19 = vpop.f32.mrf.mxu0  ;;  %10588 = vmatmul.mubr.bf16.gmra.mxu1 %v3063_v63  ;;  %10740 = vmatmul.mubr.bf16.gmra.mxu0 %v4044_v29  ;;  %v15399_v29 = vld [vmem:[#allocation66_spill] sm:$0xff]  ;;  %v4047_v48 = vpack.c.bf16 %v3920_v41, %v3919_v43 }
 0x208   : > { %15394 = vst [vmem:[#allocation57_spill] sm:$0xff] %v12882_v16  ;;  %v12887_v6 = vadd.f32 %v2422_v30, %v1578_v13  ;;  %v1599_v50 = vadd.f32 %v10325_v25, %v15397_v57  ;;  %10591 = vmatprep.mubr.bf16.mxu1 %v3064_v34  ;;  %10743 = vmatprep.mubr.bf16.mxu0 %v4045_v8  ;;  %v15401_v57 = vld [vmem:[#allocation68_spill] sm:$0xff]  ;;  %v2942_v43 = vld [vmem:[%s11859_s10 + $0xc2] sm:$0xff] }
 0x209   : > { %v1590_v21 = vpop.f32.mrf.mxu1  ;;  %v2435_v28 = vpop.f32.mrf.mxu0  ;;  %10876 = vmatpush3.bf16.msra.mxu1 %v11609_v42  ;;  %11028 = vmatpush3.bf16.msra.mxu0 %v11610_v26  ;;  %v3065_v34 = vpack.c.bf16 %v2937_v47, %v2936_v10  ;;  %v4046_v8 = vpack.c.bf16 %v3918_v15, %v3917_v14  ;;  %v3066_v16 = vpack.c.bf16 %v2939_v38, %v2938_v56  ;;  %v2940_v47 = vld [vmem:[%s11859_s10 + $0xb2] sm:$0xff]  ;;  %v2941_v14 = vld [vmem:[%s11859_s10 + $0xba] sm:$0xff] }
 0x20a   : > { %15396 = vst [vmem:[#allocation59_spill] sm:$0xff] %v12887_v6  ;;  %v12896_v63 = vadd.f32 %v10477_v19, %v1599_v50  ;;  %v1591_v2 = vadd.f32 %v1590_v21, %v15399_v29  ;;  %v15403_v50 = vld [vmem:[#allocation70_spill] sm:$0xff]  ;;  %v15405_v56 = vld [vmem:[#allocation72_spill] sm:$0xff] }
 0x20b   : > { %v10326_v30 = vpop.f32.mrf.mxu1  ;;  %v10478_v13 = vpop.f32.mrf.mxu0  ;;  %v3921_v38 = vld [vmem:[%s11859_s10 + $0xb3] sm:$0xff] }
 0x20c   : > { %15398 = vst [vmem:[#allocation62_spill] sm:$0xff] %v12896_v63  ;;  %v12899_v25 = vadd.f32 %v2435_v28, %v1591_v2  ;;  %v1602_v6 = vadd.f32 %v10326_v30, %v15401_v57  ;;  %v2943_v30 = vld [vmem:[%s11859_s10 + $0xca] sm:$0xff] }
 0x20d   : > { %v1593_v42 = vpop.f32.mrf.mxu1  ;;  %v2438_v26 = vpop.f32.mrf.mxu0  ;;  %v3924_v57 = vld [vmem:[%s11859_s10 + $0xcb] sm:$0xff] }
 0x20e   : > { %15400 = vst [vmem:[#allocation64_spill] sm:$0xff] %v12899_v25  ;;  %v12902_v19 = vadd.f32 %v10478_v13, %v1602_v6  ;;  %v1594_v21 = vadd.f32 %v1593_v42, %v15403_v50  ;;  %v3922_v6 = vld [vmem:[%s11859_s10 + $0xbb] sm:$0xff]  ;;  %v3923_v13 = vld [vmem:[%s11859_s10 + $0xc3] sm:$0xff] }
 0x20f   : > { %v10329_v29 = vpop.f32.mrf.mxu1  ;;  %v10481_v10 = vpop.f32.mrf.mxu0  ;;  %10592 = vmatmul.mubr.bf16.gmra.mxu1 %v3065_v34  ;;  %10744 = vmatmul.mubr.bf16.gmra.mxu0 %v4046_v8  ;;  %v15407_v34 = vld [vmem:[#allocation74_spill] sm:$0xff] }
 0x210   : > { %15402 = vst [vmem:[#allocation66_spill] sm:$0xff] %v12902_v19  ;;  %v12907_v15 = vadd.f32 %v2438_v26, %v1594_v21  ;;  %v1615_v28 = vadd.f32 %v10329_v29, %v15405_v56  ;;  %10595 = vmatprep.mubr.bf16.mxu1 %v3066_v16  ;;  %10747 = vmatprep.mubr.bf16.mxu0 %v4047_v48  ;;  %v15409_v48 = vld [vmem:[#allocation76_spill] sm:$0xff] }
 0x211   : > { %v1606_v41 = vpop.f32.mrf.mxu1  ;;  %v2451_v2 = vpop.f32.mrf.mxu0  ;;  %v3067_v21 = vpack.c.bf16 %v2941_v14, %v2940_v47  ;;  %v4048_v29 = vpack.c.bf16 %v3922_v6, %v3921_v38  ;;  %v4049_v19 = vpack.c.bf16 %v3924_v57, %v3923_v13  ;;  %v2944_v14 = vld [vmem:[%s11859_s10 + $0xd2] sm:$0xff]  ;;  %v2945_v38 = vld [vmem:[%s11859_s10 + $0xda] sm:$0xff]  ;;  %v2946_v57 = vld [vmem:[%s11859_s10 + $0xe2] sm:$0xff] }
 0x212   : > { %15404 = vst [vmem:[#allocation68_spill] sm:$0xff] %v12907_v15  ;;  %v12916_v42 = vadd.f32 %v10481_v10, %v1615_v28  ;;  %v1607_v8 = vadd.f32 %v1606_v41, %v15407_v34  ;;  %v3068_v15 = vpack.c.bf16 %v2943_v30, %v2942_v43  ;;  %v15411_v41 = vld [vmem:[#allocation78_spill] sm:$0xff]  ;;  %v15413_v43 = vld [vmem:[#allocation80_spill] sm:$0xff] }
 0x213   : > { %v10330_v50 = vpop.f32.mrf.mxu1  ;;  %v10482_v26 = vpop.f32.mrf.mxu0  ;;  %v3925_v30 = vld [vmem:[%s11859_s10 + $0xd3] sm:$0xff]  ;;  %v3926_v13 = vld [vmem:[%s11859_s10 + $0xdb] sm:$0xff] }
 0x214   : > { %15406 = vst [vmem:[#allocation70_spill] sm:$0xff] %v12916_v42  ;;  %v12919_v16 = vadd.f32 %v2451_v2, %v1607_v8  ;;  %v1618_v56 = vadd.f32 %v10330_v50, %v15409_v48  ;;  %v2947_v50 = vld [vmem:[%s11859_s10 + $0xea] sm:$0xff] }
 0x215   : > { %v1609_v25 = vpop.f32.mrf.mxu1  ;;  %v2454_v10 = vpop.f32.mrf.mxu0  ;;  %v3928_v48 = vld [vmem:[%s11859_s10 + $0xeb] sm:$0xff] }
 0x216   : > { %15408 = vst [vmem:[#allocation72_spill] sm:$0xff] %v12919_v16  ;;  %v12922_v28 = vadd.f32 %v10482_v26, %v1618_v56  ;;  %v1610_v34 = vadd.f32 %v1609_v25, %v15411_v41  ;;  %v3927_v26 = vld [vmem:[%s11859_s10 + $0xe3] sm:$0xff] }
 0x217   : > { %v10333_v42 = vpop.f32.mrf.mxu1  ;;  %v10485_v47 = vpop.f32.mrf.mxu0  ;;  %10596 = vmatmul.mubr.bf16.gmra.mxu1 %v3067_v21  ;;  %10748 = vmatmul.mubr.bf16.gmra.mxu0 %v4048_v29  ;;  %v15415_v21 = vld [vmem:[#allocation82_spill] sm:$0xff] }
 0x218   : > { %15410 = vst [vmem:[#allocation74_spill] sm:$0xff] %v12922_v28  ;;  %v12927_v6 = vadd.f32 %v2454_v10, %v1610_v34  ;;  %v1631_v2 = vadd.f32 %v10333_v42, %v15413_v43  ;;  %10599 = vmatprep.mubr.bf16.mxu1 %v3068_v15  ;;  %10751 = vmatprep.mubr.bf16.mxu0 %v4049_v19  ;;  %v15417_v19 = vld [vmem:[#allocation84_spill] sm:$0xff] }
 0x219   : > { %v1622_v8 = vpop.f32.mrf.mxu1  ;;  %v2467_v25 = vpop.f32.mrf.mxu0  ;;  %v3069_v34 = vpack.c.bf16 %v2945_v38, %v2944_v14  ;;  %v4050_v42 = vpack.c.bf16 %v3926_v13, %v3925_v30  ;;  %v4051_v28 = vpack.c.bf16 %v3928_v48, %v3927_v26  ;;  %v2948_v38 = vld [vmem:[%s11859_s10 + $0xf2] sm:$0xff]  ;;  %v2949_v30 = vld [vmem:[%s11859_s10 + $0xfa] sm:$0xff]  ;;  %v2950_v48 = vld [vmem:[%s11859_s10 + $0x102] sm:$0xff] }
 0x21a   : > { %15412 = vst [vmem:[#allocation76_spill] sm:$0xff] %v12927_v6  ;;  %v12936_v56 = vadd.f32 %v10485_v47, %v1631_v2  ;;  %v1623_v29 = vadd.f32 %v1622_v8, %v15415_v21  ;;  %v3070_v6 = vpack.c.bf16 %v2947_v50, %v2946_v57  ;;  %v15419_v8 = vld [vmem:[#allocation86_spill] sm:$0xff]  ;;  %v15421_v57 = vld [vmem:[#allocation88_spill] sm:$0xff] }
 0x21b   : > { %v10334_v41 = vpop.f32.mrf.mxu1  ;;  %v10486_v10 = vpop.f32.mrf.mxu0  ;;  %v3929_v50 = vld [vmem:[%s11859_s10 + $0xf3] sm:$0xff]  ;;  %v3930_v26 = vld [vmem:[%s11859_s10 + $0xfb] sm:$0xff] }
 0x21c   : > { %15414 = vst [vmem:[#allocation78_spill] sm:$0xff] %v12936_v56  ;;  %v12939_v15 = vadd.f32 %v2467_v25, %v1623_v29  ;;  %v1634_v43 = vadd.f32 %v10334_v41, %v15417_v19  ;;  %v2951_v41 = vld [vmem:[%s11859_s10 + $0x10a] sm:$0xff] }
 0x21d   : > { %v1625_v16 = vpop.f32.mrf.mxu1  ;;  %v2470_v47 = vpop.f32.mrf.mxu0  ;;  %v3932_v19 = vld [vmem:[%s11859_s10 + $0x10b] sm:$0xff] }
 0x21e   : > { %15416 = vst [vmem:[#allocation80_spill] sm:$0xff] %v12939_v15  ;;  %v12942_v2 = vadd.f32 %v10486_v10, %v1634_v43  ;;  %v1626_v21 = vadd.f32 %v1625_v16, %v15419_v8  ;;  %v3931_v10 = vld [vmem:[%s11859_s10 + $0x103] sm:$0xff] }
 0x21f   : > { %v10337_v56 = vpop.f32.mrf.mxu1  ;;  %v10489_v14 = vpop.f32.mrf.mxu0  ;;  %10600 = vmatmul.mubr.bf16.gmra.mxu1 %v3069_v34  ;;  %10752 = vmatmul.mubr.bf16.gmra.mxu0 %v4050_v42  ;;  %v15423_v34 = vld [vmem:[#allocation90_spill] sm:$0xff]  ;;  %v11611_v15 = vld [vmem:[%s15269_s1 + $0x150] sm:$0xff]  }
 0x220   : > { %15418 = vst [vmem:[#allocation82_spill] sm:$0xff] %v12942_v2  ;;  %v12947_v13 = vadd.f32 %v2470_v47, %v1626_v21  ;;  %v1647_v25 = vadd.f32 %v10337_v56, %v15421_v57  ;;  %10603 = vmatprep.mubr.bf16.mxu1 %v3070_v6  ;;  %10755 = vmatprep.mubr.bf16.mxu0 %v4051_v28  ;;  %v15425_v28 = vld [vmem:[#allocation92_spill] sm:$0xff] }
 0x221   : > { %v1638_v29 = vpop.f32.mrf.mxu1  ;;  %v2483_v16 = vpop.f32.mrf.mxu0  ;;  %v3071_v47 = vpack.c.bf16 %v2949_v30, %v2948_v38  ;;  %v4052_v21 = vpack.c.bf16 %v3930_v26, %v3929_v50  ;;  %v3072_v57 = vpack.c.bf16 %v2951_v41, %v2950_v48  ;;  %v15427_v38 = vld [vmem:[#allocation94_spill] sm:$0xff]  ;;  %10877 = vmatprep.subr.bf16.mxu1 %v11611_v15  ;;  %v11612_v50 = vld [vmem:[%s15269_s1 + $0x190] sm:$0xff]  }
 0x222   : > { %15420 = vst [vmem:[#allocation84_spill] sm:$0xff] %v12947_v13  ;;  %v12956_v43 = vadd.f32 %v10489_v14, %v1647_v25  ;;  %v1639_v42 = vadd.f32 %v1638_v29, %v15423_v34  ;;  %v4053_v13 = vpack.c.bf16 %v3932_v19, %v3931_v10  ;;  %v2953_v41 = vld [vmem:[%s11859_s10 + $0x11a] sm:$0xff]  ;;  %10878 = vmatpush3.bf16.msra.mxu1 %v11611_v15 }
 0x223   : > { %v10338_v8 = vpop.f32.mrf.mxu1  ;;  %v10490_v2 = vpop.f32.mrf.mxu0  ;;  %v3933_v34 = vld [vmem:[%s11859_s10 + $0x113] sm:$0xff]  ;;  %11029 = vmatprep.subr.bf16.mxu0 %v11612_v50 }
 0x224   : > { %15422 = vst [vmem:[#allocation86_spill] sm:$0xff] %v12956_v43  ;;  %v12959_v56 = vadd.f32 %v2483_v16, %v1639_v42  ;;  %v1650_v6 = vadd.f32 %v10338_v8, %v15425_v28  ;;  %v2952_v16 = vld [vmem:[%s11859_s10 + $0x112] sm:$0xff]  ;;  %v3934_v42 = vld [vmem:[%s11859_s10 + $0x11b] sm:$0xff]  ;;  %11030 = vmatpush3.bf16.msra.mxu0 %v11612_v50 }
 0x225   : > { %v1641_v14 = vpop.f32.mrf.mxu1  ;;  %v2486_v25 = vpop.f32.mrf.mxu0  ;;  %v2954_v8 = vld [vmem:[%s11859_s10 + $0x122] sm:$0xff] }
 0x226   : > { %15424 = vst [vmem:[#allocation88_spill] sm:$0xff] %v12959_v56  ;;  %v12965_v29 = vadd.f32 %v10490_v2, %v1650_v6  ;;  %v1642_v30 = vadd.f32 %v1641_v14, %v15427_v38  ;;  %v15429_v2 = vld [vmem:[#allocation96_spill] sm:$0xff]  ;;  %v15435_v50 = vld [vmem:[#allocation102_spill] sm:$0xff] }
 0x227   : > { %v10341_v26 = vpop.f32.mrf.mxu1  ;;  %v10493_v48 = vpop.f32.mrf.mxu0  ;;  %10604 = vmatmul.mubr.bf16.gmra.mxu1 %v3071_v47  ;;  %10756 = vmatmul.mubr.bf16.gmra.mxu0 %v4052_v21  ;;  %v2955_v14 = vld [vmem:[%s11859_s10 + $0x12a] sm:$0xff]  ;;  %v15431_v21 = vld [vmem:[#allocation98_spill] sm:$0xff] }
 0x228   : > { %15426 = vst [vmem:[#allocation90_spill] sm:$0xff] %v12965_v29  ;;  %v12973_v10 = vadd.f32 %v2486_v25, %v1642_v30  ;;  %v1663_v19 = vadd.f32 %v10341_v26, %v15429_v2  ;;  %10607 = vmatprep.mubr.bf16.mxu1 %v3072_v57  ;;  %10759 = vmatprep.mubr.bf16.mxu0 %v4053_v13  ;;  %v3935_v38 = vld [vmem:[%s11859_s10 + $0x123] sm:$0xff]  ;;  %v3936_v29 = vld [vmem:[%s11859_s10 + $0x12b] sm:$0xff] }
 0x229   : > { %v1654_v28 = vpop.f32.mrf.mxu1  ;;  %v2499_v6 = vpop.f32.mrf.mxu0  ;;  %v3073_v13 = vpack.c.bf16 %v2953_v41, %v2952_v16  ;;  %v4054_v57 = vpack.c.bf16 %v3934_v42, %v3933_v34  ;;  %v15433_v2 = vld [vmem:[#allocation100_spill] sm:$0xff]  ;;  %v3074_v43 = vpack.c.bf16 %v2955_v14, %v2954_v8  ;;  %v4055_v63 = vpack.c.bf16 %v3936_v29, %v3935_v38  ;;  %v2957_v41 = vld [vmem:[%s11859_s10 + $0x13a] sm:$0xff] }
 0x22a   : > { %15428 = vst [vmem:[#allocation92_spill] sm:$0xff] %v12973_v10  ;;  %v12982_v47 = vadd.f32 %v10493_v48, %v1663_v19  ;;  %v1655_v56 = vadd.f32 %v1654_v28, %v15431_v21  ;;  %v15437_v29 = vld [vmem:[#allocation8_spill] sm:$0xff] }
 0x22b   : > { %v10342_v25 = vpop.f32.mrf.mxu1  ;;  %v10494_v30 = vpop.f32.mrf.mxu0  ;;  %v3937_v8 = vld [vmem:[%s11859_s10 + $0x133] sm:$0xff] }
 0x22c   : > { %15430 = vst [vmem:[#allocation94_spill] sm:$0xff] %v12982_v47  ;;  %v12985_v26 = vadd.f32 %v2499_v6, %v1655_v56  ;;  %v1666_v10 = vadd.f32 %v10342_v25, %v15433_v2  ;;  %v2956_v56 = vld [vmem:[%s11859_s10 + $0x132] sm:$0xff]  ;;  %v2958_v6 = vld [vmem:[%s11859_s10 + $0x142] sm:$0xff]  ;;  %v2959_v25 = vld [vmem:[%s11859_s10 + $0x14a] sm:$0xff] }
 0x22d   : > { %v1657_v15 = vpop.f32.mrf.mxu1  ;;  %v2502_v48 = vpop.f32.mrf.mxu0  ;;  %v3940_v2 = vld [vmem:[%s11859_s10 + $0x14b] sm:$0xff] }
 0x22e   : > { %15432 = vst [vmem:[#allocation96_spill] sm:$0xff] %v12985_v26  ;;  %v12988_v19 = vadd.f32 %v10494_v30, %v1666_v10  ;;  %v1658_v28 = vadd.f32 %v1657_v15, %v15435_v50  ;;  %v3938_v10 = vld [vmem:[%s11859_s10 + $0x13b] sm:$0xff]  ;;  %v3939_v30 = vld [vmem:[%s11859_s10 + $0x143] sm:$0xff] }
 0x22f   : > { %v10345_v21 = vpop.f32.mrf.mxu1  ;;  %v10497_v16 = vpop.f32.mrf.mxu0  ;;  %10608 = vmatmul.mubr.bf16.gmra.mxu1 %v3073_v13  ;;  %10760 = vmatmul.mubr.bf16.gmra.mxu0 %v4054_v57  ;;  %v15439_v13 = vld [vmem:[#allocation9_spill] sm:$0xff] }
 0x230   : > { %15434 = vst [vmem:[#allocation98_spill] sm:$0xff] %v12988_v19  ;;  %v12993_v34 = vadd.f32 %v2502_v48, %v1658_v28  ;;  %v1679_v42 = vadd.f32 %v10345_v21, %v15437_v29  ;;  %10611 = vmatprep.mubr.bf16.mxu1 %v3074_v43  ;;  %10763 = vmatprep.mubr.bf16.mxu0 %v4055_v63  ;;  %v15441_v63 = vld [vmem:[#allocation10_spill] sm:$0xff] }
 0x231   : > { %v1670_v14 = vpop.f32.mrf.mxu1  ;;  %v2515_v38 = vpop.f32.mrf.mxu0  ;;  %v3075_v28 = vpack.c.bf16 %v2957_v41, %v2956_v56  ;;  %v4056_v21 = vpack.c.bf16 %v3938_v10, %v3937_v8  ;;  %v4057_v19 = vpack.c.bf16 %v3940_v2, %v3939_v30  ;;  %v2960_v41 = vld [vmem:[%s11859_s10 + $0x152] sm:$0xff]  ;;  %v2961_v8 = vld [vmem:[%s11859_s10 + $0x15a] sm:$0xff]  ;;  %v2962_v2 = vld [vmem:[%s11859_s10 + $0x162] sm:$0xff] }
 0x232   : > { %15436 = vst [vmem:[#allocation100_spill] sm:$0xff] %v12993_v34  ;;  %v13002_v15 = vadd.f32 %v10497_v16, %v1679_v42  ;;  %v1671_v57 = vadd.f32 %v1670_v14, %v15439_v13  ;;  %v3076_v34 = vpack.c.bf16 %v2959_v25, %v2958_v6  ;;  %v15443_v14 = vld [vmem:[#allocation11_spill] sm:$0xff]  ;;  %v15445_v6 = vld [vmem:[#allocation12_spill] sm:$0xff] }
 0x233   : > { %v10346_v50 = vpop.f32.mrf.mxu1  ;;  %v10498_v48 = vpop.f32.mrf.mxu0  ;;  %v3941_v25 = vld [vmem:[%s11859_s10 + $0x153] sm:$0xff]  ;;  %v3942_v30 = vld [vmem:[%s11859_s10 + $0x15b] sm:$0xff] }
 0x234   : > { %15438 = vst [vmem:[#allocation102_spill] sm:$0xff] %v13002_v15  ;;  %v13005_v43 = vadd.f32 %v2515_v38, %v1671_v57  ;;  %v1682_v29 = vadd.f32 %v10346_v50, %v15441_v63  ;;  %v2963_v50 = vld [vmem:[%s11859_s10 + $0x16a] sm:$0xff] }
 0x235   : > { %v1673_v26 = vpop.f32.mrf.mxu1  ;;  %v2518_v16 = vpop.f32.mrf.mxu0  ;;  %v3944_v63 = vld [vmem:[%s11859_s10 + $0x16b] sm:$0xff] }
 0x236   : > { %15440 = vst [vmem:[#allocation8_spill] sm:$0xff] %v13005_v43  ;;  %v13008_v42 = vadd.f32 %v10498_v48, %v1682_v29  ;;  %v1674_v13 = vadd.f32 %v1673_v26, %v15443_v14  ;;  %v3943_v48 = vld [vmem:[%s11859_s10 + $0x163] sm:$0xff] }
 0x237   : > { %v10349_v15 = vpop.f32.mrf.mxu1  ;;  %v10501_v56 = vpop.f32.mrf.mxu0  ;;  %10612 = vmatmul.mubr.bf16.gmra.mxu1 %v3075_v28  ;;  %10764 = vmatmul.mubr.bf16.gmra.mxu0 %v4056_v21  ;;  %v15447_v28 = vld [vmem:[#allocation13_spill] sm:$0xff] }
 0x238   : > { %15442 = vst [vmem:[#allocation9_spill] sm:$0xff] %v13008_v42  ;;  %v13013_v10 = vadd.f32 %v2518_v16, %v1674_v13  ;;  %v1695_v38 = vadd.f32 %v10349_v15, %v15445_v6  ;;  %10615 = vmatprep.mubr.bf16.mxu1 %v3076_v34  ;;  %10767 = vmatprep.mubr.bf16.mxu0 %v4057_v19  ;;  %v15449_v19 = vld [vmem:[#allocation14_spill] sm:$0xff] }
 0x239   : > { %v1686_v57 = vpop.f32.mrf.mxu1  ;;  %v2531_v26 = vpop.f32.mrf.mxu0  ;;  %v3077_v13 = vpack.c.bf16 %v2961_v8, %v2960_v41  ;;  %v4058_v15 = vpack.c.bf16 %v3942_v30, %v3941_v25  ;;  %v4059_v42 = vpack.c.bf16 %v3944_v63, %v3943_v48  ;;  %v2964_v8 = vld [vmem:[%s11859_s10 + $0x172] sm:$0xff]  ;;  %v2965_v25 = vld [vmem:[%s11859_s10 + $0x17a] sm:$0xff]  ;;  %v2966_v63 = vld [vmem:[%s11859_s10 + $0x182] sm:$0xff] }
 0x23a   : > { %15444 = vst [vmem:[#allocation10_spill] sm:$0xff] %v13013_v10  ;;  %v13022_v29 = vadd.f32 %v10501_v56, %v1695_v38  ;;  %v1687_v21 = vadd.f32 %v1686_v57, %v15447_v28  ;;  %v3078_v10 = vpack.c.bf16 %v2963_v50, %v2962_v2  ;;  %v15451_v57 = vld [vmem:[#allocation15_spill] sm:$0xff]  ;;  %v15453_v2 = vld [vmem:[#allocation16_spill] sm:$0xff] }
 0x23b   : > { %v10350_v14 = vpop.f32.mrf.mxu1  ;;  %v10502_v16 = vpop.f32.mrf.mxu0  ;;  %v3945_v50 = vld [vmem:[%s11859_s10 + $0x173] sm:$0xff]  ;;  %v3946_v48 = vld [vmem:[%s11859_s10 + $0x17b] sm:$0xff] }
 0x23c   : > { %15446 = vst [vmem:[#allocation11_spill] sm:$0xff] %v13022_v29  ;;  %v13025_v34 = vadd.f32 %v2531_v26, %v1687_v21  ;;  %v1698_v6 = vadd.f32 %v10350_v14, %v15449_v19  ;;  %v2967_v14 = vld [vmem:[%s11859_s10 + $0x18a] sm:$0xff] }
 0x23d   : > { %v1689_v43 = vpop.f32.mrf.mxu1  ;;  %v2534_v56 = vpop.f32.mrf.mxu0  ;;  %v3948_v19 = vld [vmem:[%s11859_s10 + $0x18b] sm:$0xff] }
 0x23e   : > { %15448 = vst [vmem:[#allocation12_spill] sm:$0xff] %v13025_v34  ;;  %v13028_v38 = vadd.f32 %v10502_v16, %v1698_v6  ;;  %v1690_v28 = vadd.f32 %v1689_v43, %v15451_v57  ;;  %v3947_v16 = vld [vmem:[%s11859_s10 + $0x183] sm:$0xff] }
 0x23f   : > { %v10353_v29 = vpop.f32.mrf.mxu1  ;;  %v10505_v41 = vpop.f32.mrf.mxu0  ;;  %10616 = vmatmul.mubr.bf16.gmra.mxu1 %v3077_v13  ;;  %10768 = vmatmul.mubr.bf16.gmra.mxu0 %v4058_v15  ;;  %v15455_v13 = vld [vmem:[#allocation17_spill] sm:$0xff] }
 0x240   : > { %15450 = vst [vmem:[#allocation13_spill] sm:$0xff] %v13028_v38  ;;  %v13033_v30 = vadd.f32 %v2534_v56, %v1690_v28  ;;  %v1711_v26 = vadd.f32 %v10353_v29, %v15453_v2  ;;  %10619 = vmatprep.mubr.bf16.mxu1 %v3078_v10  ;;  %10771 = vmatprep.mubr.bf16.mxu0 %v4059_v42  ;;  %v15457_v10 = vld [vmem:[#allocation18_spill] sm:$0xff] }
 0x241   : > { %v1702_v21 = vpop.f32.mrf.mxu1  ;;  %v2547_v43 = vpop.f32.mrf.mxu0  ;;  %v3079_v56 = vpack.c.bf16 %v2965_v25, %v2964_v8  ;;  %v4060_v29 = vpack.c.bf16 %v3946_v48, %v3945_v50  ;;  %v3080_v2 = vpack.c.bf16 %v2967_v14, %v2966_v63  ;;  %v11613_v8 = vld [vmem:[%s15269_s1 + $0x148] sm:$0xff]   ;;  %v2968_v48 = vld [vmem:[%s11859_s10 + $0x192] sm:$0xff] }
 0x242   : > { %15452 = vst [vmem:[#allocation14_spill] sm:$0xff] %v13033_v30  ;;  %v13042_v6 = vadd.f32 %v10505_v41, %v1711_v26  ;;  %v1703_v15 = vadd.f32 %v1702_v21, %v15455_v13  ;;  %v4061_v30 = vpack.c.bf16 %v3948_v19, %v3947_v16  ;;  %v15459_v26 = vld [vmem:[#allocation19_spill] sm:$0xff]  ;;  %v2969_v63 = vld [vmem:[%s11859_s10 + $0x19a] sm:$0xff]  ;;  %10879 = vmatprep.subr.bf16.mxu1 %v11613_v8 }
 0x243   : > { %v10354_v57 = vpop.f32.mrf.mxu1  ;;  %v10506_v38 = vpop.f32.mrf.mxu0  ;;  %v2970_v19 = vld [vmem:[%s11859_s10 + $0x1a2] sm:$0xff]  ;;  %10880 = vmatpush3.bf16.msra.mxu1 %v11613_v8 }
 0x244   : > { %15454 = vst [vmem:[#allocation15_spill] sm:$0xff] %v13042_v6  ;;  %v13045_v42 = vadd.f32 %v2547_v43, %v1703_v15  ;;  %v1714_v28 = vadd.f32 %v10354_v57, %v15457_v10  ;;  %v3949_v43 = vld [vmem:[%s11859_s10 + $0x193] sm:$0xff]  ;;  %v11614_v13 = vld [vmem:[%s15269_s1 + $0x188] sm:$0xff]  }
 0x245   : > { %v1705_v34 = vpop.f32.mrf.mxu1  ;;  %v2550_v47 = vpop.f32.mrf.mxu0  ;;  %v3951_v10 = vld [vmem:[%s11859_s10 + $0x1a3] sm:$0xff]  ;;  %11031 = vmatprep.subr.bf16.mxu0 %v11614_v13 }
 0x246   : > { %15456 = vst [vmem:[#allocation16_spill] sm:$0xff] %v13045_v42  ;;  %v13048_v41 = vadd.f32 %v10506_v38, %v1714_v28  ;;  %v1706_v21 = vadd.f32 %v1705_v34, %v15459_v26  ;;  %v15461_v38 = vld [vmem:[#allocation20_spill] sm:$0xff]  ;;  %v3950_v34 = vld [vmem:[%s11859_s10 + $0x19b] sm:$0xff]  ;;  %11032 = vmatpush3.bf16.msra.mxu0 %v11614_v13 }
 0x247   : > { %v10357_v25 = vpop.f32.mrf.mxu1  ;;  %v10509_v50 = vpop.f32.mrf.mxu0  ;;  %10620 = vmatmul.mubr.bf16.gmra.mxu1 %v3079_v56  ;;  %10772 = vmatmul.mubr.bf16.gmra.mxu0 %v4060_v29  ;;  %v2971_v56 = vld [vmem:[%s11859_s10 + $0x1aa] sm:$0xff] }
 0x248   : > { %15458 = vst [vmem:[#allocation17_spill] sm:$0xff] %v13048_v41  ;;  %v13057_v14 = vadd.f32 %v2550_v47, %v1706_v21  ;;  %v1727_v16 = vadd.f32 %v10357_v25, %v15461_v38  ;;  %10623 = vmatprep.mubr.bf16.mxu1 %v3080_v2  ;;  %10775 = vmatprep.mubr.bf16.mxu0 %v4061_v30  ;;  %v3952_v29 = vld [vmem:[%s11859_s10 + $0x1ab] sm:$0xff] }
 0x249   : > { %v1718_v15 = vpop.f32.mrf.mxu1  ;;  %v2563_v57 = vpop.f32.mrf.mxu0  ;;  %v15463_v47 = vld [vmem:[#allocation21_spill] sm:$0xff]  ;;  %v3081_v21 = vpack.c.bf16 %v2969_v63, %v2968_v48  ;;  %v4062_v25 = vpack.c.bf16 %v3950_v34, %v3949_v43  ;;  %v3082_v42 = vpack.c.bf16 %v2971_v56, %v2970_v19  ;;  %v4063_v6 = vpack.c.bf16 %v3952_v29, %v3951_v10  ;;  %v15469_v19 = vld [vmem:[#allocation24_spill] sm:$0xff]  ;;  %v2974_v56 = vld [vmem:[%s11859_s10 + $0x1c2] sm:$0xff] }
 0x24a   : > { %15460 = vst [vmem:[#allocation18_spill] sm:$0xff] %v13057_v14  ;;  %v13068_v28 = vadd.f32 %v10509_v50, %v1727_v16  ;;  %v1719_v26 = vadd.f32 %v1718_v15, %v15463_v47  ;;  %v15465_v14 = vld [vmem:[#allocation22_spill] sm:$0xff]  ;;  %v15467_v15 = vld [vmem:[#allocation23_spill] sm:$0xff]  ;;  %v2972_v43 = vld [vmem:[%s11859_s10 + $0x1b2] sm:$0xff] }
 0x24b   : > { %v10358_v2 = vpop.f32.mrf.mxu1  ;;  %v10510_v30 = vpop.f32.mrf.mxu0 }
 0x24c   : > { %15462 = vst [vmem:[#allocation19_spill] sm:$0xff] %v13068_v28  ;;  %v13071_v38 = vadd.f32 %v2563_v57, %v1719_v26  ;;  %v1730_v41 = vadd.f32 %v10358_v2, %v15465_v14  ;;  %v2973_v14 = vld [vmem:[%s11859_s10 + $0x1ba] sm:$0xff]  ;;  %v2975_v26 = vld [vmem:[%s11859_s10 + $0x1ca] sm:$0xff] }
 0x24d   : > { %v1721_v50 = vpop.f32.mrf.mxu1  ;;  %v2566_v16 = vpop.f32.mrf.mxu0  ;;  %v3953_v57 = vld [vmem:[%s11859_s10 + $0x1b3] sm:$0xff]  ;;  %v3955_v2 = vld [vmem:[%s11859_s10 + $0x1c3] sm:$0xff] }
 0x24e   : > { %15464 = vst [vmem:[#allocation20_spill] sm:$0xff] %v13071_v38  ;;  %v13074_v8 = vadd.f32 %v10510_v30, %v1730_v41  ;;  %v1722_v47 = vadd.f32 %v1721_v50, %v15467_v15  ;;  %v3954_v41 = vld [vmem:[%s11859_s10 + $0x1bb] sm:$0xff]  ;;  %v3956_v30 = vld [vmem:[%s11859_s10 + $0x1cb] sm:$0xff] }
 0x24f   : > { %v10361_v48 = vpop.f32.mrf.mxu1  ;;  %v10513_v63 = vpop.f32.mrf.mxu0  ;;  %10624 = vmatmul.mubr.bf16.gmra.mxu1 %v3081_v21  ;;  %10776 = vmatmul.mubr.bf16.gmra.mxu0 %v4062_v25  ;;  %v15471_v21 = vld [vmem:[#allocation25_spill] sm:$0xff] }
 0x250   : > { %15466 = vst [vmem:[#allocation21_spill] sm:$0xff] %v13074_v8  ;;  %v13079_v34 = vadd.f32 %v2566_v16, %v1722_v47  ;;  %v1743_v13 = vadd.f32 %v10361_v48, %v15469_v19  ;;  %10627 = vmatprep.mubr.bf16.mxu1 %v3082_v42  ;;  %10779 = vmatprep.mubr.bf16.mxu0 %v4063_v6  ;;  %v15473_v6 = vld [vmem:[#allocation26_spill] sm:$0xff] }
 0x251   : > { %v1734_v10 = vpop.f32.mrf.mxu1  ;;  %v2579_v29 = vpop.f32.mrf.mxu0  ;;  %v3083_v47 = vpack.c.bf16 %v2973_v14, %v2972_v43  ;;  %v4064_v48 = vpack.c.bf16 %v3954_v41, %v3953_v57  ;;  %v4065_v8 = vpack.c.bf16 %v3956_v30, %v3955_v2  ;;  %v2976_v14 = vld [vmem:[%s11859_s10 + $0x1d2] sm:$0xff]  ;;  %v2977_v57 = vld [vmem:[%s11859_s10 + $0x1da] sm:$0xff]  ;;  %v2978_v30 = vld [vmem:[%s11859_s10 + $0x1e2] sm:$0xff] }
 0x252   : > { %15468 = vst [vmem:[#allocation22_spill] sm:$0xff] %v13079_v34  ;;  %v13088_v50 = vadd.f32 %v10513_v63, %v1743_v13  ;;  %v1735_v25 = vadd.f32 %v1734_v10, %v15471_v21  ;;  %v3084_v34 = vpack.c.bf16 %v2975_v26, %v2974_v56  ;;  %v15475_v10 = vld [vmem:[#allocation27_spill] sm:$0xff]  ;;  %v15477_v56 = vld [vmem:[#allocation28_spill] sm:$0xff] }
 0x253   : > { %v10362_v15 = vpop.f32.mrf.mxu1  ;;  %v10514_v16 = vpop.f32.mrf.mxu0  ;;  %v3957_v26 = vld [vmem:[%s11859_s10 + $0x1d3] sm:$0xff]  ;;  %v3958_v2 = vld [vmem:[%s11859_s10 + $0x1db] sm:$0xff] }
 0x254   : > { %15470 = vst [vmem:[#allocation23_spill] sm:$0xff] %v13088_v50  ;;  %v13091_v42 = vadd.f32 %v2579_v29, %v1735_v25  ;;  %v1746_v19 = vadd.f32 %v10362_v15, %v15473_v6  ;;  %v2979_v15 = vld [vmem:[%s11859_s10 + $0x1ea] sm:$0xff] }
 0x255   : > { %v1737_v38 = vpop.f32.mrf.mxu1  ;;  %v2582_v63 = vpop.f32.mrf.mxu0  ;;  %v3960_v6 = vld [vmem:[%s11859_s10 + $0x1eb] sm:$0xff] }
 0x256   : > { %15472 = vst [vmem:[#allocation24_spill] sm:$0xff] %v13091_v42  ;;  %v13094_v13 = vadd.f32 %v10514_v16, %v1746_v19  ;;  %v1738_v21 = vadd.f32 %v1737_v38, %v15475_v10  ;;  %v3959_v16 = vld [vmem:[%s11859_s10 + $0x1e3] sm:$0xff] }
 0x257   : > { %v10365_v50 = vpop.f32.mrf.mxu1  ;;  %v10517_v43 = vpop.f32.mrf.mxu0  ;;  %10628 = vmatmul.mubr.bf16.gmra.mxu1 %v3083_v47  ;;  %10780 = vmatmul.mubr.bf16.gmra.mxu0 %v4064_v48  ;;  %v15479_v47 = vld [vmem:[#allocation29_spill] sm:$0xff] }
 0x258   : > { %15474 = vst [vmem:[#allocation25_spill] sm:$0xff] %v13094_v13  ;;  %v13099_v41 = vadd.f32 %v2582_v63, %v1738_v21  ;;  %v1759_v29 = vadd.f32 %v10365_v50, %v15477_v56  ;;  %10631 = vmatprep.mubr.bf16.mxu1 %v3084_v34  ;;  %10783 = vmatprep.mubr.bf16.mxu0 %v4065_v8  ;;  %v15481_v8 = vld [vmem:[#allocation30_spill] sm:$0xff] }
 0x259   : > { %v1750_v25 = vpop.f32.mrf.mxu1  ;;  %v2595_v38 = vpop.f32.mrf.mxu0  ;;  %v3085_v21 = vpack.c.bf16 %v2977_v57, %v2976_v14  ;;  %v4066_v50 = vpack.c.bf16 %v3958_v2, %v3957_v26  ;;  %v4067_v13 = vpack.c.bf16 %v3960_v6, %v3959_v16  ;;  %v2980_v57 = vld [vmem:[%s11859_s10 + $0x1f2] sm:$0xff]  ;;  %v2981_v26 = vld [vmem:[%s11859_s10 + $0x1fa] sm:$0xff]  ;;  %v2982_v6 = vld [vmem:[%s11859_s10 + $0x202] sm:$0xff] }
 0x25a   : > { %15476 = vst [vmem:[#allocation26_spill] sm:$0xff] %v13099_v41  ;;  %v13108_v19 = vadd.f32 %v10517_v43, %v1759_v29  ;;  %v1751_v48 = vadd.f32 %v1750_v25, %v15479_v47  ;;  %v3086_v41 = vpack.c.bf16 %v2979_v15, %v2978_v30  ;;  %v15483_v25 = vld [vmem:[#allocation31_spill] sm:$0xff]  ;;  %v15485_v30 = vld [vmem:[#allocation32_spill] sm:$0xff] }
 0x25b   : > { %v10366_v10 = vpop.f32.mrf.mxu1  ;;  %v10518_v63 = vpop.f32.mrf.mxu0  ;;  %v3961_v15 = vld [vmem:[%s11859_s10 + $0x1f3] sm:$0xff]  ;;  %v3962_v16 = vld [vmem:[%s11859_s10 + $0x1fb] sm:$0xff] }
 0x25c   : > { %15478 = vst [vmem:[#allocation27_spill] sm:$0xff] %v13108_v19  ;;  %v13111_v34 = vadd.f32 %v2595_v38, %v1751_v48  ;;  %v1762_v56 = vadd.f32 %v10366_v10, %v15481_v8  ;;  %v2983_v10 = vld [vmem:[%s11859_s10 + $0x20a] sm:$0xff] }
 0x25d   : > { %v1753_v42 = vpop.f32.mrf.mxu1  ;;  %v2598_v43 = vpop.f32.mrf.mxu0  ;;  %v3964_v8 = vld [vmem:[%s11859_s10 + $0x20b] sm:$0xff] }
 0x25e   : > { %15480 = vst [vmem:[#allocation28_spill] sm:$0xff] %v13111_v34  ;;  %v13114_v29 = vadd.f32 %v10518_v63, %v1762_v56  ;;  %v1754_v47 = vadd.f32 %v1753_v42, %v15483_v25  ;;  %v3963_v63 = vld [vmem:[%s11859_s10 + $0x203] sm:$0xff] }
 0x25f   : > { %v10369_v19 = vpop.f32.mrf.mxu1  ;;  %v10521_v14 = vpop.f32.mrf.mxu0  ;;  %10632 = vmatmul.mubr.bf16.gmra.mxu1 %v3085_v21  ;;  %10784 = vmatmul.mubr.bf16.gmra.mxu0 %v4066_v50  ;;  %v15487_v21 = vld [vmem:[#allocation33_spill] sm:$0xff] }
 0x260   : > { %15482 = vst [vmem:[#allocation29_spill] sm:$0xff] %v13114_v29  ;;  %v13119_v2 = vadd.f32 %v2598_v43, %v1754_v47  ;;  %v1775_v38 = vadd.f32 %v10369_v19, %v15485_v30  ;;  %10635 = vmatprep.mubr.bf16.mxu1 %v3086_v41  ;;  %10787 = vmatprep.mubr.bf16.mxu0 %v4067_v13  ;;  %v15489_v19 = vld [vmem:[#allocation34_spill] sm:$0xff] }
 0x261   : > { %v1766_v48 = vpop.f32.mrf.mxu1  ;;  %v2611_v42 = vpop.f32.mrf.mxu0  ;;  %v3087_v47 = vpack.c.bf16 %v2981_v26, %v2980_v57  ;;  %v4068_v41 = vpack.c.bf16 %v3962_v16, %v3961_v15  ;;  %v4069_v29 = vpack.c.bf16 %v3964_v8, %v3963_v63  ;;  %v2984_v57 = vld [vmem:[%s11859_s10 + $0x212] sm:$0xff]  ;;  %v2985_v26 = vld [vmem:[%s11859_s10 + $0x21a] sm:$0xff]  ;;  %v2986_v63 = vld [vmem:[%s11859_s10 + $0x222] sm:$0xff] }
 0x262   : > { %15484 = vst [vmem:[#allocation30_spill] sm:$0xff] %v13119_v2  ;;  %v13128_v56 = vadd.f32 %v10521_v14, %v1775_v38  ;;  %v1767_v50 = vadd.f32 %v1766_v48, %v15487_v21  ;;  %v3088_v2 = vpack.c.bf16 %v2983_v10, %v2982_v6  ;;  %v15491_v48 = vld [vmem:[#allocation35_spill] sm:$0xff]  ;;  %v3965_v15 = vld [vmem:[%s11859_s10 + $0x213] sm:$0xff] }
 0x263   : > { %v10370_v25 = vpop.f32.mrf.mxu1  ;;  %v10522_v43 = vpop.f32.mrf.mxu0  ;;  %v15493_v6 = vld [vmem:[#allocation36_spill] sm:$0xff]  ;;  %v3966_v10 = vld [vmem:[%s11859_s10 + $0x21b] sm:$0xff] }
 0x264   : > { %15486 = vst [vmem:[#allocation31_spill] sm:$0xff] %v13128_v56  ;;  %v13131_v13 = vadd.f32 %v2611_v42, %v1767_v50  ;;  %v1778_v30 = vadd.f32 %v10370_v25, %v15489_v19  ;;  %v2987_v25 = vld [vmem:[%s11859_s10 + $0x22a] sm:$0xff]  ;;  %v15495_v19 = vld [vmem:[#allocation37_spill] sm:$0xff] }
 0x265   : > { %v1769_v34 = vpop.f32.mrf.mxu1  ;;  %v2614_v14 = vpop.f32.mrf.mxu0 }
 0x266   : > { %15488 = vst [vmem:[#allocation32_spill] sm:$0xff] %v13131_v13  ;;  %v13134_v38 = vadd.f32 %v10522_v43, %v1778_v30  ;;  %v1770_v21 = vadd.f32 %v1769_v34, %v15491_v48  ;;  %v11615_v34 = vld [vmem:[%s15269_s1 + $0x140] sm:$0xff]   ;;  %v4070_v48 = vpack.c.bf16 %v3966_v10, %v3965_v15 }
 0x267   : > { %v10373_v56 = vpop.f32.mrf.mxu1  ;;  %v10525_v28 = vpop.f32.mrf.mxu0  ;;  %10636 = vmatmul.mubr.bf16.gmra.mxu1 %v3087_v47  ;;  %10788 = vmatmul.mubr.bf16.gmra.mxu0 %v4068_v41  ;;  %v3967_v43 = vld [vmem:[%s11859_s10 + $0x223] sm:$0xff]  ;;  %v3968_v47 = vld [vmem:[%s11859_s10 + $0x22b] sm:$0xff] }
 0x268   : > { %15490 = vst [vmem:[#allocation33_spill] sm:$0xff] %v13134_v38  ;;  %v13140_v16 = vadd.f32 %v2614_v14, %v1770_v21  ;;  %v1791_v42 = vadd.f32 %v10373_v56, %v15493_v6  ;;  %10639 = vmatprep.mubr.bf16.mxu1 %v3088_v2  ;;  %10791 = vmatprep.mubr.bf16.mxu0 %v4069_v29  ;;  %v11616_v29 = vld [vmem:[%s15269_s1 + $0x180] sm:$0xff]  }
 0x269   : > { %v1782_v8 = vpop.f32.mrf.mxu1  ;;  %v2627_v50 = vpop.f32.mrf.mxu0  ;;  %10881 = vmatprep.subr.bf16.mxu1 %v11615_v34  ;;  %v3089_v14 = vpack.c.bf16 %v2985_v26, %v2984_v57  ;;  %v15497_v6 = vld [vmem:[#allocation38_spill] sm:$0xff]  ;;  %11033 = vmatprep.subr.bf16.mxu0 %v11616_v29  ;;  %v15499_v57 = vld [vmem:[#allocation39_spill] sm:$0xff] }
 0x26a   : > { %15492 = vst [vmem:[#allocation34_spill] sm:$0xff] %v13140_v16  ;;  %v13151_v41 = vadd.f32 %v10525_v28, %v1791_v42  ;;  %v1783_v30 = vadd.f32 %v1782_v8, %v15495_v19  ;;  %10882 = vmatpush3.bf16.msra.mxu1 %v11615_v34  ;;  %v3090_v28 = vpack.c.bf16 %v2987_v25, %v2986_v63  ;;  %v2988_v63 = vld [vmem:[%s11859_s10 + $0x232] sm:$0xff]  ;;  %v2989_v34 = vld [vmem:[%s11859_s10 + $0x23a] sm:$0xff] }
 0x26b   : > { %v10374_v2 = vpop.f32.mrf.mxu1  ;;  %v10526_v56 = vpop.f32.mrf.mxu0  ;;  %v4071_v42 = vpack.c.bf16 %v3968_v47, %v3967_v43  ;;  %11034 = vmatpush3.bf16.msra.mxu0 %v11616_v29  ;;  %v15501_v25 = vld [vmem:[#allocation40_spill] sm:$0xff] }
 0x26c   : > { %15494 = vst [vmem:[#allocation35_spill] sm:$0xff] %v13151_v41  ;;  %v13157_v21 = vadd.f32 %v2627_v50, %v1783_v30  ;;  %v1794_v16 = vadd.f32 %v10374_v2, %v15497_v6  ;;  %v3969_v47 = vld [vmem:[%s11859_s10 + $0x233] sm:$0xff]  ;;  %v2990_v30 = vld [vmem:[%s11859_s10 + $0x242] sm:$0xff] }
 0x26d   : > { %v1785_v8 = vpop.f32.mrf.mxu1  ;;  %v2630_v19 = vpop.f32.mrf.mxu0  ;;  %v3971_v6 = vld [vmem:[%s11859_s10 + $0x243] sm:$0xff] }
 0x26e   : > { %15496 = vst [vmem:[#allocation36_spill] sm:$0xff] %v13157_v21  ;;  %v13160_v41 = vadd.f32 %v10526_v56, %v1794_v16  ;;  %v1786_v26 = vadd.f32 %v1785_v8, %v15499_v57  ;;  %v3970_v16 = vld [vmem:[%s11859_s10 + $0x23b] sm:$0xff]  ;;  %v2991_v56 = vld [vmem:[%s11859_s10 + $0x24a] sm:$0xff] }
 0x26f   : > { %v10377_v15 = vpop.f32.mrf.mxu1  ;;  %v10529_v10 = vpop.f32.mrf.mxu0  ;;  %10640 = vmatmul.mubr.bf16.gmra.mxu1 %v3089_v14  ;;  %10792 = vmatmul.mubr.bf16.gmra.mxu0 %v4070_v48  ;;  %v3972_v8 = vld [vmem:[%s11859_s10 + $0x24b] sm:$0xff] }
 0x270   : > { %15498 = vst [vmem:[#allocation37_spill] sm:$0xff] %v13160_v41  ;;  %v13165_v50 = vadd.f32 %v2630_v19, %v1786_v26  ;;  %v1807_v43 = vadd.f32 %v10377_v15, %v15501_v25  ;;  %10643 = vmatprep.mubr.bf16.mxu1 %v3090_v28  ;;  %10795 = vmatprep.mubr.bf16.mxu0 %v4071_v42  ;;  %v15503_v14 = vld [vmem:[#allocation41_spill] sm:$0xff]  ;;  %v15505_v42 = vld [vmem:[#allocation42_spill] sm:$0xff] }
 0x271   : > { %v1798_v29 = vpop.f32.mrf.mxu1  ;;  %v2643_v2 = vpop.f32.mrf.mxu0  ;;  %v3091_v26 = vpack.c.bf16 %v2989_v34, %v2988_v63  ;;  %v4072_v15 = vpack.c.bf16 %v3970_v16, %v3969_v47  ;;  %v4073_v21 = vpack.c.bf16 %v3972_v8, %v3971_v6  ;;  %v2992_v34 = vld [vmem:[%s11859_s10 + $0x252] sm:$0xff]  ;;  %v2994_v6 = vld [vmem:[%s11859_s10 + $0x262] sm:$0xff] }
 0x272   : > { %15500 = vst [vmem:[#allocation38_spill] sm:$0xff] %v13165_v50  ;;  %v13174_v57 = vadd.f32 %v10529_v10, %v1807_v43  ;;  %v1799_v48 = vadd.f32 %v1798_v29, %v15503_v14  ;;  %v3092_v50 = vpack.c.bf16 %v2991_v56, %v2990_v30  ;;  %v15507_v29 = vld [vmem:[#allocation43_spill] sm:$0xff]  ;;  %v15509_v16 = vld [vmem:[#allocation44_spill] sm:$0xff] }
 0x273   : > { %v10378_v41 = vpop.f32.mrf.mxu1  ;;  %v10530_v19 = vpop.f32.mrf.mxu0  ;;  %v3974_v56 = vld [vmem:[%s11859_s10 + $0x25b] sm:$0xff] }
 0x274   : > { %15502 = vst [vmem:[#allocation39_spill] sm:$0xff] %v13174_v57  ;;  %v13177_v28 = vadd.f32 %v2643_v2, %v1799_v48  ;;  %v1810_v25 = vadd.f32 %v10378_v41, %v15505_v42  ;;  %v2993_v41 = vld [vmem:[%s11859_s10 + $0x25a] sm:$0xff]  ;;  %v2995_v48 = vld [vmem:[%s11859_s10 + $0x26a] sm:$0xff] }
 0x275   : > { %v1801_v38 = vpop.f32.mrf.mxu1  ;;  %v2646_v10 = vpop.f32.mrf.mxu0  ;;  %v3973_v2 = vld [vmem:[%s11859_s10 + $0x253] sm:$0xff]  ;;  %v3976_v42 = vld [vmem:[%s11859_s10 + $0x26b] sm:$0xff] }
 0x276   : > { %15504 = vst [vmem:[#allocation40_spill] sm:$0xff] %v13177_v28  ;;  %v13180_v43 = vadd.f32 %v10530_v19, %v1810_v25  ;;  %v1802_v14 = vadd.f32 %v1801_v38, %v15507_v29  ;;  %v3975_v19 = vld [vmem:[%s11859_s10 + $0x263] sm:$0xff] }
 0x277   : > { %v10381_v57 = vpop.f32.mrf.mxu1  ;;  %v10533_v63 = vpop.f32.mrf.mxu0  ;;  %10644 = vmatmul.mubr.bf16.gmra.mxu1 %v3091_v26  ;;  %10796 = vmatmul.mubr.bf16.gmra.mxu0 %v4072_v15  ;;  %v15511_v26 = vld [vmem:[#allocation45_spill] sm:$0xff] }
 0x278   : > { %15506 = vst [vmem:[#allocation41_spill] sm:$0xff] %v13180_v43  ;;  %v13185_v47 = vadd.f32 %v2646_v10, %v1802_v14  ;;  %v1823_v30 = vadd.f32 %v10381_v57, %v15509_v16  ;;  %10647 = vmatprep.mubr.bf16.mxu1 %v3092_v50  ;;  %10799 = vmatprep.mubr.bf16.mxu0 %v4073_v21  ;;  %v15513_v21 = vld [vmem:[#allocation46_spill] sm:$0xff] }
 0x279   : > { %v1814_v8 = vpop.f32.mrf.mxu1  ;;  %v2659_v38 = vpop.f32.mrf.mxu0  ;;  %v3093_v14 = vpack.c.bf16 %v2993_v41, %v2992_v34  ;;  %v4074_v57 = vpack.c.bf16 %v3974_v56, %v3973_v2  ;;  %v4075_v43 = vpack.c.bf16 %v3976_v42, %v3975_v19  ;;  %v2996_v41 = vld [vmem:[%s11859_s10 + $0x272] sm:$0xff]  ;;  %v2997_v2 = vld [vmem:[%s11859_s10 + $0x27a] sm:$0xff]  ;;  %v2998_v42 = vld [vmem:[%s11859_s10 + $0x282] sm:$0xff] }
 0x27a   : > { %15508 = vst [vmem:[#allocation42_spill] sm:$0xff] %v13185_v47  ;;  %v13194_v25 = vadd.f32 %v10533_v63, %v1823_v30  ;;  %v1815_v15 = vadd.f32 %v1814_v8, %v15511_v26  ;;  %v3094_v47 = vpack.c.bf16 %v2995_v48, %v2994_v6  ;;  %v15515_v8 = vld [vmem:[#allocation47_spill] sm:$0xff]  ;;  %v15517_v6 = vld [vmem:[#allocation48_spill] sm:$0xff] }
 0x27b   : > { %v10382_v29 = vpop.f32.mrf.mxu1  ;;  %v10534_v10 = vpop.f32.mrf.mxu0  ;;  %v3977_v48 = vld [vmem:[%s11859_s10 + $0x273] sm:$0xff]  ;;  %v3978_v19 = vld [vmem:[%s11859_s10 + $0x27b] sm:$0xff] }
 0x27c   : > { %15510 = vst [vmem:[#allocation43_spill] sm:$0xff] %v13194_v25  ;;  %v13197_v50 = vadd.f32 %v2659_v38, %v1815_v15  ;;  %v1826_v16 = vadd.f32 %v10382_v29, %v15513_v21  ;;  %v2999_v29 = vld [vmem:[%s11859_s10 + $0x28a] sm:$0xff] }
 0x27d   : > { %v1817_v28 = vpop.f32.mrf.mxu1  ;;  %v2662_v63 = vpop.f32.mrf.mxu0  ;;  %v3980_v21 = vld [vmem:[%s11859_s10 + $0x28b] sm:$0xff] }
 0x27e   : > { %15512 = vst [vmem:[#allocation44_spill] sm:$0xff] %v13197_v50  ;;  %v13200_v30 = vadd.f32 %v10534_v10, %v1826_v16  ;;  %v1818_v26 = vadd.f32 %v1817_v28, %v15515_v8  ;;  %v3979_v10 = vld [vmem:[%s11859_s10 + $0x283] sm:$0xff] }
 0x27f   : > { %v10385_v25 = vpop.f32.mrf.mxu1  ;;  %v10537_v34 = vpop.f32.mrf.mxu0  ;;  %10648 = vmatmul.mubr.bf16.gmra.mxu1 %v3093_v14  ;;  %10800 = vmatmul.mubr.bf16.gmra.mxu0 %v4074_v57  ;;  %v15519_v14 = vld [vmem:[#allocation50_spill] sm:$0xff] }
 0x280   : > { %15514 = vst [vmem:[#allocation45_spill] sm:$0xff] %v13200_v30  ;;  %v13205_v56 = vadd.f32 %v2662_v63, %v1818_v26  ;;  %v1839_v38 = vadd.f32 %v10385_v25, %v15517_v6  ;;  %10651 = vmatprep.mubr.bf16.mxu1 %v3094_v47  ;;  %10803 = vmatprep.mubr.bf16.mxu0 %v4075_v43  ;;  %v15521_v43 = vld [vmem:[#allocation52_spill] sm:$0xff] }
 0x281   : > { %v1830_v15 = vpop.f32.mrf.mxu1  ;;  %v2675_v28 = vpop.f32.mrf.mxu0  ;;  %v3095_v26 = vpack.c.bf16 %v2997_v2, %v2996_v41  ;;  %v4076_v25 = vpack.c.bf16 %v3978_v19, %v3977_v48  ;;  %v4077_v30 = vpack.c.bf16 %v3980_v21, %v3979_v10  ;;  %v3000_v2 = vld [vmem:[%s11859_s10 + $0x292] sm:$0xff]  ;;  %v3001_v48 = vld [vmem:[%s11859_s10 + $0x29a] sm:$0xff]  ;;  %v3002_v21 = vld [vmem:[%s11859_s10 + $0x2a2] sm:$0xff] }
 0x282   : > { %15516 = vst [vmem:[#allocation46_spill] sm:$0xff] %v13205_v56  ;;  %v13214_v16 = vadd.f32 %v10537_v34, %v1839_v38  ;;  %v1831_v57 = vadd.f32 %v1830_v15, %v15519_v14  ;;  %v3096_v56 = vpack.c.bf16 %v2999_v29, %v2998_v42  ;;  %v15523_v15 = vld [vmem:[#allocation54_spill] sm:$0xff]  ;;  %v15525_v42 = vld [vmem:[#allocation56_spill] sm:$0xff] }
 0x283   : > { %v10386_v8 = vpop.f32.mrf.mxu1  ;;  %v10538_v63 = vpop.f32.mrf.mxu0  ;;  %v3981_v29 = vld [vmem:[%s11859_s10 + $0x293] sm:$0xff]  ;;  %v3982_v10 = vld [vmem:[%s11859_s10 + $0x29b] sm:$0xff] }
 0x284   : > { %15518 = vst [vmem:[#allocation47_spill] sm:$0xff] %v13214_v16  ;;  %v13217_v47 = vadd.f32 %v2675_v28, %v1831_v57  ;;  %v1842_v6 = vadd.f32 %v10386_v8, %v15521_v43  ;;  %v3003_v8 = vld [vmem:[%s11859_s10 + $0x2aa] sm:$0xff] }
 0x285   : > { %v1833_v50 = vpop.f32.mrf.mxu1  ;;  %v2678_v34 = vpop.f32.mrf.mxu0  ;;  %v3984_v43 = vld [vmem:[%s11859_s10 + $0x2ab] sm:$0xff] }
 0x286   : > { %15520 = vst [vmem:[#allocation48_spill] sm:$0xff] %v13217_v47  ;;  %v13220_v38 = vadd.f32 %v10538_v63, %v1842_v6  ;;  %v1834_v14 = vadd.f32 %v1833_v50, %v15523_v15  ;;  %v3983_v63 = vld [vmem:[%s11859_s10 + $0x2a3] sm:$0xff]  ;;  %v4078_v15 = vpack.c.bf16 %v3982_v10, %v3981_v29 }
 0x287   : > { %v10389_v16 = vpop.f32.mrf.mxu1  ;;  %v10541_v41 = vpop.f32.mrf.mxu0  ;;  %10652 = vmatmul.mubr.bf16.gmra.mxu1 %v3095_v26  ;;  %10804 = vmatmul.mubr.bf16.gmra.mxu0 %v4076_v25  ;;  %v15527_v26 = vld [vmem:[#allocation58_spill] sm:$0xff]  ;;  %v15531_v29 = vld [vmem:[#allocation63_spill] sm:$0xff] }
 0x288   : > { %15522 = vst [vmem:[#allocation50_spill] sm:$0xff] %v13220_v38  ;;  %v13225_v19 = vadd.f32 %v2678_v34, %v1834_v14  ;;  %v1855_v28 = vadd.f32 %v10389_v16, %v15525_v42  ;;  %10655 = vmatprep.mubr.bf16.mxu1 %v3096_v56  ;;  %10807 = vmatprep.mubr.bf16.mxu0 %v4077_v30  ;;  %v13240_v34 = vld [vmem:[%s15269_s1 + $0x1f8] sm:$0xff]  }
 0x289   : > { %v1846_v57 = vpop.f32.mrf.mxu1  ;;  %v2691_v50 = vpop.f32.mrf.mxu0  ;;  %v3097_v30 = vpack.c.bf16 %v3001_v48, %v3000_v2  ;;  %v15529_v42 = vld [vmem:[#allocation60_spill] sm:$0xff]  ;;  %v3098_v38 = vpack.c.bf16 %v3003_v8, %v3002_v21  ;;  %11171 = vmatprep.subr.bf16.mxu1 %v13240_v34 }
 0x28a   : > { %15524 = vst [vmem:[#allocation52_spill] sm:$0xff] %v13225_v19  ;;  %v13234_v6 = vadd.f32 %v10541_v41, %v1855_v28  ;;  %v1847_v25 = vadd.f32 %v1846_v57, %v15527_v26  ;;  %v4079_v41 = vpack.c.bf16 %v3984_v43, %v3983_v63  ;;  %v13249_v28 = vld [vmem:[%s15269_s1 + $0x238] sm:$0xff]  }
 0x28b   : > { %v10390_v16 = vpop.f32.mrf.mxu1  ;;  %v10542_v56 = vpop.f32.mrf.mxu0  ;;  %11323 = vmatprep.subr.bf16.mxu0 %v13249_v28  ;;  %v3004_v8 = vld [vmem:[%s11859_s10 + $0x2b2] sm:$0xff]  ;;  %v3005_v63 = vld [vmem:[%s11859_s10 + $0x2ba] sm:$0xff] }
 0x28c   : > { %15526 = vst [vmem:[#allocation54_spill] sm:$0xff] %v13234_v6  ;;  %v13242_v14 = vadd.f32 %v2691_v50, %v1847_v25  ;;  %v1858_v19 = vadd.f32 %v10390_v16, %v15529_v42  ;;  %v15533_v26 = vld [vmem:[#allocation65_spill] sm:$0xff] }
 0x28d   : > { %v1849_v57 = vpop.f32.mrf.mxu1  ;;  %v2694_v2 = vpop.f32.mrf.mxu0  ;;  %v3986_v16 = vld [vmem:[%s11859_s10 + $0x2bb] sm:$0xff] }
 0x28e   : > { %15528 = vst [vmem:[#allocation56_spill] sm:$0xff] %v13242_v14  ;;  %v13251_v48 = vadd.f32 %v10542_v56, %v1858_v19  ;;  %v1850_v10 = vadd.f32 %v1849_v57, %v15531_v29  ;;  %v3985_v19 = vld [vmem:[%s11859_s10 + $0x2b3] sm:$0xff]  ;;  %v3006_v56 = vld [vmem:[%s11859_s10 + $0x2c2] sm:$0xff]  ;;  %v3007_v29 = vld [vmem:[%s11859_s10 + $0x2ca] sm:$0xff] }
 0x28f   : > { %v10393_v21 = vpop.f32.mrf.mxu1  ;;  %v10545_v50 = vpop.f32.mrf.mxu0  ;;  %10656 = vmatmul.mubr.bf16.gmra.mxu1 %v3097_v30  ;;  %10808 = vmatmul.mubr.bf16.gmra.mxu0 %v4078_v15  ;;  %v3988_v14 = vld [vmem:[%s11859_s10 + $0x2cb] sm:$0xff] }
 0x290   : > { %15530 = vst [vmem:[#allocation58_spill] sm:$0xff] %v13251_v48  ;;  %v13257_v43 = vadd.f32 %v2694_v2, %v1850_v10  ;;  %v1871_v25 = vadd.f32 %v10393_v21, %v15533_v26  ;;  %10659 = vmatprep.mubr.bf16.mxu1 %v3098_v38  ;;  %10811 = vmatprep.mubr.bf16.mxu0 %v4079_v41  ;;  %v3987_v48 = vld [vmem:[%s11859_s10 + $0x2c3] sm:$0xff]  ;;  %v15537_v41 = vld [vmem:[#allocation69_spill] sm:$0xff] }
 0x291   : > { %v1862_v42 = vpop.f32.mrf.mxu1  ;;  %v2707_v57 = vpop.f32.mrf.mxu0  ;;  %v15535_v30 = vld [vmem:[#allocation67_spill] sm:$0xff]  ;;  %v3099_v10 = vpack.c.bf16 %v3005_v63, %v3004_v8  ;;  %v4080_v21 = vpack.c.bf16 %v3986_v16, %v3985_v19  ;;  %v4081_v13 = vpack.c.bf16 %v3988_v14, %v3987_v48  ;;  %v3008_v63 = vld [vmem:[%s11859_s10 + $0x2d2] sm:$0xff] }
 0x292   : > { %15532 = vst [vmem:[#allocation60_spill] sm:$0xff] %v13257_v43  ;;  %v13266_v6 = vadd.f32 %v10545_v50, %v1871_v25  ;;  %v1863_v15 = vadd.f32 %v1862_v42, %v15535_v30  ;;  %v3100_v43 = vpack.c.bf16 %v3007_v29, %v3006_v56  ;;  %v15539_v42 = vld [vmem:[#allocation71_spill] sm:$0xff]  ;;  %v15541_v14 = vld [vmem:[#allocation73_spill] sm:$0xff] }
 0x293   : > { %v10394_v47 = vpop.f32.mrf.mxu1  ;;  %v10546_v2 = vpop.f32.mrf.mxu0  ;;  %v3989_v16 = vld [vmem:[%s11859_s10 + $0x2d3] sm:$0xff]  ;;  %v3990_v56 = vld [vmem:[%s11859_s10 + $0x2db] sm:$0xff] }
 0x294   : > { %15534 = vst [vmem:[#allocation63_spill] sm:$0xff] %v13266_v6  ;;  %v13269_v38 = vadd.f32 %v2707_v57, %v1863_v15  ;;  %v1874_v26 = vadd.f32 %v10394_v47, %v15537_v41  ;;  %v3009_v47 = vld [vmem:[%s11859_s10 + $0x2da] sm:$0xff]  ;;  %v3010_v57 = vld [vmem:[%s11859_s10 + $0x2e2] sm:$0xff]  ;;  %v3011_v15 = vld [vmem:[%s11859_s10 + $0x2ea] sm:$0xff] }
 0x295   : > { %v1865_v61 = vpop.f32.mrf.mxu1  ;;  %v2710_v50 = vpop.f32.mrf.mxu0  ;;  %v3992_v41 = vld [vmem:[%s11859_s10 + $0x2eb] sm:$0xff] }
 0x296   : > { %15536 = vst [vmem:[#allocation65_spill] sm:$0xff] %v13269_v38  ;;  %v13272_v25 = vadd.f32 %v10546_v2, %v1874_v26  ;;  %v1866_v30 = vadd.f32 %v1865_v61, %v15539_v42  ;;  %v3991_v2 = vld [vmem:[%s11859_s10 + $0x2e3] sm:$0xff] }
 0x297   : > { %v10397_v6 = vpop.f32.mrf.mxu1  ;;  %v10549_v8 = vpop.f32.mrf.mxu0  ;;  %10660 = vmatmul.mubr.bf16.gmra.mxu1 %v3099_v10  ;;  %10812 = vmatmul.mubr.bf16.gmra.mxu0 %v4080_v21  ;;  %v15543_v10 = vld [vmem:[#allocation75_spill] sm:$0xff] }
 0x298   : > { %15538 = vst [vmem:[#allocation67_spill] sm:$0xff] %v13272_v25  ;;  %v13277_v19 = vadd.f32 %v2710_v50, %v1866_v30  ;;  %v1887_v48 = vadd.f32 %v10397_v6, %v15541_v14  ;;  %10663 = vmatprep.mubr.bf16.mxu1 %v3100_v43  ;;  %10815 = vmatprep.mubr.bf16.mxu0 %v4081_v13  ;;  %v15545_v13 = vld [vmem:[#allocation77_spill] sm:$0xff] }
 0x299   : > { %v1878_v29 = vpop.f32.mrf.mxu1  ;;  %v2723_v61 = vpop.f32.mrf.mxu0  ;;  %v3101_v30 = vpack.c.bf16 %v3009_v47, %v3008_v63  ;;  %v4082_v6 = vpack.c.bf16 %v3990_v56, %v3989_v16  ;;  %v4083_v25 = vpack.c.bf16 %v3992_v41, %v3991_v2  ;;  %v3012_v47 = vld [vmem:[%s11859_s10 + $0x2f2] sm:$0xff]  ;;  %v3013_v16 = vld [vmem:[%s11859_s10 + $0x2fa] sm:$0xff]  ;;  %v3014_v41 = vld [vmem:[%s11859_s10 + $0x302] sm:$0xff] }
 0x29a   : > { %15540 = vst [vmem:[#allocation69_spill] sm:$0xff] %v13277_v19  ;;  %v13286_v26 = vadd.f32 %v10549_v8, %v1887_v48  ;;  %v1879_v21 = vadd.f32 %v1878_v29, %v15543_v10  ;;  %v3102_v19 = vpack.c.bf16 %v3011_v15, %v3010_v57  ;;  %v15547_v29 = vld [vmem:[#allocation79_spill] sm:$0xff]  ;;  %v15549_v57 = vld [vmem:[#allocation81_spill] sm:$0xff] }
 0x29b   : > { %v10398_v42 = vpop.f32.mrf.mxu1  ;;  %v10550_v50 = vpop.f32.mrf.mxu0  ;;  %v3993_v15 = vld [vmem:[%s11859_s10 + $0x2f3] sm:$0xff]  ;;  %v3994_v2 = vld [vmem:[%s11859_s10 + $0x2fb] sm:$0xff] }
 0x29c   : > { %15542 = vst [vmem:[#allocation71_spill] sm:$0xff] %v13286_v26  ;;  %v13289_v43 = vadd.f32 %v2723_v61, %v1879_v21  ;;  %v1890_v14 = vadd.f32 %v10398_v42, %v15545_v13  ;;  %v3015_v42 = vld [vmem:[%s11859_s10 + $0x30a] sm:$0xff] }
 0x29d   : > { %v1881_v38 = vpop.f32.mrf.mxu1  ;;  %v2726_v8 = vpop.f32.mrf.mxu0  ;;  %v3996_v13 = vld [vmem:[%s11859_s10 + $0x30b] sm:$0xff] }
 0x29e   : > { %15544 = vst [vmem:[#allocation73_spill] sm:$0xff] %v13289_v43  ;;  %v13292_v48 = vadd.f32 %v10550_v50, %v1890_v14  ;;  %v1882_v10 = vadd.f32 %v1881_v38, %v15547_v29  ;;  %v3995_v50 = vld [vmem:[%s11859_s10 + $0x303] sm:$0xff] }
 0x29f   : > { %v10401_v26 = vpop.f32.mrf.mxu1  ;;  %v10553_v63 = vpop.f32.mrf.mxu0  ;;  %10664 = vmatmul.mubr.bf16.gmra.mxu1 %v3101_v30  ;;  %10816 = vmatmul.mubr.bf16.gmra.mxu0 %v4082_v6  ;;  %v15551_v30 = vld [vmem:[#allocation83_spill] sm:$0xff] }
 0x2a0   : > { %15546 = vst [vmem:[#allocation75_spill] sm:$0xff] %v13292_v48  ;;  %v13297_v56 = vadd.f32 %v2726_v8, %v1882_v10  ;;  %v1903_v61 = vadd.f32 %v10401_v26, %v15549_v57  ;;  %10667 = vmatprep.mubr.bf16.mxu1 %v3102_v19  ;;  %10819 = vmatprep.mubr.bf16.mxu0 %v4083_v25  ;;  %v15553_v25 = vld [vmem:[#allocation85_spill] sm:$0xff] }
 0x2a1   : > { %v1894_v21 = vpop.f32.mrf.mxu1  ;;  %v2739_v38 = vpop.f32.mrf.mxu0  ;;  %v3103_v10 = vpack.c.bf16 %v3013_v16, %v3012_v47  ;;  %v4084_v26 = vpack.c.bf16 %v3994_v2, %v3993_v15  ;;  %v4085_v48 = vpack.c.bf16 %v3996_v13, %v3995_v50  ;;  %v3016_v16 = vld [vmem:[%s11859_s10 + $0x312] sm:$0xff]  ;;  %v3017_v15 = vld [vmem:[%s11859_s10 + $0x31a] sm:$0xff]  ;;  %v3018_v13 = vld [vmem:[%s11859_s10 + $0x322] sm:$0xff] }
 0x2a2   : > { %15548 = vst [vmem:[#allocation77_spill] sm:$0xff] %v13297_v56  ;;  %v13306_v14 = vadd.f32 %v10553_v63, %v1903_v61  ;;  %v1895_v6 = vadd.f32 %v1894_v21, %v15551_v30  ;;  %v3104_v56 = vpack.c.bf16 %v3015_v42, %v3014_v41  ;;  %v15555_v21 = vld [vmem:[#allocation87_spill] sm:$0xff]  ;;  %v15557_v41 = vld [vmem:[#allocation89_spill] sm:$0xff] }
 0x2a3   : > { %v10402_v29 = vpop.f32.mrf.mxu1  ;;  %v10554_v8 = vpop.f32.mrf.mxu0  ;;  %v3997_v42 = vld [vmem:[%s11859_s10 + $0x313] sm:$0xff]  ;;  %v3998_v50 = vld [vmem:[%s11859_s10 + $0x31b] sm:$0xff] }
 0x2a4   : > { %15550 = vst [vmem:[#allocation79_spill] sm:$0xff] %v13306_v14  ;;  %v13309_v19 = vadd.f32 %v2739_v38, %v1895_v6  ;;  %v1906_v57 = vadd.f32 %v10402_v29, %v15553_v25  ;;  %v3019_v29 = vld [vmem:[%s11859_s10 + $0x32a] sm:$0xff] }
 0x2a5   : > { %v1897_v43 = vpop.f32.mrf.mxu1  ;;  %v2742_v63 = vpop.f32.mrf.mxu0  ;;  %v4000_v25 = vld [vmem:[%s11859_s10 + $0x32b] sm:$0xff] }
 0x2a6   : > { %15552 = vst [vmem:[#allocation81_spill] sm:$0xff] %v13309_v19  ;;  %v13312_v61 = vadd.f32 %v10554_v8, %v1906_v57  ;;  %v1898_v30 = vadd.f32 %v1897_v43, %v15555_v21  ;;  %v3999_v8 = vld [vmem:[%s11859_s10 + $0x323] sm:$0xff] }
 0x2a7   : > { %v10405_v14 = vpop.f32.mrf.mxu1  ;;  %v10557_v47 = vpop.f32.mrf.mxu0  ;;  %10668 = vmatmul.mubr.bf16.gmra.mxu1 %v3103_v10  ;;  %10820 = vmatmul.mubr.bf16.gmra.mxu0 %v4084_v26  ;;  %v15559_v10 = vld [vmem:[#allocation91_spill] sm:$0xff] }
 0x2a8   : > { %15554 = vst [vmem:[#allocation83_spill] sm:$0xff] %v13312_v61  ;;  %v13317_v2 = vadd.f32 %v2742_v63, %v1898_v30  ;;  %v1919_v38 = vadd.f32 %v10405_v14, %v15557_v41  ;;  %10671 = vmatprep.mubr.bf16.mxu1 %v3104_v56  ;;  %10823 = vmatprep.mubr.bf16.mxu0 %v4085_v48  ;;  %v15561_v48 = vld [vmem:[#allocation93_spill] sm:$0xff] }
 0x2a9   : > { %v1910_v6 = vpop.f32.mrf.mxu1  ;;  %v2755_v43 = vpop.f32.mrf.mxu0  ;;  %v3105_v30 = vpack.c.bf16 %v3017_v15, %v3016_v16  ;;  %v4086_v14 = vpack.c.bf16 %v3998_v50, %v3997_v42  ;;  %v4087_v61 = vpack.c.bf16 %v4000_v25, %v3999_v8  ;;  %v3020_v15 = vld [vmem:[%s11859_s10 + $0x332] sm:$0xff]  ;;  %v3021_v42 = vld [vmem:[%s11859_s10 + $0x33a] sm:$0xff]  ;;  %v3022_v25 = vld [vmem:[%s11859_s10 + $0x342] sm:$0xff] }
 0x2aa   : > { %15556 = vst [vmem:[#allocation85_spill] sm:$0xff] %v13317_v2  ;;  %v13326_v57 = vadd.f32 %v10557_v47, %v1919_v38  ;;  %v1911_v26 = vadd.f32 %v1910_v6, %v15559_v10  ;;  %v3106_v2 = vpack.c.bf16 %v3019_v29, %v3018_v13  ;;  %v15563_v6 = vld [vmem:[#allocation95_spill] sm:$0xff]  ;;  %v15565_v13 = vld [vmem:[#allocation97_spill] sm:$0xff] }
 0x2ab   : > { %v10406_v21 = vpop.f32.mrf.mxu1  ;;  %v10558_v63 = vpop.f32.mrf.mxu0  ;;  %v4001_v29 = vld [vmem:[%s11859_s10 + $0x333] sm:$0xff]  ;;  %v4002_v8 = vld [vmem:[%s11859_s10 + $0x33b] sm:$0xff] }
 0x2ac   : > { %15558 = vst [vmem:[#allocation87_spill] sm:$0xff] %v13326_v57  ;;  %v13329_v56 = vadd.f32 %v2755_v43, %v1911_v26  ;;  %v1922_v41 = vadd.f32 %v10406_v21, %v15561_v48  ;;  %v3023_v21 = vld [vmem:[%s11859_s10 + $0x34a] sm:$0xff] }
 0x2ad   : > { %v1913_v19 = vpop.f32.mrf.mxu1  ;;  %v2758_v47 = vpop.f32.mrf.mxu0  ;;  %v4004_v48 = vld [vmem:[%s11859_s10 + $0x34b] sm:$0xff] }
 0x2ae   : > { %15560 = vst [vmem:[#allocation89_spill] sm:$0xff] %v13329_v56  ;;  %v13332_v38 = vadd.f32 %v10558_v63, %v1922_v41  ;;  %v1914_v10 = vadd.f32 %v1913_v19, %v15563_v6  ;;  %v4003_v63 = vld [vmem:[%s11859_s10 + $0x343] sm:$0xff] }
 0x2af   : > { %v10409_v57 = vpop.f32.mrf.mxu1  ;;  %v10561_v16 = vpop.f32.mrf.mxu0  ;;  %10672 = vmatmul.mubr.bf16.gmra.mxu1 %v3105_v30  ;;  %10824 = vmatmul.mubr.bf16.gmra.mxu0 %v4086_v14  ;;  %v15567_v30 = vld [vmem:[#allocation99_spill] sm:$0xff] }
 0x2b0   : > { %15562 = vst [vmem:[#allocation91_spill] sm:$0xff] %v13332_v38  ;;  %v13337_v50 = vadd.f32 %v2758_v47, %v1914_v10  ;;  %v1935_v43 = vadd.f32 %v10409_v57, %v15565_v13  ;;  %10675 = vmatprep.mubr.bf16.mxu1 %v3106_v2  ;;  %10827 = vmatprep.mubr.bf16.mxu0 %v4087_v61  ;;  %v15568_v61 = vld [vmem:[#allocation101_spill] sm:$0xff] }
 0x2b1   : > { %v1926_v26 = vpop.f32.mrf.mxu1  ;;  %v2771_v19 = vpop.f32.mrf.mxu0  ;;  %v3107_v10 = vpack.c.bf16 %v3021_v42, %v3020_v15  ;;  %v4088_v57 = vpack.c.bf16 %v4002_v8, %v4001_v29  ;;  %v4089_v38 = vpack.c.bf16 %v4004_v48, %v4003_v63  ;;  %v3024_v42 = vld [vmem:[%s11859_s10 + $0x352] sm:$0xff]  ;;  %v3025_v29 = vld [vmem:[%s11859_s10 + $0x35a] sm:$0xff]  ;;  %v3026_v63 = vld [vmem:[%s11859_s10 + $0x362] sm:$0xff] }
 0x2b2   : > { %15564 = vst [vmem:[#allocation93_spill] sm:$0xff] %v13337_v50  ;;  %v13346_v41 = vadd.f32 %v10561_v16, %v1935_v43  ;;  %v1927_v14 = vadd.f32 %v1926_v26, %v15567_v30  ;;  %v3108_v50 = vpack.c.bf16 %v3023_v21, %v3022_v25  ;;  %v15569_v26 = vld [vmem:[#allocation103_spill] sm:$0xff] }
 0x2b3   : > { %v10410_v6 = vpop.f32.mrf.mxu1  ;;  %v10562_v47 = vpop.f32.mrf.mxu0  ;;  %v4006_v21 = vld [vmem:[%s11859_s10 + $0x35b] sm:$0xff] }
 0x2b4   : > { %15566 = vst [vmem:[#allocation95_spill] sm:$0xff] %v13346_v41  ;;  %v13349_v2 = vadd.f32 %v2771_v19, %v1927_v14  ;;  %v1938_v13 = vadd.f32 %v10410_v6, %v15568_v61  ;;  %v4005_v19 = vld [vmem:[%s11859_s10 + $0x353] sm:$0xff]  ;;  %v3027_v14 = vld [vmem:[%s11859_s10 + $0x36a] sm:$0xff] }
 0x2b5   : > { %v1929_v56 = vpop.f32.mrf.mxu1  ;;  %v2774_v16 = vpop.f32.mrf.mxu0  ;;  %v4007_v6 = vld [vmem:[%s11859_s10 + $0x363] sm:$0xff] }
 0x2b6   : > { %v13352_v43 = vadd.f32 %v10562_v47, %v1938_v13  ;;  %v1930_v30 = vadd.f32 %v1929_v56, %v15569_v26  ;;  %v4008_v47 = vld [vmem:[%s11859_s10 + $0x36b] sm:$0xff] }
 0x2b7   : > { %v10581_v41 = vpop.f32.mrf.mxu1  ;;  %10676 = vmatmul.mubr.bf16.gmra.mxu1 %v3107_v10  ;;  %v10733_v15 = vpop.f32.mrf.mxu0  ;;  %10828 = vmatmul.mubr.bf16.gmra.mxu0 %v4088_v57  ;;  %v4091_v26 = vpack.c.bf16 %v4008_v47, %v4007_v6  ;;  %v3031_v47 = vld [vmem:[%s11859_s10 + $0x38a] sm:$0xff] }
 0x2b8   : > { %v13357_v8 = vadd.f32 %v2774_v16, %v1930_v30  ;;  %v3769_v25 = vadd.f32 %v10581_v41, %v12630_v40  ;;  %10679 = vmatprep.mubr.bf16.mxu1 %v3108_v50  ;;  %10831 = vmatprep.mubr.bf16.mxu0 %v4089_v38  ;;  %v3109_v16 = vpack.c.bf16 %v3025_v29, %v3024_v42  ;;  %v3028_v29 = vld [vmem:[%s11859_s10 + $0x372] sm:$0xff] }
 0x2b9   : > { %v3224_v48 = vpop.f32.mrf.mxu1  ;;  %v4205_v56 = vpop.f32.mrf.mxu0  ;;  %v4090_v40 = vpack.c.bf16 %v4006_v21, %v4005_v19  ;;  %v3110_v41 = vpack.c.bf16 %v3027_v14, %v3026_v63  ;;  %v4009_v63 = vld [vmem:[%s11859_s10 + $0x373] sm:$0xff]  ;;  %v3030_v14 = vld [vmem:[%s11859_s10 + $0x382] sm:$0xff] }
 0x2ba   : > { %v13366_v10 = vadd.f32 %v10733_v15, %v3769_v25  ;;  %v3767_v57 = vadd.f32 %v3224_v48, %v12633_v27 }
 0x2bb   : > { %v10582_v61 = vpop.f32.mrf.mxu1  ;;  %v10734_v13 = vpop.f32.mrf.mxu0 }
 0x2bc   : > { %v13369_v50 = vadd.f32 %v4205_v56, %v3767_v57  ;;  %v3770_v38 = vadd.f32 %v10582_v61, %v12636_v32  ;;  %v3029_v32 = vld [vmem:[%s11859_s10 + $0x37a] sm:$0xff]  ;;  %v4011_v57 = vld [vmem:[%s11859_s10 + $0x383] sm:$0xff]  ;;  %v4012_v61 = vld [vmem:[%s11859_s10 + $0x38b] sm:$0xff] }
 0x2bd   : > { %v3227_v30 = vpop.f32.mrf.mxu1  ;;  %v4208_v15 = vpop.f32.mrf.mxu0  ;;  %v4010_v56 = vld [vmem:[%s11859_s10 + $0x37b] sm:$0xff] }
 0x2be   : > { %v13372_v25 = vadd.f32 %v10734_v13, %v3770_v38  ;;  %v3768_v27 = vadd.f32 %v3227_v30, %v12641_v59  ;;  %v3111_v30 = vpack.c.bf16 %v3029_v32, %v3028_v29  ;;  %v3032_v32 = vld [vmem:[%s11859_s10 + $0x392] sm:$0xff] }
 0x2bf   : > { %v10585_v48 = vpop.f32.mrf.mxu1  ;;  %10680 = vmatmul.mubr.bf16.gmra.mxu1 %v3109_v16  ;;  %v10737_v42 = vpop.f32.mrf.mxu0  ;;  %10832 = vmatmul.mubr.bf16.gmra.mxu0 %v4090_v40 }
 0x2c0   : > { %v13377_v19 = vadd.f32 %v4208_v15, %v3768_v27  ;;  %v3773_v21 = vadd.f32 %v10585_v48, %v12650_v17  ;;  %10683 = vmatprep.mubr.bf16.mxu1 %v3110_v41  ;;  %10835 = vmatprep.mubr.bf16.mxu0 %v4091_v26  ;;  %v4092_v17 = vpack.c.bf16 %v4010_v56, %v4009_v63 }
 0x2c1   : > { %v3240_v6 = vpop.f32.mrf.mxu1  ;;  %v4221_v59 = vpop.f32.mrf.mxu0  ;;  %v3112_v15 = vpack.c.bf16 %v3031_v47, %v3030_v14  ;;  %v4093_v27 = vpack.c.bf16 %v4012_v61, %v4011_v57  ;;  %v4013_v14 = vld [vmem:[%s11859_s10 + $0x393] sm:$0xff]  ;;  %v3034_v47 = vld [vmem:[%s11859_s10 + $0x3a2] sm:$0xff]  ;;  %v3035_v61 = vld [vmem:[%s11859_s10 + $0x3aa] sm:$0xff] }
 0x2c2   : > { %v13386_v13 = vadd.f32 %v10737_v42, %v3773_v21  ;;  %v3771_v16 = vadd.f32 %v3240_v6, %v12653_v7 }
 0x2c3   : > { %v10586_v40 = vpop.f32.mrf.mxu1  ;;  %v10738_v38 = vpop.f32.mrf.mxu0 }
 0x2c4   : > { %v13389_v41 = vadd.f32 %v4221_v59, %v3771_v16  ;;  %v3774_v26 = vadd.f32 %v10586_v40, %v12656_v4  ;;  %v3033_v4 = vld [vmem:[%s11859_s10 + $0x39a] sm:$0xff]  ;;  %v4015_v16 = vld [vmem:[%s11859_s10 + $0x3a3] sm:$0xff]  ;;  %v4016_v40 = vld [vmem:[%s11859_s10 + $0x3ab] sm:$0xff] }
 0x2c5   : > { %v3243_v48 = vpop.f32.mrf.mxu1  ;;  %v4224_v42 = vpop.f32.mrf.mxu0  ;;  %v4014_v59 = vld [vmem:[%s11859_s10 + $0x39b] sm:$0xff] }
 0x2c6   : > { %v13392_v21 = vadd.f32 %v10738_v38, %v3774_v26  ;;  %v3772_v7 = vadd.f32 %v3243_v48, %v12661_v11  ;;  %v3113_v48 = vpack.c.bf16 %v3033_v4, %v3032_v32  ;;  %v3036_v4 = vld [vmem:[%s11859_s10 + $0x3b2] sm:$0xff] }
 0x2c7   : > { %v10589_v6 = vpop.f32.mrf.mxu1  ;;  %10684 = vmatmul.mubr.bf16.gmra.mxu1 %v3111_v30  ;;  %v10741_v29 = vpop.f32.mrf.mxu0  ;;  %10836 = vmatmul.mubr.bf16.gmra.mxu0 %v4092_v17 }
 0x2c8   : > { %v13397_v63 = vadd.f32 %v4224_v42, %v3772_v7  ;;  %v3777_v56 = vadd.f32 %v10589_v6, %v12670_v24  ;;  %10687 = vmatprep.mubr.bf16.mxu1 %v3112_v15  ;;  %10839 = vmatprep.mubr.bf16.mxu0 %v4093_v27  ;;  %v4094_v24 = vpack.c.bf16 %v4014_v59, %v4013_v14 }
 0x2c9   : > { %v3256_v57 = vpop.f32.mrf.mxu1  ;;  %v4237_v11 = vpop.f32.mrf.mxu0  ;;  %v3114_v42 = vpack.c.bf16 %v3035_v61, %v3034_v47  ;;  %v4095_v7 = vpack.c.bf16 %v4016_v40, %v4015_v16  ;;  %v4017_v47 = vld [vmem:[%s11859_s10 + $0x3b3] sm:$0xff]  ;;  %v3038_v61 = vld [vmem:[%s11859_s10 + $0x3c2] sm:$0xff]  ;;  %v3039_v40 = vld [vmem:[%s11859_s10 + $0x3ca] sm:$0xff] }
 0x2ca   : > { %v13406_v38 = vadd.f32 %v10741_v29, %v3777_v56  ;;  %v3775_v30 = vadd.f32 %v3256_v57, %v12673_v22 }
 0x2cb   : > { %v10590_v17 = vpop.f32.mrf.mxu1  ;;  %v10742_v26 = vpop.f32.mrf.mxu0 }
 0x2cc   : > { %v13409_v15 = vadd.f32 %v4237_v11, %v3775_v30  ;;  %v3778_v27 = vadd.f32 %v10590_v17, %v12676_v49  ;;  %v3037_v49 = vld [vmem:[%s11859_s10 + $0x3ba] sm:$0xff]  ;;  %v4019_v30 = vld [vmem:[%s11859_s10 + $0x3c3] sm:$0xff]  ;;  %v4020_v17 = vld [vmem:[%s11859_s10 + $0x3cb] sm:$0xff] }
 0x2cd   : > { %v3259_v6 = vpop.f32.mrf.mxu1  ;;  %v4240_v29 = vpop.f32.mrf.mxu0  ;;  %v4018_v11 = vld [vmem:[%s11859_s10 + $0x3bb] sm:$0xff] }
 0x2ce   : > { %v13412_v56 = vadd.f32 %v10742_v26, %v3778_v27  ;;  %v3776_v22 = vadd.f32 %v3259_v6, %v12681_v23  ;;  %v3115_v6 = vpack.c.bf16 %v3037_v49, %v3036_v4  ;;  %v3040_v49 = vld [vmem:[%s11859_s10 + $0x3d2] sm:$0xff] }
 0x2cf   : > { %v10593_v57 = vpop.f32.mrf.mxu1  ;;  %10688 = vmatmul.mubr.bf16.gmra.mxu1 %v3113_v48  ;;  %v10745_v32 = vpop.f32.mrf.mxu0  ;;  %10840 = vmatmul.mubr.bf16.gmra.mxu0 %v4094_v24 }
 0x2d0   : > { %v13417_v14 = vadd.f32 %v4240_v29, %v3776_v22  ;;  %v3781_v59 = vadd.f32 %v10593_v57, %v12690_v62  ;;  %10691 = vmatprep.mubr.bf16.mxu1 %v3114_v42  ;;  %10843 = vmatprep.mubr.bf16.mxu0 %v4095_v7  ;;  %v4096_v62 = vpack.c.bf16 %v4018_v11, %v4017_v47 }
 0x2d1   : > { %v3272_v16 = vpop.f32.mrf.mxu1  ;;  %v4253_v23 = vpop.f32.mrf.mxu0  ;;  %v3116_v29 = vpack.c.bf16 %v3039_v40, %v3038_v61  ;;  %v4097_v22 = vpack.c.bf16 %v4020_v17, %v4019_v30  ;;  %v4021_v61 = vld [vmem:[%s11859_s10 + $0x3d3] sm:$0xff]  ;;  %v3042_v40 = vld [vmem:[%s11859_s10 + $0x3e2] sm:$0xff]  ;;  %v3043_v17 = vld [vmem:[%s11859_s10 + $0x3ea] sm:$0xff] }
 0x2d2   : > { %v13426_v26 = vadd.f32 %v10745_v32, %v3781_v59  ;;  %v3779_v48 = vadd.f32 %v3272_v16, %v12693_v1 }
 0x2d3   : > { %v10594_v24 = vpop.f32.mrf.mxu1  ;;  %v10746_v27 = vpop.f32.mrf.mxu0 }
 0x2d4   : > { %v13429_v42 = vadd.f32 %v4253_v23, %v3779_v48  ;;  %v3782_v7 = vadd.f32 %v10594_v24, %v12696_v37  ;;  %v3041_v37 = vld [vmem:[%s11859_s10 + $0x3da] sm:$0xff]  ;;  %v4023_v48 = vld [vmem:[%s11859_s10 + $0x3e3] sm:$0xff]  ;;  %v4024_v24 = vld [vmem:[%s11859_s10 + $0x3eb] sm:$0xff] }
 0x2d5   : > { %v3275_v57 = vpop.f32.mrf.mxu1  ;;  %v4256_v32 = vpop.f32.mrf.mxu0  ;;  %v4022_v23 = vld [vmem:[%s11859_s10 + $0x3db] sm:$0xff] }
 0x2d6   : > { %v13432_v59 = vadd.f32 %v10746_v27, %v3782_v7  ;;  %v3780_v1 = vadd.f32 %v3275_v57, %v12701_v44  ;;  %v3117_v57 = vpack.c.bf16 %v3041_v37, %v3040_v49  ;;  %v3044_v37 = vld [vmem:[%s11859_s10 + $0x3f2] sm:$0xff] }
 0x2d7   : > { %v10597_v16 = vpop.f32.mrf.mxu1  ;;  %10692 = vmatmul.mubr.bf16.gmra.mxu1 %v3115_v6  ;;  %v10749_v4 = vpop.f32.mrf.mxu0  ;;  %10844 = vmatmul.mubr.bf16.gmra.mxu0 %v4096_v62 }
 0x2d8   : > { %v13437_v47 = vadd.f32 %v4256_v32, %v3780_v1  ;;  %v3785_v11 = vadd.f32 %v10597_v16, %v12710_v31  ;;  %10695 = vmatprep.mubr.bf16.mxu1 %v3116_v29  ;;  %10847 = vmatprep.mubr.bf16.mxu0 %v4097_v22  ;;  %v4098_v31 = vpack.c.bf16 %v4022_v23, %v4021_v61 }
 0x2d9   : > { %v3288_v30 = vpop.f32.mrf.mxu1  ;;  %v4269_v44 = vpop.f32.mrf.mxu0  ;;  %v3118_v32 = vpack.c.bf16 %v3043_v17, %v3042_v40  ;;  %v4099_v1 = vpack.c.bf16 %v4024_v24, %v4023_v48  ;;  %v4025_v40 = vld [vmem:[%s11859_s10 + $0x3f3] sm:$0xff]  ;;  %v3046_v17 = vld [vmem:[%s11859_s10 + $0x402] sm:$0xff]  ;;  %v3047_v24 = vld [vmem:[%s11859_s10 + $0x40a] sm:$0xff] }
 0x2da   : > { %v13446_v27 = vadd.f32 %v10749_v4, %v3785_v11  ;;  %v3783_v6 = vadd.f32 %v3288_v30, %v12713_v54 }
 0x2db   : > { %v10598_v62 = vpop.f32.mrf.mxu1  ;;  %v10750_v7 = vpop.f32.mrf.mxu0 }
 0x2dc   : > { %v13449_v29 = vadd.f32 %v4269_v44, %v3783_v6  ;;  %v3786_v22 = vadd.f32 %v10598_v62, %v12716_v0  ;;  %v3045_v0 = vld [vmem:[%s11859_s10 + $0x3fa] sm:$0xff]  ;;  %v4027_v6 = vld [vmem:[%s11859_s10 + $0x403] sm:$0xff]  ;;  %v4028_v62 = vld [vmem:[%s11859_s10 + $0x40b] sm:$0xff] }
 0x2dd   : > { %v3291_v16 = vpop.f32.mrf.mxu1  ;;  %v4272_v4 = vpop.f32.mrf.mxu0  ;;  %v4026_v44 = vld [vmem:[%s11859_s10 + $0x3fb] sm:$0xff] }
 0x2de   : > { %v13452_v11 = vadd.f32 %v10750_v7, %v3786_v22  ;;  %v3784_v54 = vadd.f32 %v3291_v16, %v12721_v51  ;;  %v3119_v16 = vpack.c.bf16 %v3045_v0, %v3044_v37  ;;  %v3048_v0 = vld [vmem:[%s11859_s10 + $0x412] sm:$0xff] }
 0x2df   : > { %v10601_v30 = vpop.f32.mrf.mxu1  ;;  %10696 = vmatmul.mubr.bf16.gmra.mxu1 %v3117_v57  ;;  %v10753_v49 = vpop.f32.mrf.mxu0  ;;  %10848 = vmatmul.mubr.bf16.gmra.mxu0 %v4098_v31 }
 0x2e0   : > { %v13457_v61 = vadd.f32 %v4272_v4, %v3784_v54  ;;  %v3789_v23 = vadd.f32 %v10601_v30, %v12730_v53  ;;  %10699 = vmatprep.mubr.bf16.mxu1 %v3118_v32  ;;  %10851 = vmatprep.mubr.bf16.mxu0 %v4099_v1  ;;  %v4100_v53 = vpack.c.bf16 %v4026_v44, %v4025_v40 }
 0x2e1   : > { %v3304_v48 = vpop.f32.mrf.mxu1  ;;  %v4285_v51 = vpop.f32.mrf.mxu0  ;;  %v3120_v4 = vpack.c.bf16 %v3047_v24, %v3046_v17  ;;  %v4101_v54 = vpack.c.bf16 %v4028_v62, %v4027_v6  ;;  %v4029_v17 = vld [vmem:[%s11859_s10 + $0x413] sm:$0xff]  ;;  %v3050_v24 = vld [vmem:[%s11859_s10 + $0x422] sm:$0xff]  ;;  %v3051_v62 = vld [vmem:[%s11859_s10 + $0x42a] sm:$0xff] }
 0x2e2   : > { %v13466_v7 = vadd.f32 %v10753_v49, %v3789_v23  ;;  %v3787_v57 = vadd.f32 %v3304_v48, %v12733_v36 }
 0x2e3   : > { %v10602_v31 = vpop.f32.mrf.mxu1  ;;  %v10754_v22 = vpop.f32.mrf.mxu0 }
 0x2e4   : > { %v13469_v32 = vadd.f32 %v4285_v51, %v3787_v57  ;;  %v3790_v1 = vadd.f32 %v10602_v31, %v12736_v18  ;;  %v3049_v18 = vld [vmem:[%s11859_s10 + $0x41a] sm:$0xff]  ;;  %v4031_v57 = vld [vmem:[%s11859_s10 + $0x423] sm:$0xff]  ;;  %v4032_v31 = vld [vmem:[%s11859_s10 + $0x42b] sm:$0xff] }
 0x2e5   : > { %v3307_v30 = vpop.f32.mrf.mxu1  ;;  %v4288_v49 = vpop.f32.mrf.mxu0  ;;  %v4030_v51 = vld [vmem:[%s11859_s10 + $0x41b] sm:$0xff] }
 0x2e6   : > { %v13472_v23 = vadd.f32 %v10754_v22, %v3790_v1  ;;  %v3788_v36 = vadd.f32 %v3307_v30, %v12741_v45  ;;  %v3121_v30 = vpack.c.bf16 %v3049_v18, %v3048_v0  ;;  %v3052_v18 = vld [vmem:[%s11859_s10 + $0x432] sm:$0xff] }
 0x2e7   : > { %v10605_v48 = vpop.f32.mrf.mxu1  ;;  %10700 = vmatmul.mubr.bf16.gmra.mxu1 %v3119_v16  ;;  %v10757_v37 = vpop.f32.mrf.mxu0  ;;  %10852 = vmatmul.mubr.bf16.gmra.mxu0 %v4100_v53 }
 0x2e8   : > { %v13477_v40 = vadd.f32 %v4288_v49, %v3788_v36  ;;  %v3793_v44 = vadd.f32 %v10605_v48, %v12750_v39  ;;  %10703 = vmatprep.mubr.bf16.mxu1 %v3120_v4  ;;  %10855 = vmatprep.mubr.bf16.mxu0 %v4101_v54  ;;  %v4102_v39 = vpack.c.bf16 %v4030_v51, %v4029_v17 }
 0x2e9   : > { %v3320_v6 = vpop.f32.mrf.mxu1  ;;  %v4301_v45 = vpop.f32.mrf.mxu0  ;;  %v3122_v49 = vpack.c.bf16 %v3051_v62, %v3050_v24  ;;  %v4103_v36 = vpack.c.bf16 %v4032_v31, %v4031_v57  ;;  %v4033_v24 = vld [vmem:[%s11859_s10 + $0x433] sm:$0xff]  ;;  %v3054_v62 = vld [vmem:[%s11859_s10 + $0x442] sm:$0xff]  ;;  %v3055_v31 = vld [vmem:[%s11859_s10 + $0x44a] sm:$0xff] }
 0x2ea   : > { %v13486_v22 = vadd.f32 %v10757_v37, %v3793_v44  ;;  %v3791_v16 = vadd.f32 %v3320_v6, %v12753_v58 }
 0x2eb   : > { %v10606_v53 = vpop.f32.mrf.mxu1  ;;  %v10758_v1 = vpop.f32.mrf.mxu0 }
 0x2ec   : > { %v13489_v4 = vadd.f32 %v4301_v45, %v3791_v16  ;;  %v3794_v54 = vadd.f32 %v10606_v53, %v12756_v52  ;;  %v3053_v52 = vld [vmem:[%s11859_s10 + $0x43a] sm:$0xff]  ;;  %v4035_v16 = vld [vmem:[%s11859_s10 + $0x443] sm:$0xff]  ;;  %v4036_v53 = vld [vmem:[%s11859_s10 + $0x44b] sm:$0xff] }
 0x2ed   : > { %v3323_v48 = vpop.f32.mrf.mxu1  ;;  %v4304_v37 = vpop.f32.mrf.mxu0  ;;  %v4034_v45 = vld [vmem:[%s11859_s10 + $0x43b] sm:$0xff] }
 0x2ee   : > { %v13492_v44 = vadd.f32 %v10758_v1, %v3794_v54  ;;  %v3792_v58 = vadd.f32 %v3323_v48, %v12761_v46  ;;  %v3123_v48 = vpack.c.bf16 %v3053_v52, %v3052_v18  ;;  %v3056_v52 = vld [vmem:[%s11859_s10 + $0x452] sm:$0xff] }
 0x2ef   : > { %v10609_v6 = vpop.f32.mrf.mxu1  ;;  %10704 = vmatmul.mubr.bf16.gmra.mxu1 %v3121_v30  ;;  %v10761_v0 = vpop.f32.mrf.mxu0  ;;  %10856 = vmatmul.mubr.bf16.gmra.mxu0 %v4102_v39 }
 0x2f0   : > { %v13497_v17 = vadd.f32 %v4304_v37, %v3792_v58  ;;  %v3797_v51 = vadd.f32 %v10609_v6, %v12770_v33  ;;  %10707 = vmatprep.mubr.bf16.mxu1 %v3122_v49  ;;  %10859 = vmatprep.mubr.bf16.mxu0 %v4103_v36  ;;  %v4104_v33 = vpack.c.bf16 %v4034_v45, %v4033_v24 }
 0x2f1   : > { %v3336_v57 = vpop.f32.mrf.mxu1  ;;  %v4317_v46 = vpop.f32.mrf.mxu0  ;;  %v3124_v37 = vpack.c.bf16 %v3055_v31, %v3054_v62  ;;  %v4105_v58 = vpack.c.bf16 %v4036_v53, %v4035_v16  ;;  %v4037_v62 = vld [vmem:[%s11859_s10 + $0x453] sm:$0xff]  ;;  %v4884_v31 = vld [vmem:[%s11859_s10 + $0x24] sm:$0xff] }
 0x2f2   : > { %v13506_v1 = vadd.f32 %v10761_v0, %v3797_v51  ;;  %v3795_v30 = vadd.f32 %v3336_v57, %v12773_v12  ;;  %v15571_v12 = vld [vmem:[#allocation104_spill] sm:$0xff] }
 0x2f3   : > { %v10610_v39 = vpop.f32.mrf.mxu1  ;;  %v10762_v54 = vpop.f32.mrf.mxu0 }
 0x2f4   : > { %15570 = vst [vmem:[#allocation97_spill] sm:$0xff] %v13506_v1  ;;  %v13509_v49 = vadd.f32 %v4317_v46, %v3795_v30  ;;  %v3798_v36 = vadd.f32 %v10610_v39, %v12776_v20  ;;  %v3057_v20 = vld [vmem:[%s11859_s10 + $0x45a] sm:$0xff]  ;;  %v4885_v30 = vld [vmem:[%s11859_s10 + $0x2c] sm:$0xff]  ;;  %v5865_v39 = vld [vmem:[%s11859_s10 + $0x44] sm:$0xff] }
 0x2f5   : > { %v3339_v6 = vpop.f32.mrf.mxu1  ;;  %v4320_v0 = vpop.f32.mrf.mxu0  ;;  %v4038_v46 = vld [vmem:[%s11859_s10 + $0x45b] sm:$0xff] }
 0x2f6   : > { %v13512_v51 = vadd.f32 %v10762_v54, %v3798_v36  ;;  %v3796_v57 = vadd.f32 %v3339_v6, %v15571_v12  ;;  %v5866_v54 = vld [vmem:[%s11859_s10 + $0x4c] sm:$0xff]  ;;  %v4106_v12 = vpack.c.bf16 %v4038_v46, %v4037_v62  ;;  %v4887_v46 = vld [vmem:[%s11859_s10 + $0x3c] sm:$0xff] }
 0x2f7   : > { %v10613_v1 = vpop.f32.mrf.mxu1  ;;  %10708 = vmatmul.mubr.bf16.gmra.mxu1 %v3123_v48  ;;  %v10765_v18 = vpop.f32.mrf.mxu0  ;;  %10860 = vmatmul.mubr.bf16.gmra.mxu0 %v4104_v33 }
 0x2f8   : > { %v13517_v24 = vadd.f32 %v4320_v0, %v3796_v57  ;;  %v3801_v45 = vadd.f32 %v10613_v1, %v12790_v5  ;;  %10711 = vmatprep.mubr.bf16.mxu1 %v3124_v37  ;;  %10863 = vmatprep.mubr.bf16.mxu0 %v4105_v58  ;;  %v3125_v0 = vpack.c.bf16 %v3057_v20, %v3056_v52  ;;  %v4886_v20 = vld [vmem:[%s11859_s10 + $0x34] sm:$0xff] }
 0x2f9   : > { %v3352_v16 = vpop.f32.mrf.mxu1  ;;  %v4333_v53 = vpop.f32.mrf.mxu0  ;;  %v5020_v37 = vpack.c.bf16 %v4885_v30, %v4884_v31  ;;  %v6001_v58 = vpack.c.bf16 %v5866_v54, %v5865_v39  ;;  %v5867_v31 = vld [vmem:[%s11859_s10 + $0x54] sm:$0xff] }
 0x2fa   : > { %15572 = vst [vmem:[#allocation99_spill] sm:$0xff] %v13517_v24  ;;  %v13526_v48 = vadd.f32 %v10765_v18, %v3801_v45  ;;  %v3799_v33 = vadd.f32 %v3352_v16, %v12793_v55  ;;  %v5868_v16 = vld [vmem:[%s11859_s10 + $0x5c] sm:$0xff] }
 0x2fb   : > { %v10614_v36 = vpop.f32.mrf.mxu1  ;;  %v10766_v6 = vpop.f32.mrf.mxu0 }
 0x2fc   : > { %v13529_v5 = vadd.f32 %v4333_v53, %v3799_v33  ;;  %v3802_v1 = vadd.f32 %v10614_v36, %v12796_v60  ;;  %v5869_v33 = vld [vmem:[%s11859_s10 + $0x64] sm:$0xff]  ;;  %v5870_v36 = vld [vmem:[%s11859_s10 + $0x6c] sm:$0xff] }
 0x2fd   : > { %v3355_v57 = vpop.f32.mrf.mxu1  ;;  %v4336_v24 = vpop.f32.mrf.mxu0 }
 0x2fe   : > { %v13532_v18 = vadd.f32 %v10766_v6, %v3802_v1  ;;  %v3800_v55 = vadd.f32 %v3355_v57, %v12800_v9  ;;  %v15573_v9 = vld [vmem:[#allocation105_spill] sm:$0xff] }
 0x2ff   : > { %v10617_v45 = vpop.f32.mrf.mxu1  ;;  %10712 = vmatmul.mubr.bf16.gmra.mxu1 %v3125_v0  ;;  %v10769_v52 = vpop.f32.mrf.mxu0  ;;  %10864 = vmatmul.mubr.bf16.gmra.mxu0 %v4106_v12  ;;  %v5021_v12 = vpack.c.bf16 %v4887_v46, %v4886_v20  ;;  %v11620_v20 = vld [vmem:[%s15269_s1 + $0x230] sm:$0xff]  }
 0x300   : > { %v13536_v62 = vadd.f32 %v4336_v24, %v3800_v55  ;;  %v3805_v60 = vadd.f32 %v10617_v45, %v12807_v3  ;;  %10883 = vmatprep.mubr.bf16.mxu1 %v5020_v37  ;;  %11035 = vmatprep.mubr.bf16.mxu0 %v6001_v58  ;;  %v6002_v24 = vpack.c.bf16 %v5868_v16, %v5867_v31  ;;  %v15575_v3 = vld [vmem:[#allocation106_spill] sm:$0xff] }
 0x301   : > { %v3368_v53 = vpop.f32.mrf.mxu1  ;;  %v4349_v30 = vpop.f32.mrf.mxu0  ;;  %v6003_v45 = vpack.c.bf16 %v5870_v36, %v5869_v33  ;;  %v5872_v33 = vld [vmem:[%s11859_s10 + $0x7c] sm:$0xff]  ;;  %v5873_v36 = vld [vmem:[%s11859_s10 + $0x84] sm:$0xff] }
 0x302   : > { %v13542_v39 = vadd.f32 %v10769_v52, %v3805_v60  ;;  %v3803_v54 = vadd.f32 %v3368_v53, %v15573_v9  ;;  %v15577_v60 = vld [vmem:[#allocation107_spill] sm:$0xff] }
 0x303   : > { %v10618_v6 = vpop.f32.mrf.mxu1  ;;  %v10770_v0 = vpop.f32.mrf.mxu0  ;;  %v11619_v9 = vld [vmem:[%s15269_s1 + $0x1f0] sm:$0xff]  }
 0x304   : > { %v13547_v1 = vadd.f32 %v4349_v30, %v3803_v54  ;;  %v3806_v37 = vadd.f32 %v10618_v6, %v15575_v3  ;;  %v5871_v54 = vld [vmem:[%s11859_s10 + $0x74] sm:$0xff]  ;;  %v5874_v3 = vld [vmem:[%s11859_s10 + $0x8c] sm:$0xff] }
 0x305   : > { %v3371_v57 = vpop.f32.mrf.mxu1  ;;  %v4352_v55 = vpop.f32.mrf.mxu0 }
 0x306   : > { %15574 = vst [vmem:[#allocation101_spill] sm:$0xff] %v13547_v1  ;;  %v13550_v52 = vadd.f32 %v10770_v0, %v3806_v37  ;;  %v3804_v53 = vadd.f32 %v3371_v57, %v15577_v60  ;;  %v6004_v60 = vpack.c.bf16 %v5872_v33, %v5871_v54  ;;  %v11623_v54 = vld [vmem:[%s15269_s1 + $0x1e0] sm:$0xff]  }
 0x307   : > { %v10621_v46 = vpop.f32.mrf.mxu1  ;;  %v10773_v31 = vpop.f32.mrf.mxu0  ;;  %10884 = vmatmul.mubr.bf16.vlgmr.msra.gmra.mxu1 %v5021_v12  ;;  %11036 = vmatmul.mubr.bf16.vlgmr.msra.gmra.mxu0 %v6002_v24  ;;  %v11621_v12 = vld [vmem:[%s15269_s1 + $0x1e8] sm:$0xff]  }
 0x308   : > { %15576 = vst [vmem:[#allocation103_spill] sm:$0xff] %v13550_v52  ;;  %v13559_v16 = vadd.f32 %v4352_v55, %v3804_v53  ;;  %v3809_v30 = vadd.f32 %v10621_v46, %v12844_v35  ;;  %11172 = vmatpush3.bf16.msra.mxu1 %v13240_v34  ;;  %11324 = vmatpush3.bf16.msra.mxu0 %v13249_v28  ;;  %v11622_v35 = vld [vmem:[%s15269_s1 + $0x228] sm:$0xff]   ;;  %v15579_v34 = vld [vmem:[#allocation61_spill] sm:$0xff] }
 0x309   : > { %v3384_v6 = vpop.f32.mrf.mxu1  ;;  %v4365_v0 = vpop.f32.mrf.mxu0  ;;  %10887 = vmatprep.mubr.bf16.mxu1 %v6001_v58  ;;  %11039 = vmatprep.mubr.bf16.mxu0 %v6003_v45  ;;  %v15581_v53 = vld [vmem:[#allocation49_spill] sm:$0xff] }
 0x30a   : > { %15578 = vst [vmem:[#allocation104_spill] sm:$0xff] %v13559_v16  ;;  %v13574_v37 = vadd.f32 %v10773_v31, %v3809_v30  ;;  %v3807_v28 = vadd.f32 %v3384_v6, %v15579_v34  ;;  %11173 = vmatprep.subr.bf16.mxu1 %v11619_v9  ;;  %11325 = vmatprep.subr.bf16.mxu0 %v11620_v20  ;;  %v15583_v30 = vld [vmem:[#allocation51_spill] sm:$0xff] }
 0x30b   : > { %v10622_v57 = vpop.f32.mrf.mxu1  ;;  %v10774_v55 = vpop.f32.mrf.mxu0  ;;  %v6005_v16 = vpack.c.bf16 %v5874_v3, %v5873_v36  ;;  %v5876_v34 = vld [vmem:[%s11859_s10 + $0x9c] sm:$0xff] }
 0x30c   : > { %v13577_v58 = vadd.f32 %v4365_v0, %v3807_v28  ;;  %v3810_v46 = vadd.f32 %v10622_v57, %v15581_v53  ;;  %11174 = vmatpush3.bf16.msra.mxu1 %v11619_v9  ;;  %11326 = vmatpush3.bf16.msra.mxu0 %v11620_v20  ;;  %v11624_v9 = vld [vmem:[%s15269_s1 + $0x220] sm:$0xff]   ;;  %v5878_v53 = vld [vmem:[%s11859_s10 + $0xac] sm:$0xff] }
 0x30d   : > { %v3387_v52 = vpop.f32.mrf.mxu1  ;;  %v4368_v1 = vpop.f32.mrf.mxu0  ;;  %11175 = vmatprep.subr.bf16.mxu1 %v11621_v12  ;;  %11327 = vmatprep.subr.bf16.mxu0 %v11622_v35  ;;  %v15585_v0 = vld [vmem:[#allocation53_spill] sm:$0xff] }
 0x30e   : > { %15580 = vst [vmem:[#allocation105_spill] sm:$0xff] %v13577_v58  ;;  %v13580_v31 = vadd.f32 %v10774_v55, %v3810_v46  ;;  %v3808_v6 = vadd.f32 %v3387_v52, %v15583_v30  ;;  %v5875_v52 = vld [vmem:[%s11859_s10 + $0x94] sm:$0xff]  ;;  %v5877_v55 = vld [vmem:[%s11859_s10 + $0xa4] sm:$0xff] }
 0x30f   : > { %v10625_v20 = vpop.f32.mrf.mxu1  ;;  %v10777_v33 = vpop.f32.mrf.mxu0  ;;  %10888 = vmatmul.mubr.bf16.gmra.mxu1 %v6002_v24  ;;  %11040 = vmatmul.mubr.bf16.gmra.mxu0 %v6004_v60  ;;  %v15586_v30 = vld [vmem:[#allocation55_spill] sm:$0xff]  ;;  %v11625_v24 = vld [vmem:[%s15269_s1 + $0x1d8] sm:$0xff]   ;;  %v6007_v58 = vpack.c.bf16 %v5878_v53, %v5877_v55  ;;  %v15592_v55 = vld [vmem:[#allocation62_spill] sm:$0xff] }
 0x310   : > { %15582 = vst [vmem:[#allocation106_spill] sm:$0xff] %v13580_v31  ;;  %v13589_v36 = vadd.f32 %v4368_v1, %v3808_v6  ;;  %v3813_v3 = vadd.f32 %v10625_v20, %v15585_v0  ;;  %10891 = vmatprep.mubr.bf16.mxu1 %v6003_v45  ;;  %11043 = vmatprep.mubr.bf16.mxu0 %v6005_v16  ;;  %v15588_v0 = vld [vmem:[#allocation57_spill] sm:$0xff] }
 0x311   : > { %v3400_v28 = vpop.f32.mrf.mxu1  ;;  %v4381_v57 = vpop.f32.mrf.mxu0  ;;  %11176 = vmatpush3.bf16.msra.mxu1 %v11621_v12  ;;  %11328 = vmatpush3.bf16.msra.mxu0 %v11622_v35  ;;  %v6006_v6 = vpack.c.bf16 %v5876_v34, %v5875_v52  ;;  %v11626_v12 = vld [vmem:[%s15269_s1 + $0x218] sm:$0xff]  }
 0x312   : > { %15584 = vst [vmem:[#allocation107_spill] sm:$0xff] %v13589_v36  ;;  %v13596_v46 = vadd.f32 %v10777_v33, %v3813_v3  ;;  %v3811_v31 = vadd.f32 %v3400_v28, %v15586_v30  ;;  %11177 = vmatprep.subr.bf16.mxu1 %v11623_v54  ;;  %11329 = vmatprep.subr.bf16.mxu0 %v11624_v9  ;;  %v15590_v28 = vld [vmem:[#allocation59_spill] sm:$0xff] }
 0x313   : > { %v10626_v1 = vpop.f32.mrf.mxu1  ;;  %v10778_v45 = vpop.f32.mrf.mxu0 }
 0x314   : > { %v13602_v20 = vadd.f32 %v4381_v57, %v3811_v31  ;;  %v3814_v36 = vadd.f32 %v10626_v1, %v15588_v0  ;;  %v5881_v1 = vld [vmem:[%s11859_s10 + $0xc4] sm:$0xff] }
 0x315   : > { %v3403_v35 = vpop.f32.mrf.mxu1  ;;  %v4384_v33 = vpop.f32.mrf.mxu0  ;;  %11178 = vmatpush3.bf16.msra.mxu1 %v11623_v54  ;;  %11330 = vmatpush3.bf16.msra.mxu0 %v11624_v9  ;;  %v5879_v54 = vld [vmem:[%s11859_s10 + $0xb4] sm:$0xff]  ;;  %v5880_v9 = vld [vmem:[%s11859_s10 + $0xbc] sm:$0xff] }
 0x316   : > { %15587 = vst [vmem:[#allocation61_spill] sm:$0xff] %v13602_v20  ;;  %v13608_v3 = vadd.f32 %v10778_v45, %v3814_v36  ;;  %v3812_v52 = vadd.f32 %v3403_v35, %v15590_v28  ;;  %11179 = vmatprep.subr.bf16.mxu1 %v11625_v24  ;;  %11331 = vmatprep.subr.bf16.mxu0 %v11626_v12  ;;  %v5882_v45 = vld [vmem:[%s11859_s10 + $0xcc] sm:$0xff] }
 0x317   : > { %v10629_v31 = vpop.f32.mrf.mxu1  ;;  %v10781_v34 = vpop.f32.mrf.mxu0  ;;  %10892 = vmatmul.mubr.bf16.gmra.mxu1 %v6004_v60  ;;  %11044 = vmatmul.mubr.bf16.gmra.mxu0 %v6006_v6  ;;  %v15594_v35 = vld [vmem:[#allocation64_spill] sm:$0xff] }
 0x318   : > { %15589 = vst [vmem:[#allocation49_spill] sm:$0xff] %v13608_v3  ;;  %v13611_v57 = vadd.f32 %v4384_v33, %v3812_v52  ;;  %v3817_v53 = vadd.f32 %v10629_v31, %v15592_v55  ;;  %10895 = vmatprep.mubr.bf16.mxu1 %v6005_v16  ;;  %11047 = vmatprep.mubr.bf16.mxu0 %v6007_v58  ;;  %v15596_v16 = vld [vmem:[#allocation66_spill] sm:$0xff] }
 0x319   : > { %v3416_v36 = vpop.f32.mrf.mxu1  ;;  %v4397_v30 = vpop.f32.mrf.mxu0  ;;  %11180 = vmatpush3.bf16.msra.mxu1 %v11625_v24  ;;  %11332 = vmatpush3.bf16.msra.mxu0 %v11626_v12  ;;  %v6008_v33 = vpack.c.bf16 %v5880_v9, %v5879_v54  ;;  %v6009_v55 = vpack.c.bf16 %v5882_v45, %v5881_v1  ;;  %v15598_v12 = vld [vmem:[#allocation68_spill] sm:$0xff]  ;;  %v15600_v9 = vld [vmem:[#allocation70_spill] sm:$0xff] }
 0x31a   : > { %15591 = vst [vmem:[#allocation51_spill] sm:$0xff] %v13611_v57  ;;  %v13618_v0 = vadd.f32 %v10781_v34, %v3817_v53  ;;  %v3815_v28 = vadd.f32 %v3416_v36, %v15594_v35  ;;  %v5883_v35 = vld [vmem:[%s11859_s10 + $0xd4] sm:$0xff]  ;;  %v5884_v1 = vld [vmem:[%s11859_s10 + $0xdc] sm:$0xff] }
 0x31b   : > { %v10630_v60 = vpop.f32.mrf.mxu1  ;;  %v10782_v3 = vpop.f32.mrf.mxu0 }
 0x31c   : > { %15593 = vst [vmem:[#allocation53_spill] sm:$0xff] %v13618_v0  ;;  %v13621_v52 = vadd.f32 %v4397_v30, %v3815_v28  ;;  %v3818_v31 = vadd.f32 %v10630_v60, %v15596_v16  ;;  %v5885_v60 = vld [vmem:[%s11859_s10 + $0xe4] sm:$0xff]  ;;  %v5886_v16 = vld [vmem:[%s11859_s10 + $0xec] sm:$0xff] }
 0x31d   : > { %v3419_v57 = vpop.f32.mrf.mxu1  ;;  %v4400_v20 = vpop.f32.mrf.mxu0 }
 0x31e   : > { %15595 = vst [vmem:[#allocation55_spill] sm:$0xff] %v13621_v52  ;;  %v13624_v24 = vadd.f32 %v10782_v3, %v3818_v31  ;;  %v3816_v34 = vadd.f32 %v3419_v57, %v15598_v12  ;;  %v15602_v31 = vld [vmem:[#allocation72_spill] sm:$0xff] }
 0x31f   : > { %v10633_v53 = vpop.f32.mrf.mxu1  ;;  %v10785_v36 = vpop.f32.mrf.mxu0  ;;  %10896 = vmatmul.mubr.bf16.gmra.mxu1 %v6006_v6  ;;  %11048 = vmatmul.mubr.bf16.gmra.mxu0 %v6008_v33  ;;  %v6010_v6 = vpack.c.bf16 %v5884_v1, %v5883_v35  ;;  %v15608_v1 = vld [vmem:[#allocation78_spill] sm:$0xff] }
 0x320   : > { %15597 = vst [vmem:[#allocation57_spill] sm:$0xff] %v13624_v24  ;;  %v13627_v54 = vadd.f32 %v4400_v20, %v3816_v34  ;;  %v3821_v30 = vadd.f32 %v10633_v53, %v15600_v9  ;;  %10899 = vmatprep.mubr.bf16.mxu1 %v6007_v58  ;;  %11051 = vmatprep.mubr.bf16.mxu0 %v6009_v55  ;;  %v15604_v34 = vld [vmem:[#allocation74_spill] sm:$0xff] }
 0x321   : > { %v3432_v45 = vpop.f32.mrf.mxu1  ;;  %v4413_v28 = vpop.f32.mrf.mxu0  ;;  %v6011_v53 = vpack.c.bf16 %v5886_v16, %v5885_v60  ;;  %v5888_v60 = vld [vmem:[%s11859_s10 + $0xfc] sm:$0xff] }
 0x322   : > { %15599 = vst [vmem:[#allocation59_spill] sm:$0xff] %v13627_v54  ;;  %v13634_v3 = vadd.f32 %v10785_v36, %v3821_v30  ;;  %v3819_v57 = vadd.f32 %v3432_v45, %v15602_v31  ;;  %v15606_v36 = vld [vmem:[#allocation76_spill] sm:$0xff] }
 0x323   : > { %v10634_v12 = vpop.f32.mrf.mxu1  ;;  %v10786_v24 = vpop.f32.mrf.mxu0  ;;  %v5887_v31 = vld [vmem:[%s11859_s10 + $0xf4] sm:$0xff] }
 0x324   : > { %15601 = vst [vmem:[#allocation62_spill] sm:$0xff] %v13634_v3  ;;  %v13637_v20 = vadd.f32 %v4413_v28, %v3819_v57  ;;  %v3822_v58 = vadd.f32 %v10634_v12, %v15604_v34  ;;  %v5889_v12 = vld [vmem:[%s11859_s10 + $0x104] sm:$0xff]  ;;  %v5890_v34 = vld [vmem:[%s11859_s10 + $0x10c] sm:$0xff] }
 0x325   : > { %v3435_v9 = vpop.f32.mrf.mxu1  ;;  %v4416_v54 = vpop.f32.mrf.mxu0 }
 0x326   : > { %15603 = vst [vmem:[#allocation64_spill] sm:$0xff] %v13637_v20  ;;  %v13640_v52 = vadd.f32 %v10786_v24, %v3822_v58  ;;  %v3820_v30 = vadd.f32 %v3435_v9, %v15606_v36  ;;  %v15610_v58 = vld [vmem:[#allocation80_spill] sm:$0xff] }
 0x327   : > { %v10637_v3 = vpop.f32.mrf.mxu1  ;;  %v10789_v45 = vpop.f32.mrf.mxu0  ;;  %10900 = vmatmul.mubr.bf16.gmra.mxu1 %v6008_v33  ;;  %11052 = vmatmul.mubr.bf16.gmra.mxu0 %v6010_v6  ;;  %v6012_v33 = vpack.c.bf16 %v5888_v60, %v5887_v31  ;;  %v15616_v60 = vld [vmem:[#allocation86_spill] sm:$0xff] }
 0x328   : > { %15605 = vst [vmem:[#allocation66_spill] sm:$0xff] %v13640_v52  ;;  %v13643_v35 = vadd.f32 %v4416_v54, %v3820_v30  ;;  %v3825_v28 = vadd.f32 %v10637_v3, %v15608_v1  ;;  %10903 = vmatprep.mubr.bf16.mxu1 %v6009_v55  ;;  %11055 = vmatprep.mubr.bf16.mxu0 %v6011_v53  ;;  %v15612_v30 = vld [vmem:[#allocation82_spill] sm:$0xff] }
 0x329   : > { %v3448_v16 = vpop.f32.mrf.mxu1  ;;  %v4429_v57 = vpop.f32.mrf.mxu0  ;;  %v6013_v3 = vpack.c.bf16 %v5890_v34, %v5889_v12  ;;  %v5892_v12 = vld [vmem:[%s11859_s10 + $0x11c] sm:$0xff] }
 0x32a   : > { %15607 = vst [vmem:[#allocation68_spill] sm:$0xff] %v13643_v35  ;;  %v13650_v24 = vadd.f32 %v10789_v45, %v3825_v28  ;;  %v3823_v9 = vadd.f32 %v3448_v16, %v15610_v58  ;;  %v15614_v45 = vld [vmem:[#allocation84_spill] sm:$0xff] }
 0x32b   : > { %v10638_v36 = vpop.f32.mrf.mxu1  ;;  %v10790_v52 = vpop.f32.mrf.mxu0  ;;  %v5891_v58 = vld [vmem:[%s11859_s10 + $0x114] sm:$0xff] }
 0x32c   : > { %15609 = vst [vmem:[#allocation70_spill] sm:$0xff] %v13650_v24  ;;  %v13653_v54 = vadd.f32 %v4429_v57, %v3823_v9  ;;  %v3826_v55 = vadd.f32 %v10638_v36, %v15612_v30  ;;  %v5893_v36 = vld [vmem:[%s11859_s10 + $0x124] sm:$0xff]  ;;  %v5894_v30 = vld [vmem:[%s11859_s10 + $0x12c] sm:$0xff] }
 0x32d   : > { %v3451_v1 = vpop.f32.mrf.mxu1  ;;  %v4432_v35 = vpop.f32.mrf.mxu0 }
 0x32e   : > { %15611 = vst [vmem:[#allocation72_spill] sm:$0xff] %v13653_v54  ;;  %v13656_v20 = vadd.f32 %v10790_v52, %v3826_v55  ;;  %v3824_v28 = vadd.f32 %v3451_v1, %v15614_v45  ;;  %v15618_v55 = vld [vmem:[#allocation88_spill] sm:$0xff] }
 0x32f   : > { %v10641_v24 = vpop.f32.mrf.mxu1  ;;  %v10793_v16 = vpop.f32.mrf.mxu0  ;;  %10904 = vmatmul.mubr.bf16.gmra.mxu1 %v6010_v6  ;;  %11056 = vmatmul.mubr.bf16.gmra.mxu0 %v6012_v33  ;;  %v6014_v6 = vpack.c.bf16 %v5892_v12, %v5891_v58  ;;  %v11628_v58 = vld [vmem:[%s15269_s1 + $0x210] sm:$0xff]  }
 0x330   : > { %15613 = vst [vmem:[#allocation74_spill] sm:$0xff] %v13656_v20  ;;  %v13659_v31 = vadd.f32 %v4432_v35, %v3824_v28  ;;  %v3829_v57 = vadd.f32 %v10641_v24, %v15616_v60  ;;  %10907 = vmatprep.mubr.bf16.mxu1 %v6011_v53  ;;  %11059 = vmatprep.mubr.bf16.mxu0 %v6013_v3  ;;  %v15620_v35 = vld [vmem:[#allocation90_spill] sm:$0xff]  ;;  %v11627_v53 = vld [vmem:[%s15269_s1 + $0x1d0] sm:$0xff]  }
 0x331   : > { %v3464_v34 = vpop.f32.mrf.mxu1  ;;  %v4445_v9 = vpop.f32.mrf.mxu0  ;;  %v6015_v24 = vpack.c.bf16 %v5894_v30, %v5893_v36  ;;  %11181 = vmatprep.subr.bf16.mxu1 %v11627_v53  ;;  %v15624_v30 = vld [vmem:[#allocation94_spill] sm:$0xff]  ;;  %11333 = vmatprep.subr.bf16.mxu0 %v11628_v58 }
 0x332   : > { %15615 = vst [vmem:[#allocation76_spill] sm:$0xff] %v13659_v31  ;;  %v13666_v52 = vadd.f32 %v10793_v16, %v3829_v57  ;;  %v3827_v1 = vadd.f32 %v3464_v34, %v15618_v55  ;;  %v15622_v57 = vld [vmem:[#allocation92_spill] sm:$0xff]  ;;  %11182 = vmatpush3.bf16.msra.mxu1 %v11627_v53  ;;  %11334 = vmatpush3.bf16.msra.mxu0 %v11628_v58 }
 0x333   : > { %v10642_v45 = vpop.f32.mrf.mxu1  ;;  %v10794_v20 = vpop.f32.mrf.mxu0 }
 0x334   : > { %15617 = vst [vmem:[#allocation78_spill] sm:$0xff] %v13666_v52  ;;  %v13669_v54 = vadd.f32 %v4445_v9, %v3827_v1  ;;  %v3830_v28 = vadd.f32 %v10642_v45, %v15620_v35  ;;  %v5896_v1 = vld [vmem:[%s11859_s10 + $0x13c] sm:$0xff] }
 0x335   : > { %v3467_v60 = vpop.f32.mrf.mxu1  ;;  %v4448_v31 = vpop.f32.mrf.mxu0 }
 0x336   : > { %15619 = vst [vmem:[#allocation80_spill] sm:$0xff] %v13669_v54  ;;  %v13675_v16 = vadd.f32 %v10794_v20, %v3830_v28  ;;  %v3828_v34 = vadd.f32 %v3467_v60, %v15622_v57  ;;  %v5895_v20 = vld [vmem:[%s11859_s10 + $0x134] sm:$0xff]  ;;  %v5897_v28 = vld [vmem:[%s11859_s10 + $0x144] sm:$0xff]  ;;  %v5898_v60 = vld [vmem:[%s11859_s10 + $0x14c] sm:$0xff] }
 0x337   : > { %v10645_v12 = vpop.f32.mrf.mxu1  ;;  %v10797_v9 = vpop.f32.mrf.mxu0  ;;  %10908 = vmatmul.mubr.bf16.gmra.mxu1 %v6012_v33  ;;  %11060 = vmatmul.mubr.bf16.gmra.mxu0 %v6014_v6 }
 0x338   : > { %15621 = vst [vmem:[#allocation82_spill] sm:$0xff] %v13675_v16  ;;  %v13681_v36 = vadd.f32 %v4448_v31, %v3828_v34  ;;  %v3833_v55 = vadd.f32 %v10645_v12, %v15624_v30  ;;  %10911 = vmatprep.mubr.bf16.mxu1 %v6013_v3  ;;  %11063 = vmatprep.mubr.bf16.mxu0 %v6015_v24  ;;  %v15626_v16 = vld [vmem:[#allocation96_spill] sm:$0xff]  ;;  %v15628_v3 = vld [vmem:[#allocation98_spill] sm:$0xff] }
 0x339   : > { %v3480_v45 = vpop.f32.mrf.mxu1  ;;  %v4461_v35 = vpop.f32.mrf.mxu0  ;;  %v6016_v34 = vpack.c.bf16 %v5896_v1, %v5895_v20 }
 0x33a   : > { %15623 = vst [vmem:[#allocation84_spill] sm:$0xff] %v13681_v36  ;;  %v13688_v57 = vadd.f32 %v10797_v9, %v3833_v55  ;;  %v3831_v54 = vadd.f32 %v3480_v45, %v15626_v16  ;;  %v6017_v36 = vpack.c.bf16 %v5898_v60, %v5897_v28  ;;  %v15630_v9 = vld [vmem:[#allocation100_spill] sm:$0xff] }
 0x33b   : > { %v10646_v33 = vpop.f32.mrf.mxu1  ;;  %v10798_v31 = vpop.f32.mrf.mxu0  ;;  %v5899_v45 = vld [vmem:[%s11859_s10 + $0x154] sm:$0xff] }
 0x33c   : > { %15625 = vst [vmem:[#allocation86_spill] sm:$0xff] %v13688_v57  ;;  %v13691_v12 = vadd.f32 %v4461_v35, %v3831_v54  ;;  %v3834_v30 = vadd.f32 %v10646_v33, %v15628_v3  ;;  %v15632_v54 = vld [vmem:[#allocation102_spill] sm:$0xff]  ;;  %v5902_v3 = vld [vmem:[%s11859_s10 + $0x16c] sm:$0xff] }
 0x33d   : > { %v3483_v52 = vpop.f32.mrf.mxu1  ;;  %v4464_v0 = vpop.f32.mrf.mxu0  ;;  %v5900_v35 = vld [vmem:[%s11859_s10 + $0x15c] sm:$0xff]  ;;  %v5901_v33 = vld [vmem:[%s11859_s10 + $0x164] sm:$0xff] }
 0x33e   : > { %15627 = vst [vmem:[#allocation88_spill] sm:$0xff] %v13691_v12  ;;  %v13694_v53 = vadd.f32 %v10798_v31, %v3834_v30  ;;  %v3832_v55 = vadd.f32 %v3483_v52, %v15630_v9  ;;  %v15634_v30 = vld [vmem:[#allocation8_spill] sm:$0xff]  ;;  %v15654_v57 = vld [vmem:[#allocation18_spill] sm:$0xff] }
 0x33f   : > { %v10649_v16 = vpop.f32.mrf.mxu1  ;;  %v10801_v58 = vpop.f32.mrf.mxu0  ;;  %10912 = vmatmul.mubr.bf16.gmra.mxu1 %v6014_v6  ;;  %11064 = vmatmul.mubr.bf16.gmra.mxu0 %v6016_v34  ;;  %v6018_v6 = vpack.c.bf16 %v5900_v35, %v5899_v45  ;;  %v15640_v35 = vld [vmem:[#allocation11_spill] sm:$0xff] }
 0x340   : > { %15629 = vst [vmem:[#allocation90_spill] sm:$0xff] %v13694_v53  ;;  %v13697_v20 = vadd.f32 %v4464_v0, %v3832_v55  ;;  %v3837_v1 = vadd.f32 %v10649_v16, %v15632_v54  ;;  %10915 = vmatprep.mubr.bf16.mxu1 %v6015_v24  ;;  %11067 = vmatprep.mubr.bf16.mxu0 %v6017_v36  ;;  %v15636_v55 = vld [vmem:[#allocation9_spill] sm:$0xff] }
 0x341   : > { %v3496_v28 = vpop.f32.mrf.mxu1  ;;  %v4477_v60 = vpop.f32.mrf.mxu0  ;;  %v6019_v16 = vpack.c.bf16 %v5902_v3, %v5901_v33  ;;  %v5904_v33 = vld [vmem:[%s11859_s10 + $0x17c] sm:$0xff] }
 0x342   : > { %15631 = vst [vmem:[#allocation92_spill] sm:$0xff] %v13697_v20  ;;  %v13704_v31 = vadd.f32 %v10801_v58, %v3837_v1  ;;  %v3835_v52 = vadd.f32 %v3496_v28, %v15634_v30  ;;  %v15638_v58 = vld [vmem:[#allocation10_spill] sm:$0xff] }
 0x343   : > { %v10650_v9 = vpop.f32.mrf.mxu1  ;;  %v10802_v53 = vpop.f32.mrf.mxu0  ;;  %v5903_v30 = vld [vmem:[%s11859_s10 + $0x174] sm:$0xff] }
 0x344   : > { %15633 = vst [vmem:[#allocation94_spill] sm:$0xff] %v13704_v31  ;;  %v13707_v0 = vadd.f32 %v4477_v60, %v3835_v52  ;;  %v3838_v24 = vadd.f32 %v10650_v9, %v15636_v55  ;;  %v5905_v9 = vld [vmem:[%s11859_s10 + $0x184] sm:$0xff]  ;;  %v5906_v55 = vld [vmem:[%s11859_s10 + $0x18c] sm:$0xff] }
 0x345   : > { %v3499_v54 = vpop.f32.mrf.mxu1  ;;  %v4480_v20 = vpop.f32.mrf.mxu0 }
 0x346   : > { %15635 = vst [vmem:[#allocation96_spill] sm:$0xff] %v13707_v0  ;;  %v13710_v12 = vadd.f32 %v10802_v53, %v3838_v24  ;;  %v3836_v1 = vadd.f32 %v3499_v54, %v15638_v58  ;;  %v15642_v24 = vld [vmem:[#allocation12_spill] sm:$0xff] }
 0x347   : > { %v10653_v31 = vpop.f32.mrf.mxu1  ;;  %v10805_v28 = vpop.f32.mrf.mxu0  ;;  %10916 = vmatmul.mubr.bf16.gmra.mxu1 %v6016_v34  ;;  %11068 = vmatmul.mubr.bf16.gmra.mxu0 %v6018_v6  ;;  %v6020_v34 = vpack.c.bf16 %v5904_v33, %v5903_v30  ;;  %v15648_v33 = vld [vmem:[#allocation15_spill] sm:$0xff] }
 0x348   : > { %15637 = vst [vmem:[#allocation98_spill] sm:$0xff] %v13710_v12  ;;  %v13713_v45 = vadd.f32 %v4480_v20, %v3836_v1  ;;  %v3841_v60 = vadd.f32 %v10653_v31, %v15640_v35  ;;  %10919 = vmatprep.mubr.bf16.mxu1 %v6017_v36  ;;  %11071 = vmatprep.mubr.bf16.mxu0 %v6019_v16  ;;  %v15644_v1 = vld [vmem:[#allocation13_spill] sm:$0xff] }
 0x349   : > { %v3512_v3 = vpop.f32.mrf.mxu1  ;;  %v4493_v52 = vpop.f32.mrf.mxu0  ;;  %v6021_v31 = vpack.c.bf16 %v5906_v55, %v5905_v9  ;;  %v5908_v9 = vld [vmem:[%s11859_s10 + $0x19c] sm:$0xff] }
 0x34a   : > { %15639 = vst [vmem:[#allocation100_spill] sm:$0xff] %v13713_v45  ;;  %v13720_v53 = vadd.f32 %v10805_v28, %v3841_v60  ;;  %v3839_v54 = vadd.f32 %v3512_v3, %v15642_v24  ;;  %v15646_v28 = vld [vmem:[#allocation14_spill] sm:$0xff] }
 0x34b   : > { %v10654_v58 = vpop.f32.mrf.mxu1  ;;  %v10806_v12 = vpop.f32.mrf.mxu0  ;;  %v5907_v24 = vld [vmem:[%s11859_s10 + $0x194] sm:$0xff] }
 0x34c   : > { %15641 = vst [vmem:[#allocation102_spill] sm:$0xff] %v13720_v53  ;;  %v13723_v20 = vadd.f32 %v4493_v52, %v3839_v54  ;;  %v3842_v36 = vadd.f32 %v10654_v58, %v15644_v1  ;;  %v5909_v58 = vld [vmem:[%s11859_s10 + $0x1a4] sm:$0xff]  ;;  %v5910_v1 = vld [vmem:[%s11859_s10 + $0x1ac] sm:$0xff] }
 0x34d   : > { %v3515_v35 = vpop.f32.mrf.mxu1  ;;  %v4496_v45 = vpop.f32.mrf.mxu0 }
 0x34e   : > { %15643 = vst [vmem:[#allocation8_spill] sm:$0xff] %v13723_v20  ;;  %v13726_v0 = vadd.f32 %v10806_v12, %v3842_v36  ;;  %v3840_v60 = vadd.f32 %v3515_v35, %v15646_v28  ;;  %v15650_v36 = vld [vmem:[#allocation16_spill] sm:$0xff] }
 0x34f   : > { %v10657_v53 = vpop.f32.mrf.mxu1  ;;  %v10809_v3 = vpop.f32.mrf.mxu0  ;;  %10920 = vmatmul.mubr.bf16.gmra.mxu1 %v6018_v6  ;;  %11072 = vmatmul.mubr.bf16.gmra.mxu0 %v6020_v34  ;;  %v6022_v6 = vpack.c.bf16 %v5908_v9, %v5907_v24 }
 0x350   : > { %15645 = vst [vmem:[#allocation9_spill] sm:$0xff] %v13726_v0  ;;  %v13729_v30 = vadd.f32 %v4496_v45, %v3840_v60  ;;  %v3845_v52 = vadd.f32 %v10657_v53, %v15648_v33  ;;  %10923 = vmatprep.mubr.bf16.mxu1 %v6019_v16  ;;  %11075 = vmatprep.mubr.bf16.mxu0 %v6021_v31  ;;  %v15652_v45 = vld [vmem:[#allocation17_spill] sm:$0xff] }
 0x351   : > { %v3528_v55 = vpop.f32.mrf.mxu1  ;;  %v4509_v54 = vpop.f32.mrf.mxu0  ;;  %v6023_v16 = vpack.c.bf16 %v5910_v1, %v5909_v58  ;;  %v5912_v1 = vld [vmem:[%s11859_s10 + $0x1bc] sm:$0xff] }
 0x352   : > { %15647 = vst [vmem:[#allocation10_spill] sm:$0xff] %v13729_v30  ;;  %v13736_v12 = vadd.f32 %v10809_v3, %v3845_v52  ;;  %v3843_v35 = vadd.f32 %v3528_v55, %v15650_v36  ;;  %v11629_v52 = vld [vmem:[%s15269_s1 + $0x1c8] sm:$0xff]  }
 0x353   : > { %v10658_v28 = vpop.f32.mrf.mxu1  ;;  %v10810_v0 = vpop.f32.mrf.mxu0  ;;  %11183 = vmatprep.subr.bf16.mxu1 %v11629_v52 }
 0x354   : > { %15649 = vst [vmem:[#allocation11_spill] sm:$0xff] %v13736_v12  ;;  %v13739_v20 = vadd.f32 %v4509_v54, %v3843_v35  ;;  %v3846_v53 = vadd.f32 %v10658_v28, %v15652_v45  ;;  %v15656_v54 = vld [vmem:[#allocation19_spill] sm:$0xff]  ;;  %11184 = vmatpush3.bf16.msra.mxu1 %v11629_v52 }
 0x355   : > { %v3531_v60 = vpop.f32.mrf.mxu1  ;;  %v4512_v33 = vpop.f32.mrf.mxu0  ;;  %v5913_v28 = vld [vmem:[%s11859_s10 + $0x1c4] sm:$0xff]  ;;  %v5914_v45 = vld [vmem:[%s11859_s10 + $0x1cc] sm:$0xff] }
 0x356   : > { %15651 = vst [vmem:[#allocation12_spill] sm:$0xff] %v13739_v20  ;;  %v13742_v30 = vadd.f32 %v10810_v0, %v3846_v53  ;;  %v3844_v3 = vadd.f32 %v3531_v60, %v15654_v57  ;;  %v5911_v0 = vld [vmem:[%s11859_s10 + $0x1b4] sm:$0xff]  ;;  %v11630_v57 = vld [vmem:[%s15269_s1 + $0x208] sm:$0xff]  }
 0x357   : > { %v10661_v24 = vpop.f32.mrf.mxu1  ;;  %v10813_v9 = vpop.f32.mrf.mxu0  ;;  %10924 = vmatmul.mubr.bf16.gmra.mxu1 %v6020_v34  ;;  %11076 = vmatmul.mubr.bf16.gmra.mxu0 %v6022_v6  ;;  %v15658_v34 = vld [vmem:[#allocation20_spill] sm:$0xff] }
 0x358   : > { %15653 = vst [vmem:[#allocation13_spill] sm:$0xff] %v13742_v30  ;;  %v13748_v55 = vadd.f32 %v4512_v33, %v3844_v3  ;;  %v3849_v58 = vadd.f32 %v10661_v24, %v15656_v54  ;;  %10927 = vmatprep.mubr.bf16.mxu1 %v6021_v31  ;;  %11079 = vmatprep.mubr.bf16.mxu0 %v6023_v16  ;;  %v15660_v54 = vld [vmem:[#allocation21_spill] sm:$0xff] }
 0x359   : > { %v3544_v36 = vpop.f32.mrf.mxu1  ;;  %v4525_v35 = vpop.f32.mrf.mxu0  ;;  %11335 = vmatprep.subr.bf16.mxu0 %v11630_v57  ;;  %v6024_v3 = vpack.c.bf16 %v5912_v1, %v5911_v0  ;;  %v6025_v30 = vpack.c.bf16 %v5914_v45, %v5913_v28  ;;  %v15664_v1 = vld [vmem:[#allocation23_spill] sm:$0xff] }
 0x35a   : > { %15655 = vst [vmem:[#allocation14_spill] sm:$0xff] %v13748_v55  ;;  %v13758_v53 = vadd.f32 %v10813_v9, %v3849_v58  ;;  %v3847_v60 = vadd.f32 %v3544_v36, %v15658_v34  ;;  %11336 = vmatpush3.bf16.msra.mxu0 %v11630_v57  ;;  %v15662_v58 = vld [vmem:[#allocation22_spill] sm:$0xff] }
 0x35b   : > { %v10662_v33 = vpop.f32.mrf.mxu1  ;;  %v10814_v31 = vpop.f32.mrf.mxu0  ;;  %v5916_v28 = vld [vmem:[%s11859_s10 + $0x1dc] sm:$0xff] }
 0x35c   : > { %15657 = vst [vmem:[#allocation15_spill] sm:$0xff] %v13758_v53  ;;  %v13761_v24 = vadd.f32 %v4525_v35, %v3847_v60  ;;  %v3850_v55 = vadd.f32 %v10662_v33, %v15660_v54  ;;  %v5915_v35 = vld [vmem:[%s11859_s10 + $0x1d4] sm:$0xff]  ;;  %v5917_v33 = vld [vmem:[%s11859_s10 + $0x1e4] sm:$0xff]  ;;  %v5918_v54 = vld [vmem:[%s11859_s10 + $0x1ec] sm:$0xff] }
 0x35d   : > { %v3547_v20 = vpop.f32.mrf.mxu1  ;;  %v4528_v12 = vpop.f32.mrf.mxu0  ;;  %v15685_v53 = vld [vmem:[#allocation34_spill] sm:$0xff] }
 0x35e   : > { %15659 = vst [vmem:[#allocation16_spill] sm:$0xff] %v13761_v24  ;;  %v13764_v9 = vadd.f32 %v10814_v31, %v3850_v55  ;;  %v3848_v52 = vadd.f32 %v3547_v20, %v15662_v58  ;;  %v15666_v31 = vld [vmem:[#allocation24_spill] sm:$0xff] }
 0x35f   : > { %v10665_v36 = vpop.f32.mrf.mxu1  ;;  %v10817_v34 = vpop.f32.mrf.mxu0  ;;  %10928 = vmatmul.mubr.bf16.gmra.mxu1 %v6022_v6  ;;  %11080 = vmatmul.mubr.bf16.gmra.mxu0 %v6024_v3  ;;  %v6026_v6 = vpack.c.bf16 %v5916_v28, %v5915_v35  ;;  %v15672_v28 = vld [vmem:[#allocation27_spill] sm:$0xff] }
 0x360   : > { %15661 = vst [vmem:[#allocation17_spill] sm:$0xff] %v13764_v9  ;;  %v13767_v0 = vadd.f32 %v4528_v12, %v3848_v52  ;;  %v3853_v57 = vadd.f32 %v10665_v36, %v15664_v1  ;;  %10931 = vmatprep.mubr.bf16.mxu1 %v6023_v16  ;;  %11083 = vmatprep.mubr.bf16.mxu0 %v6025_v30  ;;  %v15668_v52 = vld [vmem:[#allocation25_spill] sm:$0xff] }
 0x361   : > { %v3560_v45 = vpop.f32.mrf.mxu1  ;;  %v4541_v60 = vpop.f32.mrf.mxu0  ;;  %v6027_v36 = vpack.c.bf16 %v5918_v54, %v5917_v33  ;;  %v5920_v33 = vld [vmem:[%s11859_s10 + $0x1fc] sm:$0xff] }
 0x362   : > { %15663 = vst [vmem:[#allocation18_spill] sm:$0xff] %v13767_v0  ;;  %v13774_v55 = vadd.f32 %v10817_v34, %v3853_v57  ;;  %v3851_v20 = vadd.f32 %v3560_v45, %v15666_v31  ;;  %v15670_v34 = vld [vmem:[#allocation26_spill] sm:$0xff] }
 0x363   : > { %v10666_v58 = vpop.f32.mrf.mxu1  ;;  %v10818_v9 = vpop.f32.mrf.mxu0  ;;  %v5919_v31 = vld [vmem:[%s11859_s10 + $0x1f4] sm:$0xff] }
 0x364   : > { %15665 = vst [vmem:[#allocation19_spill] sm:$0xff] %v13774_v55  ;;  %v13777_v12 = vadd.f32 %v4541_v60, %v3851_v20  ;;  %v3854_v16 = vadd.f32 %v10666_v58, %v15668_v52  ;;  %v5921_v58 = vld [vmem:[%s11859_s10 + $0x204] sm:$0xff]  ;;  %v5922_v52 = vld [vmem:[%s11859_s10 + $0x20c] sm:$0xff] }
 0x365   : > { %v3563_v1 = vpop.f32.mrf.mxu1  ;;  %v4544_v0 = vpop.f32.mrf.mxu0 }
 0x366   : > { %15667 = vst [vmem:[#allocation20_spill] sm:$0xff] %v13777_v12  ;;  %v13780_v24 = vadd.f32 %v10818_v9, %v3854_v16  ;;  %v3852_v57 = vadd.f32 %v3563_v1, %v15670_v34  ;;  %v15674_v16 = vld [vmem:[#allocation28_spill] sm:$0xff] }
 0x367   : > { %v10669_v55 = vpop.f32.mrf.mxu1  ;;  %v10821_v45 = vpop.f32.mrf.mxu0  ;;  %10932 = vmatmul.mubr.bf16.gmra.mxu1 %v6024_v3  ;;  %11084 = vmatmul.mubr.bf16.gmra.mxu0 %v6026_v6  ;;  %v6028_v3 = vpack.c.bf16 %v5920_v33, %v5919_v31  ;;  %v15680_v33 = vld [vmem:[#allocation31_spill] sm:$0xff] }
 0x368   : > { %15669 = vst [vmem:[#allocation21_spill] sm:$0xff] %v13780_v24  ;;  %v13783_v35 = vadd.f32 %v4544_v0, %v3852_v57  ;;  %v3857_v60 = vadd.f32 %v10669_v55, %v15672_v28  ;;  %10935 = vmatprep.mubr.bf16.mxu1 %v6025_v30  ;;  %11087 = vmatprep.mubr.bf16.mxu0 %v6027_v36  ;;  %v15676_v57 = vld [vmem:[#allocation29_spill] sm:$0xff] }
 0x369   : > { %v3576_v54 = vpop.f32.mrf.mxu1  ;;  %v4557_v20 = vpop.f32.mrf.mxu0  ;;  %v6029_v55 = vpack.c.bf16 %v5922_v52, %v5921_v58  ;;  %v5924_v58 = vld [vmem:[%s11859_s10 + $0x21c] sm:$0xff] }
 0x36a   : > { %15671 = vst [vmem:[#allocation22_spill] sm:$0xff] %v13783_v35  ;;  %v13790_v9 = vadd.f32 %v10821_v45, %v3857_v60  ;;  %v3855_v1 = vadd.f32 %v3576_v54, %v15674_v16  ;;  %v15678_v45 = vld [vmem:[#allocation30_spill] sm:$0xff] }
 0x36b   : > { %v10670_v34 = vpop.f32.mrf.mxu1  ;;  %v10822_v24 = vpop.f32.mrf.mxu0  ;;  %v5923_v16 = vld [vmem:[%s11859_s10 + $0x214] sm:$0xff] }
 0x36c   : > { %15673 = vst [vmem:[#allocation23_spill] sm:$0xff] %v13790_v9  ;;  %v13793_v0 = vadd.f32 %v4557_v20, %v3855_v1  ;;  %v3858_v30 = vadd.f32 %v10670_v34, %v15676_v57  ;;  %v5925_v34 = vld [vmem:[%s11859_s10 + $0x224] sm:$0xff]  ;;  %v5926_v57 = vld [vmem:[%s11859_s10 + $0x22c] sm:$0xff] }
 0x36d   : > { %v3579_v28 = vpop.f32.mrf.mxu1  ;;  %v4560_v35 = vpop.f32.mrf.mxu0 }
 0x36e   : > { %15675 = vst [vmem:[#allocation24_spill] sm:$0xff] %v13793_v0  ;;  %v13796_v12 = vadd.f32 %v10822_v24, %v3858_v30  ;;  %v3856_v60 = vadd.f32 %v3579_v28, %v15678_v45  ;;  %v15681_v30 = vld [vmem:[#allocation32_spill] sm:$0xff] }
 0x36f   : > { %v10673_v9 = vpop.f32.mrf.mxu1  ;;  %v10825_v54 = vpop.f32.mrf.mxu0  ;;  %10936 = vmatmul.mubr.bf16.gmra.mxu1 %v6026_v6  ;;  %11088 = vmatmul.mubr.bf16.gmra.mxu0 %v6028_v3  ;;  %v6030_v6 = vpack.c.bf16 %v5924_v58, %v5923_v16  ;;  %v15687_v58 = vld [vmem:[#allocation35_spill] sm:$0xff] }
 0x370   : > { %15677 = vst [vmem:[#allocation25_spill] sm:$0xff] %v13796_v12  ;;  %v13799_v31 = vadd.f32 %v4560_v35, %v3856_v60  ;;  %v3861_v20 = vadd.f32 %v10673_v9, %v15680_v33  ;;  %10939 = vmatprep.mubr.bf16.mxu1 %v6027_v36  ;;  %11091 = vmatprep.mubr.bf16.mxu0 %v6029_v55  ;;  %v15683_v60 = vld [vmem:[#allocation33_spill] sm:$0xff] }
 0x371   : > { %v3592_v52 = vpop.f32.mrf.mxu1  ;;  %v4573_v1 = vpop.f32.mrf.mxu0  ;;  %v6031_v9 = vpack.c.bf16 %v5926_v57, %v5925_v34  ;;  %v5928_v34 = vld [vmem:[%s11859_s10 + $0x23c] sm:$0xff] }
 0x372   : > { %15679 = vst [vmem:[#allocation26_spill] sm:$0xff] %v13799_v31  ;;  %v13806_v24 = vadd.f32 %v10825_v54, %v3861_v20  ;;  %v3859_v28 = vadd.f32 %v3592_v52, %v15681_v30  ;;  %v5927_v30 = vld [vmem:[%s11859_s10 + $0x234] sm:$0xff] }
 0x373   : > { %v10674_v45 = vpop.f32.mrf.mxu1  ;;  %v10826_v12 = vpop.f32.mrf.mxu0 }
 0x374   : > { %v13809_v35 = vadd.f32 %v4573_v1, %v3859_v28  ;;  %v3862_v36 = vadd.f32 %v10674_v45, %v15683_v60  ;;  %v5929_v45 = vld [vmem:[%s11859_s10 + $0x244] sm:$0xff] }
 0x375   : > { %v3595_v33 = vpop.f32.mrf.mxu1  ;;  %v4576_v31 = vpop.f32.mrf.mxu0 }
 0x376   : > { %15682 = vst [vmem:[#allocation27_spill] sm:$0xff] %v13809_v35  ;;  %v13812_v0 = vadd.f32 %v10826_v12, %v3862_v36  ;;  %v3860_v54 = vadd.f32 %v3595_v33, %v15685_v53  ;;  %v11631_v12 = vld [vmem:[%s15269_s1 + $0x1c0] sm:$0xff]   ;;  %v5930_v53 = vld [vmem:[%s11859_s10 + $0x24c] sm:$0xff] }
 0x377   : > { %v10677_v20 = vpop.f32.mrf.mxu1  ;;  %v10829_v52 = vpop.f32.mrf.mxu0  ;;  %10940 = vmatmul.mubr.bf16.gmra.mxu1 %v6028_v3  ;;  %11092 = vmatmul.mubr.bf16.gmra.mxu0 %v6030_v6  ;;  %v15689_v3 = vld [vmem:[#allocation36_spill] sm:$0xff] }
 0x378   : > { %15684 = vst [vmem:[#allocation28_spill] sm:$0xff] %v13812_v0  ;;  %v13815_v16 = vadd.f32 %v4576_v31, %v3860_v54  ;;  %v3865_v1 = vadd.f32 %v10677_v20, %v15687_v58  ;;  %10943 = vmatprep.mubr.bf16.mxu1 %v6029_v55  ;;  %11095 = vmatprep.mubr.bf16.mxu0 %v6031_v9  ;;  %v11632_v55 = vld [vmem:[%s15269_s1 + $0x200] sm:$0xff]  }
 0x379   : > { %v3608_v57 = vpop.f32.mrf.mxu1  ;;  %v4589_v28 = vpop.f32.mrf.mxu0  ;;  %11185 = vmatprep.subr.bf16.mxu1 %v11631_v12  ;;  %v6032_v54 = vpack.c.bf16 %v5928_v34, %v5927_v30  ;;  %v15691_v58 = vld [vmem:[#allocation37_spill] sm:$0xff]  ;;  %v6033_v0 = vpack.c.bf16 %v5930_v53, %v5929_v45  ;;  %11337 = vmatprep.subr.bf16.mxu0 %v11632_v55 }
 0x37a   : > { %15686 = vst [vmem:[#allocation29_spill] sm:$0xff] %v13815_v16  ;;  %v13825_v60 = vadd.f32 %v10829_v52, %v3865_v1  ;;  %v3863_v36 = vadd.f32 %v3608_v57, %v15689_v3  ;;  %11186 = vmatpush3.bf16.msra.mxu1 %v11631_v12  ;;  %11338 = vmatpush3.bf16.msra.mxu0 %v11632_v55  ;;  %v15693_v3 = vld [vmem:[#allocation38_spill] sm:$0xff]  ;;  %v15695_v12 = vld [vmem:[#allocation39_spill] sm:$0xff] }
 0x37b   : > { %v10678_v31 = vpop.f32.mrf.mxu1  ;;  %v10830_v33 = vpop.f32.mrf.mxu0  ;;  %v5931_v45 = vld [vmem:[%s11859_s10 + $0x254] sm:$0xff]  ;;  %v5932_v53 = vld [vmem:[%s11859_s10 + $0x25c] sm:$0xff]  ;;  %v5933_v55 = vld [vmem:[%s11859_s10 + $0x264] sm:$0xff] }
 0x37c   : > { %15688 = vst [vmem:[#allocation30_spill] sm:$0xff] %v13825_v60  ;;  %v13831_v20 = vadd.f32 %v4589_v28, %v3863_v36  ;;  %v3866_v16 = vadd.f32 %v10678_v31, %v15691_v58  ;;  %v5934_v58 = vld [vmem:[%s11859_s10 + $0x26c] sm:$0xff] }
 0x37d   : > { %v3611_v52 = vpop.f32.mrf.mxu1  ;;  %v4592_v1 = vpop.f32.mrf.mxu0 }
 0x37e   : > { %15690 = vst [vmem:[#allocation31_spill] sm:$0xff] %v13831_v20  ;;  %v13834_v57 = vadd.f32 %v10830_v33, %v3866_v16  ;;  %v3864_v60 = vadd.f32 %v3611_v52, %v15693_v3  ;;  %v15697_v33 = vld [vmem:[#allocation40_spill] sm:$0xff] }
 0x37f   : > { %v10681_v35 = vpop.f32.mrf.mxu1  ;;  %v10833_v30 = vpop.f32.mrf.mxu0  ;;  %10944 = vmatmul.mubr.bf16.gmra.mxu1 %v6030_v6  ;;  %11096 = vmatmul.mubr.bf16.gmra.mxu0 %v6032_v54  ;;  %v6034_v6 = vpack.c.bf16 %v5932_v53, %v5931_v45  ;;  %v15703_v53 = vld [vmem:[#allocation43_spill] sm:$0xff] }
 0x380   : > { %15692 = vst [vmem:[#allocation32_spill] sm:$0xff] %v13834_v57  ;;  %v13837_v34 = vadd.f32 %v4592_v1, %v3864_v60  ;;  %v3869_v28 = vadd.f32 %v10681_v35, %v15695_v12  ;;  %10947 = vmatprep.mubr.bf16.mxu1 %v6031_v9  ;;  %11099 = vmatprep.mubr.bf16.mxu0 %v6033_v0  ;;  %v15699_v1 = vld [vmem:[#allocation41_spill] sm:$0xff] }
 0x381   : > { %v3624_v36 = vpop.f32.mrf.mxu1  ;;  %v4605_v31 = vpop.f32.mrf.mxu0  ;;  %v6035_v9 = vpack.c.bf16 %v5934_v58, %v5933_v55  ;;  %v5936_v55 = vld [vmem:[%s11859_s10 + $0x27c] sm:$0xff] }
 0x382   : > { %15694 = vst [vmem:[#allocation33_spill] sm:$0xff] %v13837_v34  ;;  %v13844_v16 = vadd.f32 %v10833_v30, %v3869_v28  ;;  %v3867_v52 = vadd.f32 %v3624_v36, %v15697_v33  ;;  %v15701_v30 = vld [vmem:[#allocation42_spill] sm:$0xff] }
 0x383   : > { %v10682_v3 = vpop.f32.mrf.mxu1  ;;  %v10834_v57 = vpop.f32.mrf.mxu0  ;;  %v5935_v33 = vld [vmem:[%s11859_s10 + $0x274] sm:$0xff] }
 0x384   : > { %15696 = vst [vmem:[#allocation34_spill] sm:$0xff] %v13844_v16  ;;  %v13847_v60 = vadd.f32 %v4605_v31, %v3867_v52  ;;  %v3870_v35 = vadd.f32 %v10682_v3, %v15699_v1  ;;  %v5937_v3 = vld [vmem:[%s11859_s10 + $0x284] sm:$0xff]  ;;  %v5938_v1 = vld [vmem:[%s11859_s10 + $0x28c] sm:$0xff] }
 0x385   : > { %v3627_v12 = vpop.f32.mrf.mxu1  ;;  %v4608_v34 = vpop.f32.mrf.mxu0 }
 0x386   : > { %15698 = vst [vmem:[#allocation35_spill] sm:$0xff] %v13847_v60  ;;  %v13850_v20 = vadd.f32 %v10834_v57, %v3870_v35  ;;  %v3868_v28 = vadd.f32 %v3627_v12, %v15701_v30  ;;  %v15705_v35 = vld [vmem:[#allocation44_spill] sm:$0xff] }
 0x387   : > { %v10685_v16 = vpop.f32.mrf.mxu1  ;;  %v10837_v36 = vpop.f32.mrf.mxu0  ;;  %10948 = vmatmul.mubr.bf16.gmra.mxu1 %v6032_v54  ;;  %11100 = vmatmul.mubr.bf16.gmra.mxu0 %v6034_v6  ;;  %v6036_v54 = vpack.c.bf16 %v5936_v55, %v5935_v33  ;;  %v15711_v55 = vld [vmem:[#allocation47_spill] sm:$0xff] }
 0x388   : > { %15700 = vst [vmem:[#allocation36_spill] sm:$0xff] %v13850_v20  ;;  %v13853_v45 = vadd.f32 %v4608_v34, %v3868_v28  ;;  %v3873_v31 = vadd.f32 %v10685_v16, %v15703_v53  ;;  %10951 = vmatprep.mubr.bf16.mxu1 %v6033_v0  ;;  %11103 = vmatprep.mubr.bf16.mxu0 %v6035_v9  ;;  %v15707_v28 = vld [vmem:[#allocation45_spill] sm:$0xff] }
 0x389   : > { %v3640_v58 = vpop.f32.mrf.mxu1  ;;  %v4621_v52 = vpop.f32.mrf.mxu0  ;;  %v6037_v16 = vpack.c.bf16 %v5938_v1, %v5937_v3  ;;  %v5940_v3 = vld [vmem:[%s11859_s10 + $0x29c] sm:$0xff] }
 0x38a   : > { %15702 = vst [vmem:[#allocation37_spill] sm:$0xff] %v13853_v45  ;;  %v13860_v57 = vadd.f32 %v10837_v36, %v3873_v31  ;;  %v3871_v12 = vadd.f32 %v3640_v58, %v15705_v35  ;;  %v15709_v36 = vld [vmem:[#allocation46_spill] sm:$0xff] }
 0x38b   : > { %v10686_v30 = vpop.f32.mrf.mxu1  ;;  %v10838_v20 = vpop.f32.mrf.mxu0  ;;  %v5939_v35 = vld [vmem:[%s11859_s10 + $0x294] sm:$0xff] }
 0x38c   : > { %15704 = vst [vmem:[#allocation38_spill] sm:$0xff] %v13860_v57  ;;  %v13863_v34 = vadd.f32 %v4621_v52, %v3871_v12  ;;  %v3874_v0 = vadd.f32 %v10686_v30, %v15707_v28  ;;  %v5941_v30 = vld [vmem:[%s11859_s10 + $0x2a4] sm:$0xff]  ;;  %v5942_v28 = vld [vmem:[%s11859_s10 + $0x2ac] sm:$0xff] }
 0x38d   : > { %v3643_v53 = vpop.f32.mrf.mxu1  ;;  %v4624_v45 = vpop.f32.mrf.mxu0 }
 0x38e   : > { %15706 = vst [vmem:[#allocation39_spill] sm:$0xff] %v13863_v34  ;;  %v13866_v60 = vadd.f32 %v10838_v20, %v3874_v0  ;;  %v3872_v31 = vadd.f32 %v3643_v53, %v15709_v36  ;;  %v15713_v0 = vld [vmem:[#allocation48_spill] sm:$0xff] }
 0x38f   : > { %v10689_v57 = vpop.f32.mrf.mxu1  ;;  %v10841_v58 = vpop.f32.mrf.mxu0  ;;  %10952 = vmatmul.mubr.bf16.gmra.mxu1 %v6034_v6  ;;  %11104 = vmatmul.mubr.bf16.gmra.mxu0 %v6036_v54  ;;  %v6038_v6 = vpack.c.bf16 %v5940_v3, %v5939_v35  ;;  %v15719_v3 = vld [vmem:[#allocation54_spill] sm:$0xff] }
 0x390   : > { %15708 = vst [vmem:[#allocation40_spill] sm:$0xff] %v13866_v60  ;;  %v13869_v33 = vadd.f32 %v4624_v45, %v3872_v31  ;;  %v3877_v52 = vadd.f32 %v10689_v57, %v15711_v55  ;;  %10955 = vmatprep.mubr.bf16.mxu1 %v6035_v9  ;;  %11107 = vmatprep.mubr.bf16.mxu0 %v6037_v16  ;;  %v15715_v31 = vld [vmem:[#allocation50_spill] sm:$0xff] }
 0x391   : > { %v3656_v1 = vpop.f32.mrf.mxu1  ;;  %v4637_v12 = vpop.f32.mrf.mxu0  ;;  %v6039_v57 = vpack.c.bf16 %v5942_v28, %v5941_v30  ;;  %v5944_v30 = vld [vmem:[%s11859_s10 + $0x2bc] sm:$0xff] }
 0x392   : > { %15710 = vst [vmem:[#allocation41_spill] sm:$0xff] %v13869_v33  ;;  %v13876_v20 = vadd.f32 %v10841_v58, %v3877_v52  ;;  %v3875_v53 = vadd.f32 %v3656_v1, %v15713_v0  ;;  %v15717_v58 = vld [vmem:[#allocation52_spill] sm:$0xff] }
 0x393   : > { %v10690_v36 = vpop.f32.mrf.mxu1  ;;  %v10842_v60 = vpop.f32.mrf.mxu0  ;;  %v5943_v0 = vld [vmem:[%s11859_s10 + $0x2b4] sm:$0xff] }
 0x394   : > { %15712 = vst [vmem:[#allocation42_spill] sm:$0xff] %v13876_v20  ;;  %v13879_v45 = vadd.f32 %v4637_v12, %v3875_v53  ;;  %v3878_v9 = vadd.f32 %v10690_v36, %v15715_v31  ;;  %v5945_v36 = vld [vmem:[%s11859_s10 + $0x2c4] sm:$0xff]  ;;  %v5946_v31 = vld [vmem:[%s11859_s10 + $0x2cc] sm:$0xff] }
 0x395   : > { %v3659_v55 = vpop.f32.mrf.mxu1  ;;  %v4640_v33 = vpop.f32.mrf.mxu0 }
 0x396   : > { %15714 = vst [vmem:[#allocation43_spill] sm:$0xff] %v13879_v45  ;;  %v13882_v34 = vadd.f32 %v10842_v60, %v3878_v9  ;;  %v3876_v52 = vadd.f32 %v3659_v55, %v15717_v58  ;;  %v15721_v9 = vld [vmem:[#allocation56_spill] sm:$0xff] }
 0x397   : > { %v10693_v20 = vpop.f32.mrf.mxu1  ;;  %v10845_v1 = vpop.f32.mrf.mxu0  ;;  %10956 = vmatmul.mubr.bf16.gmra.mxu1 %v6036_v54  ;;  %11108 = vmatmul.mubr.bf16.gmra.mxu0 %v6038_v6  ;;  %v6040_v54 = vpack.c.bf16 %v5944_v30, %v5943_v0  ;;  %v15727_v30 = vld [vmem:[#allocation63_spill] sm:$0xff] }
 0x398   : > { %15716 = vst [vmem:[#allocation44_spill] sm:$0xff] %v13882_v34  ;;  %v13885_v35 = vadd.f32 %v4640_v33, %v3876_v52  ;;  %v3881_v12 = vadd.f32 %v10693_v20, %v15719_v3  ;;  %10959 = vmatprep.mubr.bf16.mxu1 %v6037_v16  ;;  %11111 = vmatprep.mubr.bf16.mxu0 %v6039_v57  ;;  %v15723_v52 = vld [vmem:[#allocation58_spill] sm:$0xff] }
 0x399   : > { %v3672_v28 = vpop.f32.mrf.mxu1  ;;  %v4653_v53 = vpop.f32.mrf.mxu0  ;;  %v6041_v20 = vpack.c.bf16 %v5946_v31, %v5945_v36  ;;  %v5948_v36 = vld [vmem:[%s11859_s10 + $0x2dc] sm:$0xff] }
 0x39a   : > { %15718 = vst [vmem:[#allocation45_spill] sm:$0xff] %v13885_v35  ;;  %v13892_v60 = vadd.f32 %v10845_v1, %v3881_v12  ;;  %v3879_v55 = vadd.f32 %v3672_v28, %v15721_v9  ;;  %v15725_v1 = vld [vmem:[#allocation60_spill] sm:$0xff] }
 0x39b   : > { %v10694_v58 = vpop.f32.mrf.mxu1  ;;  %v10846_v34 = vpop.f32.mrf.mxu0  ;;  %v5947_v9 = vld [vmem:[%s11859_s10 + $0x2d4] sm:$0xff] }
 0x39c   : > { %15720 = vst [vmem:[#allocation46_spill] sm:$0xff] %v13892_v60  ;;  %v13895_v33 = vadd.f32 %v4653_v53, %v3879_v55  ;;  %v3882_v16 = vadd.f32 %v10694_v58, %v15723_v52  ;;  %v5949_v58 = vld [vmem:[%s11859_s10 + $0x2e4] sm:$0xff]  ;;  %v5950_v52 = vld [vmem:[%s11859_s10 + $0x2ec] sm:$0xff] }
 0x39d   : > { %v3675_v3 = vpop.f32.mrf.mxu1  ;;  %v4656_v35 = vpop.f32.mrf.mxu0 }
 0x39e   : > { %15722 = vst [vmem:[#allocation47_spill] sm:$0xff] %v13895_v33  ;;  %v13898_v45 = vadd.f32 %v10846_v34, %v3882_v16  ;;  %v3880_v12 = vadd.f32 %v3675_v3, %v15725_v1  ;;  %v15729_v16 = vld [vmem:[#allocation65_spill] sm:$0xff] }
 0x39f   : > { %v10697_v60 = vpop.f32.mrf.mxu1  ;;  %v10849_v28 = vpop.f32.mrf.mxu0  ;;  %10960 = vmatmul.mubr.bf16.gmra.mxu1 %v6038_v6  ;;  %11112 = vmatmul.mubr.bf16.gmra.mxu0 %v6040_v54  ;;  %v6042_v6 = vpack.c.bf16 %v5948_v36, %v5947_v9  ;;  %v15735_v36 = vld [vmem:[#allocation71_spill] sm:$0xff] }
 0x3a0   : > { %15724 = vst [vmem:[#allocation48_spill] sm:$0xff] %v13898_v45  ;;  %v13901_v0 = vadd.f32 %v4656_v35, %v3880_v12  ;;  %v3885_v53 = vadd.f32 %v10697_v60, %v15727_v30  ;;  %10963 = vmatprep.mubr.bf16.mxu1 %v6039_v57  ;;  %11115 = vmatprep.mubr.bf16.mxu0 %v6041_v20  ;;  %v15731_v12 = vld [vmem:[#allocation67_spill] sm:$0xff] }
 0x3a1   : > { %v3688_v31 = vpop.f32.mrf.mxu1  ;;  %v4669_v55 = vpop.f32.mrf.mxu0  ;;  %v6043_v60 = vpack.c.bf16 %v5950_v52, %v5949_v58  ;;  %v5952_v58 = vld [vmem:[%s11859_s10 + $0x2fc] sm:$0xff] }
 0x3a2   : > { %15726 = vst [vmem:[#allocation50_spill] sm:$0xff] %v13901_v0  ;;  %v13908_v34 = vadd.f32 %v10849_v28, %v3885_v53  ;;  %v3883_v3 = vadd.f32 %v3688_v31, %v15729_v16  ;;  %v15733_v28 = vld [vmem:[#allocation69_spill] sm:$0xff] }
 0x3a3   : > { %v10698_v1 = vpop.f32.mrf.mxu1  ;;  %v10850_v45 = vpop.f32.mrf.mxu0  ;;  %v5951_v16 = vld [vmem:[%s11859_s10 + $0x2f4] sm:$0xff] }
 0x3a4   : > { %15728 = vst [vmem:[#allocation52_spill] sm:$0xff] %v13908_v34  ;;  %v13911_v35 = vadd.f32 %v4669_v55, %v3883_v3  ;;  %v3886_v57 = vadd.f32 %v10698_v1, %v15731_v12  ;;  %v5953_v1 = vld [vmem:[%s11859_s10 + $0x304] sm:$0xff]  ;;  %v5954_v12 = vld [vmem:[%s11859_s10 + $0x30c] sm:$0xff] }
 0x3a5   : > { %v3691_v30 = vpop.f32.mrf.mxu1  ;;  %v4672_v0 = vpop.f32.mrf.mxu0 }
 0x3a6   : > { %15730 = vst [vmem:[#allocation54_spill] sm:$0xff] %v13911_v35  ;;  %v13914_v33 = vadd.f32 %v10850_v45, %v3886_v57  ;;  %v3884_v53 = vadd.f32 %v3691_v30, %v15733_v28  ;;  %v15737_v57 = vld [vmem:[#allocation73_spill] sm:$0xff] }
 0x3a7   : > { %v10701_v34 = vpop.f32.mrf.mxu1  ;;  %v10853_v31 = vpop.f32.mrf.mxu0  ;;  %10964 = vmatmul.mubr.bf16.gmra.mxu1 %v6040_v54  ;;  %11116 = vmatmul.mubr.bf16.gmra.mxu0 %v6042_v6  ;;  %v6044_v54 = vpack.c.bf16 %v5952_v58, %v5951_v16  ;;  %v15743_v58 = vld [vmem:[#allocation79_spill] sm:$0xff] }
 0x3a8   : > { %15732 = vst [vmem:[#allocation56_spill] sm:$0xff] %v13914_v33  ;;  %v13917_v9 = vadd.f32 %v4672_v0, %v3884_v53  ;;  %v3889_v55 = vadd.f32 %v10701_v34, %v15735_v36  ;;  %10967 = vmatprep.mubr.bf16.mxu1 %v6041_v20  ;;  %11119 = vmatprep.mubr.bf16.mxu0 %v6043_v60  ;;  %v15739_v53 = vld [vmem:[#allocation75_spill] sm:$0xff] }
 0x3a9   : > { %v3704_v52 = vpop.f32.mrf.mxu1  ;;  %v4685_v3 = vpop.f32.mrf.mxu0  ;;  %v6045_v34 = vpack.c.bf16 %v5954_v12, %v5953_v1  ;;  %v5956_v1 = vld [vmem:[%s11859_s10 + $0x31c] sm:$0xff] }
 0x3aa   : > { %15734 = vst [vmem:[#allocation58_spill] sm:$0xff] %v13917_v9  ;;  %v13924_v45 = vadd.f32 %v10853_v31, %v3889_v55  ;;  %v3887_v30 = vadd.f32 %v3704_v52, %v15737_v57  ;;  %v15741_v31 = vld [vmem:[#allocation77_spill] sm:$0xff] }
 0x3ab   : > { %v10702_v28 = vpop.f32.mrf.mxu1  ;;  %v10854_v33 = vpop.f32.mrf.mxu0  ;;  %v5955_v57 = vld [vmem:[%s11859_s10 + $0x314] sm:$0xff] }
 0x3ac   : > { %15736 = vst [vmem:[#allocation60_spill] sm:$0xff] %v13924_v45  ;;  %v13927_v0 = vadd.f32 %v4685_v3, %v3887_v30  ;;  %v3890_v20 = vadd.f32 %v10702_v28, %v15739_v53  ;;  %v5957_v28 = vld [vmem:[%s11859_s10 + $0x324] sm:$0xff]  ;;  %v5958_v53 = vld [vmem:[%s11859_s10 + $0x32c] sm:$0xff] }
 0x3ad   : > { %v3707_v36 = vpop.f32.mrf.mxu1  ;;  %v4688_v9 = vpop.f32.mrf.mxu0 }
 0x3ae   : > { %15738 = vst [vmem:[#allocation63_spill] sm:$0xff] %v13927_v0  ;;  %v13930_v35 = vadd.f32 %v10854_v33, %v3890_v20  ;;  %v3888_v55 = vadd.f32 %v3707_v36, %v15741_v31  ;;  %v15745_v20 = vld [vmem:[#allocation81_spill] sm:$0xff] }
 0x3af   : > { %v10705_v45 = vpop.f32.mrf.mxu1  ;;  %v10857_v52 = vpop.f32.mrf.mxu0  ;;  %10968 = vmatmul.mubr.bf16.gmra.mxu1 %v6042_v6  ;;  %11120 = vmatmul.mubr.bf16.gmra.mxu0 %v6044_v54  ;;  %v6046_v6 = vpack.c.bf16 %v5956_v1, %v5955_v57  ;;  %v15751_v1 = vld [vmem:[#allocation87_spill] sm:$0xff] }
 0x3b0   : > { %15740 = vst [vmem:[#allocation65_spill] sm:$0xff] %v13930_v35  ;;  %v13933_v16 = vadd.f32 %v4688_v9, %v3888_v55  ;;  %v3893_v3 = vadd.f32 %v10705_v45, %v15743_v58  ;;  %10971 = vmatprep.mubr.bf16.mxu1 %v6043_v60  ;;  %11123 = vmatprep.mubr.bf16.mxu0 %v6045_v34  ;;  %v15747_v55 = vld [vmem:[#allocation83_spill] sm:$0xff] }
 0x3b1   : > { %v3720_v12 = vpop.f32.mrf.mxu1  ;;  %v4701_v30 = vpop.f32.mrf.mxu0  ;;  %v6047_v45 = vpack.c.bf16 %v5958_v53, %v5957_v28  ;;  %v5960_v28 = vld [vmem:[%s11859_s10 + $0x33c] sm:$0xff] }
 0x3b2   : > { %15742 = vst [vmem:[#allocation67_spill] sm:$0xff] %v13933_v16  ;;  %v13940_v33 = vadd.f32 %v10857_v52, %v3893_v3  ;;  %v3891_v36 = vadd.f32 %v3720_v12, %v15745_v20  ;;  %v15749_v52 = vld [vmem:[#allocation85_spill] sm:$0xff] }
 0x3b3   : > { %v10706_v31 = vpop.f32.mrf.mxu1  ;;  %v10858_v35 = vpop.f32.mrf.mxu0  ;;  %v5959_v20 = vld [vmem:[%s11859_s10 + $0x334] sm:$0xff] }
 0x3b4   : > { %15744 = vst [vmem:[#allocation69_spill] sm:$0xff] %v13940_v33  ;;  %v13943_v9 = vadd.f32 %v4701_v30, %v3891_v36  ;;  %v3894_v60 = vadd.f32 %v10706_v31, %v15747_v55  ;;  %v5961_v31 = vld [vmem:[%s11859_s10 + $0x344] sm:$0xff]  ;;  %v5962_v55 = vld [vmem:[%s11859_s10 + $0x34c] sm:$0xff] }
 0x3b5   : > { %v3723_v58 = vpop.f32.mrf.mxu1  ;;  %v4704_v16 = vpop.f32.mrf.mxu0 }
 0x3b6   : > { %15746 = vst [vmem:[#allocation71_spill] sm:$0xff] %v13943_v9  ;;  %v13946_v0 = vadd.f32 %v10858_v35, %v3894_v60  ;;  %v3892_v3 = vadd.f32 %v3723_v58, %v15749_v52  ;;  %v15753_v60 = vld [vmem:[#allocation89_spill] sm:$0xff] }
 0x3b7   : > { %v10709_v33 = vpop.f32.mrf.mxu1  ;;  %v10861_v12 = vpop.f32.mrf.mxu0  ;;  %10972 = vmatmul.mubr.bf16.gmra.mxu1 %v6044_v54  ;;  %11124 = vmatmul.mubr.bf16.gmra.mxu0 %v6046_v6  ;;  %v6048_v54 = vpack.c.bf16 %v5960_v28, %v5959_v20  ;;  %v15757_v28 = vld [vmem:[#allocation95_spill] sm:$0xff] }
 0x3b8   : > { %15748 = vst [vmem:[#allocation73_spill] sm:$0xff] %v13946_v0  ;;  %v13949_v57 = vadd.f32 %v4704_v16, %v3892_v3  ;;  %v3897_v30 = vadd.f32 %v10709_v33, %v15751_v1  ;;  %10975 = vmatprep.mubr.bf16.mxu1 %v6045_v34  ;;  %11127 = vmatprep.mubr.bf16.mxu0 %v6047_v45  ;;  %v15754_v3 = vld [vmem:[#allocation91_spill] sm:$0xff] }
 0x3b9   : > { %v3736_v53 = vpop.f32.mrf.mxu1  ;;  %v4717_v36 = vpop.f32.mrf.mxu0  ;;  %v6049_v33 = vpack.c.bf16 %v5962_v55, %v5961_v31  ;;  %v5964_v31 = vld [vmem:[%s11859_s10 + $0x35c] sm:$0xff] }
 0x3ba   : > { %15750 = vst [vmem:[#allocation75_spill] sm:$0xff] %v13949_v57  ;;  %v13956_v35 = vadd.f32 %v10861_v12, %v3897_v30  ;;  %v3895_v58 = vadd.f32 %v3736_v53, %v15753_v60  ;;  %v15755_v12 = vld [vmem:[#allocation93_spill] sm:$0xff] }
 0x3bb   : > { %v10710_v52 = vpop.f32.mrf.mxu1  ;;  %v10862_v0 = vpop.f32.mrf.mxu0  ;;  %v5963_v60 = vld [vmem:[%s11859_s10 + $0x354] sm:$0xff] }
 0x3bc   : > { %15752 = vst [vmem:[#allocation77_spill] sm:$0xff] %v13956_v35  ;;  %v13959_v16 = vadd.f32 %v4717_v36, %v3895_v58  ;;  %v3898_v34 = vadd.f32 %v10710_v52, %v15754_v3  ;;  %v5965_v52 = vld [vmem:[%s11859_s10 + $0x364] sm:$0xff]  ;;  %v5966_v3 = vld [vmem:[%s11859_s10 + $0x36c] sm:$0xff] }
 0x3bd   : > { %v3739_v1 = vpop.f32.mrf.mxu1  ;;  %v4720_v57 = vpop.f32.mrf.mxu0 }
 0x3be   : > { %v13962_v9 = vadd.f32 %v10862_v0, %v3898_v34  ;;  %v3896_v30 = vadd.f32 %v3739_v1, %v15755_v12 }
 0x3bf   : > { %v10713_v35 = vpop.f32.mrf.mxu1  ;;  %v10865_v53 = vpop.f32.mrf.mxu0  ;;  %10976 = vmatmul.mubr.bf16.gmra.mxu1 %v6046_v6  ;;  %11128 = vmatmul.mubr.bf16.gmra.mxu0 %v6048_v54  ;;  %v6050_v6 = vpack.c.bf16 %v5964_v31, %v5963_v60 }
 0x3c0   : > { %v13965_v20 = vadd.f32 %v4720_v57, %v3896_v30  ;;  %v3901_v36 = vadd.f32 %v10713_v35, %v15757_v28  ;;  %10979 = vmatprep.mubr.bf16.mxu1 %v6047_v45  ;;  %11131 = vmatprep.mubr.bf16.mxu0 %v6049_v33  ;;  %v6051_v35 = vpack.c.bf16 %v5966_v3, %v5965_v52  ;;  %v5969_v3 = vld [vmem:[%s11859_s10 + $0x384] sm:$0xff] }
 0x3c1   : > { %v3752_v55 = vpop.f32.mrf.mxu1  ;;  %v4733_v58 = vpop.f32.mrf.mxu0 }
 0x3c2   : > { %15756 = vst [vmem:[#allocation79_spill] sm:$0xff] %v13965_v20  ;;  %v13972_v0 = vadd.f32 %v10865_v53, %v3901_v36  ;;  %v3899_v34 = vadd.f32 %v3752_v55, %v13349_v2  ;;  %v5968_v55 = vld [vmem:[%s11859_s10 + $0x37c] sm:$0xff] }
 0x3c3   : > { %v10714_v1 = vpop.f32.mrf.mxu1  ;;  %v10866_v12 = vpop.f32.mrf.mxu0 }
 0x3c4   : > { %v13975_v57 = vadd.f32 %v4733_v58, %v3899_v34  ;;  %v3902_v45 = vadd.f32 %v10714_v1, %v13352_v43  ;;  %v5967_v43 = vld [vmem:[%s11859_s10 + $0x374] sm:$0xff]  ;;  %v5970_v34 = vld [vmem:[%s11859_s10 + $0x38c] sm:$0xff] }
 0x3c5   : > { %v3755_v30 = vpop.f32.mrf.mxu1  ;;  %v4736_v28 = vpop.f32.mrf.mxu0 }
 0x3c6   : > { %v13978_v20 = vadd.f32 %v10866_v12, %v3902_v45  ;;  %v3900_v53 = vadd.f32 %v3755_v30, %v13357_v8  ;;  %v6052_v45 = vpack.c.bf16 %v5968_v55, %v5967_v43 }
 0x3c7   : > { %v10885_v36 = vpop.f32.mrf.mxu1  ;;  %10980 = vmatmul.mubr.bf16.gmra.mxu1 %v6048_v54  ;;  %v11037_v2 = vpop.f32.mrf.mxu0  ;;  %11132 = vmatmul.mubr.bf16.gmra.mxu0 %v6050_v6 }
 0x3c8   : > { %v13981_v60 = vadd.f32 %v4736_v28, %v3900_v53  ;;  %v5731_v31 = vadd.f32 %v10885_v36, %v13366_v10  ;;  %10983 = vmatprep.mubr.bf16.mxu1 %v6049_v33  ;;  %11135 = vmatprep.mubr.bf16.mxu0 %v6051_v35  ;;  %v6053_v33 = vpack.c.bf16 %v5970_v34, %v5969_v3  ;;  %v5973_v34 = vld [vmem:[%s11859_s10 + $0x3a4] sm:$0xff] }
 0x3c9   : > { %v5186_v58 = vpop.f32.mrf.mxu1  ;;  %v6167_v52 = vpop.f32.mrf.mxu0 }
 0x3ca   : > { %v13988_v1 = vadd.f32 %v11037_v2, %v5731_v31  ;;  %v5729_v8 = vadd.f32 %v5186_v58, %v13369_v50  ;;  %v5972_v58 = vld [vmem:[%s11859_s10 + $0x39c] sm:$0xff] }
 0x3cb   : > { %v10886_v12 = vpop.f32.mrf.mxu1  ;;  %v11038_v54 = vpop.f32.mrf.mxu0 }
 0x3cc   : > { %v13991_v30 = vadd.f32 %v6167_v52, %v5729_v8  ;;  %v5732_v10 = vadd.f32 %v10886_v12, %v13372_v25  ;;  %v5971_v25 = vld [vmem:[%s11859_s10 + $0x394] sm:$0xff]  ;;  %v5974_v8 = vld [vmem:[%s11859_s10 + $0x3ac] sm:$0xff] }
 0x3cd   : > { %v5189_v28 = vpop.f32.mrf.mxu1  ;;  %v6170_v53 = vpop.f32.mrf.mxu0 }
 0x3ce   : > { %v13994_v36 = vadd.f32 %v11038_v54, %v5732_v10  ;;  %v5730_v2 = vadd.f32 %v5189_v28, %v13377_v19  ;;  %v6054_v10 = vpack.c.bf16 %v5972_v58, %v5971_v25 }
 0x3cf   : > { %v10889_v31 = vpop.f32.mrf.mxu1  ;;  %10984 = vmatmul.mubr.bf16.gmra.mxu1 %v6050_v6  ;;  %v11041_v50 = vpop.f32.mrf.mxu0  ;;  %11136 = vmatmul.mubr.bf16.gmra.mxu0 %v6052_v45 }
 0x3d0   : > { %v13997_v43 = vadd.f32 %v6170_v53, %v5730_v2  ;;  %v5735_v55 = vadd.f32 %v10889_v31, %v13386_v13  ;;  %10987 = vmatprep.mubr.bf16.mxu1 %v6051_v35  ;;  %11139 = vmatprep.mubr.bf16.mxu0 %v6053_v33  ;;  %v6055_v35 = vpack.c.bf16 %v5974_v8, %v5973_v34  ;;  %v5977_v8 = vld [vmem:[%s11859_s10 + $0x3c4] sm:$0xff] }
 0x3d1   : > { %v5202_v52 = vpop.f32.mrf.mxu1  ;;  %v6183_v3 = vpop.f32.mrf.mxu0 }
 0x3d2   : > { %v14004_v12 = vadd.f32 %v11041_v50, %v5735_v55  ;;  %v5733_v19 = vadd.f32 %v5202_v52, %v13389_v41  ;;  %v5976_v52 = vld [vmem:[%s11859_s10 + $0x3bc] sm:$0xff] }
 0x3d3   : > { %v10890_v54 = vpop.f32.mrf.mxu1  ;;  %v11042_v6 = vpop.f32.mrf.mxu0 }
 0x3d4   : > { %v14007_v28 = vadd.f32 %v6183_v3, %v5733_v19  ;;  %v5736_v13 = vadd.f32 %v10890_v54, %v13392_v21  ;;  %v5975_v21 = vld [vmem:[%s11859_s10 + $0x3b4] sm:$0xff]  ;;  %v5978_v19 = vld [vmem:[%s11859_s10 + $0x3cc] sm:$0xff] }
 0x3d5   : > { %v5205_v53 = vpop.f32.mrf.mxu1  ;;  %v6186_v2 = vpop.f32.mrf.mxu0 }
 0x3d6   : > { %v14010_v31 = vadd.f32 %v11042_v6, %v5736_v13  ;;  %v5734_v50 = vadd.f32 %v5205_v53, %v13397_v63  ;;  %v6056_v13 = vpack.c.bf16 %v5976_v52, %v5975_v21 }
 0x3d7   : > { %v10893_v55 = vpop.f32.mrf.mxu1  ;;  %10988 = vmatmul.mubr.bf16.gmra.mxu1 %v6052_v45  ;;  %v11045_v41 = vpop.f32.mrf.mxu0  ;;  %11140 = vmatmul.mubr.bf16.gmra.mxu0 %v6054_v10 }
 0x3d8   : > { %v14013_v25 = vadd.f32 %v6186_v2, %v5734_v50  ;;  %v5739_v58 = vadd.f32 %v10893_v55, %v13406_v38  ;;  %10991 = vmatprep.mubr.bf16.mxu1 %v6053_v33  ;;  %11143 = vmatprep.mubr.bf16.mxu0 %v6055_v35  ;;  %v6057_v33 = vpack.c.bf16 %v5978_v19, %v5977_v8  ;;  %v5981_v19 = vld [vmem:[%s11859_s10 + $0x3e4] sm:$0xff] }
 0x3d9   : > { %v5218_v3 = vpop.f32.mrf.mxu1  ;;  %v6199_v34 = vpop.f32.mrf.mxu0 }
 0x3da   : > { %v14020_v54 = vadd.f32 %v11045_v41, %v5739_v58  ;;  %v5737_v63 = vadd.f32 %v5218_v3, %v13409_v15  ;;  %v5980_v3 = vld [vmem:[%s11859_s10 + $0x3dc] sm:$0xff] }
 0x3db   : > { %v10894_v6 = vpop.f32.mrf.mxu1  ;;  %v11046_v45 = vpop.f32.mrf.mxu0 }
 0x3dc   : > { %v14023_v53 = vadd.f32 %v6199_v34, %v5737_v63  ;;  %v5740_v38 = vadd.f32 %v10894_v6, %v13412_v56  ;;  %v5979_v56 = vld [vmem:[%s11859_s10 + $0x3d4] sm:$0xff]  ;;  %v5982_v63 = vld [vmem:[%s11859_s10 + $0x3ec] sm:$0xff] }
 0x3dd   : > { %v5221_v2 = vpop.f32.mrf.mxu1  ;;  %v6202_v50 = vpop.f32.mrf.mxu0 }
 0x3de   : > { %v14026_v55 = vadd.f32 %v11046_v45, %v5740_v38  ;;  %v5738_v41 = vadd.f32 %v5221_v2, %v13417_v14  ;;  %v6058_v38 = vpack.c.bf16 %v5980_v3, %v5979_v56 }
 0x3df   : > { %v10897_v58 = vpop.f32.mrf.mxu1  ;;  %10992 = vmatmul.mubr.bf16.gmra.mxu1 %v6054_v10  ;;  %v11049_v15 = vpop.f32.mrf.mxu0  ;;  %11144 = vmatmul.mubr.bf16.gmra.mxu0 %v6056_v13 }
 0x3e0   : > { %v14029_v21 = vadd.f32 %v6202_v50, %v5738_v41  ;;  %v5743_v52 = vadd.f32 %v10897_v58, %v13426_v26  ;;  %10995 = vmatprep.mubr.bf16.mxu1 %v6055_v35  ;;  %11147 = vmatprep.mubr.bf16.mxu0 %v6057_v33  ;;  %v6059_v35 = vpack.c.bf16 %v5982_v63, %v5981_v19  ;;  %v5985_v63 = vld [vmem:[%s11859_s10 + $0x404] sm:$0xff] }
 0x3e1   : > { %v5234_v34 = vpop.f32.mrf.mxu1  ;;  %v6215_v8 = vpop.f32.mrf.mxu0 }
 0x3e2   : > { %v14036_v6 = vadd.f32 %v11049_v15, %v5743_v52  ;;  %v5741_v14 = vadd.f32 %v5234_v34, %v13429_v42  ;;  %v5984_v34 = vld [vmem:[%s11859_s10 + $0x3fc] sm:$0xff] }
 0x3e3   : > { %v10898_v45 = vpop.f32.mrf.mxu1  ;;  %v11050_v10 = vpop.f32.mrf.mxu0 }
 0x3e4   : > { %v14039_v2 = vadd.f32 %v6215_v8, %v5741_v14  ;;  %v5744_v26 = vadd.f32 %v10898_v45, %v13432_v59  ;;  %v5983_v59 = vld [vmem:[%s11859_s10 + $0x3f4] sm:$0xff]  ;;  %v5986_v14 = vld [vmem:[%s11859_s10 + $0x40c] sm:$0xff] }
 0x3e5   : > { %v5237_v50 = vpop.f32.mrf.mxu1  ;;  %v6218_v41 = vpop.f32.mrf.mxu0 }
 0x3e6   : > { %v14042_v58 = vadd.f32 %v11050_v10, %v5744_v26  ;;  %v5742_v15 = vadd.f32 %v5237_v50, %v13437_v47  ;;  %v6060_v26 = vpack.c.bf16 %v5984_v34, %v5983_v59 }
 0x3e7   : > { %v10901_v52 = vpop.f32.mrf.mxu1  ;;  %10996 = vmatmul.mubr.bf16.gmra.mxu1 %v6056_v13  ;;  %v11053_v42 = vpop.f32.mrf.mxu0  ;;  %11148 = vmatmul.mubr.bf16.gmra.mxu0 %v6058_v38 }
 0x3e8   : > { %v14045_v56 = vadd.f32 %v6218_v41, %v5742_v15  ;;  %v5747_v3 = vadd.f32 %v10901_v52, %v13446_v27  ;;  %10999 = vmatprep.mubr.bf16.mxu1 %v6057_v33  ;;  %11151 = vmatprep.mubr.bf16.mxu0 %v6059_v35  ;;  %v6061_v33 = vpack.c.bf16 %v5986_v14, %v5985_v63  ;;  %v5989_v14 = vld [vmem:[%s11859_s10 + $0x424] sm:$0xff] }
 0x3e9   : > { %v5250_v8 = vpop.f32.mrf.mxu1  ;;  %v6231_v19 = vpop.f32.mrf.mxu0 }
 0x3ea   : > { %v14052_v45 = vadd.f32 %v11053_v42, %v5747_v3  ;;  %v5745_v47 = vadd.f32 %v5250_v8, %v13449_v29  ;;  %v5988_v8 = vld [vmem:[%s11859_s10 + $0x41c] sm:$0xff] }
 0x3eb   : > { %v10902_v10 = vpop.f32.mrf.mxu1  ;;  %v11054_v13 = vpop.f32.mrf.mxu0 }
 0x3ec   : > { %v14055_v50 = vadd.f32 %v6231_v19, %v5745_v47  ;;  %v5748_v27 = vadd.f32 %v10902_v10, %v13452_v11  ;;  %v5987_v11 = vld [vmem:[%s11859_s10 + $0x414] sm:$0xff]  ;;  %v5990_v47 = vld [vmem:[%s11859_s10 + $0x42c] sm:$0xff] }
 0x3ed   : > { %v5253_v41 = vpop.f32.mrf.mxu1  ;;  %v6234_v15 = vpop.f32.mrf.mxu0 }
 0x3ee   : > { %v14058_v52 = vadd.f32 %v11054_v13, %v5748_v27  ;;  %v5746_v42 = vadd.f32 %v5253_v41, %v13457_v61  ;;  %v6062_v27 = vpack.c.bf16 %v5988_v8, %v5987_v11 }
 0x3ef   : > { %v10905_v3 = vpop.f32.mrf.mxu1  ;;  %11000 = vmatmul.mubr.bf16.gmra.mxu1 %v6058_v38  ;;  %v11057_v29 = vpop.f32.mrf.mxu0  ;;  %11152 = vmatmul.mubr.bf16.gmra.mxu0 %v6060_v26 }
 0x3f0   : > { %v14061_v59 = vadd.f32 %v6234_v15, %v5746_v42  ;;  %v5751_v34 = vadd.f32 %v10905_v3, %v13466_v7  ;;  %11003 = vmatprep.mubr.bf16.mxu1 %v6059_v35  ;;  %11155 = vmatprep.mubr.bf16.mxu0 %v6061_v33  ;;  %v6063_v35 = vpack.c.bf16 %v5990_v47, %v5989_v14  ;;  %v5993_v47 = vld [vmem:[%s11859_s10 + $0x444] sm:$0xff] }
 0x3f1   : > { %v5266_v19 = vpop.f32.mrf.mxu1  ;;  %v6247_v63 = vpop.f32.mrf.mxu0 }
 0x3f2   : > { %v14068_v10 = vadd.f32 %v11057_v29, %v5751_v34  ;;  %v5749_v61 = vadd.f32 %v5266_v19, %v13469_v32  ;;  %v5992_v19 = vld [vmem:[%s11859_s10 + $0x43c] sm:$0xff] }
 0x3f3   : > { %v10906_v13 = vpop.f32.mrf.mxu1  ;;  %v11058_v38 = vpop.f32.mrf.mxu0 }
 0x3f4   : > { %v14071_v41 = vadd.f32 %v6247_v63, %v5749_v61  ;;  %v5752_v7 = vadd.f32 %v10906_v13, %v13472_v23  ;;  %v5991_v23 = vld [vmem:[%s11859_s10 + $0x434] sm:$0xff]  ;;  %v5994_v61 = vld [vmem:[%s11859_s10 + $0x44c] sm:$0xff] }
 0x3f5   : > { %v5269_v15 = vpop.f32.mrf.mxu1  ;;  %v6250_v42 = vpop.f32.mrf.mxu0 }
 0x3f6   : > { %v14074_v3 = vadd.f32 %v11058_v38, %v5752_v7  ;;  %v5750_v29 = vadd.f32 %v5269_v15, %v13477_v40  ;;  %v6064_v7 = vpack.c.bf16 %v5992_v19, %v5991_v23  ;;  %v15759_v19 = vld [vmem:[#allocation97_spill] sm:$0xff] }
 0x3f7   : > { %v10909_v34 = vpop.f32.mrf.mxu1  ;;  %11004 = vmatmul.mubr.bf16.gmra.mxu1 %v6060_v26  ;;  %v11061_v32 = vpop.f32.mrf.mxu0  ;;  %11156 = vmatmul.mubr.bf16.gmra.mxu0 %v6062_v27 }
 0x3f8   : > { %v14077_v11 = vadd.f32 %v6250_v42, %v5750_v29  ;;  %v5755_v8 = vadd.f32 %v10909_v34, %v13486_v22  ;;  %11007 = vmatprep.mubr.bf16.mxu1 %v6061_v33  ;;  %11159 = vmatprep.mubr.bf16.mxu0 %v6063_v35  ;;  %v6065_v33 = vpack.c.bf16 %v5994_v61, %v5993_v47 }
 0x3f9   : > { %v5282_v63 = vpop.f32.mrf.mxu1  ;;  %v6263_v14 = vpop.f32.mrf.mxu0 }
 0x3fa   : > { %v14084_v13 = vadd.f32 %v11061_v32, %v5755_v8  ;;  %v5753_v40 = vadd.f32 %v5282_v63, %v13489_v4 }
 0x3fb   : > { %v10910_v38 = vpop.f32.mrf.mxu1  ;;  %v11062_v26 = vpop.f32.mrf.mxu0 }
 0x3fc   : > { %v14087_v15 = vadd.f32 %v6263_v14, %v5753_v40  ;;  %v5756_v22 = vadd.f32 %v10910_v38, %v13492_v44  ;;  %v5995_v44 = vld [vmem:[%s11859_s10 + $0x454] sm:$0xff]  ;;  %v5996_v14 = vld [vmem:[%s11859_s10 + $0x45c] sm:$0xff]  ;;  %v5997_v40 = vld [vmem:[%s11859_s10 + $0x464] sm:$0xff] }
 0x3fd   : > { %v5285_v42 = vpop.f32.mrf.mxu1  ;;  %v6266_v29 = vpop.f32.mrf.mxu0  ;;  %v5998_v38 = vld [vmem:[%s11859_s10 + $0x46c] sm:$0xff] }
 0x3fe   : > { %v14090_v34 = vadd.f32 %v11062_v26, %v5756_v22  ;;  %v5754_v32 = vadd.f32 %v5285_v42, %v13497_v17  ;;  %v6066_v42 = vpack.c.bf16 %v5996_v14, %v5995_v44 }
 0x3ff   : > { %v10913_v8 = vpop.f32.mrf.mxu1  ;;  %11008 = vmatmul.mubr.bf16.gmra.mxu1 %v6062_v27  ;;  %v11065_v4 = vpop.f32.mrf.mxu0  ;;  %11160 = vmatmul.mubr.bf16.gmra.mxu0 %v6064_v7 }
 0x400   : > { %v14093_v23 = vadd.f32 %v6266_v29, %v5754_v32  ;;  %v5759_v63 = vadd.f32 %v10913_v8, %v15759_v19  ;;  %11011 = vmatprep.mubr.bf16.mxu1 %v6063_v35  ;;  %11163 = vmatprep.mubr.bf16.mxu0 %v6065_v33  ;;  %v6067_v32 = vpack.c.bf16 %v5998_v38, %v5997_v40  ;;  %v6846_v40 = vld [vmem:[%s11859_s10 + $0x45] sm:$0xff] }
 0x401   : > { %v5298_v47 = vpop.f32.mrf.mxu1  ;;  %v6279_v61 = vpop.f32.mrf.mxu0 }
 0x402   : > { %15758 = vst [vmem:[#allocation81_spill] sm:$0xff] %v14093_v23  ;;  %v14100_v26 = vadd.f32 %v11065_v4, %v5759_v63  ;;  %v5757_v17 = vadd.f32 %v5298_v47, %v13509_v49  ;;  %v15761_v4 = vld [vmem:[#allocation99_spill] sm:$0xff] }
 0x403   : > { %v10914_v22 = vpop.f32.mrf.mxu1  ;;  %v11066_v27 = vpop.f32.mrf.mxu0 }
 0x404   : > { %v14103_v29 = vadd.f32 %v6279_v61, %v5757_v17  ;;  %v5760_v35 = vadd.f32 %v10914_v22, %v13512_v51  ;;  %v5999_v51 = vld [vmem:[%s11859_s10 + $0x474] sm:$0xff]  ;;  %v6000_v61 = vld [vmem:[%s11859_s10 + $0x47c] sm:$0xff] }
 0x405   : > { %v5301_v8 = vpop.f32.mrf.mxu1  ;;  %v6282_v19 = vpop.f32.mrf.mxu0  ;;  %v6847_v22 = vld [vmem:[%s11859_s10 + $0x4d] sm:$0xff] }
 0x406   : > { %v14106_v23 = vadd.f32 %v11066_v27, %v5760_v35  ;;  %v5758_v63 = vadd.f32 %v5301_v8, %v15761_v4  ;;  %v7827_v27 = vld [vmem:[%s11859_s10 + $0x46] sm:$0xff]  ;;  %v7828_v35 = vld [vmem:[%s11859_s10 + $0x4e] sm:$0xff] }
 0x407   : > { %v10917_v49 = vpop.f32.mrf.mxu1  ;;  %11012 = vmatmul.mubr.bf16.gmra.mxu1 %v6064_v7  ;;  %v11069_v44 = vpop.f32.mrf.mxu0  ;;  %11164 = vmatmul.mubr.bf16.gmra.mxu0 %v6066_v42 }
 0x408   : > { %15760 = vst [vmem:[#allocation83_spill] sm:$0xff] %v14106_v23  ;;  %v14109_v14 = vadd.f32 %v6282_v19, %v5758_v63  ;;  %v5763_v47 = vadd.f32 %v10917_v49, %v13526_v48  ;;  %11015 = vmatprep.mubr.bf16.mxu1 %v6065_v33  ;;  %11167 = vmatprep.mubr.bf16.mxu0 %v6067_v32 }
 0x409   : > { %v5314_v38 = vpop.f32.mrf.mxu1  ;;  %v6295_v17 = vpop.f32.mrf.mxu0  ;;  %v6068_v63 = vpack.c.bf16 %v6000_v61, %v5999_v51  ;;  %v6982_v32 = vpack.c.bf16 %v6847_v22, %v6846_v40  ;;  %v7963_v49 = vpack.c.bf16 %v7828_v35, %v7827_v27  ;;  %v6848_v61 = vld [vmem:[%s11859_s10 + $0x55] sm:$0xff]  ;;  %v7830_v22 = vld [vmem:[%s11859_s10 + $0x5e] sm:$0xff] }
 0x40a   : > { %15762 = vst [vmem:[#allocation85_spill] sm:$0xff] %v14109_v14  ;;  %v14118_v8 = vadd.f32 %v11069_v44, %v5763_v47  ;;  %v5761_v7 = vadd.f32 %v5314_v38, %v13529_v5  ;;  %v6850_v27 = vld [vmem:[%s11859_s10 + $0x65] sm:$0xff] }
 0x40b   : > { %v10918_v4 = vpop.f32.mrf.mxu1  ;;  %v11070_v19 = vpop.f32.mrf.mxu0 }
 0x40c   : > { %v14121_v48 = vadd.f32 %v6295_v17, %v5761_v7  ;;  %v5764_v33 = vadd.f32 %v10918_v4, %v13532_v18  ;;  %v6849_v18 = vld [vmem:[%s11859_s10 + $0x5d] sm:$0xff]  ;;  %v7831_v7 = vld [vmem:[%s11859_s10 + $0x66] sm:$0xff]  ;;  %v7832_v4 = vld [vmem:[%s11859_s10 + $0x6e] sm:$0xff] }
 0x40d   : > { %v5317_v14 = vpop.f32.mrf.mxu1  ;;  %v6298_v23 = vpop.f32.mrf.mxu0  ;;  %v7829_v17 = vld [vmem:[%s11859_s10 + $0x56] sm:$0xff] }
 0x40e   : > { %15763 = vst [vmem:[#allocation87_spill] sm:$0xff] %v14121_v48  ;;  %v14124_v44 = vadd.f32 %v11070_v19, %v5764_v33  ;;  %v5762_v5 = vadd.f32 %v5317_v14, %v13536_v62  ;;  %v6851_v14 = vld [vmem:[%s11859_s10 + $0x6d] sm:$0xff] }
 0x40f   : > { %v10921_v47 = vpop.f32.mrf.mxu1  ;;  %11016 = vmatmul.mubr.bf16.gmra.mxu1 %v6066_v42  ;;  %v11073_v51 = vpop.f32.mrf.mxu0  ;;  %11168 = vmatmul.mubr.bf16.gmra.mxu0 %v6068_v63  ;;  %v15767_v19 = vld [vmem:[#allocation101_spill] sm:$0xff] }
 0x410   : > { %15764 = vst [vmem:[#allocation89_spill] sm:$0xff] %v14124_v44  ;;  %v14129_v40 = vadd.f32 %v6298_v23, %v5762_v5  ;;  %v5767_v38 = vadd.f32 %v10921_v47, %v13542_v39  ;;  %11187 = vmatprep.mubr.bf16.mxu1 %v6982_v32  ;;  %11339 = vmatprep.mubr.bf16.mxu0 %v7963_v49  ;;  %v15768_v49 = vld [vmem:[#allocation103_spill] sm:$0xff] }
 0x411   : > { %v5330_v35 = vpop.f32.mrf.mxu1  ;;  %v6311_v62 = vpop.f32.mrf.mxu0  ;;  %v6983_v5 = vpack.c.bf16 %v6849_v18, %v6848_v61  ;;  %v7964_v39 = vpack.c.bf16 %v7830_v22, %v7829_v17  ;;  %v7965_v44 = vpack.c.bf16 %v7832_v4, %v7831_v7  ;;  %v6852_v18 = vld [vmem:[%s11859_s10 + $0x75] sm:$0xff]  ;;  %v6853_v17 = vld [vmem:[%s11859_s10 + $0x7d] sm:$0xff]  ;;  %v6854_v7 = vld [vmem:[%s11859_s10 + $0x85] sm:$0xff] }
 0x412   : > { %15765 = vst [vmem:[#allocation91_spill] sm:$0xff] %v14129_v40  ;;  %v14138_v42 = vadd.f32 %v11073_v51, %v5767_v38  ;;  %v5765_v63 = vadd.f32 %v5330_v35, %v15767_v19  ;;  %v6984_v40 = vpack.c.bf16 %v6851_v14, %v6850_v27  ;;  %v15770_v35 = vld [vmem:[#allocation104_spill] sm:$0xff]  ;;  %v7834_v14 = vld [vmem:[%s11859_s10 + $0x7e] sm:$0xff] }
 0x413   : > { %v10922_v33 = vpop.f32.mrf.mxu1  ;;  %v11074_v23 = vpop.f32.mrf.mxu0 }
 0x414   : > { %15766 = vst [vmem:[#allocation93_spill] sm:$0xff] %v14138_v42  ;;  %v14141_v32 = vadd.f32 %v6311_v62, %v5765_v63  ;;  %v5768_v47 = vadd.f32 %v10922_v33, %v15768_v49  ;;  %v7833_v62 = vld [vmem:[%s11859_s10 + $0x76] sm:$0xff]  ;;  %v6855_v63 = vld [vmem:[%s11859_s10 + $0x8d] sm:$0xff] }
 0x415   : > { %v5333_v48 = vpop.f32.mrf.mxu1  ;;  %v6314_v51 = vpop.f32.mrf.mxu0  ;;  %v7835_v33 = vld [vmem:[%s11859_s10 + $0x86] sm:$0xff] }
 0x416   : > { %v14144_v38 = vadd.f32 %v11074_v23, %v5768_v47  ;;  %v5766_v19 = vadd.f32 %v5333_v48, %v15770_v35  ;;  %v7836_v23 = vld [vmem:[%s11859_s10 + $0x8e] sm:$0xff]  ;;  %v6985_v35 = vpack.c.bf16 %v6853_v17, %v6852_v18 }
 0x417   : > { %v10925_v42 = vpop.f32.mrf.mxu1  ;;  %v11077_v61 = vpop.f32.mrf.mxu0  ;;  %11188 = vmatmul.mubr.bf16.vlgmr.msra.gmra.mxu1 %v6983_v5  ;;  %11340 = vmatmul.mubr.bf16.vlgmr.msra.gmra.mxu0 %v7964_v39  ;;  %v15773_v5 = vld [vmem:[#allocation105_spill] sm:$0xff] }
 0x418   : > { %15769 = vst [vmem:[#allocation95_spill] sm:$0xff] %v14144_v38  ;;  %v14149_v22 = vadd.f32 %v6314_v51, %v5766_v19  ;;  %v5771_v27 = vadd.f32 %v10925_v42, %v13574_v37  ;;  %11191 = vmatprep.mubr.bf16.mxu1 %v6984_v40  ;;  %11343 = vmatprep.mubr.bf16.mxu0 %v7965_v44  ;;  %v15774_v44 = vld [vmem:[#allocation106_spill] sm:$0xff] }
 0x419   : > { %v5346_v4 = vpop.f32.mrf.mxu1  ;;  %v6327_v48 = vpop.f32.mrf.mxu0  ;;  %v7966_v37 = vpack.c.bf16 %v7834_v14, %v7833_v62  ;;  %v6986_v19 = vpack.c.bf16 %v6855_v63, %v6854_v7  ;;  %v6856_v17 = vld [vmem:[%s11859_s10 + $0x95] sm:$0xff]  ;;  %v6857_v62 = vld [vmem:[%s11859_s10 + $0x9d] sm:$0xff] }
 0x41a   : > { %15771 = vst [vmem:[#allocation97_spill] sm:$0xff] %v14149_v22  ;;  %v14158_v49 = vadd.f32 %v11077_v61, %v5771_v27  ;;  %v5769_v39 = vadd.f32 %v5346_v4, %v15773_v5  ;;  %v7967_v22 = vpack.c.bf16 %v7836_v23, %v7835_v33  ;;  %v15776_v4 = vld [vmem:[#allocation107_spill] sm:$0xff] }
 0x41b   : > { %v10926_v47 = vpop.f32.mrf.mxu1  ;;  %v11078_v51 = vpop.f32.mrf.mxu0  ;;  %v7838_v63 = vld [vmem:[%s11859_s10 + $0x9e] sm:$0xff] }
 0x41c   : > { %15772 = vst [vmem:[#allocation99_spill] sm:$0xff] %v14158_v49  ;;  %v14161_v40 = vadd.f32 %v6327_v48, %v5769_v39  ;;  %v5772_v42 = vadd.f32 %v10926_v47, %v15774_v44  ;;  %v7837_v48 = vld [vmem:[%s11859_s10 + $0x96] sm:$0xff]  ;;  %v6858_v33 = vld [vmem:[%s11859_s10 + $0xa5] sm:$0xff]  ;;  %v6859_v39 = vld [vmem:[%s11859_s10 + $0xad] sm:$0xff] }
 0x41d   : > { %v5349_v38 = vpop.f32.mrf.mxu1  ;;  %v6330_v61 = vpop.f32.mrf.mxu0  ;;  %v7839_v47 = vld [vmem:[%s11859_s10 + $0xa6] sm:$0xff] }
 0x41e   : > { %v14164_v27 = vadd.f32 %v11078_v51, %v5772_v42  ;;  %v5770_v5 = vadd.f32 %v5349_v38, %v15776_v4  ;;  %v7840_v51 = vld [vmem:[%s11859_s10 + $0xae] sm:$0xff]  ;;  %v6987_v4 = vpack.c.bf16 %v6857_v62, %v6856_v17 }
 0x41f   : > { %v10929_v49 = vpop.f32.mrf.mxu1  ;;  %v11081_v18 = vpop.f32.mrf.mxu0  ;;  %11192 = vmatmul.mubr.bf16.gmra.mxu1 %v6985_v35  ;;  %11344 = vmatmul.mubr.bf16.gmra.mxu0 %v7966_v37  ;;  %v15779_v35 = vld [vmem:[#allocation61_spill] sm:$0xff] }
 0x420   : > { %15775 = vst [vmem:[#allocation101_spill] sm:$0xff] %v14164_v27  ;;  %v14169_v14 = vadd.f32 %v6330_v61, %v5770_v5  ;;  %v5775_v7 = vadd.f32 %v10929_v49, %v13596_v46  ;;  %11195 = vmatprep.mubr.bf16.mxu1 %v6986_v19  ;;  %11347 = vmatprep.mubr.bf16.mxu0 %v7967_v22  ;;  %v15781_v22 = vld [vmem:[#allocation49_spill] sm:$0xff] }
 0x421   : > { %v5362_v23 = vpop.f32.mrf.mxu1  ;;  %v6343_v38 = vpop.f32.mrf.mxu0  ;;  %v7968_v46 = vpack.c.bf16 %v7838_v63, %v7837_v48  ;;  %v6988_v5 = vpack.c.bf16 %v6859_v39, %v6858_v33  ;;  %v6860_v62 = vld [vmem:[%s11859_s10 + $0xb5] sm:$0xff]  ;;  %v6861_v48 = vld [vmem:[%s11859_s10 + $0xbd] sm:$0xff] }
 0x422   : > { %15777 = vst [vmem:[#allocation103_spill] sm:$0xff] %v14169_v14  ;;  %v14178_v44 = vadd.f32 %v11081_v18, %v5775_v7  ;;  %v5773_v37 = vadd.f32 %v5362_v23, %v15779_v35  ;;  %v7969_v14 = vpack.c.bf16 %v7840_v51, %v7839_v47  ;;  %v15783_v23 = vld [vmem:[#allocation51_spill] sm:$0xff]  ;;  %v15785_v33 = vld [vmem:[#allocation53_spill] sm:$0xff] }
 0x423   : > { %v10930_v42 = vpop.f32.mrf.mxu1  ;;  %v11082_v61 = vpop.f32.mrf.mxu0  ;;  %v7841_v39 = vld [vmem:[%s11859_s10 + $0xb6] sm:$0xff]  ;;  %v7842_v47 = vld [vmem:[%s11859_s10 + $0xbe] sm:$0xff] }
 0x424   : > { %15778 = vst [vmem:[#allocation104_spill] sm:$0xff] %v14178_v44  ;;  %v14181_v49 = vadd.f32 %v6343_v38, %v5773_v37  ;;  %v5776_v19 = vadd.f32 %v10930_v42, %v15781_v22  ;;  %v6862_v51 = vld [vmem:[%s11859_s10 + $0xc5] sm:$0xff]  ;;  %v6863_v42 = vld [vmem:[%s11859_s10 + $0xcd] sm:$0xff] }
 0x425   : > { %v5365_v27 = vpop.f32.mrf.mxu1  ;;  %v6346_v18 = vpop.f32.mrf.mxu0  ;;  %v7844_v22 = vld [vmem:[%s11859_s10 + $0xce] sm:$0xff] }
 0x426   : > { %15780 = vst [vmem:[#allocation105_spill] sm:$0xff] %v14181_v49  ;;  %v14184_v7 = vadd.f32 %v11082_v61, %v5776_v19  ;;  %v5774_v35 = vadd.f32 %v5365_v27, %v15783_v23  ;;  %v7843_v61 = vld [vmem:[%s11859_s10 + $0xc6] sm:$0xff] }
 0x427   : > { %v10933_v44 = vpop.f32.mrf.mxu1  ;;  %v11085_v17 = vpop.f32.mrf.mxu0  ;;  %11196 = vmatmul.mubr.bf16.gmra.mxu1 %v6987_v4  ;;  %11348 = vmatmul.mubr.bf16.gmra.mxu0 %v7968_v46  ;;  %v15787_v4 = vld [vmem:[#allocation55_spill] sm:$0xff] }
 0x428   : > { %15782 = vst [vmem:[#allocation106_spill] sm:$0xff] %v14184_v7  ;;  %v14189_v63 = vadd.f32 %v6346_v18, %v5774_v35  ;;  %v5779_v38 = vadd.f32 %v10933_v44, %v15785_v33  ;;  %11199 = vmatprep.mubr.bf16.mxu1 %v6988_v5  ;;  %11351 = vmatprep.mubr.bf16.mxu0 %v7969_v14  ;;  %v15789_v14 = vld [vmem:[#allocation57_spill] sm:$0xff] }
 0x429   : > { %v5378_v37 = vpop.f32.mrf.mxu1  ;;  %v6359_v27 = vpop.f32.mrf.mxu0  ;;  %v6989_v35 = vpack.c.bf16 %v6861_v48, %v6860_v62  ;;  %v7970_v44 = vpack.c.bf16 %v7842_v47, %v7841_v39  ;;  %v7971_v7 = vpack.c.bf16 %v7844_v22, %v7843_v61  ;;  %v6864_v48 = vld [vmem:[%s11859_s10 + $0xd5] sm:$0xff]  ;;  %v6865_v39 = vld [vmem:[%s11859_s10 + $0xdd] sm:$0xff]  ;;  %v6866_v22 = vld [vmem:[%s11859_s10 + $0xe5] sm:$0xff] }
 0x42a   : > { %15784 = vst [vmem:[#allocation107_spill] sm:$0xff] %v14189_v63  ;;  %v14198_v19 = vadd.f32 %v11085_v17, %v5779_v38  ;;  %v5777_v46 = vadd.f32 %v5378_v37, %v15787_v4  ;;  %v6990_v63 = vpack.c.bf16 %v6863_v42, %v6862_v51  ;;  %v15791_v37 = vld [vmem:[#allocation59_spill] sm:$0xff]  ;;  %v15793_v51 = vld [vmem:[#allocation62_spill] sm:$0xff] }
 0x42b   : > { %v10934_v23 = vpop.f32.mrf.mxu1  ;;  %v11086_v18 = vpop.f32.mrf.mxu0  ;;  %v7845_v42 = vld [vmem:[%s11859_s10 + $0xd6] sm:$0xff]  ;;  %v7846_v61 = vld [vmem:[%s11859_s10 + $0xde] sm:$0xff] }
 0x42c   : > { %15786 = vst [vmem:[#allocation61_spill] sm:$0xff] %v14198_v19  ;;  %v14201_v5 = vadd.f32 %v6359_v27, %v5777_v46  ;;  %v5780_v33 = vadd.f32 %v10934_v23, %v15789_v14  ;;  %v6867_v23 = vld [vmem:[%s11859_s10 + $0xed] sm:$0xff] }
 0x42d   : > { %v5381_v49 = vpop.f32.mrf.mxu1  ;;  %v6362_v17 = vpop.f32.mrf.mxu0  ;;  %v7848_v14 = vld [vmem:[%s11859_s10 + $0xee] sm:$0xff] }
 0x42e   : > { %15788 = vst [vmem:[#allocation49_spill] sm:$0xff] %v14201_v5  ;;  %v14204_v38 = vadd.f32 %v11086_v18, %v5780_v33  ;;  %v5778_v4 = vadd.f32 %v5381_v49, %v15791_v37  ;;  %v7847_v18 = vld [vmem:[%s11859_s10 + $0xe6] sm:$0xff] }
 0x42f   : > { %v10937_v19 = vpop.f32.mrf.mxu1  ;;  %v11089_v62 = vpop.f32.mrf.mxu0  ;;  %11200 = vmatmul.mubr.bf16.gmra.mxu1 %v6989_v35  ;;  %11352 = vmatmul.mubr.bf16.gmra.mxu0 %v7970_v44  ;;  %v15795_v35 = vld [vmem:[#allocation64_spill] sm:$0xff] }
 0x430   : > { %15790 = vst [vmem:[#allocation51_spill] sm:$0xff] %v14204_v38  ;;  %v14209_v47 = vadd.f32 %v6362_v17, %v5778_v4  ;;  %v5783_v27 = vadd.f32 %v10937_v19, %v15793_v51  ;;  %11203 = vmatprep.mubr.bf16.mxu1 %v6990_v63  ;;  %11355 = vmatprep.mubr.bf16.mxu0 %v7971_v7  ;;  %v15797_v7 = vld [vmem:[#allocation66_spill] sm:$0xff] }
 0x431   : > { %v5394_v46 = vpop.f32.mrf.mxu1  ;;  %v6375_v49 = vpop.f32.mrf.mxu0  ;;  %v6991_v4 = vpack.c.bf16 %v6865_v39, %v6864_v48  ;;  %v7972_v19 = vpack.c.bf16 %v7846_v61, %v7845_v42  ;;  %v7973_v38 = vpack.c.bf16 %v7848_v14, %v7847_v18  ;;  %v6868_v39 = vld [vmem:[%s11859_s10 + $0xf5] sm:$0xff]  ;;  %v6869_v42 = vld [vmem:[%s11859_s10 + $0xfd] sm:$0xff]  ;;  %v6870_v14 = vld [vmem:[%s11859_s10 + $0x105] sm:$0xff] }
 0x432   : > { %15792 = vst [vmem:[#allocation53_spill] sm:$0xff] %v14209_v47  ;;  %v14218_v33 = vadd.f32 %v11089_v62, %v5783_v27  ;;  %v5781_v44 = vadd.f32 %v5394_v46, %v15795_v35  ;;  %v6992_v47 = vpack.c.bf16 %v6867_v23, %v6866_v22  ;;  %v15799_v46 = vld [vmem:[#allocation68_spill] sm:$0xff]  ;;  %v15801_v22 = vld [vmem:[#allocation70_spill] sm:$0xff] }
 0x433   : > { %v10938_v37 = vpop.f32.mrf.mxu1  ;;  %v11090_v17 = vpop.f32.mrf.mxu0  ;;  %v7849_v23 = vld [vmem:[%s11859_s10 + $0xf6] sm:$0xff]  ;;  %v7850_v18 = vld [vmem:[%s11859_s10 + $0xfe] sm:$0xff] }
 0x434   : > { %15794 = vst [vmem:[#allocation55_spill] sm:$0xff] %v14218_v33  ;;  %v14221_v63 = vadd.f32 %v6375_v49, %v5781_v44  ;;  %v5784_v51 = vadd.f32 %v10938_v37, %v15797_v7  ;;  %v6871_v37 = vld [vmem:[%s11859_s10 + $0x10d] sm:$0xff] }
 0x435   : > { %v5397_v5 = vpop.f32.mrf.mxu1  ;;  %v6378_v62 = vpop.f32.mrf.mxu0  ;;  %v7852_v7 = vld [vmem:[%s11859_s10 + $0x10e] sm:$0xff] }
 0x436   : > { %15796 = vst [vmem:[#allocation57_spill] sm:$0xff] %v14221_v63  ;;  %v14224_v27 = vadd.f32 %v11090_v17, %v5784_v51  ;;  %v5782_v35 = vadd.f32 %v5397_v5, %v15799_v46  ;;  %v7851_v17 = vld [vmem:[%s11859_s10 + $0x106] sm:$0xff] }
 0x437   : > { %v10941_v33 = vpop.f32.mrf.mxu1  ;;  %v11093_v48 = vpop.f32.mrf.mxu0  ;;  %11204 = vmatmul.mubr.bf16.gmra.mxu1 %v6991_v4  ;;  %11356 = vmatmul.mubr.bf16.gmra.mxu0 %v7972_v19  ;;  %v15803_v4 = vld [vmem:[#allocation72_spill] sm:$0xff] }
 0x438   : > { %15798 = vst [vmem:[#allocation59_spill] sm:$0xff] %v14224_v27  ;;  %v14229_v61 = vadd.f32 %v6378_v62, %v5782_v35  ;;  %v5787_v49 = vadd.f32 %v10941_v33, %v15801_v22  ;;  %11207 = vmatprep.mubr.bf16.mxu1 %v6992_v47  ;;  %11359 = vmatprep.mubr.bf16.mxu0 %v7973_v38  ;;  %v15805_v38 = vld [vmem:[#allocation74_spill] sm:$0xff] }
 0x439   : > { %v5410_v44 = vpop.f32.mrf.mxu1  ;;  %v6391_v5 = vpop.f32.mrf.mxu0  ;;  %v6993_v35 = vpack.c.bf16 %v6869_v42, %v6868_v39  ;;  %v7974_v33 = vpack.c.bf16 %v7850_v18, %v7849_v23  ;;  %v7975_v27 = vpack.c.bf16 %v7852_v7, %v7851_v17  ;;  %v6872_v42 = vld [vmem:[%s11859_s10 + $0x115] sm:$0xff]  ;;  %v6873_v23 = vld [vmem:[%s11859_s10 + $0x11d] sm:$0xff]  ;;  %v6874_v7 = vld [vmem:[%s11859_s10 + $0x125] sm:$0xff] }
 0x43a   : > { %15800 = vst [vmem:[#allocation62_spill] sm:$0xff] %v14229_v61  ;;  %v14238_v51 = vadd.f32 %v11093_v48, %v5787_v49  ;;  %v5785_v19 = vadd.f32 %v5410_v44, %v15803_v4  ;;  %v6994_v61 = vpack.c.bf16 %v6871_v37, %v6870_v14  ;;  %v15807_v44 = vld [vmem:[#allocation76_spill] sm:$0xff]  ;;  %v15809_v14 = vld [vmem:[#allocation78_spill] sm:$0xff] }
 0x43b   : > { %v10942_v46 = vpop.f32.mrf.mxu1  ;;  %v11094_v62 = vpop.f32.mrf.mxu0  ;;  %v7853_v37 = vld [vmem:[%s11859_s10 + $0x116] sm:$0xff]  ;;  %v7854_v17 = vld [vmem:[%s11859_s10 + $0x11e] sm:$0xff] }
 0x43c   : > { %15802 = vst [vmem:[#allocation64_spill] sm:$0xff] %v14238_v51  ;;  %v14241_v47 = vadd.f32 %v6391_v5, %v5785_v19  ;;  %v5788_v22 = vadd.f32 %v10942_v46, %v15805_v38  ;;  %v6875_v46 = vld [vmem:[%s11859_s10 + $0x12d] sm:$0xff] }
 0x43d   : > { %v5413_v63 = vpop.f32.mrf.mxu1  ;;  %v6394_v48 = vpop.f32.mrf.mxu0  ;;  %v7856_v38 = vld [vmem:[%s11859_s10 + $0x12e] sm:$0xff] }
 0x43e   : > { %15804 = vst [vmem:[#allocation66_spill] sm:$0xff] %v14241_v47  ;;  %v14244_v49 = vadd.f32 %v11094_v62, %v5788_v22  ;;  %v5786_v4 = vadd.f32 %v5413_v63, %v15807_v44  ;;  %v7855_v62 = vld [vmem:[%s11859_s10 + $0x126] sm:$0xff] }
 0x43f   : > { %v10945_v51 = vpop.f32.mrf.mxu1  ;;  %v11097_v39 = vpop.f32.mrf.mxu0  ;;  %11208 = vmatmul.mubr.bf16.gmra.mxu1 %v6993_v35  ;;  %11360 = vmatmul.mubr.bf16.gmra.mxu0 %v7974_v33  ;;  %v15811_v35 = vld [vmem:[#allocation80_spill] sm:$0xff] }
 0x440   : > { %15806 = vst [vmem:[#allocation68_spill] sm:$0xff] %v14244_v49  ;;  %v14249_v18 = vadd.f32 %v6394_v48, %v5786_v4  ;;  %v5791_v5 = vadd.f32 %v10945_v51, %v15809_v14  ;;  %11211 = vmatprep.mubr.bf16.mxu1 %v6994_v61  ;;  %11363 = vmatprep.mubr.bf16.mxu0 %v7975_v27  ;;  %v15813_v27 = vld [vmem:[#allocation82_spill] sm:$0xff] }
 0x441   : > { %v5426_v19 = vpop.f32.mrf.mxu1  ;;  %v6407_v63 = vpop.f32.mrf.mxu0  ;;  %v6995_v4 = vpack.c.bf16 %v6873_v23, %v6872_v42  ;;  %v7976_v51 = vpack.c.bf16 %v7854_v17, %v7853_v37  ;;  %v7977_v49 = vpack.c.bf16 %v7856_v38, %v7855_v62  ;;  %v6876_v23 = vld [vmem:[%s11859_s10 + $0x135] sm:$0xff]  ;;  %v6877_v37 = vld [vmem:[%s11859_s10 + $0x13d] sm:$0xff]  ;;  %v6878_v38 = vld [vmem:[%s11859_s10 + $0x145] sm:$0xff] }
 0x442   : > { %15808 = vst [vmem:[#allocation70_spill] sm:$0xff] %v14249_v18  ;;  %v14258_v22 = vadd.f32 %v11097_v39, %v5791_v5  ;;  %v5789_v33 = vadd.f32 %v5426_v19, %v15811_v35  ;;  %v6996_v18 = vpack.c.bf16 %v6875_v46, %v6874_v7  ;;  %v15815_v19 = vld [vmem:[#allocation84_spill] sm:$0xff]  ;;  %v15817_v7 = vld [vmem:[#allocation86_spill] sm:$0xff] }
 0x443   : > { %v10946_v44 = vpop.f32.mrf.mxu1  ;;  %v11098_v48 = vpop.f32.mrf.mxu0  ;;  %v7857_v46 = vld [vmem:[%s11859_s10 + $0x136] sm:$0xff]  ;;  %v7858_v62 = vld [vmem:[%s11859_s10 + $0x13e] sm:$0xff] }
 0x444   : > { %15810 = vst [vmem:[#allocation72_spill] sm:$0xff] %v14258_v22  ;;  %v14261_v61 = vadd.f32 %v6407_v63, %v5789_v33  ;;  %v5792_v14 = vadd.f32 %v10946_v44, %v15813_v27  ;;  %v6879_v44 = vld [vmem:[%s11859_s10 + $0x14d] sm:$0xff] }
 0x445   : > { %v5429_v47 = vpop.f32.mrf.mxu1  ;;  %v6410_v39 = vpop.f32.mrf.mxu0  ;;  %v7860_v27 = vld [vmem:[%s11859_s10 + $0x14e] sm:$0xff] }
 0x446   : > { %15812 = vst [vmem:[#allocation74_spill] sm:$0xff] %v14261_v61  ;;  %v14264_v5 = vadd.f32 %v11098_v48, %v5792_v14  ;;  %v5790_v35 = vadd.f32 %v5429_v47, %v15815_v19  ;;  %v7859_v48 = vld [vmem:[%s11859_s10 + $0x146] sm:$0xff] }
 0x447   : > { %v10949_v22 = vpop.f32.mrf.mxu1  ;;  %v11101_v42 = vpop.f32.mrf.mxu0  ;;  %11212 = vmatmul.mubr.bf16.gmra.mxu1 %v6995_v4  ;;  %11364 = vmatmul.mubr.bf16.gmra.mxu0 %v7976_v51  ;;  %v15819_v4 = vld [vmem:[#allocation88_spill] sm:$0xff] }
 0x448   : > { %15814 = vst [vmem:[#allocation76_spill] sm:$0xff] %v14264_v5  ;;  %v14269_v17 = vadd.f32 %v6410_v39, %v5790_v35  ;;  %v5795_v63 = vadd.f32 %v10949_v22, %v15817_v7  ;;  %11215 = vmatprep.mubr.bf16.mxu1 %v6996_v18  ;;  %11367 = vmatprep.mubr.bf16.mxu0 %v7977_v49  ;;  %v15821_v49 = vld [vmem:[#allocation90_spill] sm:$0xff] }
 0x449   : > { %v5442_v33 = vpop.f32.mrf.mxu1  ;;  %v6423_v47 = vpop.f32.mrf.mxu0  ;;  %v6997_v35 = vpack.c.bf16 %v6877_v37, %v6876_v23  ;;  %v7978_v22 = vpack.c.bf16 %v7858_v62, %v7857_v46  ;;  %v7979_v5 = vpack.c.bf16 %v7860_v27, %v7859_v48  ;;  %v6880_v37 = vld [vmem:[%s11859_s10 + $0x155] sm:$0xff]  ;;  %v6881_v46 = vld [vmem:[%s11859_s10 + $0x15d] sm:$0xff]  ;;  %v6882_v27 = vld [vmem:[%s11859_s10 + $0x165] sm:$0xff] }
 0x44a   : > { %15816 = vst [vmem:[#allocation78_spill] sm:$0xff] %v14269_v17  ;;  %v14278_v14 = vadd.f32 %v11101_v42, %v5795_v63  ;;  %v5793_v51 = vadd.f32 %v5442_v33, %v15819_v4  ;;  %v6998_v17 = vpack.c.bf16 %v6879_v44, %v6878_v38  ;;  %v15823_v33 = vld [vmem:[#allocation92_spill] sm:$0xff]  ;;  %v15825_v38 = vld [vmem:[#allocation94_spill] sm:$0xff] }
 0x44b   : > { %v10950_v19 = vpop.f32.mrf.mxu1  ;;  %v11102_v39 = vpop.f32.mrf.mxu0  ;;  %v7861_v44 = vld [vmem:[%s11859_s10 + $0x156] sm:$0xff]  ;;  %v7862_v48 = vld [vmem:[%s11859_s10 + $0x15e] sm:$0xff] }
 0x44c   : > { %15818 = vst [vmem:[#allocation80_spill] sm:$0xff] %v14278_v14  ;;  %v14281_v18 = vadd.f32 %v6423_v47, %v5793_v51  ;;  %v5796_v7 = vadd.f32 %v10950_v19, %v15821_v49  ;;  %v6883_v19 = vld [vmem:[%s11859_s10 + $0x16d] sm:$0xff] }
 0x44d   : > { %v5445_v61 = vpop.f32.mrf.mxu1  ;;  %v6426_v42 = vpop.f32.mrf.mxu0  ;;  %v7864_v49 = vld [vmem:[%s11859_s10 + $0x16e] sm:$0xff] }
 0x44e   : > { %15820 = vst [vmem:[#allocation82_spill] sm:$0xff] %v14281_v18  ;;  %v14284_v63 = vadd.f32 %v11102_v39, %v5796_v7  ;;  %v5794_v4 = vadd.f32 %v5445_v61, %v15823_v33  ;;  %v7863_v39 = vld [vmem:[%s11859_s10 + $0x166] sm:$0xff] }
 0x44f   : > { %v10953_v14 = vpop.f32.mrf.mxu1  ;;  %v11105_v23 = vpop.f32.mrf.mxu0  ;;  %11216 = vmatmul.mubr.bf16.gmra.mxu1 %v6997_v35  ;;  %11368 = vmatmul.mubr.bf16.gmra.mxu0 %v7978_v22  ;;  %v15827_v35 = vld [vmem:[#allocation96_spill] sm:$0xff] }
 0x450   : > { %15822 = vst [vmem:[#allocation84_spill] sm:$0xff] %v14284_v63  ;;  %v14289_v62 = vadd.f32 %v6426_v42, %v5794_v4  ;;  %v5799_v47 = vadd.f32 %v10953_v14, %v15825_v38  ;;  %11219 = vmatprep.mubr.bf16.mxu1 %v6998_v17  ;;  %11371 = vmatprep.mubr.bf16.mxu0 %v7979_v5  ;;  %v15829_v5 = vld [vmem:[#allocation98_spill] sm:$0xff] }
 0x451   : > { %v5458_v51 = vpop.f32.mrf.mxu1  ;;  %v6439_v61 = vpop.f32.mrf.mxu0  ;;  %v6999_v4 = vpack.c.bf16 %v6881_v46, %v6880_v37  ;;  %v7980_v14 = vpack.c.bf16 %v7862_v48, %v7861_v44  ;;  %v7981_v63 = vpack.c.bf16 %v7864_v49, %v7863_v39  ;;  %v6884_v46 = vld [vmem:[%s11859_s10 + $0x175] sm:$0xff]  ;;  %v6885_v44 = vld [vmem:[%s11859_s10 + $0x17d] sm:$0xff]  ;;  %v6886_v49 = vld [vmem:[%s11859_s10 + $0x185] sm:$0xff] }
 0x452   : > { %15824 = vst [vmem:[#allocation86_spill] sm:$0xff] %v14289_v62  ;;  %v14298_v7 = vadd.f32 %v11105_v23, %v5799_v47  ;;  %v5797_v22 = vadd.f32 %v5458_v51, %v15827_v35  ;;  %v7000_v62 = vpack.c.bf16 %v6883_v19, %v6882_v27  ;;  %v15831_v51 = vld [vmem:[#allocation100_spill] sm:$0xff]  ;;  %v15833_v27 = vld [vmem:[#allocation102_spill] sm:$0xff] }
 0x453   : > { %v10954_v33 = vpop.f32.mrf.mxu1  ;;  %v11106_v42 = vpop.f32.mrf.mxu0  ;;  %v7865_v19 = vld [vmem:[%s11859_s10 + $0x176] sm:$0xff]  ;;  %v7866_v39 = vld [vmem:[%s11859_s10 + $0x17e] sm:$0xff] }
 0x454   : > { %15826 = vst [vmem:[#allocation88_spill] sm:$0xff] %v14298_v7  ;;  %v14301_v17 = vadd.f32 %v6439_v61, %v5797_v22  ;;  %v5800_v38 = vadd.f32 %v10954_v33, %v15829_v5  ;;  %v6887_v33 = vld [vmem:[%s11859_s10 + $0x18d] sm:$0xff] }
 0x455   : > { %v5461_v18 = vpop.f32.mrf.mxu1  ;;  %v6442_v23 = vpop.f32.mrf.mxu0  ;;  %v7868_v5 = vld [vmem:[%s11859_s10 + $0x18e] sm:$0xff] }
 0x456   : > { %15828 = vst [vmem:[#allocation90_spill] sm:$0xff] %v14301_v17  ;;  %v14304_v47 = vadd.f32 %v11106_v42, %v5800_v38  ;;  %v5798_v35 = vadd.f32 %v5461_v18, %v15831_v51  ;;  %v7867_v42 = vld [vmem:[%s11859_s10 + $0x186] sm:$0xff] }
 0x457   : > { %v10957_v7 = vpop.f32.mrf.mxu1  ;;  %v11109_v37 = vpop.f32.mrf.mxu0  ;;  %11220 = vmatmul.mubr.bf16.gmra.mxu1 %v6999_v4  ;;  %11372 = vmatmul.mubr.bf16.gmra.mxu0 %v7980_v14  ;;  %v15835_v4 = vld [vmem:[#allocation8_spill] sm:$0xff] }
 0x458   : > { %15830 = vst [vmem:[#allocation92_spill] sm:$0xff] %v14304_v47  ;;  %v14309_v48 = vadd.f32 %v6442_v23, %v5798_v35  ;;  %v5803_v61 = vadd.f32 %v10957_v7, %v15833_v27  ;;  %11223 = vmatprep.mubr.bf16.mxu1 %v7000_v62  ;;  %11375 = vmatprep.mubr.bf16.mxu0 %v7981_v63  ;;  %v15837_v63 = vld [vmem:[#allocation9_spill] sm:$0xff] }
 0x459   : > { %v5474_v22 = vpop.f32.mrf.mxu1  ;;  %v6455_v18 = vpop.f32.mrf.mxu0  ;;  %v7001_v35 = vpack.c.bf16 %v6885_v44, %v6884_v46  ;;  %v7982_v7 = vpack.c.bf16 %v7866_v39, %v7865_v19  ;;  %v7983_v47 = vpack.c.bf16 %v7868_v5, %v7867_v42  ;;  %v6888_v44 = vld [vmem:[%s11859_s10 + $0x195] sm:$0xff]  ;;  %v6889_v19 = vld [vmem:[%s11859_s10 + $0x19d] sm:$0xff]  ;;  %v6890_v5 = vld [vmem:[%s11859_s10 + $0x1a5] sm:$0xff] }
 0x45a   : > { %15832 = vst [vmem:[#allocation94_spill] sm:$0xff] %v14309_v48  ;;  %v14318_v38 = vadd.f32 %v11109_v37, %v5803_v61  ;;  %v5801_v14 = vadd.f32 %v5474_v22, %v15835_v4  ;;  %v7002_v48 = vpack.c.bf16 %v6887_v33, %v6886_v49  ;;  %v15839_v22 = vld [vmem:[#allocation10_spill] sm:$0xff]  ;;  %v15841_v49 = vld [vmem:[#allocation11_spill] sm:$0xff] }
 0x45b   : > { %v10958_v51 = vpop.f32.mrf.mxu1  ;;  %v11110_v23 = vpop.f32.mrf.mxu0  ;;  %v7869_v33 = vld [vmem:[%s11859_s10 + $0x196] sm:$0xff]  ;;  %v7870_v42 = vld [vmem:[%s11859_s10 + $0x19e] sm:$0xff] }
 0x45c   : > { %15834 = vst [vmem:[#allocation96_spill] sm:$0xff] %v14318_v38  ;;  %v14321_v62 = vadd.f32 %v6455_v18, %v5801_v14  ;;  %v5804_v27 = vadd.f32 %v10958_v51, %v15837_v63  ;;  %v6891_v51 = vld [vmem:[%s11859_s10 + $0x1ad] sm:$0xff] }
 0x45d   : > { %v5477_v17 = vpop.f32.mrf.mxu1  ;;  %v6458_v37 = vpop.f32.mrf.mxu0  ;;  %v7872_v63 = vld [vmem:[%s11859_s10 + $0x1ae] sm:$0xff] }
 0x45e   : > { %15836 = vst [vmem:[#allocation98_spill] sm:$0xff] %v14321_v62  ;;  %v14324_v61 = vadd.f32 %v11110_v23, %v5804_v27  ;;  %v5802_v4 = vadd.f32 %v5477_v17, %v15839_v22  ;;  %v7871_v23 = vld [vmem:[%s11859_s10 + $0x1a6] sm:$0xff] }
 0x45f   : > { %v10961_v38 = vpop.f32.mrf.mxu1  ;;  %v11113_v46 = vpop.f32.mrf.mxu0  ;;  %11224 = vmatmul.mubr.bf16.gmra.mxu1 %v7001_v35  ;;  %11376 = vmatmul.mubr.bf16.gmra.mxu0 %v7982_v7  ;;  %v15843_v35 = vld [vmem:[#allocation12_spill] sm:$0xff] }
 0x460   : > { %15838 = vst [vmem:[#allocation100_spill] sm:$0xff] %v14324_v61  ;;  %v14329_v39 = vadd.f32 %v6458_v37, %v5802_v4  ;;  %v5807_v18 = vadd.f32 %v10961_v38, %v15841_v49  ;;  %11227 = vmatprep.mubr.bf16.mxu1 %v7002_v48  ;;  %11379 = vmatprep.mubr.bf16.mxu0 %v7983_v47  ;;  %v15845_v47 = vld [vmem:[#allocation13_spill] sm:$0xff] }
 0x461   : > { %v5490_v14 = vpop.f32.mrf.mxu1  ;;  %v6471_v17 = vpop.f32.mrf.mxu0  ;;  %v7003_v4 = vpack.c.bf16 %v6889_v19, %v6888_v44  ;;  %v7984_v38 = vpack.c.bf16 %v7870_v42, %v7869_v33  ;;  %v7985_v61 = vpack.c.bf16 %v7872_v63, %v7871_v23  ;;  %v6892_v19 = vld [vmem:[%s11859_s10 + $0x1b5] sm:$0xff]  ;;  %v6893_v33 = vld [vmem:[%s11859_s10 + $0x1bd] sm:$0xff]  ;;  %v6894_v63 = vld [vmem:[%s11859_s10 + $0x1c5] sm:$0xff] }
 0x462   : > { %15840 = vst [vmem:[#allocation102_spill] sm:$0xff] %v14329_v39  ;;  %v14338_v27 = vadd.f32 %v11113_v46, %v5807_v18  ;;  %v5805_v7 = vadd.f32 %v5490_v14, %v15843_v35  ;;  %v7004_v39 = vpack.c.bf16 %v6891_v51, %v6890_v5  ;;  %v15847_v14 = vld [vmem:[#allocation14_spill] sm:$0xff]  ;;  %v15849_v5 = vld [vmem:[#allocation15_spill] sm:$0xff] }
 0x463   : > { %v10962_v22 = vpop.f32.mrf.mxu1  ;;  %v11114_v37 = vpop.f32.mrf.mxu0  ;;  %v7873_v51 = vld [vmem:[%s11859_s10 + $0x1b6] sm:$0xff]  ;;  %v7874_v23 = vld [vmem:[%s11859_s10 + $0x1be] sm:$0xff] }
 0x464   : > { %15842 = vst [vmem:[#allocation8_spill] sm:$0xff] %v14338_v27  ;;  %v14341_v48 = vadd.f32 %v6471_v17, %v5805_v7  ;;  %v5808_v49 = vadd.f32 %v10962_v22, %v15845_v47  ;;  %v6895_v22 = vld [vmem:[%s11859_s10 + $0x1cd] sm:$0xff] }
 0x465   : > { %v5493_v62 = vpop.f32.mrf.mxu1  ;;  %v6474_v46 = vpop.f32.mrf.mxu0  ;;  %v7876_v47 = vld [vmem:[%s11859_s10 + $0x1ce] sm:$0xff] }
 0x466   : > { %15844 = vst [vmem:[#allocation9_spill] sm:$0xff] %v14341_v48  ;;  %v14344_v18 = vadd.f32 %v11114_v37, %v5808_v49  ;;  %v5806_v35 = vadd.f32 %v5493_v62, %v15847_v14  ;;  %v7875_v37 = vld [vmem:[%s11859_s10 + $0x1c6] sm:$0xff] }
 0x467   : > { %v10965_v27 = vpop.f32.mrf.mxu1  ;;  %v11117_v44 = vpop.f32.mrf.mxu0  ;;  %11228 = vmatmul.mubr.bf16.gmra.mxu1 %v7003_v4  ;;  %11380 = vmatmul.mubr.bf16.gmra.mxu0 %v7984_v38  ;;  %v15851_v4 = vld [vmem:[#allocation16_spill] sm:$0xff] }
 0x468   : > { %15846 = vst [vmem:[#allocation10_spill] sm:$0xff] %v14344_v18  ;;  %v14349_v42 = vadd.f32 %v6474_v46, %v5806_v35  ;;  %v5811_v17 = vadd.f32 %v10965_v27, %v15849_v5  ;;  %11231 = vmatprep.mubr.bf16.mxu1 %v7004_v39  ;;  %11383 = vmatprep.mubr.bf16.mxu0 %v7985_v61  ;;  %v15853_v61 = vld [vmem:[#allocation17_spill] sm:$0xff] }
 0x469   : > { %v5506_v7 = vpop.f32.mrf.mxu1  ;;  %v6487_v62 = vpop.f32.mrf.mxu0  ;;  %v7005_v35 = vpack.c.bf16 %v6893_v33, %v6892_v19  ;;  %v7986_v27 = vpack.c.bf16 %v7874_v23, %v7873_v51  ;;  %v7987_v18 = vpack.c.bf16 %v7876_v47, %v7875_v37  ;;  %v6896_v33 = vld [vmem:[%s11859_s10 + $0x1d5] sm:$0xff]  ;;  %v6897_v51 = vld [vmem:[%s11859_s10 + $0x1dd] sm:$0xff]  ;;  %v6898_v47 = vld [vmem:[%s11859_s10 + $0x1e5] sm:$0xff] }
 0x46a   : > { %15848 = vst [vmem:[#allocation11_spill] sm:$0xff] %v14349_v42  ;;  %v14358_v49 = vadd.f32 %v11117_v44, %v5811_v17  ;;  %v5809_v38 = vadd.f32 %v5506_v7, %v15851_v4  ;;  %v7006_v42 = vpack.c.bf16 %v6895_v22, %v6894_v63  ;;  %v15855_v7 = vld [vmem:[#allocation18_spill] sm:$0xff]  ;;  %v15857_v63 = vld [vmem:[#allocation19_spill] sm:$0xff] }
 0x46b   : > { %v10966_v14 = vpop.f32.mrf.mxu1  ;;  %v11118_v46 = vpop.f32.mrf.mxu0  ;;  %v7877_v22 = vld [vmem:[%s11859_s10 + $0x1d6] sm:$0xff]  ;;  %v7878_v37 = vld [vmem:[%s11859_s10 + $0x1de] sm:$0xff] }
 0x46c   : > { %15850 = vst [vmem:[#allocation12_spill] sm:$0xff] %v14358_v49  ;;  %v14361_v39 = vadd.f32 %v6487_v62, %v5809_v38  ;;  %v5812_v5 = vadd.f32 %v10966_v14, %v15853_v61  ;;  %v6899_v14 = vld [vmem:[%s11859_s10 + $0x1ed] sm:$0xff] }
 0x46d   : > { %v5509_v48 = vpop.f32.mrf.mxu1  ;;  %v6490_v44 = vpop.f32.mrf.mxu0  ;;  %v7880_v61 = vld [vmem:[%s11859_s10 + $0x1ee] sm:$0xff] }
 0x46e   : > { %15852 = vst [vmem:[#allocation13_spill] sm:$0xff] %v14361_v39  ;;  %v14364_v17 = vadd.f32 %v11118_v46, %v5812_v5  ;;  %v5810_v4 = vadd.f32 %v5509_v48, %v15855_v7  ;;  %v7879_v46 = vld [vmem:[%s11859_s10 + $0x1e6] sm:$0xff] }
 0x46f   : > { %v10969_v49 = vpop.f32.mrf.mxu1  ;;  %v11121_v19 = vpop.f32.mrf.mxu0  ;;  %11232 = vmatmul.mubr.bf16.gmra.mxu1 %v7005_v35  ;;  %11384 = vmatmul.mubr.bf16.gmra.mxu0 %v7986_v27  ;;  %v15859_v35 = vld [vmem:[#allocation20_spill] sm:$0xff] }
 0x470   : > { %15854 = vst [vmem:[#allocation14_spill] sm:$0xff] %v14364_v17  ;;  %v14369_v23 = vadd.f32 %v6490_v44, %v5810_v4  ;;  %v5815_v62 = vadd.f32 %v10969_v49, %v15857_v63  ;;  %11235 = vmatprep.mubr.bf16.mxu1 %v7006_v42  ;;  %11387 = vmatprep.mubr.bf16.mxu0 %v7987_v18  ;;  %v15861_v18 = vld [vmem:[#allocation21_spill] sm:$0xff] }
 0x471   : > { %v5522_v38 = vpop.f32.mrf.mxu1  ;;  %v6503_v48 = vpop.f32.mrf.mxu0  ;;  %v7007_v4 = vpack.c.bf16 %v6897_v51, %v6896_v33  ;;  %v7988_v49 = vpack.c.bf16 %v7878_v37, %v7877_v22  ;;  %v7989_v17 = vpack.c.bf16 %v7880_v61, %v7879_v46  ;;  %v6900_v51 = vld [vmem:[%s11859_s10 + $0x1f5] sm:$0xff]  ;;  %v6901_v22 = vld [vmem:[%s11859_s10 + $0x1fd] sm:$0xff]  ;;  %v6902_v61 = vld [vmem:[%s11859_s10 + $0x205] sm:$0xff] }
 0x472   : > { %15856 = vst [vmem:[#allocation15_spill] sm:$0xff] %v14369_v23  ;;  %v14378_v5 = vadd.f32 %v11121_v19, %v5815_v62  ;;  %v5813_v27 = vadd.f32 %v5522_v38, %v15859_v35  ;;  %v7008_v23 = vpack.c.bf16 %v6899_v14, %v6898_v47  ;;  %v15863_v38 = vld [vmem:[#allocation22_spill] sm:$0xff]  ;;  %v15865_v47 = vld [vmem:[#allocation23_spill] sm:$0xff] }
 0x473   : > { %v10970_v7 = vpop.f32.mrf.mxu1  ;;  %v11122_v44 = vpop.f32.mrf.mxu0  ;;  %v7881_v14 = vld [vmem:[%s11859_s10 + $0x1f6] sm:$0xff]  ;;  %v7882_v46 = vld [vmem:[%s11859_s10 + $0x1fe] sm:$0xff] }
 0x474   : > { %15858 = vst [vmem:[#allocation16_spill] sm:$0xff] %v14378_v5  ;;  %v14381_v42 = vadd.f32 %v6503_v48, %v5813_v27  ;;  %v5816_v63 = vadd.f32 %v10970_v7, %v15861_v18  ;;  %v6903_v7 = vld [vmem:[%s11859_s10 + $0x20d] sm:$0xff] }
 0x475   : > { %v5525_v39 = vpop.f32.mrf.mxu1  ;;  %v6506_v19 = vpop.f32.mrf.mxu0  ;;  %v7884_v18 = vld [vmem:[%s11859_s10 + $0x20e] sm:$0xff] }
 0x476   : > { %15860 = vst [vmem:[#allocation17_spill] sm:$0xff] %v14381_v42  ;;  %v14384_v62 = vadd.f32 %v11122_v44, %v5816_v63  ;;  %v5814_v35 = vadd.f32 %v5525_v39, %v15863_v38  ;;  %v7883_v44 = vld [vmem:[%s11859_s10 + $0x206] sm:$0xff] }
 0x477   : > { %v10973_v5 = vpop.f32.mrf.mxu1  ;;  %v11125_v33 = vpop.f32.mrf.mxu0  ;;  %11236 = vmatmul.mubr.bf16.gmra.mxu1 %v7007_v4  ;;  %11388 = vmatmul.mubr.bf16.gmra.mxu0 %v7988_v49  ;;  %v15867_v4 = vld [vmem:[#allocation24_spill] sm:$0xff] }
 0x478   : > { %15862 = vst [vmem:[#allocation18_spill] sm:$0xff] %v14384_v62  ;;  %v14389_v37 = vadd.f32 %v6506_v19, %v5814_v35  ;;  %v5819_v48 = vadd.f32 %v10973_v5, %v15865_v47  ;;  %11239 = vmatprep.mubr.bf16.mxu1 %v7008_v23  ;;  %11391 = vmatprep.mubr.bf16.mxu0 %v7989_v17  ;;  %v15868_v17 = vld [vmem:[#allocation25_spill] sm:$0xff] }
 0x479   : > { %v5538_v27 = vpop.f32.mrf.mxu1  ;;  %v6519_v39 = vpop.f32.mrf.mxu0  ;;  %v7009_v35 = vpack.c.bf16 %v6901_v22, %v6900_v51  ;;  %v7990_v5 = vpack.c.bf16 %v7882_v46, %v7881_v14  ;;  %v7991_v62 = vpack.c.bf16 %v7884_v18, %v7883_v44  ;;  %v6904_v22 = vld [vmem:[%s11859_s10 + $0x215] sm:$0xff]  ;;  %v6905_v14 = vld [vmem:[%s11859_s10 + $0x21d] sm:$0xff]  ;;  %v6906_v44 = vld [vmem:[%s11859_s10 + $0x225] sm:$0xff] }
 0x47a   : > { %15864 = vst [vmem:[#allocation19_spill] sm:$0xff] %v14389_v37  ;;  %v14398_v63 = vadd.f32 %v11125_v33, %v5819_v48  ;;  %v5817_v49 = vadd.f32 %v5538_v27, %v15867_v4  ;;  %v7010_v37 = vpack.c.bf16 %v6903_v7, %v6902_v61  ;;  %v15870_v27 = vld [vmem:[#allocation26_spill] sm:$0xff] }
 0x47b   : > { %v10974_v38 = vpop.f32.mrf.mxu1  ;;  %v11126_v19 = vpop.f32.mrf.mxu0  ;;  %v7886_v7 = vld [vmem:[%s11859_s10 + $0x21e] sm:$0xff] }
 0x47c   : > { %15866 = vst [vmem:[#allocation20_spill] sm:$0xff] %v14398_v63  ;;  %v14401_v23 = vadd.f32 %v6519_v39, %v5817_v49  ;;  %v5820_v47 = vadd.f32 %v10974_v38, %v15868_v17  ;;  %v7885_v39 = vld [vmem:[%s11859_s10 + $0x216] sm:$0xff]  ;;  %v6907_v49 = vld [vmem:[%s11859_s10 + $0x22d] sm:$0xff] }
 0x47d   : > { %v5541_v42 = vpop.f32.mrf.mxu1  ;;  %v6522_v33 = vpop.f32.mrf.mxu0  ;;  %v7887_v38 = vld [vmem:[%s11859_s10 + $0x226] sm:$0xff] }
 0x47e   : > { %v14404_v48 = vadd.f32 %v11126_v19, %v5820_v47  ;;  %v5818_v4 = vadd.f32 %v5541_v42, %v15870_v27  ;;  %v7888_v19 = vld [vmem:[%s11859_s10 + $0x22e] sm:$0xff]  ;;  %v7011_v27 = vpack.c.bf16 %v6905_v14, %v6904_v22 }
 0x47f   : > { %v10977_v63 = vpop.f32.mrf.mxu1  ;;  %v11129_v51 = vpop.f32.mrf.mxu0  ;;  %11240 = vmatmul.mubr.bf16.gmra.mxu1 %v7009_v35  ;;  %11392 = vmatmul.mubr.bf16.gmra.mxu0 %v7990_v5  ;;  %v15873_v35 = vld [vmem:[#allocation27_spill] sm:$0xff]  ;;  %v6908_v14 = vld [vmem:[%s11859_s10 + $0x235] sm:$0xff] }
 0x480   : > { %15869 = vst [vmem:[#allocation21_spill] sm:$0xff] %v14404_v48  ;;  %v14409_v46 = vadd.f32 %v6522_v33, %v5818_v4  ;;  %v5823_v61 = vadd.f32 %v10977_v63, %v13806_v24  ;;  %11243 = vmatprep.mubr.bf16.mxu1 %v7010_v37  ;;  %11395 = vmatprep.mubr.bf16.mxu0 %v7991_v62  ;;  %v15875_v62 = vld [vmem:[#allocation28_spill] sm:$0xff] }
 0x481   : > { %v5554_v18 = vpop.f32.mrf.mxu1  ;;  %v6535_v42 = vpop.f32.mrf.mxu0  ;;  %v7992_v24 = vpack.c.bf16 %v7886_v7, %v7885_v39  ;;  %v7012_v4 = vpack.c.bf16 %v6907_v49, %v6906_v44  ;;  %v6909_v39 = vld [vmem:[%s11859_s10 + $0x23d] sm:$0xff] }
 0x482   : > { %15871 = vst [vmem:[#allocation22_spill] sm:$0xff] %v14409_v46  ;;  %v14418_v17 = vadd.f32 %v11129_v51, %v5823_v61  ;;  %v5821_v5 = vadd.f32 %v5554_v18, %v15873_v35  ;;  %v7993_v46 = vpack.c.bf16 %v7888_v19, %v7887_v38  ;;  %v15877_v18 = vld [vmem:[#allocation29_spill] sm:$0xff]  ;;  %v15879_v44 = vld [vmem:[#allocation30_spill] sm:$0xff] }
 0x483   : > { %v10978_v47 = vpop.f32.mrf.mxu1  ;;  %v11130_v33 = vpop.f32.mrf.mxu0  ;;  %v7889_v49 = vld [vmem:[%s11859_s10 + $0x236] sm:$0xff]  ;;  %v7890_v38 = vld [vmem:[%s11859_s10 + $0x23e] sm:$0xff] }
 0x484   : > { %15872 = vst [vmem:[#allocation23_spill] sm:$0xff] %v14418_v17  ;;  %v14421_v37 = vadd.f32 %v6535_v42, %v5821_v5  ;;  %v5824_v63 = vadd.f32 %v10978_v47, %v15875_v62  ;;  %v6910_v19 = vld [vmem:[%s11859_s10 + $0x245] sm:$0xff]  ;;  %v6911_v47 = vld [vmem:[%s11859_s10 + $0x24d] sm:$0xff] }
 0x485   : > { %v5557_v48 = vpop.f32.mrf.mxu1  ;;  %v6538_v51 = vpop.f32.mrf.mxu0  ;;  %v7892_v62 = vld [vmem:[%s11859_s10 + $0x24e] sm:$0xff] }
 0x486   : > { %15874 = vst [vmem:[#allocation24_spill] sm:$0xff] %v14421_v37  ;;  %v14424_v61 = vadd.f32 %v11130_v33, %v5824_v63  ;;  %v5822_v35 = vadd.f32 %v5557_v48, %v15877_v18  ;;  %v7891_v33 = vld [vmem:[%s11859_s10 + $0x246] sm:$0xff] }
 0x487   : > { %v10981_v17 = vpop.f32.mrf.mxu1  ;;  %v11133_v22 = vpop.f32.mrf.mxu0  ;;  %11244 = vmatmul.mubr.bf16.gmra.mxu1 %v7011_v27  ;;  %11396 = vmatmul.mubr.bf16.gmra.mxu0 %v7992_v24  ;;  %v15881_v27 = vld [vmem:[#allocation31_spill] sm:$0xff] }
 0x488   : > { %15876 = vst [vmem:[#allocation25_spill] sm:$0xff] %v14424_v61  ;;  %v14429_v7 = vadd.f32 %v6538_v51, %v5822_v35  ;;  %v5827_v42 = vadd.f32 %v10981_v17, %v15879_v44  ;;  %11247 = vmatprep.mubr.bf16.mxu1 %v7012_v4  ;;  %11399 = vmatprep.mubr.bf16.mxu0 %v7993_v46  ;;  %v15883_v46 = vld [vmem:[#allocation32_spill] sm:$0xff] }
 0x489   : > { %v5570_v5 = vpop.f32.mrf.mxu1  ;;  %v6551_v48 = vpop.f32.mrf.mxu0  ;;  %v7013_v35 = vpack.c.bf16 %v6909_v39, %v6908_v14  ;;  %v7994_v17 = vpack.c.bf16 %v7890_v38, %v7889_v49  ;;  %v7995_v61 = vpack.c.bf16 %v7892_v62, %v7891_v33  ;;  %v6912_v39 = vld [vmem:[%s11859_s10 + $0x255] sm:$0xff]  ;;  %v6913_v49 = vld [vmem:[%s11859_s10 + $0x25d] sm:$0xff]  ;;  %v6914_v62 = vld [vmem:[%s11859_s10 + $0x265] sm:$0xff] }
 0x48a   : > { %15878 = vst [vmem:[#allocation26_spill] sm:$0xff] %v14429_v7  ;;  %v14438_v63 = vadd.f32 %v11133_v22, %v5827_v42  ;;  %v5825_v24 = vadd.f32 %v5570_v5, %v15881_v27  ;;  %v7014_v7 = vpack.c.bf16 %v6911_v47, %v6910_v19  ;;  %v15885_v5 = vld [vmem:[#allocation33_spill] sm:$0xff]  ;;  %v15887_v19 = vld [vmem:[#allocation34_spill] sm:$0xff] }
 0x48b   : > { %v10982_v18 = vpop.f32.mrf.mxu1  ;;  %v11134_v51 = vpop.f32.mrf.mxu0  ;;  %v7893_v47 = vld [vmem:[%s11859_s10 + $0x256] sm:$0xff]  ;;  %v7894_v33 = vld [vmem:[%s11859_s10 + $0x25e] sm:$0xff] }
 0x48c   : > { %15880 = vst [vmem:[#allocation27_spill] sm:$0xff] %v14438_v63  ;;  %v14441_v4 = vadd.f32 %v6551_v48, %v5825_v24  ;;  %v5828_v44 = vadd.f32 %v10982_v18, %v15883_v46  ;;  %v6915_v18 = vld [vmem:[%s11859_s10 + $0x26d] sm:$0xff] }
 0x48d   : > { %v5573_v37 = vpop.f32.mrf.mxu1  ;;  %v6554_v22 = vpop.f32.mrf.mxu0  ;;  %v7896_v46 = vld [vmem:[%s11859_s10 + $0x26e] sm:$0xff] }
 0x48e   : > { %15882 = vst [vmem:[#allocation28_spill] sm:$0xff] %v14441_v4  ;;  %v14444_v42 = vadd.f32 %v11134_v51, %v5828_v44  ;;  %v5826_v27 = vadd.f32 %v5573_v37, %v15885_v5  ;;  %v7895_v51 = vld [vmem:[%s11859_s10 + $0x266] sm:$0xff] }
 0x48f   : > { %v10985_v63 = vpop.f32.mrf.mxu1  ;;  %v11137_v14 = vpop.f32.mrf.mxu0  ;;  %11248 = vmatmul.mubr.bf16.gmra.mxu1 %v7013_v35  ;;  %11400 = vmatmul.mubr.bf16.gmra.mxu0 %v7994_v17  ;;  %v15889_v35 = vld [vmem:[#allocation35_spill] sm:$0xff] }
 0x490   : > { %15884 = vst [vmem:[#allocation29_spill] sm:$0xff] %v14444_v42  ;;  %v14449_v38 = vadd.f32 %v6554_v22, %v5826_v27  ;;  %v5831_v48 = vadd.f32 %v10985_v63, %v15887_v19  ;;  %11251 = vmatprep.mubr.bf16.mxu1 %v7014_v7  ;;  %11403 = vmatprep.mubr.bf16.mxu0 %v7995_v61  ;;  %v15891_v61 = vld [vmem:[#allocation36_spill] sm:$0xff] }
 0x491   : > { %v5586_v24 = vpop.f32.mrf.mxu1  ;;  %v6567_v37 = vpop.f32.mrf.mxu0  ;;  %v7015_v27 = vpack.c.bf16 %v6913_v49, %v6912_v39  ;;  %v7996_v63 = vpack.c.bf16 %v7894_v33, %v7893_v47  ;;  %v7997_v42 = vpack.c.bf16 %v7896_v46, %v7895_v51  ;;  %v6916_v49 = vld [vmem:[%s11859_s10 + $0x275] sm:$0xff]  ;;  %v6917_v47 = vld [vmem:[%s11859_s10 + $0x27d] sm:$0xff]  ;;  %v6918_v46 = vld [vmem:[%s11859_s10 + $0x285] sm:$0xff] }
 0x492   : > { %15886 = vst [vmem:[#allocation30_spill] sm:$0xff] %v14449_v38  ;;  %v14458_v44 = vadd.f32 %v11137_v14, %v5831_v48  ;;  %v5829_v17 = vadd.f32 %v5586_v24, %v15889_v35  ;;  %v7016_v38 = vpack.c.bf16 %v6915_v18, %v6914_v62  ;;  %v15893_v24 = vld [vmem:[#allocation37_spill] sm:$0xff]  ;;  %v15895_v62 = vld [vmem:[#allocation38_spill] sm:$0xff] }
 0x493   : > { %v10986_v5 = vpop.f32.mrf.mxu1  ;;  %v11138_v22 = vpop.f32.mrf.mxu0  ;;  %v7897_v18 = vld [vmem:[%s11859_s10 + $0x276] sm:$0xff]  ;;  %v7898_v51 = vld [vmem:[%s11859_s10 + $0x27e] sm:$0xff] }
 0x494   : > { %15888 = vst [vmem:[#allocation31_spill] sm:$0xff] %v14458_v44  ;;  %v14461_v7 = vadd.f32 %v6567_v37, %v5829_v17  ;;  %v5832_v19 = vadd.f32 %v10986_v5, %v15891_v61  ;;  %v6919_v5 = vld [vmem:[%s11859_s10 + $0x28d] sm:$0xff] }
 0x495   : > { %v5589_v4 = vpop.f32.mrf.mxu1  ;;  %v6570_v14 = vpop.f32.mrf.mxu0  ;;  %v7900_v61 = vld [vmem:[%s11859_s10 + $0x28e] sm:$0xff] }
 0x496   : > { %15890 = vst [vmem:[#allocation32_spill] sm:$0xff] %v14461_v7  ;;  %v14464_v48 = vadd.f32 %v11138_v22, %v5832_v19  ;;  %v5830_v35 = vadd.f32 %v5589_v4, %v15893_v24  ;;  %v7899_v22 = vld [vmem:[%s11859_s10 + $0x286] sm:$0xff] }
 0x497   : > { %v10989_v44 = vpop.f32.mrf.mxu1  ;;  %v11141_v39 = vpop.f32.mrf.mxu0  ;;  %11252 = vmatmul.mubr.bf16.gmra.mxu1 %v7015_v27  ;;  %11404 = vmatmul.mubr.bf16.gmra.mxu0 %v7996_v63  ;;  %v15897_v27 = vld [vmem:[#allocation39_spill] sm:$0xff] }
 0x498   : > { %15892 = vst [vmem:[#allocation33_spill] sm:$0xff] %v14464_v48  ;;  %v14469_v33 = vadd.f32 %v6570_v14, %v5830_v35  ;;  %v5835_v37 = vadd.f32 %v10989_v44, %v15895_v62  ;;  %11255 = vmatprep.mubr.bf16.mxu1 %v7016_v38  ;;  %11407 = vmatprep.mubr.bf16.mxu0 %v7997_v42  ;;  %v15899_v42 = vld [vmem:[#allocation40_spill] sm:$0xff] }
 0x499   : > { %v5602_v17 = vpop.f32.mrf.mxu1  ;;  %v6583_v4 = vpop.f32.mrf.mxu0  ;;  %v7017_v35 = vpack.c.bf16 %v6917_v47, %v6916_v49  ;;  %v7998_v44 = vpack.c.bf16 %v7898_v51, %v7897_v18  ;;  %v7999_v48 = vpack.c.bf16 %v7900_v61, %v7899_v22  ;;  %v6920_v47 = vld [vmem:[%s11859_s10 + $0x295] sm:$0xff]  ;;  %v6921_v18 = vld [vmem:[%s11859_s10 + $0x29d] sm:$0xff]  ;;  %v6922_v61 = vld [vmem:[%s11859_s10 + $0x2a5] sm:$0xff] }
 0x49a   : > { %15894 = vst [vmem:[#allocation34_spill] sm:$0xff] %v14469_v33  ;;  %v14478_v19 = vadd.f32 %v11141_v39, %v5835_v37  ;;  %v5833_v63 = vadd.f32 %v5602_v17, %v15897_v27  ;;  %v7018_v33 = vpack.c.bf16 %v6919_v5, %v6918_v46  ;;  %v15901_v17 = vld [vmem:[#allocation41_spill] sm:$0xff]  ;;  %v15903_v46 = vld [vmem:[#allocation42_spill] sm:$0xff] }
 0x49b   : > { %v10990_v24 = vpop.f32.mrf.mxu1  ;;  %v11142_v14 = vpop.f32.mrf.mxu0  ;;  %v7901_v5 = vld [vmem:[%s11859_s10 + $0x296] sm:$0xff]  ;;  %v7902_v22 = vld [vmem:[%s11859_s10 + $0x29e] sm:$0xff] }
 0x49c   : > { %15896 = vst [vmem:[#allocation35_spill] sm:$0xff] %v14478_v19  ;;  %v14481_v38 = vadd.f32 %v6583_v4, %v5833_v63  ;;  %v5836_v62 = vadd.f32 %v10990_v24, %v15899_v42  ;;  %v6923_v24 = vld [vmem:[%s11859_s10 + $0x2ad] sm:$0xff] }
 0x49d   : > { %v5605_v7 = vpop.f32.mrf.mxu1  ;;  %v6586_v39 = vpop.f32.mrf.mxu0  ;;  %v7904_v42 = vld [vmem:[%s11859_s10 + $0x2ae] sm:$0xff] }
 0x49e   : > { %15898 = vst [vmem:[#allocation36_spill] sm:$0xff] %v14481_v38  ;;  %v14484_v37 = vadd.f32 %v11142_v14, %v5836_v62  ;;  %v5834_v27 = vadd.f32 %v5605_v7, %v15901_v17  ;;  %v7903_v14 = vld [vmem:[%s11859_s10 + $0x2a6] sm:$0xff] }
 0x49f   : > { %v10993_v19 = vpop.f32.mrf.mxu1  ;;  %v11145_v49 = vpop.f32.mrf.mxu0  ;;  %11256 = vmatmul.mubr.bf16.gmra.mxu1 %v7017_v35  ;;  %11408 = vmatmul.mubr.bf16.gmra.mxu0 %v7998_v44  ;;  %v15905_v35 = vld [vmem:[#allocation43_spill] sm:$0xff] }
 0x4a0   : > { %15900 = vst [vmem:[#allocation37_spill] sm:$0xff] %v14484_v37  ;;  %v14489_v51 = vadd.f32 %v6586_v39, %v5834_v27  ;;  %v5839_v4 = vadd.f32 %v10993_v19, %v15903_v46  ;;  %11259 = vmatprep.mubr.bf16.mxu1 %v7018_v33  ;;  %11411 = vmatprep.mubr.bf16.mxu0 %v7999_v48  ;;  %v15907_v48 = vld [vmem:[#allocation44_spill] sm:$0xff] }
 0x4a1   : > { %v5618_v63 = vpop.f32.mrf.mxu1  ;;  %v6599_v7 = vpop.f32.mrf.mxu0  ;;  %v7019_v27 = vpack.c.bf16 %v6921_v18, %v6920_v47  ;;  %v8000_v19 = vpack.c.bf16 %v7902_v22, %v7901_v5  ;;  %v8001_v37 = vpack.c.bf16 %v7904_v42, %v7903_v14  ;;  %v6924_v18 = vld [vmem:[%s11859_s10 + $0x2b5] sm:$0xff]  ;;  %v6925_v5 = vld [vmem:[%s11859_s10 + $0x2bd] sm:$0xff]  ;;  %v6926_v42 = vld [vmem:[%s11859_s10 + $0x2c5] sm:$0xff] }
 0x4a2   : > { %15902 = vst [vmem:[#allocation38_spill] sm:$0xff] %v14489_v51  ;;  %v14498_v62 = vadd.f32 %v11145_v49, %v5839_v4  ;;  %v5837_v44 = vadd.f32 %v5618_v63, %v15905_v35  ;;  %v7020_v51 = vpack.c.bf16 %v6923_v24, %v6922_v61  ;;  %v15909_v63 = vld [vmem:[#allocation45_spill] sm:$0xff]  ;;  %v15911_v61 = vld [vmem:[#allocation46_spill] sm:$0xff] }
 0x4a3   : > { %v10994_v17 = vpop.f32.mrf.mxu1  ;;  %v11146_v39 = vpop.f32.mrf.mxu0  ;;  %v7905_v24 = vld [vmem:[%s11859_s10 + $0x2b6] sm:$0xff]  ;;  %v7906_v14 = vld [vmem:[%s11859_s10 + $0x2be] sm:$0xff] }
 0x4a4   : > { %15904 = vst [vmem:[#allocation39_spill] sm:$0xff] %v14498_v62  ;;  %v14501_v33 = vadd.f32 %v6599_v7, %v5837_v44  ;;  %v5840_v46 = vadd.f32 %v10994_v17, %v15907_v48  ;;  %v6927_v17 = vld [vmem:[%s11859_s10 + $0x2cd] sm:$0xff] }
 0x4a5   : > { %v5621_v38 = vpop.f32.mrf.mxu1  ;;  %v6602_v49 = vpop.f32.mrf.mxu0  ;;  %v7908_v48 = vld [vmem:[%s11859_s10 + $0x2ce] sm:$0xff] }
 0x4a6   : > { %15906 = vst [vmem:[#allocation40_spill] sm:$0xff] %v14501_v33  ;;  %v14504_v4 = vadd.f32 %v11146_v39, %v5840_v46  ;;  %v5838_v35 = vadd.f32 %v5621_v38, %v15909_v63  ;;  %v7907_v39 = vld [vmem:[%s11859_s10 + $0x2c6] sm:$0xff] }
 0x4a7   : > { %v10997_v62 = vpop.f32.mrf.mxu1  ;;  %v11149_v47 = vpop.f32.mrf.mxu0  ;;  %11260 = vmatmul.mubr.bf16.gmra.mxu1 %v7019_v27  ;;  %11412 = vmatmul.mubr.bf16.gmra.mxu0 %v8000_v19  ;;  %v15913_v27 = vld [vmem:[#allocation47_spill] sm:$0xff] }
 0x4a8   : > { %15908 = vst [vmem:[#allocation41_spill] sm:$0xff] %v14504_v4  ;;  %v14509_v22 = vadd.f32 %v6602_v49, %v5838_v35  ;;  %v5843_v7 = vadd.f32 %v10997_v62, %v15911_v61  ;;  %11263 = vmatprep.mubr.bf16.mxu1 %v7020_v51  ;;  %11415 = vmatprep.mubr.bf16.mxu0 %v8001_v37  ;;  %v15915_v37 = vld [vmem:[#allocation48_spill] sm:$0xff] }
 0x4a9   : > { %v5634_v44 = vpop.f32.mrf.mxu1  ;;  %v6615_v38 = vpop.f32.mrf.mxu0  ;;  %v7021_v35 = vpack.c.bf16 %v6925_v5, %v6924_v18  ;;  %v8002_v62 = vpack.c.bf16 %v7906_v14, %v7905_v24  ;;  %v8003_v4 = vpack.c.bf16 %v7908_v48, %v7907_v39  ;;  %v6928_v5 = vld [vmem:[%s11859_s10 + $0x2d5] sm:$0xff]  ;;  %v6929_v24 = vld [vmem:[%s11859_s10 + $0x2dd] sm:$0xff]  ;;  %v6930_v48 = vld [vmem:[%s11859_s10 + $0x2e5] sm:$0xff] }
 0x4aa   : > { %15910 = vst [vmem:[#allocation42_spill] sm:$0xff] %v14509_v22  ;;  %v14518_v46 = vadd.f32 %v11149_v47, %v5843_v7  ;;  %v5841_v19 = vadd.f32 %v5634_v44, %v15913_v27  ;;  %v7022_v22 = vpack.c.bf16 %v6927_v17, %v6926_v42  ;;  %v15917_v44 = vld [vmem:[#allocation50_spill] sm:$0xff]  ;;  %v15919_v42 = vld [vmem:[#allocation52_spill] sm:$0xff] }
 0x4ab   : > { %v10998_v63 = vpop.f32.mrf.mxu1  ;;  %v11150_v49 = vpop.f32.mrf.mxu0  ;;  %v7909_v17 = vld [vmem:[%s11859_s10 + $0x2d6] sm:$0xff]  ;;  %v7910_v39 = vld [vmem:[%s11859_s10 + $0x2de] sm:$0xff] }
 0x4ac   : > { %15912 = vst [vmem:[#allocation43_spill] sm:$0xff] %v14518_v46  ;;  %v14521_v51 = vadd.f32 %v6615_v38, %v5841_v19  ;;  %v5844_v61 = vadd.f32 %v10998_v63, %v15915_v37  ;;  %v6931_v63 = vld [vmem:[%s11859_s10 + $0x2ed] sm:$0xff] }
 0x4ad   : > { %v5637_v33 = vpop.f32.mrf.mxu1  ;;  %v6618_v47 = vpop.f32.mrf.mxu0  ;;  %v7912_v37 = vld [vmem:[%s11859_s10 + $0x2ee] sm:$0xff] }
 0x4ae   : > { %15914 = vst [vmem:[#allocation44_spill] sm:$0xff] %v14521_v51  ;;  %v14524_v7 = vadd.f32 %v11150_v49, %v5844_v61  ;;  %v5842_v27 = vadd.f32 %v5637_v33, %v15917_v44  ;;  %v7911_v49 = vld [vmem:[%s11859_s10 + $0x2e6] sm:$0xff] }
 0x4af   : > { %v11001_v46 = vpop.f32.mrf.mxu1  ;;  %v11153_v18 = vpop.f32.mrf.mxu0  ;;  %11264 = vmatmul.mubr.bf16.gmra.mxu1 %v7021_v35  ;;  %11416 = vmatmul.mubr.bf16.gmra.mxu0 %v8002_v62  ;;  %v15921_v35 = vld [vmem:[#allocation54_spill] sm:$0xff] }
 0x4b0   : > { %15916 = vst [vmem:[#allocation45_spill] sm:$0xff] %v14524_v7  ;;  %v14529_v14 = vadd.f32 %v6618_v47, %v5842_v27  ;;  %v5847_v38 = vadd.f32 %v11001_v46, %v15919_v42  ;;  %11267 = vmatprep.mubr.bf16.mxu1 %v7022_v22  ;;  %11419 = vmatprep.mubr.bf16.mxu0 %v8003_v4  ;;  %v15923_v4 = vld [vmem:[#allocation56_spill] sm:$0xff] }
 0x4b1   : > { %v5650_v19 = vpop.f32.mrf.mxu1  ;;  %v6631_v33 = vpop.f32.mrf.mxu0  ;;  %v7023_v27 = vpack.c.bf16 %v6929_v24, %v6928_v5  ;;  %v8004_v46 = vpack.c.bf16 %v7910_v39, %v7909_v17  ;;  %v8005_v7 = vpack.c.bf16 %v7912_v37, %v7911_v49  ;;  %v6932_v24 = vld [vmem:[%s11859_s10 + $0x2f5] sm:$0xff]  ;;  %v6933_v17 = vld [vmem:[%s11859_s10 + $0x2fd] sm:$0xff]  ;;  %v6934_v37 = vld [vmem:[%s11859_s10 + $0x305] sm:$0xff] }
 0x4b2   : > { %15918 = vst [vmem:[#allocation46_spill] sm:$0xff] %v14529_v14  ;;  %v14538_v61 = vadd.f32 %v11153_v18, %v5847_v38  ;;  %v5845_v62 = vadd.f32 %v5650_v19, %v15921_v35  ;;  %v7024_v14 = vpack.c.bf16 %v6931_v63, %v6930_v48  ;;  %v15925_v19 = vld [vmem:[#allocation58_spill] sm:$0xff]  ;;  %v15927_v48 = vld [vmem:[#allocation60_spill] sm:$0xff] }
 0x4b3   : > { %v11002_v44 = vpop.f32.mrf.mxu1  ;;  %v11154_v47 = vpop.f32.mrf.mxu0  ;;  %v7913_v63 = vld [vmem:[%s11859_s10 + $0x2f6] sm:$0xff]  ;;  %v7914_v49 = vld [vmem:[%s11859_s10 + $0x2fe] sm:$0xff] }
 0x4b4   : > { %15920 = vst [vmem:[#allocation47_spill] sm:$0xff] %v14538_v61  ;;  %v14541_v22 = vadd.f32 %v6631_v33, %v5845_v62  ;;  %v5848_v42 = vadd.f32 %v11002_v44, %v15923_v4  ;;  %v6935_v44 = vld [vmem:[%s11859_s10 + $0x30d] sm:$0xff] }
 0x4b5   : > { %v5653_v51 = vpop.f32.mrf.mxu1  ;;  %v6634_v18 = vpop.f32.mrf.mxu0  ;;  %v7916_v4 = vld [vmem:[%s11859_s10 + $0x30e] sm:$0xff] }
 0x4b6   : > { %15922 = vst [vmem:[#allocation48_spill] sm:$0xff] %v14541_v22  ;;  %v14544_v38 = vadd.f32 %v11154_v47, %v5848_v42  ;;  %v5846_v35 = vadd.f32 %v5653_v51, %v15925_v19  ;;  %v7915_v47 = vld [vmem:[%s11859_s10 + $0x306] sm:$0xff] }
 0x4b7   : > { %v11005_v61 = vpop.f32.mrf.mxu1  ;;  %v11157_v5 = vpop.f32.mrf.mxu0  ;;  %11268 = vmatmul.mubr.bf16.gmra.mxu1 %v7023_v27  ;;  %11420 = vmatmul.mubr.bf16.gmra.mxu0 %v8004_v46  ;;  %v15929_v27 = vld [vmem:[#allocation63_spill] sm:$0xff] }
 0x4b8   : > { %15924 = vst [vmem:[#allocation50_spill] sm:$0xff] %v14544_v38  ;;  %v14549_v39 = vadd.f32 %v6634_v18, %v5846_v35  ;;  %v5851_v33 = vadd.f32 %v11005_v61, %v15927_v48  ;;  %11271 = vmatprep.mubr.bf16.mxu1 %v7024_v14  ;;  %11423 = vmatprep.mubr.bf16.mxu0 %v8005_v7  ;;  %v15931_v7 = vld [vmem:[#allocation65_spill] sm:$0xff] }
 0x4b9   : > { %v5666_v62 = vpop.f32.mrf.mxu1  ;;  %v6647_v51 = vpop.f32.mrf.mxu0  ;;  %v7025_v35 = vpack.c.bf16 %v6933_v17, %v6932_v24  ;;  %v8006_v61 = vpack.c.bf16 %v7914_v49, %v7913_v63  ;;  %v8007_v38 = vpack.c.bf16 %v7916_v4, %v7915_v47  ;;  %v6936_v17 = vld [vmem:[%s11859_s10 + $0x315] sm:$0xff]  ;;  %v6937_v63 = vld [vmem:[%s11859_s10 + $0x31d] sm:$0xff]  ;;  %v6938_v4 = vld [vmem:[%s11859_s10 + $0x325] sm:$0xff] }
 0x4ba   : > { %15926 = vst [vmem:[#allocation52_spill] sm:$0xff] %v14549_v39  ;;  %v14558_v42 = vadd.f32 %v11157_v5, %v5851_v33  ;;  %v5849_v46 = vadd.f32 %v5666_v62, %v15929_v27  ;;  %v7026_v39 = vpack.c.bf16 %v6935_v44, %v6934_v37  ;;  %v15933_v62 = vld [vmem:[#allocation67_spill] sm:$0xff]  ;;  %v15935_v37 = vld [vmem:[#allocation69_spill] sm:$0xff] }
 0x4bb   : > { %v11006_v19 = vpop.f32.mrf.mxu1  ;;  %v11158_v18 = vpop.f32.mrf.mxu0  ;;  %v7917_v44 = vld [vmem:[%s11859_s10 + $0x316] sm:$0xff]  ;;  %v7918_v47 = vld [vmem:[%s11859_s10 + $0x31e] sm:$0xff] }
 0x4bc   : > { %15928 = vst [vmem:[#allocation54_spill] sm:$0xff] %v14558_v42  ;;  %v14561_v14 = vadd.f32 %v6647_v51, %v5849_v46  ;;  %v5852_v48 = vadd.f32 %v11006_v19, %v15931_v7  ;;  %v6939_v19 = vld [vmem:[%s11859_s10 + $0x32d] sm:$0xff] }
 0x4bd   : > { %v5669_v22 = vpop.f32.mrf.mxu1  ;;  %v6650_v5 = vpop.f32.mrf.mxu0  ;;  %v7920_v7 = vld [vmem:[%s11859_s10 + $0x32e] sm:$0xff] }
 0x4be   : > { %15930 = vst [vmem:[#allocation56_spill] sm:$0xff] %v14561_v14  ;;  %v14564_v33 = vadd.f32 %v11158_v18, %v5852_v48  ;;  %v5850_v27 = vadd.f32 %v5669_v22, %v15933_v62  ;;  %v7919_v18 = vld [vmem:[%s11859_s10 + $0x326] sm:$0xff] }
 0x4bf   : > { %v11009_v42 = vpop.f32.mrf.mxu1  ;;  %v11161_v24 = vpop.f32.mrf.mxu0  ;;  %11272 = vmatmul.mubr.bf16.gmra.mxu1 %v7025_v35  ;;  %11424 = vmatmul.mubr.bf16.gmra.mxu0 %v8006_v61  ;;  %v15937_v35 = vld [vmem:[#allocation71_spill] sm:$0xff] }
 0x4c0   : > { %15932 = vst [vmem:[#allocation58_spill] sm:$0xff] %v14564_v33  ;;  %v14569_v49 = vadd.f32 %v6650_v5, %v5850_v27  ;;  %v5855_v51 = vadd.f32 %v11009_v42, %v15935_v37  ;;  %11275 = vmatprep.mubr.bf16.mxu1 %v7026_v39  ;;  %11427 = vmatprep.mubr.bf16.mxu0 %v8007_v38  ;;  %v15938_v38 = vld [vmem:[#allocation73_spill] sm:$0xff] }
 0x4c1   : > { %v5682_v46 = vpop.f32.mrf.mxu1  ;;  %v6663_v22 = vpop.f32.mrf.mxu0  ;;  %v7027_v27 = vpack.c.bf16 %v6937_v63, %v6936_v17  ;;  %v8008_v42 = vpack.c.bf16 %v7918_v47, %v7917_v44  ;;  %v8009_v33 = vpack.c.bf16 %v7920_v7, %v7919_v18  ;;  %v6940_v63 = vld [vmem:[%s11859_s10 + $0x335] sm:$0xff]  ;;  %v6941_v44 = vld [vmem:[%s11859_s10 + $0x33d] sm:$0xff]  ;;  %v6942_v7 = vld [vmem:[%s11859_s10 + $0x345] sm:$0xff] }
 0x4c2   : > { %15934 = vst [vmem:[#allocation60_spill] sm:$0xff] %v14569_v49  ;;  %v14578_v48 = vadd.f32 %v11161_v24, %v5855_v51  ;;  %v5853_v61 = vadd.f32 %v5682_v46, %v15937_v35  ;;  %v7028_v49 = vpack.c.bf16 %v6939_v19, %v6938_v4  ;;  %v15940_v46 = vld [vmem:[#allocation75_spill] sm:$0xff]  ;;  %v15942_v4 = vld [vmem:[#allocation77_spill] sm:$0xff] }
 0x4c3   : > { %v11010_v62 = vpop.f32.mrf.mxu1  ;;  %v11162_v5 = vpop.f32.mrf.mxu0  ;;  %v7921_v19 = vld [vmem:[%s11859_s10 + $0x336] sm:$0xff]  ;;  %v7922_v18 = vld [vmem:[%s11859_s10 + $0x33e] sm:$0xff] }
 0x4c4   : > { %15936 = vst [vmem:[#allocation63_spill] sm:$0xff] %v14578_v48  ;;  %v14581_v39 = vadd.f32 %v6663_v22, %v5853_v61  ;;  %v5856_v37 = vadd.f32 %v11010_v62, %v15938_v38  ;;  %v6943_v62 = vld [vmem:[%s11859_s10 + $0x34d] sm:$0xff] }
 0x4c5   : > { %v5685_v14 = vpop.f32.mrf.mxu1  ;;  %v6666_v24 = vpop.f32.mrf.mxu0  ;;  %v7924_v38 = vld [vmem:[%s11859_s10 + $0x34e] sm:$0xff] }
 0x4c6   : > { %v14584_v51 = vadd.f32 %v11162_v5, %v5856_v37  ;;  %v5854_v35 = vadd.f32 %v5685_v14, %v15940_v46  ;;  %v7923_v5 = vld [vmem:[%s11859_s10 + $0x346] sm:$0xff]  ;;  %v7029_v46 = vpack.c.bf16 %v6941_v44, %v6940_v63 }
 0x4c7   : > { %v11013_v48 = vpop.f32.mrf.mxu1  ;;  %v11165_v17 = vpop.f32.mrf.mxu0  ;;  %11276 = vmatmul.mubr.bf16.gmra.mxu1 %v7027_v27  ;;  %11428 = vmatmul.mubr.bf16.gmra.mxu0 %v8008_v42 }
 0x4c8   : > { %15939 = vst [vmem:[#allocation65_spill] sm:$0xff] %v14584_v51  ;;  %v14589_v47 = vadd.f32 %v6666_v24, %v5854_v35  ;;  %v5859_v22 = vadd.f32 %v11013_v48, %v15942_v4  ;;  %11279 = vmatprep.mubr.bf16.mxu1 %v7028_v49  ;;  %11431 = vmatprep.mubr.bf16.mxu0 %v8009_v33 }
 0x4c9   : > { %v5698_v61 = vpop.f32.mrf.mxu1  ;;  %v6679_v14 = vpop.f32.mrf.mxu0  ;;  %v8010_v49 = vpack.c.bf16 %v7922_v18, %v7921_v19  ;;  %v7030_v35 = vpack.c.bf16 %v6943_v62, %v6942_v7  ;;  %v8011_v4 = vpack.c.bf16 %v7924_v38, %v7923_v5  ;;  %v6945_v19 = vld [vmem:[%s11859_s10 + $0x35d] sm:$0xff]  ;;  %v6947_v38 = vld [vmem:[%s11859_s10 + $0x36d] sm:$0xff] }
 0x4ca   : > { %15941 = vst [vmem:[#allocation67_spill] sm:$0xff] %v14589_v47  ;;  %v14598_v37 = vadd.f32 %v11165_v17, %v5859_v22  ;;  %v5857_v27 = vadd.f32 %v5698_v61, %v13959_v16  ;;  %v15943_v16 = vld [vmem:[#allocation79_spill] sm:$0xff]  ;;  %v7925_v61 = vld [vmem:[%s11859_s10 + $0x356] sm:$0xff] }
 0x4cb   : > { %v11014_v42 = vpop.f32.mrf.mxu1  ;;  %v11166_v24 = vpop.f32.mrf.mxu0 }
 0x4cc   : > { %v14601_v33 = vadd.f32 %v6679_v14, %v5857_v27  ;;  %v5860_v48 = vadd.f32 %v11014_v42, %v13962_v9  ;;  %v6944_v9 = vld [vmem:[%s11859_s10 + $0x355] sm:$0xff]  ;;  %v7926_v14 = vld [vmem:[%s11859_s10 + $0x35e] sm:$0xff]  ;;  %v7927_v27 = vld [vmem:[%s11859_s10 + $0x366] sm:$0xff] }
 0x4cd   : > { %v5701_v47 = vpop.f32.mrf.mxu1  ;;  %v6682_v51 = vpop.f32.mrf.mxu0  ;;  %v7928_v42 = vld [vmem:[%s11859_s10 + $0x36e] sm:$0xff] }
 0x4ce   : > { %v14604_v17 = vadd.f32 %v11166_v24, %v5860_v48  ;;  %v5858_v22 = vadd.f32 %v5701_v47, %v15943_v16  ;;  %v6946_v47 = vld [vmem:[%s11859_s10 + $0x365] sm:$0xff]  ;;  %v8012_v48 = vpack.c.bf16 %v7926_v14, %v7925_v61  ;;  %v6949_v61 = vld [vmem:[%s11859_s10 + $0x37d] sm:$0xff] }
 0x4cf   : > { %v11017_v63 = vpop.f32.mrf.mxu1  ;;  %v11169_v44 = vpop.f32.mrf.mxu0  ;;  %11280 = vmatmul.mubr.bf16.gmra.mxu1 %v7029_v46  ;;  %11432 = vmatmul.mubr.bf16.gmra.mxu0 %v8010_v49  ;;  %v7032_v16 = vpack.c.bf16 %v6947_v38, %v6946_v47  ;;  %v7929_v14 = vld [vmem:[%s11859_s10 + $0x376] sm:$0xff]  ;;  %v6951_v38 = vld [vmem:[%s11859_s10 + $0x38d] sm:$0xff] }
 0x4d0   : > { %v14610_v18 = vadd.f32 %v6682_v51, %v5858_v22  ;;  %v5863_v7 = vadd.f32 %v11017_v63, %v13972_v0  ;;  %11283 = vmatprep.mubr.bf16.mxu1 %v7030_v35  ;;  %11435 = vmatprep.mubr.bf16.mxu0 %v8011_v4  ;;  %v7031_v0 = vpack.c.bf16 %v6945_v19, %v6944_v9 }
 0x4d1   : > { %v5714_v62 = vpop.f32.mrf.mxu1  ;;  %v6695_v5 = vpop.f32.mrf.mxu0  ;;  %v8013_v22 = vpack.c.bf16 %v7928_v42, %v7927_v27  ;;  %v14643_v27 = vld [vmem:[#allocation4] ss:$0 sm:$0xff] }
 0x4d2   : > { %v14619_v24 = vadd.f32 %v11169_v44, %v5863_v7  ;;  %v5861_v46 = vadd.f32 %v5714_v62, %v13975_v57 }
 0x4d3   : > { %v11018_v51 = vpop.f32.mrf.mxu1  ;;  %v11170_v49 = vpop.f32.mrf.mxu0 }
 0x4d4   : > { %v14624_v35 = vadd.f32 %v6695_v5, %v5861_v46  ;;  %v5864_v4 = vadd.f32 %v11018_v51, %v13978_v20  ;;  %v6948_v20 = vld [vmem:[%s11859_s10 + $0x375] sm:$0xff]  ;;  %v6950_v5 = vld [vmem:[%s11859_s10 + $0x385] sm:$0xff] }
 0x4d5   : > { %v5717_v63 = vpop.f32.mrf.mxu1  ;;  %v6698_v44 = vpop.f32.mrf.mxu0  ;;  %v7931_v51 = vld [vmem:[%s11859_s10 + $0x386] sm:$0xff] }
 0x4d6   : > { %v14627_v57 = vadd.f32 %v11170_v49, %v5864_v4  ;;  %v5862_v7 = vadd.f32 %v5717_v63, %v13981_v60  ;;  %v7930_v60 = vld [vmem:[%s11859_s10 + $0x37e] sm:$0xff]  ;;  %v7932_v49 = vld [vmem:[%s11859_s10 + $0x38e] sm:$0xff] }
 0x4d7   : > { %v11189_v9 = vpop.f32.mrf.mxu1  ;;  %11284 = vmatmul.mubr.bf16.gmra.mxu1 %v7031_v0  ;;  %v11341_v19 = vpop.f32.mrf.mxu0  ;;  %11436 = vmatmul.mubr.bf16.gmra.mxu0 %v8012_v48 }
 0x4d8   : > { %v14637_v47 = vadd.f32 %v6698_v44, %v5862_v7  ;;  %v7693_v62 = vadd.f32 %v11189_v9, %v13988_v1  ;;  %11287 = vmatprep.mubr.bf16.mxu1 %v7032_v16  ;;  %11439 = vmatprep.mubr.bf16.mxu0 %v8013_v22  ;;  %v7033_v44 = vpack.c.bf16 %v6949_v61, %v6948_v20 }
 0x4d9   : > { %v7148_v42 = vpop.f32.mrf.mxu1  ;;  %v8129_v46 = vpop.f32.mrf.mxu0  ;;  %v8014_v1 = vpack.c.bf16 %v7930_v60, %v7929_v14  ;;  %v7034_v16 = vpack.c.bf16 %v6951_v38, %v6950_v5  ;;  %v6953_v60 = vld [vmem:[%s11859_s10 + $0x39d] sm:$0xff] }
 0x4da   : > { %15944 = vst [vmem:[#allocation69_spill] sm:$0xff] %v14637_v47  ;;  %v8674_v0 = vadd.f32 %v11341_v19, %v7693_v62  ;;  %v7691_v48 = vadd.f32 %v7148_v42, %v13991_v30  ;;  %v8015_v47 = vpack.c.bf16 %v7932_v49, %v7931_v51  ;;  %v7933_v42 = vld [vmem:[%s11859_s10 + $0x396] sm:$0xff]  ;;  %v6954_v51 = vld [vmem:[%s11859_s10 + $0x3a5] sm:$0xff] }
 0x4db   : > { %v11190_v4 = vpop.f32.mrf.mxu1  ;;  %v11342_v63 = vpop.f32.mrf.mxu0 }
 0x4dc   : > { %v8817_v22 = vadd.f32 %v14643_v27, %v8674_v0  ;;  %v8672_v7 = vadd.f32 %v8129_v46, %v7691_v48  ;;  %v7694_v9 = vadd.f32 %v11190_v4, %v13994_v36  ;;  %v6952_v36 = vld [vmem:[%s11859_s10 + $0x395] sm:$0xff]  ;;  %v7934_v46 = vld [vmem:[%s11859_s10 + $0x39e] sm:$0xff]  ;;  %v6955_v4 = vld [vmem:[%s11859_s10 + $0x3ad] sm:$0xff] }
 0x4dd   : > { %v7151_v30 = vpop.f32.mrf.mxu1  ;;  %v8132_v19 = vpop.f32.mrf.mxu0 }
 0x4de   : > { %v8953_v20 = vmax.f32 %v8817_v22, 0.0  ;;  %v8815_v61 = vadd.f32 %v14643_v27, %v8672_v7  ;;  %v8675_v14 = vadd.f32 %v11342_v63, %v7694_v9  ;;  %v7692_v62 = vadd.f32 %v7151_v30, %v13997_v43  ;;  %v7935_v63 = vld [vmem:[%s11859_s10 + $0x3a6] sm:$0xff] }
 0x4df   : > { %v11193_v5 = vpop.f32.mrf.mxu1  ;;  %11288 = vmatmul.mubr.bf16.gmra.mxu1 %v7033_v44  ;;  %v11345_v38 = vpop.f32.mrf.mxu0  ;;  %11440 = vmatmul.mubr.bf16.gmra.mxu0 %v8014_v1  ;;  %v7936_v44 = vld [vmem:[%s11859_s10 + $0x3ae] sm:$0xff] }
 0x4e0   : > { %9090 = vst.msk [vmem:[%s14654_s30 + $0x10] sm:$0xff] %vm9087_vm0, %v8953_v20  ;;  %v8951_v49 = vmax.f32 %v8815_v61, 0.0  ;;  %v8818_v0 = vadd.f32 %v14643_v27, %v8675_v14  ;;  %v8673_v48 = vadd.f32 %v8132_v19, %v7692_v62  ;;  %v7697_v43 = vadd.f32 %v11193_v5, %v14004_v12  ;;  %11291 = vmatprep.mubr.bf16.mxu1 %v7034_v16 }
 0x4e1   : > { %11443 = vmatprep.mubr.bf16.mxu0 %v8015_v47  ;;  %v7164_v22 = vpop.f32.mrf.mxu1  ;;  %v8145_v1 = vpop.f32.mrf.mxu0  ;;  %v7035_v12 = vpack.c.bf16 %v6953_v60, %v6952_v36  ;;  %v8016_v47 = vpack.c.bf16 %v7934_v46, %v7933_v42  ;;  %v7036_v16 = vpack.c.bf16 %v6955_v4, %v6954_v51  ;;  %v8017_v14 = vpack.c.bf16 %v7936_v44, %v7935_v63  ;;  %v6956_v51 = vld [vmem:[%s11859_s10 + $0x3b5] sm:$0xff]  ;;  %v7938_v63 = vld [vmem:[%s11859_s10 + $0x3be] sm:$0xff] }
 0x4e2   : > { %9088 = vst.msk [vmem:[%s14654_s30] sm:$0xff] %vm9087_vm0, %v8951_v49  ;;  %v8954_v7 = vmax.f32 %v8818_v0, 0.0  ;;  %v8816_v9 = vadd.f32 %v14643_v27, %v8673_v48  ;;  %v8678_v30 = vadd.f32 %v11345_v38, %v7697_v43  ;;  %v7695_v20 = vadd.f32 %v7164_v22, %v14007_v28  ;;  %v6957_v48 = vld [vmem:[%s11859_s10 + $0x3bd] sm:$0xff]  ;;  %v6958_v44 = vld [vmem:[%s11859_s10 + $0x3c5] sm:$0xff] }
 0x4e3   : > { %v11194_v19 = vpop.f32.mrf.mxu1  ;;  %v11346_v61 = vpop.f32.mrf.mxu0  ;;  %v7937_v4 = vld [vmem:[%s11859_s10 + $0x3b6] sm:$0xff] }
 0x4e4   : > { %9091 = vst.msk [vmem:[%s14654_s30 + $0x18] sm:$0xff] %vm9087_vm0, %v8954_v7  ;;  %v8952_v62 = vmax.f32 %v8816_v9, 0.0  ;;  %v8821_v5 = vadd.f32 %v14643_v27, %v8678_v30  ;;  %v8676_v49 = vadd.f32 %v8145_v1, %v7695_v20  ;;  %v7698_v38 = vadd.f32 %v11194_v19, %v14010_v31  ;;  %v6959_v9 = vld [vmem:[%s11859_s10 + $0x3cd] sm:$0xff] }
 0x4e5   : > { %v7167_v28 = vpop.f32.mrf.mxu1  ;;  %v8148_v0 = vpop.f32.mrf.mxu0  ;;  %v7939_v30 = vld [vmem:[%s11859_s10 + $0x3c6] sm:$0xff]  ;;  %v7940_v20 = vld [vmem:[%s11859_s10 + $0x3ce] sm:$0xff] }
 0x4e6   : > { %9089 = vst.msk [vmem:[%s14654_s30 + $0x8] sm:$0xff] %vm9087_vm0, %v8952_v62  ;;  %v8957_v36 = vmax.f32 %v8821_v5, 0.0  ;;  %v8819_v60 = vadd.f32 %v14643_v27, %v8676_v49  ;;  %v8679_v42 = vadd.f32 %v11346_v61, %v7698_v38  ;;  %v7696_v46 = vadd.f32 %v7167_v28, %v14013_v25 }
 0x4e7   : > { %v11197_v43 = vpop.f32.mrf.mxu1  ;;  %11292 = vmatmul.mubr.bf16.gmra.mxu1 %v7035_v12  ;;  %v11349_v31 = vpop.f32.mrf.mxu0  ;;  %11444 = vmatmul.mubr.bf16.gmra.mxu0 %v8016_v47  ;;  %v8019_v28 = vpack.c.bf16 %v7940_v20, %v7939_v30  ;;  %v6963_v20 = vld [vmem:[%s11859_s10 + $0x3ed] sm:$0xff] }
 0x4e8   : > { %9094 = vst.msk [vmem:[%s14654_s30 + $0x30] sm:$0xff] %vm9087_vm0, %v8957_v36  ;;  %v8955_v22 = vmax.f32 %v8819_v60, 0.0  ;;  %v8822_v1 = vadd.f32 %v14643_v27, %v8679_v42  ;;  %v8677_v7 = vadd.f32 %v8148_v0, %v7696_v46  ;;  %v7701_v25 = vadd.f32 %v11197_v43, %v14020_v54  ;;  %11295 = vmatprep.mubr.bf16.mxu1 %v7036_v16 }
 0x4e9   : > { %11447 = vmatprep.mubr.bf16.mxu0 %v8017_v14  ;;  %v7180_v19 = vpop.f32.mrf.mxu1  ;;  %v8161_v61 = vpop.f32.mrf.mxu0  ;;  %v7037_v54 = vpack.c.bf16 %v6957_v48, %v6956_v51  ;;  %v8018_v16 = vpack.c.bf16 %v7938_v63, %v7937_v4  ;;  %v7038_v14 = vpack.c.bf16 %v6959_v9, %v6958_v44  ;;  %v6960_v4 = vld [vmem:[%s11859_s10 + $0x3d5] sm:$0xff]  ;;  %v6961_v63 = vld [vmem:[%s11859_s10 + $0x3dd] sm:$0xff] }
 0x4ea   : > { %9092 = vst.msk [vmem:[%s14654_s30 + $0x20] sm:$0xff] %vm9087_vm0, %v8955_v22  ;;  %v8958_v12 = vmax.f32 %v8822_v1, 0.0  ;;  %v8820_v47 = vadd.f32 %v14643_v27, %v8677_v7  ;;  %v8682_v62 = vadd.f32 %v11349_v31, %v7701_v25  ;;  %v7699_v5 = vadd.f32 %v7180_v19, %v14023_v53  ;;  %v7941_v22 = vld [vmem:[%s11859_s10 + $0x3d6] sm:$0xff]  ;;  %v7942_v1 = vld [vmem:[%s11859_s10 + $0x3de] sm:$0xff]  ;;  %v7943_v19 = vld [vmem:[%s11859_s10 + $0x3e6] sm:$0xff] }
 0x4eb   : > { %v11198_v49 = vpop.f32.mrf.mxu1  ;;  %v11350_v38 = vpop.f32.mrf.mxu0  ;;  %v6962_v7 = vld [vmem:[%s11859_s10 + $0x3e5] sm:$0xff] }
 0x4ec   : > { %9095 = vst.msk [vmem:[%s14654_s30 + $0x38] sm:$0xff] %vm9087_vm0, %v8958_v12  ;;  %v8956_v0 = vmax.f32 %v8820_v47, 0.0  ;;  %v8825_v36 = vadd.f32 %v14643_v27, %v8682_v62  ;;  %v8680_v60 = vadd.f32 %v8161_v61, %v7699_v5  ;;  %v7702_v42 = vadd.f32 %v11198_v49, %v14026_v55  ;;  %v7944_v61 = vld [vmem:[%s11859_s10 + $0x3ee] sm:$0xff] }
 0x4ed   : > { %v7183_v53 = vpop.f32.mrf.mxu1  ;;  %v8164_v46 = vpop.f32.mrf.mxu0 }
 0x4ee   : > { %9093 = vst.msk [vmem:[%s14654_s30 + $0x28] sm:$0xff] %vm9087_vm0, %v8956_v0  ;;  %v8961_v51 = vmax.f32 %v8825_v36, 0.0  ;;  %v8823_v48 = vadd.f32 %v14643_v27, %v8680_v60  ;;  %v8683_v43 = vadd.f32 %v11350_v38, %v7702_v42  ;;  %v7700_v31 = vadd.f32 %v7183_v53, %v14029_v21 }
 0x4ef   : > { %v11201_v44 = vpop.f32.mrf.mxu1  ;;  %11296 = vmatmul.mubr.bf16.gmra.mxu1 %v7037_v54  ;;  %v11353_v55 = vpop.f32.mrf.mxu0  ;;  %11448 = vmatmul.mubr.bf16.gmra.mxu0 %v8018_v16  ;;  %v8021_v0 = vpack.c.bf16 %v7944_v61, %v7943_v19 }
 0x4f0   : > { %9098 = vst.msk [vmem:[%s14654_s30 + $0x50] sm:$0xff] %vm9087_vm0, %v8961_v51  ;;  %v8959_v25 = vmax.f32 %v8823_v48, 0.0  ;;  %v8826_v9 = vadd.f32 %v14643_v27, %v8683_v43  ;;  %v8681_v30 = vadd.f32 %v8164_v46, %v7700_v31  ;;  %v7705_v21 = vadd.f32 %v11201_v44, %v14036_v6  ;;  %11299 = vmatprep.mubr.bf16.mxu1 %v7038_v14 }
 0x4f1   : > { %11451 = vmatprep.mubr.bf16.mxu0 %v8019_v28  ;;  %v7196_v12 = vpop.f32.mrf.mxu1  ;;  %v8177_v47 = vpop.f32.mrf.mxu0  ;;  %v7039_v6 = vpack.c.bf16 %v6961_v63, %v6960_v4  ;;  %v8020_v14 = vpack.c.bf16 %v7942_v1, %v7941_v22  ;;  %v7040_v28 = vpack.c.bf16 %v6963_v20, %v6962_v7  ;;  %v6964_v4 = vld [vmem:[%s11859_s10 + $0x3f5] sm:$0xff]  ;;  %v6965_v63 = vld [vmem:[%s11859_s10 + $0x3fd] sm:$0xff]  ;;  %v6966_v1 = vld [vmem:[%s11859_s10 + $0x405] sm:$0xff] }
 0x4f2   : > { %9096 = vst.msk [vmem:[%s14654_s30 + $0x40] sm:$0xff] %vm9087_vm0, %v8959_v25  ;;  %v8962_v62 = vmax.f32 %v8826_v9, 0.0  ;;  %v8824_v5 = vadd.f32 %v14643_v27, %v8681_v30  ;;  %v8686_v49 = vadd.f32 %v11353_v55, %v7705_v21  ;;  %v7703_v38 = vadd.f32 %v7196_v12, %v14039_v2  ;;  %v7945_v55 = vld [vmem:[%s11859_s10 + $0x3f6] sm:$0xff]  ;;  %v7946_v22 = vld [vmem:[%s11859_s10 + $0x3fe] sm:$0xff]  ;;  %v6967_v30 = vld [vmem:[%s11859_s10 + $0x40d] sm:$0xff] }
 0x4f3   : > { %v11202_v54 = vpop.f32.mrf.mxu1  ;;  %v11354_v16 = vpop.f32.mrf.mxu0  ;;  %v7947_v21 = vld [vmem:[%s11859_s10 + $0x406] sm:$0xff]  ;;  %v7948_v20 = vld [vmem:[%s11859_s10 + $0x40e] sm:$0xff] }
 0x4f4   : > { %9099 = vst.msk [vmem:[%s14654_s30 + $0x58] sm:$0xff] %vm9087_vm0, %v8962_v62  ;;  %v8960_v36 = vmax.f32 %v8824_v5, 0.0  ;;  %v8829_v60 = vadd.f32 %v14643_v27, %v8686_v49  ;;  %v8684_v42 = vadd.f32 %v8177_v47, %v7703_v38  ;;  %v7706_v53 = vadd.f32 %v11202_v54, %v14042_v58 }
 0x4f5   : > { %v7199_v2 = vpop.f32.mrf.mxu1  ;;  %v8180_v46 = vpop.f32.mrf.mxu0  ;;  %v8022_v54 = vpack.c.bf16 %v7946_v22, %v7945_v55  ;;  %v6971_v22 = vld [vmem:[%s11859_s10 + $0x42d] sm:$0xff] }
 0x4f6   : > { %9097 = vst.msk [vmem:[%s14654_s30 + $0x48] sm:$0xff] %vm9087_vm0, %v8960_v36  ;;  %v8965_v51 = vmax.f32 %v8829_v60, 0.0  ;;  %v8827_v48 = vadd.f32 %v14643_v27, %v8684_v42  ;;  %v8687_v43 = vadd.f32 %v11354_v16, %v7706_v53  ;;  %v7704_v31 = vadd.f32 %v7199_v2, %v14045_v56 }
 0x4f7   : > { %v11205_v44 = vpop.f32.mrf.mxu1  ;;  %11300 = vmatmul.mubr.bf16.gmra.mxu1 %v7039_v6  ;;  %v11357_v58 = vpop.f32.mrf.mxu0  ;;  %11452 = vmatmul.mubr.bf16.gmra.mxu0 %v8020_v14  ;;  %v7042_v16 = vpack.c.bf16 %v6967_v30, %v6966_v1  ;;  %v8023_v6 = vpack.c.bf16 %v7948_v20, %v7947_v21  ;;  %v7951_v1 = vld [vmem:[%s11859_s10 + $0x426] sm:$0xff] }
 0x4f8   : > { %9102 = vst.msk [vmem:[%s14654_s30 + $0x70] sm:$0xff] %vm9087_vm0, %v8965_v51  ;;  %v8963_v7 = vmax.f32 %v8827_v48, 0.0  ;;  %v8830_v25 = vadd.f32 %v14643_v27, %v8687_v43  ;;  %v8685_v9 = vadd.f32 %v8180_v46, %v7704_v31  ;;  %v7709_v56 = vadd.f32 %v11205_v44, %v14052_v45  ;;  %11303 = vmatprep.mubr.bf16.mxu1 %v7040_v28  ;;  %v6968_v51 = vld [vmem:[%s11859_s10 + $0x415] sm:$0xff]  ;;  %v6969_v48 = vld [vmem:[%s11859_s10 + $0x41d] sm:$0xff] }
 0x4f9   : > { %11455 = vmatprep.mubr.bf16.mxu0 %v8021_v0  ;;  %v7212_v19 = vpop.f32.mrf.mxu1  ;;  %v8193_v61 = vpop.f32.mrf.mxu0  ;;  %v7041_v45 = vpack.c.bf16 %v6965_v63, %v6964_v4  ;;  %v7949_v31 = vld [vmem:[%s11859_s10 + $0x416] sm:$0xff]  ;;  %v7950_v4 = vld [vmem:[%s11859_s10 + $0x41e] sm:$0xff] }
 0x4fa   : > { %9100 = vst.msk [vmem:[%s14654_s30 + $0x60] sm:$0xff] %vm9087_vm0, %v8963_v7  ;;  %v8966_v12 = vmax.f32 %v8830_v25, 0.0  ;;  %v8828_v47 = vadd.f32 %v14643_v27, %v8685_v9  ;;  %v8690_v62 = vadd.f32 %v11357_v58, %v7709_v56  ;;  %v7707_v5 = vadd.f32 %v7212_v19, %v14055_v50  ;;  %v6970_v63 = vld [vmem:[%s11859_s10 + $0x425] sm:$0xff]  ;;  %v7952_v7 = vld [vmem:[%s11859_s10 + $0x42e] sm:$0xff] }
 0x4fb   : > { %v11206_v49 = vpop.f32.mrf.mxu1  ;;  %v11358_v38 = vpop.f32.mrf.mxu0 }
 0x4fc   : > { %9103 = vst.msk [vmem:[%s14654_s30 + $0x78] sm:$0xff] %vm9087_vm0, %v8966_v12  ;;  %v8964_v14 = vmax.f32 %v8828_v47, 0.0  ;;  %v8833_v28 = vadd.f32 %v14643_v27, %v8690_v62  ;;  %v8688_v0 = vadd.f32 %v8193_v61, %v7707_v5  ;;  %v7710_v36 = vadd.f32 %v11206_v49, %v14058_v52 }
 0x4fd   : > { %v7215_v50 = vpop.f32.mrf.mxu1  ;;  %v8196_v60 = vpop.f32.mrf.mxu0  ;;  %v8024_v12 = vpack.c.bf16 %v7950_v4, %v7949_v31  ;;  %v7044_v47 = vpack.c.bf16 %v6971_v22, %v6970_v63  ;;  %v8025_v62 = vpack.c.bf16 %v7952_v7, %v7951_v1 }
 0x4fe   : > { %9101 = vst.msk [vmem:[%s14654_s30 + $0x68] sm:$0xff] %vm9087_vm0, %v8964_v14  ;;  %v8969_v42 = vmax.f32 %v8833_v28, 0.0  ;;  %v8831_v53 = vadd.f32 %v14643_v27, %v8688_v0  ;;  %v8691_v2 = vadd.f32 %v11358_v38, %v7710_v36  ;;  %v7708_v46 = vadd.f32 %v7215_v50, %v14061_v59  ;;  %v6972_v0 = vld [vmem:[%s11859_s10 + $0x435] sm:$0xff]  ;;  %v6973_v36 = vld [vmem:[%s11859_s10 + $0x43d] sm:$0xff] }
 0x4ff   : > { %v11209_v43 = vpop.f32.mrf.mxu1  ;;  %11304 = vmatmul.mubr.bf16.gmra.mxu1 %v7041_v45  ;;  %v11361_v52 = vpop.f32.mrf.mxu0  ;;  %11456 = vmatmul.mubr.bf16.gmra.mxu0 %v8022_v54 }
 0x500   : > { %9106 = vst.msk [vmem:[%s14654_s30 + $0x90] sm:$0xff] %vm9087_vm0, %v8969_v42  ;;  %v8967_v44 = vmax.f32 %v8831_v53, 0.0  ;;  %v8834_v58 = vadd.f32 %v14643_v27, %v8691_v2  ;;  %v8689_v55 = vadd.f32 %v8196_v60, %v7708_v46  ;;  %v7713_v59 = vadd.f32 %v11209_v43, %v14068_v10  ;;  %11307 = vmatprep.mubr.bf16.mxu1 %v7042_v16  ;;  %v7953_v60 = vld [vmem:[%s11859_s10 + $0x436] sm:$0xff]  ;;  %v7954_v42 = vld [vmem:[%s11859_s10 + $0x43e] sm:$0xff]  ;;  %v7955_v43 = vld [vmem:[%s11859_s10 + $0x446] sm:$0xff] }
 0x501   : > { %11459 = vmatprep.mubr.bf16.mxu0 %v8023_v6  ;;  %v7228_v25 = vpop.f32.mrf.mxu1  ;;  %v8209_v9 = vpop.f32.mrf.mxu0  ;;  %v7043_v10 = vpack.c.bf16 %v6969_v48, %v6968_v51  ;;  %v6974_v53 = vld [vmem:[%s11859_s10 + $0x445] sm:$0xff]  ;;  %v6975_v48 = vld [vmem:[%s11859_s10 + $0x44d] sm:$0xff]  ;;  %v8026_v1 = vpack.c.bf16 %v7954_v42, %v7953_v60 }
 0x502   : > { %9104 = vst.msk [vmem:[%s14654_s30 + $0x80] sm:$0xff] %vm9087_vm0, %v8967_v44  ;;  %v8970_v56 = vmax.f32 %v8834_v58, 0.0  ;;  %v8832_v30 = vadd.f32 %v14643_v27, %v8689_v55  ;;  %v8694_v21 = vadd.f32 %v11361_v52, %v7713_v59  ;;  %v7711_v20 = vadd.f32 %v7228_v25, %v14071_v41  ;;  %v7956_v52 = vld [vmem:[%s11859_s10 + $0x44e] sm:$0xff] }
 0x503   : > { %v11210_v19 = vpop.f32.mrf.mxu1  ;;  %v11362_v61 = vpop.f32.mrf.mxu0  ;;  %v7046_v7 = vpack.c.bf16 %v6975_v48, %v6974_v53  ;;  %v8027_v25 = vpack.c.bf16 %v7956_v52, %v7955_v43 }
 0x504   : > { %9107 = vst.msk [vmem:[%s14654_s30 + $0x98] sm:$0xff] %vm9087_vm0, %v8970_v56  ;;  %v8968_v5 = vmax.f32 %v8832_v30, 0.0  ;;  %v8837_v49 = vadd.f32 %v14643_v27, %v8694_v21  ;;  %v8692_v38 = vadd.f32 %v8209_v9, %v7711_v20  ;;  %v7714_v45 = vadd.f32 %v11210_v19, %v14074_v3 }
 0x505   : > { %v7231_v41 = vpop.f32.mrf.mxu1  ;;  %v8212_v54 = vpop.f32.mrf.mxu0 }
 0x506   : > { %9105 = vst.msk [vmem:[%s14654_s30 + $0x88] sm:$0xff] %vm9087_vm0, %v8968_v5  ;;  %v8973_v16 = vmax.f32 %v8837_v49, 0.0  ;;  %v8835_v6 = vadd.f32 %v14643_v27, %v8692_v38  ;;  %v8695_v14 = vadd.f32 %v11362_v61, %v7714_v45  ;;  %v7712_v28 = vadd.f32 %v7231_v41, %v14077_v11  ;;  %v6977_v5 = vld [vmem:[%s11859_s10 + $0x45d] sm:$0xff]  ;;  %v6978_v41 = vld [vmem:[%s11859_s10 + $0x465] sm:$0xff] }
 0x507   : > { %v11213_v50 = vpop.f32.mrf.mxu1  ;;  %11308 = vmatmul.mubr.bf16.gmra.mxu1 %v7043_v10  ;;  %v11365_v3 = vpop.f32.mrf.mxu0  ;;  %11460 = vmatmul.mubr.bf16.gmra.mxu0 %v8024_v12  ;;  %v15945_v12 = vld [vmem:[#allocation81_spill] sm:$0xff] }
 0x508   : > { %9110 = vst.msk [vmem:[%s14654_s30 + $0xb0] sm:$0xff] %vm9087_vm0, %v8973_v16  ;;  %v8971_v2 = vmax.f32 %v8835_v6, 0.0  ;;  %v8838_v46 = vadd.f32 %v14643_v27, %v8695_v14  ;;  %v8693_v51 = vadd.f32 %v8212_v54, %v7712_v28  ;;  %v7717_v11 = vadd.f32 %v11213_v50, %v14084_v13  ;;  %11311 = vmatprep.mubr.bf16.mxu1 %v7044_v47  ;;  %v7957_v38 = vld [vmem:[%s11859_s10 + $0x456] sm:$0xff]  ;;  %v7958_v45 = vld [vmem:[%s11859_s10 + $0x45e] sm:$0xff]  ;;  %v6979_v28 = vld [vmem:[%s11859_s10 + $0x46d] sm:$0xff] }
 0x509   : > { %11463 = vmatprep.mubr.bf16.mxu0 %v8025_v62  ;;  %v7244_v31 = vpop.f32.mrf.mxu1  ;;  %v8225_v4 = vpop.f32.mrf.mxu0  ;;  %v7045_v13 = vpack.c.bf16 %v6973_v36, %v6972_v0  ;;  %v6976_v62 = vld [vmem:[%s11859_s10 + $0x455] sm:$0xff]  ;;  %v7959_v0 = vld [vmem:[%s11859_s10 + $0x466] sm:$0xff]  ;;  %v7048_v48 = vpack.c.bf16 %v6979_v28, %v6978_v41 }
 0x50a   : > { %9108 = vst.msk [vmem:[%s14654_s30 + $0xa0] sm:$0xff] %vm9087_vm0, %v8971_v2  ;;  %v8974_v63 = vmax.f32 %v8838_v46, 0.0  ;;  %v8836_v44 = vadd.f32 %v14643_v27, %v8693_v51  ;;  %v8698_v58 = vadd.f32 %v11365_v3, %v7717_v11  ;;  %v7715_v55 = vadd.f32 %v7244_v31, %v14087_v15  ;;  %v7960_v36 = vld [vmem:[%s11859_s10 + $0x46e] sm:$0xff] }
 0x50b   : > { %v11214_v59 = vpop.f32.mrf.mxu1  ;;  %v11366_v22 = vpop.f32.mrf.mxu0  ;;  %v8028_v11 = vpack.c.bf16 %v7958_v45, %v7957_v38  ;;  %v8029_v43 = vpack.c.bf16 %v7960_v36, %v7959_v0 }
 0x50c   : > { %9111 = vst.msk [vmem:[%s14654_s30 + $0xb8] sm:$0xff] %vm9087_vm0, %v8974_v63  ;;  %v8972_v9 = vmax.f32 %v8836_v44, 0.0  ;;  %v8841_v56 = vadd.f32 %v14643_v27, %v8698_v58  ;;  %v8696_v30 = vadd.f32 %v8225_v4, %v7715_v55  ;;  %v7718_v21 = vadd.f32 %v11214_v59, %v14090_v34  ;;  %v15946_v63 = vld [vmem:[#allocation83_spill] sm:$0xff] }
 0x50d   : > { %v7247_v15 = vpop.f32.mrf.mxu1  ;;  %v8228_v20 = vpop.f32.mrf.mxu0 }
 0x50e   : > { %9109 = vst.msk [vmem:[%s14654_s30 + $0xa8] sm:$0xff] %vm9087_vm0, %v8972_v9  ;;  %v8977_v19 = vmax.f32 %v8841_v56, 0.0  ;;  %v8839_v61 = vadd.f32 %v14643_v27, %v8696_v30  ;;  %v8699_v10 = vadd.f32 %v11366_v22, %v7718_v21  ;;  %v7716_v47 = vadd.f32 %v7247_v15, %v15945_v12  ;;  %v6980_v9 = vld [vmem:[%s11859_s10 + $0x475] sm:$0xff] }
 0x50f   : > { %v11217_v49 = vpop.f32.mrf.mxu1  ;;  %11312 = vmatmul.mubr.bf16.gmra.mxu1 %v7045_v13  ;;  %v11369_v34 = vpop.f32.mrf.mxu0  ;;  %11464 = vmatmul.mubr.bf16.gmra.mxu0 %v8026_v1  ;;  %v15947_v13 = vld [vmem:[#allocation85_spill] sm:$0xff] }
 0x510   : > { %9114 = vst.msk [vmem:[%s14654_s30 + $0xd0] sm:$0xff] %vm9087_vm0, %v8977_v19  ;;  %v8975_v54 = vmax.f32 %v8839_v61, 0.0  ;;  %v8842_v16 = vadd.f32 %v14643_v27, %v8699_v10  ;;  %v8697_v6 = vadd.f32 %v8228_v20, %v7716_v47  ;;  %v7721_v14 = vadd.f32 %v11217_v49, %v14100_v26  ;;  %11315 = vmatprep.mubr.bf16.mxu1 %v7046_v7  ;;  %v6981_v20 = vld [vmem:[%s11859_s10 + $0x47d] sm:$0xff] }
 0x511   : > { %11467 = vmatprep.mubr.bf16.mxu0 %v8027_v25  ;;  %v7260_v50 = vpop.f32.mrf.mxu1  ;;  %v8241_v3 = vpop.f32.mrf.mxu0  ;;  %v7047_v26 = vpack.c.bf16 %v6977_v5, %v6976_v62  ;;  %v7961_v19 = vld [vmem:[%s11859_s10 + $0x476] sm:$0xff]  ;;  %v7962_v61 = vld [vmem:[%s11859_s10 + $0x47e] sm:$0xff] }
 0x512   : > { %9112 = vst.msk [vmem:[%s14654_s30 + $0xc0] sm:$0xff] %vm9087_vm0, %v8975_v54  ;;  %v8978_v60 = vmax.f32 %v8842_v16, 0.0  ;;  %v8840_v42 = vadd.f32 %v14643_v27, %v8697_v6  ;;  %v8702_v53 = vadd.f32 %v11369_v34, %v7721_v14  ;;  %v7719_v2 = vadd.f32 %v7260_v50, %v14103_v29  ;;  %v15948_v49 = vld [vmem:[#allocation87_spill] sm:$0xff]  ;;  %v15949_v14 = vld [vmem:[#allocation89_spill] sm:$0xff] }
 0x513   : > { %v11218_v46 = vpop.f32.mrf.mxu1  ;;  %v11370_v51 = vpop.f32.mrf.mxu0  ;;  %v8030_v41 = vpack.c.bf16 %v7962_v61, %v7961_v19 }
 0x514   : > { %9115 = vst.msk [vmem:[%s14654_s30 + $0xd8] sm:$0xff] %vm9087_vm0, %v8978_v60  ;;  %v8976_v52 = vmax.f32 %v8840_v42, 0.0  ;;  %v8845_v31 = vadd.f32 %v14643_v27, %v8702_v53  ;;  %v8700_v4 = vadd.f32 %v8241_v3, %v7719_v2  ;;  %v7722_v44 = vadd.f32 %v11218_v46, %v15946_v63  ;;  %v15950_v42 = vld [vmem:[#allocation91_spill] sm:$0xff] }
 0x515   : > { %v7263_v58 = vpop.f32.mrf.mxu1  ;;  %v8244_v55 = vpop.f32.mrf.mxu0 }
 0x516   : > { %9113 = vst.msk [vmem:[%s14654_s30 + $0xc8] sm:$0xff] %vm9087_vm0, %v8976_v52  ;;  %v8981_v29 = vmax.f32 %v8845_v31, 0.0  ;;  %v8843_v59 = vadd.f32 %v14643_v27, %v8700_v4  ;;  %v8703_v22 = vadd.f32 %v11370_v51, %v7722_v44  ;;  %v7720_v1 = vadd.f32 %v7263_v58, %v15947_v13 }
 0x517   : > { %v11221_v7 = vpop.f32.mrf.mxu1  ;;  %11316 = vmatmul.mubr.bf16.gmra.mxu1 %v7047_v26  ;;  %v11373_v25 = vpop.f32.mrf.mxu0  ;;  %11468 = vmatmul.mubr.bf16.gmra.mxu0 %v8028_v11 }
 0x518   : > { %9118 = vst.msk [vmem:[%s14654_s30 + $0xf0] sm:$0xff] %vm9087_vm0, %v8981_v29  ;;  %v8979_v56 = vmax.f32 %v8843_v59, 0.0  ;;  %v8846_v30 = vadd.f32 %v14643_v27, %v8703_v22  ;;  %v8701_v21 = vadd.f32 %v8244_v55, %v7720_v1  ;;  %v7725_v15 = vadd.f32 %v11221_v7, %v14118_v8  ;;  %11319 = vmatprep.mubr.bf16.mxu1 %v7048_v48  ;;  %v15951_v48 = vld [vmem:[#allocation93_spill] sm:$0xff]  ;;  %v15952_v1 = vld [vmem:[#allocation95_spill] sm:$0xff] }
 0x519   : > { %11471 = vmatprep.mubr.bf16.mxu0 %v8029_v43  ;;  %v7276_v10 = vpop.f32.mrf.mxu1  ;;  %v8257_v12 = vpop.f32.mrf.mxu0  ;;  %v7049_v8 = vpack.c.bf16 %v6981_v20, %v6980_v9 }
 0x51a   : > { %9116 = vst.msk [vmem:[%s14654_s30 + $0xe0] sm:$0xff] %vm9087_vm0, %v8979_v56  ;;  %v8982_v47 = vmax.f32 %v8846_v30, 0.0  ;;  %v8844_v62 = vadd.f32 %v14643_v27, %v8701_v21  ;;  %v8706_v5 = vadd.f32 %v11373_v25, %v7725_v15  ;;  %v7723_v34 = vadd.f32 %v7276_v10, %v15948_v49  ;;  %v15953_v21 = vld [vmem:[#allocation97_spill] sm:$0xff] }
 0x51b   : > { %v11222_v38 = vpop.f32.mrf.mxu1  ;;  %v11374_v45 = vpop.f32.mrf.mxu0 }
 0x51c   : > { %9119 = vst.msk [vmem:[%s14654_s30 + $0xf8] sm:$0xff] %vm9087_vm0, %v8982_v47  ;;  %v8980_v54 = vmax.f32 %v8844_v62, 0.0  ;;  %v8849_v16 = vadd.f32 %v14643_v27, %v8706_v5  ;;  %v8704_v6 = vadd.f32 %v8257_v12, %v7723_v34  ;;  %v7726_v28 = vadd.f32 %v11222_v38, %v15949_v14  ;;  %v15954_v47 = vld [vmem:[#allocation99_spill] sm:$0xff] }
 0x51d   : > { %v7279_v0 = vpop.f32.mrf.mxu1  ;;  %v8260_v36 = vpop.f32.mrf.mxu0 }
 0x51e   : > { %9117 = vst.msk [vmem:[%s14654_s30 + $0xe8] sm:$0xff] %vm9087_vm0, %v8980_v54  ;;  %v8985_v50 = vmax.f32 %v8849_v16, 0.0  ;;  %v8847_v3 = vadd.f32 %v14643_v27, %v8704_v6  ;;  %v8707_v60 = vadd.f32 %v11374_v45, %v7726_v28  ;;  %v7724_v53 = vadd.f32 %v7279_v0, %v15950_v42  ;;  %v15955_v28 = vld [vmem:[#allocation101_spill] sm:$0xff]  ;;  %v15956_v42 = vld [vmem:[#allocation103_spill] sm:$0xff] }
 0x51f   : > { %v11225_v2 = vpop.f32.mrf.mxu1  ;;  %11320 = vmatmul.mubr.bf16.gmra.mxu1 %v7049_v8  ;;  %v11377_v46 = vpop.f32.mrf.mxu0  ;;  %11472 = vmatmul.mubr.bf16.gmra.mxu0 %v8030_v41 }
 0x520   : > { %9122 = vst.msk [vmem:[%s14654_s30 + $0x110] sm:$0xff] %vm9087_vm0, %v8985_v50  ;;  %v8983_v51 = vmax.f32 %v8847_v3, 0.0  ;;  %v8850_v26 = vadd.f32 %v14643_v27, %v8707_v60  ;;  %v8705_v11 = vadd.f32 %v8260_v36, %v7724_v53  ;;  %v7729_v43 = vadd.f32 %v11225_v2, %v15951_v48  ;;  %v15957_v48 = vld [vmem:[#allocation104_spill] sm:$0xff] }
 0x521   : > { %v7292_v52 = vpop.f32.mrf.mxu1  ;;  %v8273_v31 = vpop.f32.mrf.mxu0 }
 0x522   : > { %9120 = vst.msk [vmem:[%s14654_s30 + $0x100] sm:$0xff] %vm9087_vm0, %v8983_v51  ;;  %v8986_v4 = vmax.f32 %v8850_v26, 0.0  ;;  %v8848_v63 = vadd.f32 %v14643_v27, %v8705_v11  ;;  %v8710_v44 = vadd.f32 %v11377_v46, %v7729_v43  ;;  %v7727_v58 = vadd.f32 %v7292_v52, %v14141_v32 }
 0x523   : > { %v11226_v55 = vpop.f32.mrf.mxu1  ;;  %v11378_v29 = vpop.f32.mrf.mxu0 }
 0x524   : > { %9123 = vst.msk [vmem:[%s14654_s30 + $0x118] sm:$0xff] %vm9087_vm0, %v8986_v4  ;;  %v8984_v59 = vmax.f32 %v8848_v63, 0.0  ;;  %v8853_v22 = vadd.f32 %v14643_v27, %v8710_v44  ;;  %v8708_v13 = vadd.f32 %v8273_v31, %v7727_v58  ;;  %v7730_v7 = vadd.f32 %v11226_v55, %v15952_v1  ;;  %v15958_v58 = vld [vmem:[#allocation105_spill] sm:$0xff] }
 0x525   : > { %v7295_v25 = vpop.f32.mrf.mxu1  ;;  %v8276_v9 = vpop.f32.mrf.mxu0 }
 0x526   : > { %9121 = vst.msk [vmem:[%s14654_s30 + $0x108] sm:$0xff] %vm9087_vm0, %v8984_v59  ;;  %v8989_v56 = vmax.f32 %v8853_v22, 0.0  ;;  %v8851_v30 = vadd.f32 %v14643_v27, %v8708_v13  ;;  %v8711_v32 = vadd.f32 %v11378_v29, %v7730_v7  ;;  %v7728_v15 = vadd.f32 %v7295_v25, %v15953_v21  ;;  %v15959_v7 = vld [vmem:[#allocation106_spill] sm:$0xff] }
 0x527   : > { %v11229_v20 = vpop.f32.mrf.mxu1  ;;  %v11381_v19 = vpop.f32.mrf.mxu0 }
 0x528   : > { %9126 = vst.msk [vmem:[%s14654_s30 + $0x130] sm:$0xff] %vm9087_vm0, %v8989_v56  ;;  %v8987_v61 = vmax.f32 %v8851_v30, 0.0  ;;  %v8854_v10 = vadd.f32 %v14643_v27, %v8711_v32  ;;  %v8709_v12 = vadd.f32 %v8276_v9, %v7728_v15  ;;  %v7733_v62 = vadd.f32 %v11229_v20, %v15954_v47  ;;  %v15960_v15 = vld [vmem:[#allocation107_spill] sm:$0xff] }
 0x529   : > { %v7308_v5 = vpop.f32.mrf.mxu1  ;;  %v8289_v49 = vpop.f32.mrf.mxu0 }
 0x52a   : > { %9124 = vst.msk [vmem:[%s14654_s30 + $0x120] sm:$0xff] %vm9087_vm0, %v8987_v61  ;;  %v8990_v34 = vmax.f32 %v8854_v10, 0.0  ;;  %v8852_v38 = vadd.f32 %v14643_v27, %v8709_v12  ;;  %v8714_v45 = vadd.f32 %v11381_v19, %v7733_v62  ;;  %v7731_v8 = vadd.f32 %v7308_v5, %v14161_v40  ;;  %v15961_v62 = vld [vmem:[#allocation61_spill] sm:$0xff] }
 0x52b   : > { %v11230_v41 = vpop.f32.mrf.mxu1  ;;  %v11382_v54 = vpop.f32.mrf.mxu0 }
 0x52c   : > { %9127 = vst.msk [vmem:[%s14654_s30 + $0x138] sm:$0xff] %vm9087_vm0, %v8990_v34  ;;  %v8988_v16 = vmax.f32 %v8852_v38, 0.0  ;;  %v8857_v6 = vadd.f32 %v14643_v27, %v8714_v45  ;;  %v8712_v14 = vadd.f32 %v8289_v49, %v7731_v8  ;;  %v7734_v0 = vadd.f32 %v11230_v41, %v15955_v28  ;;  %v15962_v41 = vld [vmem:[#allocation49_spill] sm:$0xff] }
 0x52d   : > { %v7311_v36 = vpop.f32.mrf.mxu1  ;;  %v8292_v50 = vpop.f32.mrf.mxu0 }
 0x52e   : > { %9125 = vst.msk [vmem:[%s14654_s30 + $0x128] sm:$0xff] %vm9087_vm0, %v8988_v16  ;;  %v8993_v3 = vmax.f32 %v8857_v6, 0.0  ;;  %v8855_v60 = vadd.f32 %v14643_v27, %v8712_v14  ;;  %v8715_v40 = vadd.f32 %v11382_v54, %v7734_v0  ;;  %v7732_v53 = vadd.f32 %v7311_v36, %v15956_v42  ;;  %v15963_v36 = vld [vmem:[#allocation51_spill] sm:$0xff] }
 0x52f   : > { %v11233_v2 = vpop.f32.mrf.mxu1  ;;  %v11385_v46 = vpop.f32.mrf.mxu0 }
 0x530   : > { %9130 = vst.msk [vmem:[%s14654_s30 + $0x150] sm:$0xff] %vm9087_vm0, %v8993_v3  ;;  %v8991_v51 = vmax.f32 %v8855_v60, 0.0  ;;  %v8858_v26 = vadd.f32 %v14643_v27, %v8715_v40  ;;  %v8713_v11 = vadd.f32 %v8292_v50, %v7732_v53  ;;  %v7737_v43 = vadd.f32 %v11233_v2, %v15957_v48  ;;  %v15964_v2 = vld [vmem:[#allocation53_spill] sm:$0xff] }
 0x531   : > { %v7324_v52 = vpop.f32.mrf.mxu1  ;;  %v8305_v31 = vpop.f32.mrf.mxu0 }
 0x532   : > { %9128 = vst.msk [vmem:[%s14654_s30 + $0x140] sm:$0xff] %vm9087_vm0, %v8991_v51  ;;  %v8994_v4 = vmax.f32 %v8858_v26, 0.0  ;;  %v8856_v63 = vadd.f32 %v14643_v27, %v8713_v11  ;;  %v8718_v44 = vadd.f32 %v11385_v46, %v7737_v43  ;;  %v7735_v55 = vadd.f32 %v7324_v52, %v15958_v58  ;;  %v15965_v52 = vld [vmem:[#allocation55_spill] sm:$0xff] }
 0x533   : > { %v11234_v29 = vpop.f32.mrf.mxu1  ;;  %v11386_v59 = vpop.f32.mrf.mxu0 }
 0x534   : > { %9131 = vst.msk [vmem:[%s14654_s30 + $0x158] sm:$0xff] %vm9087_vm0, %v8994_v4  ;;  %v8992_v22 = vmax.f32 %v8856_v63, 0.0  ;;  %v8861_v13 = vadd.f32 %v14643_v27, %v8718_v44  ;;  %v8716_v1 = vadd.f32 %v8305_v31, %v7735_v55  ;;  %v7738_v25 = vadd.f32 %v11234_v29, %v15959_v7  ;;  %v15966_v29 = vld [vmem:[#allocation57_spill] sm:$0xff] }
 0x535   : > { %v7327_v9 = vpop.f32.mrf.mxu1  ;;  %v8308_v56 = vpop.f32.mrf.mxu0 }
 0x536   : > { %9129 = vst.msk [vmem:[%s14654_s30 + $0x148] sm:$0xff] %vm9087_vm0, %v8992_v22  ;;  %v8997_v30 = vmax.f32 %v8861_v13, 0.0  ;;  %v8859_v32 = vadd.f32 %v14643_v27, %v8716_v1  ;;  %v8719_v21 = vadd.f32 %v11386_v59, %v7738_v25  ;;  %v7736_v20 = vadd.f32 %v7327_v9, %v15960_v15  ;;  %v15967_v9 = vld [vmem:[#allocation59_spill] sm:$0xff] }
 0x537   : > { %v11237_v19 = vpop.f32.mrf.mxu1  ;;  %v11389_v61 = vpop.f32.mrf.mxu0 }
 0x538   : > { %9134 = vst.msk [vmem:[%s14654_s30 + $0x170] sm:$0xff] %vm9087_vm0, %v8997_v30  ;;  %v8995_v10 = vmax.f32 %v8859_v32, 0.0  ;;  %v8862_v12 = vadd.f32 %v14643_v27, %v8719_v21  ;;  %v8717_v47 = vadd.f32 %v8308_v56, %v7736_v20  ;;  %v7741_v5 = vadd.f32 %v11237_v19, %v15961_v62  ;;  %v15968_v19 = vld [vmem:[#allocation62_spill] sm:$0xff]  ;;  %v14928_v62 = vld [vmem:[#allocation4] ss:$0 sm:$0xff] }
 0x539   : > { %v7340_v49 = vpop.f32.mrf.mxu1  ;;  %v8321_v34 = vpop.f32.mrf.mxu0 }
 0x53a   : > { %9132 = vst.msk [vmem:[%s14654_s30 + $0x160] sm:$0xff] %vm9087_vm0, %v8995_v10  ;;  %v8998_v38 = vmax.f32 %v8862_v12, 0.0  ;;  %v8860_v45 = vadd.f32 %v14643_v27, %v8717_v47  ;;  %v8722_v8 = vadd.f32 %v11389_v61, %v7741_v5  ;;  %v7739_v54 = vadd.f32 %v7340_v49, %v15962_v41 }
 0x53b   : > { %v11238_v16 = vpop.f32.mrf.mxu1  ;;  %v11390_v6 = vpop.f32.mrf.mxu0 }
 0x53c   : > { %9135 = vst.msk [vmem:[%s14654_s30 + $0x178] sm:$0xff] %vm9087_vm0, %v8998_v38  ;;  %v8996_v14 = vmax.f32 %v8860_v45, 0.0  ;;  %v8865_v28 = vadd.f32 %v14643_v27, %v8722_v8  ;;  %v8720_v0 = vadd.f32 %v8321_v34, %v7739_v54  ;;  %v7742_v50 = vadd.f32 %v11238_v16, %v15963_v36  ;;  %v15969_v34 = vld [vmem:[#allocation64_spill] sm:$0xff]  ;;  %v15970_v16 = vld [vmem:[#allocation66_spill] sm:$0xff] }
 0x53d   : > { %v7343_v3 = vpop.f32.mrf.mxu1  ;;  %v8324_v60 = vpop.f32.mrf.mxu0 }
 0x53e   : > { %9133 = vst.msk [vmem:[%s14654_s30 + $0x168] sm:$0xff] %vm9087_vm0, %v8996_v14  ;;  %v9001_v40 = vmax.f32 %v8865_v28, 0.0  ;;  %v8863_v42 = vadd.f32 %v14643_v27, %v8720_v0  ;;  %v8723_v53 = vadd.f32 %v11390_v6, %v7742_v50  ;;  %v7740_v46 = vadd.f32 %v7343_v3, %v15964_v2  ;;  %v15971_v3 = vld [vmem:[#allocation68_spill] sm:$0xff] }
 0x53f   : > { %v11241_v51 = vpop.f32.mrf.mxu1  ;;  %v11393_v26 = vpop.f32.mrf.mxu0 }
 0x540   : > { %9138 = vst.msk [vmem:[%s14654_s30 + $0x190] sm:$0xff] %vm9087_vm0, %v9001_v40  ;;  %v8999_v11 = vmax.f32 %v8863_v42, 0.0  ;;  %v8866_v48 = vadd.f32 %v14643_v27, %v8723_v53  ;;  %v8721_v43 = vadd.f32 %v8324_v60, %v7740_v46  ;;  %v7745_v31 = vadd.f32 %v11241_v51, %v15965_v52  ;;  %v15972_v51 = vld [vmem:[#allocation70_spill] sm:$0xff] }
 0x541   : > { %v7356_v4 = vpop.f32.mrf.mxu1  ;;  %v8337_v63 = vpop.f32.mrf.mxu0 }
 0x542   : > { %9136 = vst.msk [vmem:[%s14654_s30 + $0x180] sm:$0xff] %vm9087_vm0, %v8999_v11  ;;  %v9002_v44 = vmax.f32 %v8866_v48, 0.0  ;;  %v8864_v58 = vadd.f32 %v14643_v27, %v8721_v43  ;;  %v8726_v55 = vadd.f32 %v11393_v26, %v7745_v31  ;;  %v7743_v59 = vadd.f32 %v7356_v4, %v15966_v29  ;;  %v15973_v4 = vld [vmem:[#allocation72_spill] sm:$0xff] }
 0x543   : > { %v11242_v22 = vpop.f32.mrf.mxu1  ;;  %v11394_v13 = vpop.f32.mrf.mxu0 }
 0x544   : > { %9139 = vst.msk [vmem:[%s14654_s30 + $0x198] sm:$0xff] %vm9087_vm0, %v9002_v44  ;;  %v9000_v1 = vmax.f32 %v8864_v58, 0.0  ;;  %v8869_v7 = vadd.f32 %v14643_v27, %v8726_v55  ;;  %v8724_v25 = vadd.f32 %v8337_v63, %v7743_v59  ;;  %v7746_v56 = vadd.f32 %v11242_v22, %v15967_v9  ;;  %v15974_v22 = vld [vmem:[#allocation74_spill] sm:$0xff] }
 0x545   : > { %v7359_v30 = vpop.f32.mrf.mxu1  ;;  %v8340_v32 = vpop.f32.mrf.mxu0 }
 0x546   : > { %9137 = vst.msk [vmem:[%s14654_s30 + $0x188] sm:$0xff] %vm9087_vm0, %v9000_v1  ;;  %v9005_v21 = vmax.f32 %v8869_v7, 0.0  ;;  %v8867_v15 = vadd.f32 %v14643_v27, %v8724_v25  ;;  %v8727_v20 = vadd.f32 %v11394_v13, %v7746_v56  ;;  %v7744_v61 = vadd.f32 %v7359_v30, %v15968_v19  ;;  %v15975_v30 = vld [vmem:[#allocation76_spill] sm:$0xff] }
 0x547   : > { %v11245_v10 = vpop.f32.mrf.mxu1  ;;  %v11397_v12 = vpop.f32.mrf.mxu0 }
 0x548   : > { %9142 = vst.msk [vmem:[%s14654_s30 + $0x1b0] sm:$0xff] %vm9087_vm0, %v9005_v21  ;;  %v9003_v47 = vmax.f32 %v8867_v15, 0.0  ;;  %v8870_v5 = vadd.f32 %v14928_v62, %v8727_v20  ;;  %v8725_v49 = vadd.f32 %v8340_v32, %v7744_v61  ;;  %v7749_v38 = vadd.f32 %v11245_v10, %v15969_v34  ;;  %v15976_v10 = vld [vmem:[#allocation78_spill] sm:$0xff] }
 0x549   : > { %v7372_v45 = vpop.f32.mrf.mxu1  ;;  %v8353_v8 = vpop.f32.mrf.mxu0 }
 0x54a   : > { %9140 = vst.msk [vmem:[%s14654_s30 + $0x1a0] sm:$0xff] %vm9087_vm0, %v9003_v47  ;;  %v9006_v27 = vmax.f32 %v8870_v5, 0.0  ;;  %v8868_v41 = vadd.f32 %v14928_v62, %v8725_v49  ;;  %v8730_v54 = vadd.f32 %v11397_v12, %v7749_v38  ;;  %v7747_v6 = vadd.f32 %v7372_v45, %v15970_v16  ;;  %v15977_v45 = vld [vmem:[#allocation80_spill] sm:$0xff] }
 0x54b   : > { %v11246_v14 = vpop.f32.mrf.mxu1  ;;  %v11398_v28 = vpop.f32.mrf.mxu0 }
 0x54c   : > { %9143 = vst.msk [vmem:[%s14654_s30 + $0x1b8] sm:$0xff] %vm9087_vm0, %v9006_v27  ;;  %v9004_v0 = vmax.f32 %v8868_v41, 0.0  ;;  %v8873_v36 = vadd.f32 %v14928_v62, %v8730_v54  ;;  %v8728_v50 = vadd.f32 %v8353_v8, %v7747_v6  ;;  %v7750_v60 = vadd.f32 %v11246_v14, %v15971_v3  ;;  %v15978_v14 = vld [vmem:[#allocation82_spill] sm:$0xff] }
 0x54d   : > { %v7375_v40 = vpop.f32.mrf.mxu1  ;;  %v8356_v42 = vpop.f32.mrf.mxu0 }
 0x54e   : > { %9141 = vst.msk [vmem:[%s14654_s30 + $0x1a8] sm:$0xff] %vm9087_vm0, %v9004_v0  ;;  %v9009_v53 = vmax.f32 %v8873_v36, 0.0  ;;  %v8871_v2 = vadd.f32 %v14928_v62, %v8728_v50  ;;  %v8731_v46 = vadd.f32 %v11398_v28, %v7750_v60  ;;  %v7748_v26 = vadd.f32 %v7375_v40, %v15972_v51  ;;  %v15979_v40 = vld [vmem:[#allocation84_spill] sm:$0xff] }
 0x54f   : > { %v11249_v11 = vpop.f32.mrf.mxu1  ;;  %v11401_v48 = vpop.f32.mrf.mxu0 }
 0x550   : > { %9146 = vst.msk [vmem:[%s14654_s30 + $0x1d0] sm:$0xff] %vm9087_vm0, %v9009_v53  ;;  %v9007_v43 = vmax.f32 %v8871_v2, 0.0  ;;  %v8874_v52 = vadd.f32 %v14928_v62, %v8731_v46  ;;  %v8729_v31 = vadd.f32 %v8356_v42, %v7748_v26  ;;  %v7753_v63 = vadd.f32 %v11249_v11, %v15973_v4  ;;  %v15980_v11 = vld [vmem:[#allocation86_spill] sm:$0xff] }
 0x551   : > { %v7388_v44 = vpop.f32.mrf.mxu1  ;;  %v8369_v58 = vpop.f32.mrf.mxu0 }
 0x552   : > { %9144 = vst.msk [vmem:[%s14654_s30 + $0x1c0] sm:$0xff] %vm9087_vm0, %v9007_v43  ;;  %v9010_v55 = vmax.f32 %v8874_v52, 0.0  ;;  %v8872_v29 = vadd.f32 %v14928_v62, %v8729_v31  ;;  %v8734_v59 = vadd.f32 %v11401_v48, %v7753_v63  ;;  %v7751_v13 = vadd.f32 %v7388_v44, %v15974_v22  ;;  %v15981_v44 = vld [vmem:[#allocation88_spill] sm:$0xff] }
 0x553   : > { %v11250_v1 = vpop.f32.mrf.mxu1  ;;  %v11402_v7 = vpop.f32.mrf.mxu0 }
 0x554   : > { %9147 = vst.msk [vmem:[%s14654_s30 + $0x1d8] sm:$0xff] %vm9087_vm0, %v9010_v55  ;;  %v9008_v25 = vmax.f32 %v8872_v29, 0.0  ;;  %v8877_v9 = vadd.f32 %v14928_v62, %v8734_v59  ;;  %v8732_v56 = vadd.f32 %v8369_v58, %v7751_v13  ;;  %v7754_v32 = vadd.f32 %v11250_v1, %v15975_v30  ;;  %v15982_v1 = vld [vmem:[#allocation90_spill] sm:$0xff] }
 0x555   : > { %v7391_v21 = vpop.f32.mrf.mxu1  ;;  %v8372_v15 = vpop.f32.mrf.mxu0 }
 0x556   : > { %9145 = vst.msk [vmem:[%s14654_s30 + $0x1c8] sm:$0xff] %vm9087_vm0, %v9008_v25  ;;  %v9013_v20 = vmax.f32 %v8877_v9, 0.0  ;;  %v8875_v19 = vadd.f32 %v14928_v62, %v8732_v56  ;;  %v8735_v61 = vadd.f32 %v11402_v7, %v7754_v32  ;;  %v7752_v12 = vadd.f32 %v7391_v21, %v15976_v10  ;;  %v15983_v21 = vld [vmem:[#allocation92_spill] sm:$0xff] }
 0x557   : > { %v11253_v47 = vpop.f32.mrf.mxu1  ;;  %v11405_v5 = vpop.f32.mrf.mxu0 }
 0x558   : > { %9150 = vst.msk [vmem:[%s14654_s30 + $0x1f0] sm:$0xff] %vm9087_vm0, %v9013_v20  ;;  %v9011_v49 = vmax.f32 %v8875_v19, 0.0  ;;  %v8878_v34 = vadd.f32 %v14928_v62, %v8735_v61  ;;  %v8733_v38 = vadd.f32 %v8372_v15, %v7752_v12  ;;  %v7757_v8 = vadd.f32 %v11253_v47, %v15977_v45  ;;  %v15984_v47 = vld [vmem:[#allocation94_spill] sm:$0xff] }
 0x559   : > { %v7404_v27 = vpop.f32.mrf.mxu1  ;;  %v8385_v41 = vpop.f32.mrf.mxu0 }
 0x55a   : > { %9148 = vst.msk [vmem:[%s14654_s30 + $0x1e0] sm:$0xff] %vm9087_vm0, %v9011_v49  ;;  %v9014_v54 = vmax.f32 %v8878_v34, 0.0  ;;  %v8876_v16 = vadd.f32 %v14928_v62, %v8733_v38  ;;  %v8738_v6 = vadd.f32 %v11405_v5, %v7757_v8  ;;  %v7755_v28 = vadd.f32 %v7404_v27, %v15978_v14  ;;  %v15985_v27 = vld [vmem:[#allocation96_spill] sm:$0xff] }
 0x55b   : > { %v11254_v0 = vpop.f32.mrf.mxu1  ;;  %v11406_v36 = vpop.f32.mrf.mxu0 }
 0x55c   : > { %9151 = vst.msk [vmem:[%s14654_s30 + $0x1f8] sm:$0xff] %vm9087_vm0, %v9014_v54  ;;  %v9012_v50 = vmax.f32 %v8876_v16, 0.0  ;;  %v8881_v3 = vadd.f32 %v14928_v62, %v8738_v6  ;;  %v8736_v60 = vadd.f32 %v8385_v41, %v7755_v28  ;;  %v7758_v42 = vadd.f32 %v11254_v0, %v15979_v40  ;;  %v15986_v0 = vld [vmem:[#allocation98_spill] sm:$0xff] }
 0x55d   : > { %v7407_v53 = vpop.f32.mrf.mxu1  ;;  %v8388_v2 = vpop.f32.mrf.mxu0 }
 0x55e   : > { %9149 = vst.msk [vmem:[%s14654_s30 + $0x1e8] sm:$0xff] %vm9087_vm0, %v9012_v50  ;;  %v9017_v46 = vmax.f32 %v8881_v3, 0.0  ;;  %v8879_v51 = vadd.f32 %v14928_v62, %v8736_v60  ;;  %v8739_v26 = vadd.f32 %v11406_v36, %v7758_v42  ;;  %v7756_v48 = vadd.f32 %v7407_v53, %v15980_v11  ;;  %v15987_v53 = vld [vmem:[#allocation100_spill] sm:$0xff] }
 0x55f   : > { %v11257_v43 = vpop.f32.mrf.mxu1  ;;  %v11409_v52 = vpop.f32.mrf.mxu0 }
 0x560   : > { %9154 = vst.msk [vmem:[%s14654_s30 + $0x210] sm:$0xff] %vm9087_vm0, %v9017_v46  ;;  %v9015_v31 = vmax.f32 %v8879_v51, 0.0  ;;  %v8882_v4 = vadd.f32 %v14928_v62, %v8739_v26  ;;  %v8737_v63 = vadd.f32 %v8388_v2, %v7756_v48  ;;  %v7761_v58 = vadd.f32 %v11257_v43, %v15981_v44  ;;  %v15988_v43 = vld [vmem:[#allocation102_spill] sm:$0xff] }
 0x561   : > { %v7420_v55 = vpop.f32.mrf.mxu1  ;;  %v8401_v29 = vpop.f32.mrf.mxu0 }
 0x562   : > { %9152 = vst.msk [vmem:[%s14654_s30 + $0x200] sm:$0xff] %vm9087_vm0, %v9015_v31  ;;  %v9018_v59 = vmax.f32 %v8882_v4, 0.0  ;;  %v8880_v22 = vadd.f32 %v14928_v62, %v8737_v63  ;;  %v8742_v13 = vadd.f32 %v11409_v52, %v7761_v58  ;;  %v7759_v7 = vadd.f32 %v7420_v55, %v15982_v1  ;;  %v15989_v55 = vld [vmem:[#allocation8_spill] sm:$0xff] }
 0x563   : > { %v11258_v25 = vpop.f32.mrf.mxu1  ;;  %v11410_v9 = vpop.f32.mrf.mxu0 }
 0x564   : > { %9155 = vst.msk [vmem:[%s14654_s30 + $0x218] sm:$0xff] %vm9087_vm0, %v9018_v59  ;;  %v9016_v56 = vmax.f32 %v8880_v22, 0.0  ;;  %v8885_v30 = vadd.f32 %v14928_v62, %v8742_v13  ;;  %v8740_v32 = vadd.f32 %v8401_v29, %v7759_v7  ;;  %v7762_v15 = vadd.f32 %v11258_v25, %v15983_v21  ;;  %v15990_v25 = vld [vmem:[#allocation9_spill] sm:$0xff] }
 0x565   : > { %v7423_v20 = vpop.f32.mrf.mxu1  ;;  %v8404_v19 = vpop.f32.mrf.mxu0 }
 0x566   : > { %9153 = vst.msk [vmem:[%s14654_s30 + $0x208] sm:$0xff] %vm9087_vm0, %v9016_v56  ;;  %v9021_v61 = vmax.f32 %v8885_v30, 0.0  ;;  %v8883_v10 = vadd.f32 %v14928_v62, %v8740_v32  ;;  %v8743_v12 = vadd.f32 %v11410_v9, %v7762_v15  ;;  %v7760_v5 = vadd.f32 %v7423_v20, %v15984_v47  ;;  %v15991_v20 = vld [vmem:[#allocation10_spill] sm:$0xff] }
 0x567   : > { %v11261_v49 = vpop.f32.mrf.mxu1  ;;  %v11413_v34 = vpop.f32.mrf.mxu0 }
 0x568   : > { %9158 = vst.msk [vmem:[%s14654_s30 + $0x230] sm:$0xff] %vm9087_vm0, %v9021_v61  ;;  %v9019_v38 = vmax.f32 %v8883_v10, 0.0  ;;  %v8886_v45 = vadd.f32 %v14928_v62, %v8743_v12  ;;  %v8741_v8 = vadd.f32 %v8404_v19, %v7760_v5  ;;  %v7765_v41 = vadd.f32 %v11261_v49, %v15985_v27  ;;  %v15992_v49 = vld [vmem:[#allocation11_spill] sm:$0xff] }
 0x569   : > { %v7436_v54 = vpop.f32.mrf.mxu1  ;;  %v8417_v16 = vpop.f32.mrf.mxu0 }
 0x56a   : > { %9156 = vst.msk [vmem:[%s14654_s30 + $0x220] sm:$0xff] %vm9087_vm0, %v9019_v38  ;;  %v9022_v6 = vmax.f32 %v8886_v45, 0.0  ;;  %v8884_v14 = vadd.f32 %v14928_v62, %v8741_v8  ;;  %v8746_v28 = vadd.f32 %v11413_v34, %v7765_v41  ;;  %v7763_v36 = vadd.f32 %v7436_v54, %v15986_v0  ;;  %v15993_v54 = vld [vmem:[#allocation12_spill] sm:$0xff] }
 0x56b   : > { %v11262_v50 = vpop.f32.mrf.mxu1  ;;  %v11414_v3 = vpop.f32.mrf.mxu0 }
 0x56c   : > { %9159 = vst.msk [vmem:[%s14654_s30 + $0x238] sm:$0xff] %vm9087_vm0, %v9022_v6  ;;  %v9020_v60 = vmax.f32 %v8884_v14, 0.0  ;;  %v8889_v40 = vadd.f32 %v14928_v62, %v8746_v28  ;;  %v8744_v42 = vadd.f32 %v8417_v16, %v7763_v36  ;;  %v7766_v2 = vadd.f32 %v11262_v50, %v15987_v53  ;;  %v15994_v50 = vld [vmem:[#allocation13_spill] sm:$0xff] }
 0x56d   : > { %v7439_v46 = vpop.f32.mrf.mxu1  ;;  %v8420_v51 = vpop.f32.mrf.mxu0 }
 0x56e   : > { %9157 = vst.msk [vmem:[%s14654_s30 + $0x228] sm:$0xff] %vm9087_vm0, %v9020_v60  ;;  %v9025_v26 = vmax.f32 %v8889_v40, 0.0  ;;  %v8887_v11 = vadd.f32 %v14928_v62, %v8744_v42  ;;  %v8747_v48 = vadd.f32 %v11414_v3, %v7766_v2  ;;  %v7764_v52 = vadd.f32 %v7439_v46, %v15988_v43  ;;  %v15995_v46 = vld [vmem:[#allocation14_spill] sm:$0xff] }
 0x56f   : > { %v11265_v31 = vpop.f32.mrf.mxu1  ;;  %v11417_v4 = vpop.f32.mrf.mxu0 }
 0x570   : > { %9162 = vst.msk [vmem:[%s14654_s30 + $0x250] sm:$0xff] %vm9087_vm0, %v9025_v26  ;;  %v9023_v63 = vmax.f32 %v8887_v11, 0.0  ;;  %v8890_v44 = vadd.f32 %v14928_v62, %v8747_v48  ;;  %v8745_v58 = vadd.f32 %v8420_v51, %v7764_v52  ;;  %v7769_v29 = vadd.f32 %v11265_v31, %v15989_v55  ;;  %v15996_v31 = vld [vmem:[#allocation15_spill] sm:$0xff] }
 0x571   : > { %v7452_v59 = vpop.f32.mrf.mxu1  ;;  %v8433_v22 = vpop.f32.mrf.mxu0 }
 0x572   : > { %9160 = vst.msk [vmem:[%s14654_s30 + $0x240] sm:$0xff] %vm9087_vm0, %v9023_v63  ;;  %v9026_v13 = vmax.f32 %v8890_v44, 0.0  ;;  %v8888_v1 = vadd.f32 %v14928_v62, %v8745_v58  ;;  %v8750_v7 = vadd.f32 %v11417_v4, %v7769_v29  ;;  %v7767_v9 = vadd.f32 %v7452_v59, %v15990_v25  ;;  %v15997_v59 = vld [vmem:[#allocation16_spill] sm:$0xff] }
 0x573   : > { %v11266_v56 = vpop.f32.mrf.mxu1  ;;  %v11418_v30 = vpop.f32.mrf.mxu0 }
 0x574   : > { %9163 = vst.msk [vmem:[%s14654_s30 + $0x258] sm:$0xff] %vm9087_vm0, %v9026_v13  ;;  %v9024_v32 = vmax.f32 %v8888_v1, 0.0  ;;  %v8893_v21 = vadd.f32 %v14928_v62, %v8750_v7  ;;  %v8748_v15 = vadd.f32 %v8433_v22, %v7767_v9  ;;  %v7770_v19 = vadd.f32 %v11266_v56, %v15991_v20  ;;  %v15998_v56 = vld [vmem:[#allocation17_spill] sm:$0xff] }
 0x575   : > { %v7455_v61 = vpop.f32.mrf.mxu1  ;;  %v8436_v10 = vpop.f32.mrf.mxu0 }
 0x576   : > { %9161 = vst.msk [vmem:[%s14654_s30 + $0x248] sm:$0xff] %vm9087_vm0, %v9024_v32  ;;  %v9029_v12 = vmax.f32 %v8893_v21, 0.0  ;;  %v8891_v47 = vadd.f32 %v14928_v62, %v8748_v15  ;;  %v8751_v5 = vadd.f32 %v11418_v30, %v7770_v19  ;;  %v7768_v34 = vadd.f32 %v7455_v61, %v15992_v49  ;;  %v15999_v61 = vld [vmem:[#allocation18_spill] sm:$0xff] }
 0x577   : > { %v11269_v38 = vpop.f32.mrf.mxu1  ;;  %v11421_v45 = vpop.f32.mrf.mxu0 }
 0x578   : > { %9166 = vst.msk [vmem:[%s14654_s30 + $0x270] sm:$0xff] %vm9087_vm0, %v9029_v12  ;;  %v9027_v8 = vmax.f32 %v8891_v47, 0.0  ;;  %v8894_v27 = vadd.f32 %v14928_v62, %v8751_v5  ;;  %v8749_v41 = vadd.f32 %v8436_v10, %v7768_v34  ;;  %v7773_v16 = vadd.f32 %v11269_v38, %v15993_v54  ;;  %v16000_v38 = vld [vmem:[#allocation19_spill] sm:$0xff] }
 0x579   : > { %v7468_v6 = vpop.f32.mrf.mxu1  ;;  %v8449_v14 = vpop.f32.mrf.mxu0 }
 0x57a   : > { %9164 = vst.msk [vmem:[%s14654_s30 + $0x260] sm:$0xff] %vm9087_vm0, %v9027_v8  ;;  %v9030_v28 = vmax.f32 %v8894_v27, 0.0  ;;  %v8892_v0 = vadd.f32 %v14928_v62, %v8749_v41  ;;  %v8754_v36 = vadd.f32 %v11421_v45, %v7773_v16  ;;  %v7771_v3 = vadd.f32 %v7468_v6, %v15994_v50  ;;  %v16001_v6 = vld [vmem:[#allocation20_spill] sm:$0xff] }
 0x57b   : > { %v11270_v60 = vpop.f32.mrf.mxu1  ;;  %v11422_v40 = vpop.f32.mrf.mxu0 }
 0x57c   : > { %9167 = vst.msk [vmem:[%s14654_s30 + $0x278] sm:$0xff] %vm9087_vm0, %v9030_v28  ;;  %v9028_v42 = vmax.f32 %v8892_v0, 0.0  ;;  %v8897_v53 = vadd.f32 %v14928_v62, %v8754_v36  ;;  %v8752_v2 = vadd.f32 %v8449_v14, %v7771_v3  ;;  %v7774_v51 = vadd.f32 %v11270_v60, %v15995_v46 }
 0x57d   : > { %v7471_v26 = vpop.f32.mrf.mxu1  ;;  %v8452_v11 = vpop.f32.mrf.mxu0 }
 0x57e   : > { %9165 = vst.msk [vmem:[%s14654_s30 + $0x268] sm:$0xff] %vm9087_vm0, %v9028_v42  ;;  %v9033_v48 = vmax.f32 %v8897_v53, 0.0  ;;  %v8895_v43 = vadd.f32 %v14928_v62, %v8752_v2  ;;  %v8755_v52 = vadd.f32 %v11422_v40, %v7774_v51  ;;  %v7772_v4 = vadd.f32 %v7471_v26, %v15996_v31  ;;  %v16002_v51 = vld [vmem:[#allocation21_spill] sm:$0xff]  ;;  %v16003_v31 = vld [vmem:[#allocation22_spill] sm:$0xff] }
 0x57f   : > { %v11273_v63 = vpop.f32.mrf.mxu1  ;;  %v11425_v44 = vpop.f32.mrf.mxu0 }
 0x580   : > { %9170 = vst.msk [vmem:[%s14654_s30 + $0x290] sm:$0xff] %vm9087_vm0, %v9033_v48  ;;  %v9031_v58 = vmax.f32 %v8895_v43, 0.0  ;;  %v8898_v55 = vadd.f32 %v14928_v62, %v8755_v52  ;;  %v8753_v29 = vadd.f32 %v8452_v11, %v7772_v4  ;;  %v7777_v22 = vadd.f32 %v11273_v63, %v15997_v59  ;;  %v16004_v59 = vld [vmem:[#allocation23_spill] sm:$0xff] }
 0x581   : > { %v7484_v13 = vpop.f32.mrf.mxu1  ;;  %v8465_v1 = vpop.f32.mrf.mxu0 }
 0x582   : > { %9168 = vst.msk [vmem:[%s14654_s30 + $0x280] sm:$0xff] %vm9087_vm0, %v9031_v58  ;;  %v9034_v7 = vmax.f32 %v8898_v55, 0.0  ;;  %v8896_v25 = vadd.f32 %v14928_v62, %v8753_v29  ;;  %v8758_v9 = vadd.f32 %v11425_v44, %v7777_v22  ;;  %v7775_v30 = vadd.f32 %v7484_v13, %v15998_v56  ;;  %v16005_v56 = vld [vmem:[#allocation24_spill] sm:$0xff] }
 0x583   : > { %v11274_v32 = vpop.f32.mrf.mxu1  ;;  %v11426_v21 = vpop.f32.mrf.mxu0 }
 0x584   : > { %9171 = vst.msk [vmem:[%s14654_s30 + $0x298] sm:$0xff] %vm9087_vm0, %v9034_v7  ;;  %v9032_v15 = vmax.f32 %v8896_v25, 0.0  ;;  %v8901_v20 = vadd.f32 %v14928_v62, %v8758_v9  ;;  %v8756_v19 = vadd.f32 %v8465_v1, %v7775_v30  ;;  %v7778_v10 = vadd.f32 %v11274_v32, %v15999_v61  ;;  %v16006_v61 = vld [vmem:[#allocation25_spill] sm:$0xff] }
 0x585   : > { %v7487_v12 = vpop.f32.mrf.mxu1  ;;  %v8468_v47 = vpop.f32.mrf.mxu0 }
 0x586   : > { %9169 = vst.msk [vmem:[%s14654_s30 + $0x288] sm:$0xff] %vm9087_vm0, %v9032_v15  ;;  %v9037_v5 = vmax.f32 %v8901_v20, 0.0  ;;  %v8899_v49 = vadd.f32 %v14928_v62, %v8756_v19  ;;  %v8759_v34 = vadd.f32 %v11426_v21, %v7778_v10  ;;  %v7776_v45 = vadd.f32 %v7487_v12, %v16000_v38  ;;  %v16007_v38 = vld [vmem:[#allocation26_spill] sm:$0xff] }
 0x587   : > { %v11277_v8 = vpop.f32.mrf.mxu1  ;;  %v11429_v27 = vpop.f32.mrf.mxu0 }
 0x588   : > { %9174 = vst.msk [vmem:[%s14654_s30 + $0x2b0] sm:$0xff] %vm9087_vm0, %v9037_v5  ;;  %v9035_v41 = vmax.f32 %v8899_v49, 0.0  ;;  %v8902_v54 = vadd.f32 %v14928_v62, %v8759_v34  ;;  %v8757_v16 = vadd.f32 %v8468_v47, %v7776_v45  ;;  %v7781_v14 = vadd.f32 %v11277_v8, %v16001_v6  ;;  %v16008_v6 = vld [vmem:[#allocation27_spill] sm:$0xff] }
 0x589   : > { %v7500_v28 = vpop.f32.mrf.mxu1  ;;  %v8481_v0 = vpop.f32.mrf.mxu0 }
 0x58a   : > { %9172 = vst.msk [vmem:[%s14654_s30 + $0x2a0] sm:$0xff] %vm9087_vm0, %v9035_v41  ;;  %v9038_v36 = vmax.f32 %v8902_v54, 0.0  ;;  %v8900_v50 = vadd.f32 %v14928_v62, %v8757_v16  ;;  %v8762_v3 = vadd.f32 %v11429_v27, %v7781_v14  ;;  %v7779_v60 = vadd.f32 %v7500_v28, %v14401_v23 }
 0x58b   : > { %v11278_v40 = vpop.f32.mrf.mxu1  ;;  %v11430_v42 = vpop.f32.mrf.mxu0 }
 0x58c   : > { %9175 = vst.msk [vmem:[%s14654_s30 + $0x2b8] sm:$0xff] %vm9087_vm0, %v9038_v36  ;;  %v9036_v53 = vmax.f32 %v8900_v50, 0.0  ;;  %v8905_v2 = vadd.f32 %v14928_v62, %v8762_v3  ;;  %v8760_v46 = vadd.f32 %v8481_v0, %v7779_v60  ;;  %v7782_v26 = vadd.f32 %v11278_v40, %v16002_v51  ;;  %v16009_v60 = vld [vmem:[#allocation28_spill] sm:$0xff] }
 0x58d   : > { %v7503_v11 = vpop.f32.mrf.mxu1  ;;  %v8484_v48 = vpop.f32.mrf.mxu0 }
 0x58e   : > { %9173 = vst.msk [vmem:[%s14654_s30 + $0x2a8] sm:$0xff] %vm9087_vm0, %v9036_v53  ;;  %v9041_v43 = vmax.f32 %v8905_v2, 0.0  ;;  %v8903_v52 = vadd.f32 %v14928_v62, %v8760_v46  ;;  %v8763_v23 = vadd.f32 %v11430_v42, %v7782_v26  ;;  %v7780_v4 = vadd.f32 %v7503_v11, %v16003_v31  ;;  %v16010_v26 = vld [vmem:[#allocation29_spill] sm:$0xff] }
 0x58f   : > { %v11281_v63 = vpop.f32.mrf.mxu1  ;;  %v11433_v44 = vpop.f32.mrf.mxu0 }
 0x590   : > { %9178 = vst.msk [vmem:[%s14654_s30 + $0x2d0] sm:$0xff] %vm9087_vm0, %v9041_v43  ;;  %v9039_v58 = vmax.f32 %v8903_v52, 0.0  ;;  %v8906_v55 = vadd.f32 %v14928_v62, %v8763_v23  ;;  %v8761_v29 = vadd.f32 %v8484_v48, %v7780_v4  ;;  %v7785_v22 = vadd.f32 %v11281_v63, %v16004_v59  ;;  %v16011_v4 = vld [vmem:[#allocation30_spill] sm:$0xff] }
 0x591   : > { %v7516_v13 = vpop.f32.mrf.mxu1  ;;  %v8497_v1 = vpop.f32.mrf.mxu0 }
 0x592   : > { %9176 = vst.msk [vmem:[%s14654_s30 + $0x2c0] sm:$0xff] %vm9087_vm0, %v9039_v58  ;;  %v9042_v7 = vmax.f32 %v8906_v55, 0.0  ;;  %v8904_v25 = vadd.f32 %v14928_v62, %v8761_v29  ;;  %v8766_v9 = vadd.f32 %v11433_v44, %v7785_v22  ;;  %v7783_v30 = vadd.f32 %v7516_v13, %v16005_v56  ;;  %v16012_v22 = vld [vmem:[#allocation31_spill] sm:$0xff] }
 0x593   : > { %v11282_v32 = vpop.f32.mrf.mxu1  ;;  %v11434_v21 = vpop.f32.mrf.mxu0 }
 0x594   : > { %9179 = vst.msk [vmem:[%s14654_s30 + $0x2d8] sm:$0xff] %vm9087_vm0, %v9042_v7  ;;  %v9040_v15 = vmax.f32 %v8904_v25, 0.0  ;;  %v8909_v20 = vadd.f32 %v14928_v62, %v8766_v9  ;;  %v8764_v19 = vadd.f32 %v8497_v1, %v7783_v30  ;;  %v7786_v10 = vadd.f32 %v11282_v32, %v16006_v61  ;;  %v16013_v30 = vld [vmem:[#allocation32_spill] sm:$0xff] }
 0x595   : > { %v7519_v12 = vpop.f32.mrf.mxu1  ;;  %v8500_v47 = vpop.f32.mrf.mxu0 }
 0x596   : > { %9177 = vst.msk [vmem:[%s14654_s30 + $0x2c8] sm:$0xff] %vm9087_vm0, %v9040_v15  ;;  %v9045_v5 = vmax.f32 %v8909_v20, 0.0  ;;  %v8907_v49 = vadd.f32 %v14928_v62, %v8764_v19  ;;  %v8767_v34 = vadd.f32 %v11434_v21, %v7786_v10  ;;  %v7784_v45 = vadd.f32 %v7519_v12, %v16007_v38  ;;  %v16014_v10 = vld [vmem:[#allocation33_spill] sm:$0xff] }
 0x597   : > { %v11285_v8 = vpop.f32.mrf.mxu1  ;;  %v11437_v27 = vpop.f32.mrf.mxu0 }
 0x598   : > { %9182 = vst.msk [vmem:[%s14654_s30 + $0x2f0] sm:$0xff] %vm9087_vm0, %v9045_v5  ;;  %v9043_v41 = vmax.f32 %v8907_v49, 0.0  ;;  %v8910_v54 = vadd.f32 %v14928_v62, %v8767_v34  ;;  %v8765_v16 = vadd.f32 %v8500_v47, %v7784_v45  ;;  %v7789_v14 = vadd.f32 %v11285_v8, %v16008_v6  ;;  %v16015_v45 = vld [vmem:[#allocation34_spill] sm:$0xff] }
 0x599   : > { %v7532_v28 = vpop.f32.mrf.mxu1  ;;  %v8513_v0 = vpop.f32.mrf.mxu0 }
 0x59a   : > { %9180 = vst.msk [vmem:[%s14654_s30 + $0x2e0] sm:$0xff] %vm9087_vm0, %v9043_v41  ;;  %v9046_v36 = vmax.f32 %v8910_v54, 0.0  ;;  %v8908_v50 = vadd.f32 %v14928_v62, %v8765_v16  ;;  %v8770_v3 = vadd.f32 %v11437_v27, %v7789_v14  ;;  %v7787_v40 = vadd.f32 %v7532_v28, %v16009_v60  ;;  %v16016_v14 = vld [vmem:[#allocation35_spill] sm:$0xff] }
 0x59b   : > { %v11286_v42 = vpop.f32.mrf.mxu1  ;;  %v11438_v53 = vpop.f32.mrf.mxu0 }
 0x59c   : > { %9183 = vst.msk [vmem:[%s14654_s30 + $0x2f8] sm:$0xff] %vm9087_vm0, %v9046_v36  ;;  %v9044_v2 = vmax.f32 %v8908_v50, 0.0  ;;  %v8913_v46 = vadd.f32 %v14928_v62, %v8770_v3  ;;  %v8768_v51 = vadd.f32 %v8513_v0, %v7787_v40  ;;  %v7790_v11 = vadd.f32 %v11286_v42, %v16010_v26  ;;  %v16017_v40 = vld [vmem:[#allocation36_spill] sm:$0xff] }
 0x59d   : > { %v7535_v48 = vpop.f32.mrf.mxu1  ;;  %v8516_v43 = vpop.f32.mrf.mxu0 }
 0x59e   : > { %9181 = vst.msk [vmem:[%s14654_s30 + $0x2e8] sm:$0xff] %vm9087_vm0, %v9044_v2  ;;  %v9049_v52 = vmax.f32 %v8913_v46, 0.0  ;;  %v8911_v23 = vadd.f32 %v14928_v62, %v8768_v51  ;;  %v8771_v31 = vadd.f32 %v11438_v53, %v7790_v11  ;;  %v7788_v63 = vadd.f32 %v7535_v48, %v16011_v4  ;;  %v16018_v11 = vld [vmem:[#allocation37_spill] sm:$0xff] }
 0x59f   : > { %v11289_v44 = vpop.f32.mrf.mxu1  ;;  %v11441_v58 = vpop.f32.mrf.mxu0 }
 0x5a0   : > { %9186 = vst.msk [vmem:[%s14654_s30 + $0x310] sm:$0xff] %vm9087_vm0, %v9049_v52  ;;  %v9047_v55 = vmax.f32 %v8911_v23, 0.0  ;;  %v8914_v29 = vadd.f32 %v14928_v62, %v8771_v31  ;;  %v8769_v59 = vadd.f32 %v8516_v43, %v7788_v63  ;;  %v7793_v13 = vadd.f32 %v11289_v44, %v16012_v22  ;;  %v16019_v63 = vld [vmem:[#allocation38_spill] sm:$0xff] }
 0x5a1   : > { %v7548_v1 = vpop.f32.mrf.mxu1  ;;  %v8529_v7 = vpop.f32.mrf.mxu0 }
 0x5a2   : > { %9184 = vst.msk [vmem:[%s14654_s30 + $0x300] sm:$0xff] %vm9087_vm0, %v9047_v55  ;;  %v9050_v25 = vmax.f32 %v8914_v29, 0.0  ;;  %v8912_v9 = vadd.f32 %v14928_v62, %v8769_v59  ;;  %v8774_v56 = vadd.f32 %v11441_v58, %v7793_v13  ;;  %v7791_v32 = vadd.f32 %v7548_v1, %v16013_v30  ;;  %v16020_v13 = vld [vmem:[#allocation39_spill] sm:$0xff] }
 0x5a3   : > { %v11290_v21 = vpop.f32.mrf.mxu1  ;;  %v11442_v15 = vpop.f32.mrf.mxu0 }
 0x5a4   : > { %9187 = vst.msk [vmem:[%s14654_s30 + $0x318] sm:$0xff] %vm9087_vm0, %v9050_v25  ;;  %v9048_v20 = vmax.f32 %v8912_v9, 0.0  ;;  %v8917_v19 = vadd.f32 %v14928_v62, %v8774_v56  ;;  %v8772_v61 = vadd.f32 %v8529_v7, %v7791_v32  ;;  %v7794_v12 = vadd.f32 %v11290_v21, %v16014_v10  ;;  %v16021_v32 = vld [vmem:[#allocation40_spill] sm:$0xff] }
 0x5a5   : > { %v7551_v47 = vpop.f32.mrf.mxu1  ;;  %v8532_v5 = vpop.f32.mrf.mxu0 }
 0x5a6   : > { %9185 = vst.msk [vmem:[%s14654_s30 + $0x308] sm:$0xff] %vm9087_vm0, %v9048_v20  ;;  %v9053_v49 = vmax.f32 %v8917_v19, 0.0  ;;  %v8915_v34 = vadd.f32 %v14928_v62, %v8772_v61  ;;  %v8775_v38 = vadd.f32 %v11442_v15, %v7794_v12  ;;  %v7792_v8 = vadd.f32 %v7551_v47, %v16015_v45  ;;  %v16022_v12 = vld [vmem:[#allocation41_spill] sm:$0xff] }
 0x5a7   : > { %v11293_v27 = vpop.f32.mrf.mxu1  ;;  %v11445_v41 = vpop.f32.mrf.mxu0 }
 0x5a8   : > { %9190 = vst.msk [vmem:[%s14654_s30 + $0x330] sm:$0xff] %vm9087_vm0, %v9053_v49  ;;  %v9051_v54 = vmax.f32 %v8915_v34, 0.0  ;;  %v8918_v16 = vadd.f32 %v14928_v62, %v8775_v38  ;;  %v8773_v6 = vadd.f32 %v8532_v5, %v7792_v8  ;;  %v7797_v28 = vadd.f32 %v11293_v27, %v16016_v14  ;;  %v16023_v8 = vld [vmem:[#allocation42_spill] sm:$0xff] }
 0x5a9   : > { %v7564_v0 = vpop.f32.mrf.mxu1  ;;  %v8545_v36 = vpop.f32.mrf.mxu0 }
 0x5aa   : > { %9188 = vst.msk [vmem:[%s14654_s30 + $0x320] sm:$0xff] %vm9087_vm0, %v9051_v54  ;;  %v9054_v50 = vmax.f32 %v8918_v16, 0.0  ;;  %v8916_v3 = vadd.f32 %v14928_v62, %v8773_v6  ;;  %v8778_v60 = vadd.f32 %v11445_v41, %v7797_v28  ;;  %v7795_v42 = vadd.f32 %v7564_v0, %v16017_v40  ;;  %v16024_v28 = vld [vmem:[#allocation43_spill] sm:$0xff] }
 0x5ab   : > { %v11294_v53 = vpop.f32.mrf.mxu1  ;;  %v11446_v2 = vpop.f32.mrf.mxu0 }
 0x5ac   : > { %9191 = vst.msk [vmem:[%s14654_s30 + $0x338] sm:$0xff] %vm9087_vm0, %v9054_v50  ;;  %v9052_v46 = vmax.f32 %v8916_v3, 0.0  ;;  %v8921_v51 = vadd.f32 %v14928_v62, %v8778_v60  ;;  %v8776_v26 = vadd.f32 %v8545_v36, %v7795_v42  ;;  %v7798_v48 = vadd.f32 %v11294_v53, %v16018_v11  ;;  %v16025_v42 = vld [vmem:[#allocation44_spill] sm:$0xff] }
 0x5ad   : > { %v7567_v43 = vpop.f32.mrf.mxu1  ;;  %v8548_v52 = vpop.f32.mrf.mxu0 }
 0x5ae   : > { %9189 = vst.msk [vmem:[%s14654_s30 + $0x328] sm:$0xff] %vm9087_vm0, %v9052_v46  ;;  %v9057_v23 = vmax.f32 %v8921_v51, 0.0  ;;  %v8919_v31 = vadd.f32 %v14928_v62, %v8776_v26  ;;  %v8779_v4 = vadd.f32 %v11446_v2, %v7798_v48  ;;  %v7796_v44 = vadd.f32 %v7567_v43, %v16019_v63  ;;  %v16026_v48 = vld [vmem:[#allocation45_spill] sm:$0xff] }
 0x5af   : > { %v11297_v58 = vpop.f32.mrf.mxu1  ;;  %v11449_v55 = vpop.f32.mrf.mxu0 }
 0x5b0   : > { %9194 = vst.msk [vmem:[%s14654_s30 + $0x350] sm:$0xff] %vm9087_vm0, %v9057_v23  ;;  %v9055_v29 = vmax.f32 %v8919_v31, 0.0  ;;  %v8922_v59 = vadd.f32 %v14928_v62, %v8779_v4  ;;  %v8777_v22 = vadd.f32 %v8548_v52, %v7796_v44  ;;  %v7801_v1 = vadd.f32 %v11297_v58, %v16020_v13  ;;  %v16027_v44 = vld [vmem:[#allocation46_spill] sm:$0xff] }
 0x5b1   : > { %v7580_v7 = vpop.f32.mrf.mxu1  ;;  %v8561_v25 = vpop.f32.mrf.mxu0 }
 0x5b2   : > { %9192 = vst.msk [vmem:[%s14654_s30 + $0x340] sm:$0xff] %vm9087_vm0, %v9055_v29  ;;  %v9058_v9 = vmax.f32 %v8922_v59, 0.0  ;;  %v8920_v56 = vadd.f32 %v14928_v62, %v8777_v22  ;;  %v8782_v30 = vadd.f32 %v11449_v55, %v7801_v1  ;;  %v7799_v21 = vadd.f32 %v7580_v7, %v16021_v32  ;;  %v16028_v1 = vld [vmem:[#allocation47_spill] sm:$0xff] }
 0x5b3   : > { %v11298_v15 = vpop.f32.mrf.mxu1  ;;  %v11450_v20 = vpop.f32.mrf.mxu0 }
 0x5b4   : > { %9195 = vst.msk [vmem:[%s14654_s30 + $0x358] sm:$0xff] %vm9087_vm0, %v9058_v9  ;;  %v9056_v19 = vmax.f32 %v8920_v56, 0.0  ;;  %v8925_v61 = vadd.f32 %v14928_v62, %v8782_v30  ;;  %v8780_v10 = vadd.f32 %v8561_v25, %v7799_v21  ;;  %v7802_v47 = vadd.f32 %v11298_v15, %v16022_v12  ;;  %v16029_v21 = vld [vmem:[#allocation48_spill] sm:$0xff] }
 0x5b5   : > { %v7583_v5 = vpop.f32.mrf.mxu1  ;;  %v8564_v49 = vpop.f32.mrf.mxu0 }
 0x5b6   : > { %9193 = vst.msk [vmem:[%s14654_s30 + $0x348] sm:$0xff] %vm9087_vm0, %v9056_v19  ;;  %v9061_v34 = vmax.f32 %v8925_v61, 0.0  ;;  %v8923_v38 = vadd.f32 %v14928_v62, %v8780_v10  ;;  %v8783_v45 = vadd.f32 %v11450_v20, %v7802_v47  ;;  %v7800_v27 = vadd.f32 %v7583_v5, %v16023_v8  ;;  %v16030_v47 = vld [vmem:[#allocation50_spill] sm:$0xff] }
 0x5b7   : > { %v11301_v41 = vpop.f32.mrf.mxu1  ;;  %v11453_v54 = vpop.f32.mrf.mxu0 }
 0x5b8   : > { %9198 = vst.msk [vmem:[%s14654_s30 + $0x370] sm:$0xff] %vm9087_vm0, %v9061_v34  ;;  %v9059_v16 = vmax.f32 %v8923_v38, 0.0  ;;  %v8926_v6 = vadd.f32 %v14928_v62, %v8783_v45  ;;  %v8781_v14 = vadd.f32 %v8564_v49, %v7800_v27  ;;  %v7805_v0 = vadd.f32 %v11301_v41, %v16024_v28  ;;  %v16031_v27 = vld [vmem:[#allocation52_spill] sm:$0xff] }
 0x5b9   : > { %v7596_v36 = vpop.f32.mrf.mxu1  ;;  %v8577_v50 = vpop.f32.mrf.mxu0 }
 0x5ba   : > { %9196 = vst.msk [vmem:[%s14654_s30 + $0x360] sm:$0xff] %vm9087_vm0, %v9059_v16  ;;  %v9062_v3 = vmax.f32 %v8926_v6, 0.0  ;;  %v8924_v60 = vadd.f32 %v14928_v62, %v8781_v14  ;;  %v8786_v40 = vadd.f32 %v11453_v54, %v7805_v0  ;;  %v7803_v53 = vadd.f32 %v7596_v36, %v16025_v42  ;;  %v16032_v0 = vld [vmem:[#allocation54_spill] sm:$0xff] }
 0x5bb   : > { %v11302_v2 = vpop.f32.mrf.mxu1  ;;  %v11454_v46 = vpop.f32.mrf.mxu0 }
 0x5bc   : > { %9199 = vst.msk [vmem:[%s14654_s30 + $0x378] sm:$0xff] %vm9087_vm0, %v9062_v3  ;;  %v9060_v51 = vmax.f32 %v8924_v60, 0.0  ;;  %v8929_v26 = vadd.f32 %v14928_v62, %v8786_v40  ;;  %v8784_v11 = vadd.f32 %v8577_v50, %v7803_v53  ;;  %v7806_v43 = vadd.f32 %v11302_v2, %v16026_v48  ;;  %v16033_v53 = vld [vmem:[#allocation56_spill] sm:$0xff] }
 0x5bd   : > { %v7599_v52 = vpop.f32.mrf.mxu1  ;;  %v8580_v23 = vpop.f32.mrf.mxu0 }
 0x5be   : > { %9197 = vst.msk [vmem:[%s14654_s30 + $0x368] sm:$0xff] %vm9087_vm0, %v9060_v51  ;;  %v9065_v31 = vmax.f32 %v8929_v26, 0.0  ;;  %v8927_v4 = vadd.f32 %v14928_v62, %v8784_v11  ;;  %v8787_v63 = vadd.f32 %v11454_v46, %v7806_v43  ;;  %v7804_v58 = vadd.f32 %v7599_v52, %v16027_v44  ;;  %v16034_v43 = vld [vmem:[#allocation58_spill] sm:$0xff] }
 0x5bf   : > { %v11305_v55 = vpop.f32.mrf.mxu1  ;;  %v11457_v29 = vpop.f32.mrf.mxu0 }
 0x5c0   : > { %9202 = vst.msk [vmem:[%s14654_s30 + $0x390] sm:$0xff] %vm9087_vm0, %v9065_v31  ;;  %v9063_v59 = vmax.f32 %v8927_v4, 0.0  ;;  %v8930_v22 = vadd.f32 %v14928_v62, %v8787_v63  ;;  %v8785_v13 = vadd.f32 %v8580_v23, %v7804_v58  ;;  %v7809_v7 = vadd.f32 %v11305_v55, %v16028_v1  ;;  %v16035_v58 = vld [vmem:[#allocation60_spill] sm:$0xff] }
 0x5c1   : > { %v7612_v25 = vpop.f32.mrf.mxu1  ;;  %v8593_v9 = vpop.f32.mrf.mxu0 }
 0x5c2   : > { %9200 = vst.msk [vmem:[%s14654_s30 + $0x380] sm:$0xff] %vm9087_vm0, %v9063_v59  ;;  %v9066_v56 = vmax.f32 %v8930_v22, 0.0  ;;  %v8928_v30 = vadd.f32 %v14928_v62, %v8785_v13  ;;  %v8790_v32 = vadd.f32 %v11457_v29, %v7809_v7  ;;  %v7807_v15 = vadd.f32 %v7612_v25, %v16029_v21  ;;  %v16036_v7 = vld [vmem:[#allocation63_spill] sm:$0xff] }
 0x5c3   : > { %v11306_v20 = vpop.f32.mrf.mxu1  ;;  %v11458_v19 = vpop.f32.mrf.mxu0 }
 0x5c4   : > { %9203 = vst.msk [vmem:[%s14654_s30 + $0x398] sm:$0xff] %vm9087_vm0, %v9066_v56  ;;  %v9064_v61 = vmax.f32 %v8928_v30, 0.0  ;;  %v8933_v10 = vadd.f32 %v14928_v62, %v8790_v32  ;;  %v8788_v12 = vadd.f32 %v8593_v9, %v7807_v15  ;;  %v7810_v5 = vadd.f32 %v11306_v20, %v16030_v47  ;;  %v16037_v47 = vld [vmem:[#allocation65_spill] sm:$0xff] }
 0x5c5   : > { %v7615_v49 = vpop.f32.mrf.mxu1  ;;  %v8596_v34 = vpop.f32.mrf.mxu0 }
 0x5c6   : > { %9201 = vst.msk [vmem:[%s14654_s30 + $0x388] sm:$0xff] %vm9087_vm0, %v9064_v61  ;;  %v9069_v38 = vmax.f32 %v8933_v10, 0.0  ;;  %v8931_v45 = vadd.f32 %v14928_v62, %v8788_v12  ;;  %v8791_v8 = vadd.f32 %v11458_v19, %v7810_v5  ;;  %v7808_v41 = vadd.f32 %v7615_v49, %v16031_v27 }
 0x5c7   : > { %v11309_v54 = vpop.f32.mrf.mxu1  ;;  %v11461_v16 = vpop.f32.mrf.mxu0 }
 0x5c8   : > { %9206 = vst.msk [vmem:[%s14654_s30 + $0x3b0] sm:$0xff] %vm9087_vm0, %v9069_v38  ;;  %v9067_v6 = vmax.f32 %v8931_v45, 0.0  ;;  %v8934_v14 = vadd.f32 %v14928_v62, %v8791_v8  ;;  %v8789_v28 = vadd.f32 %v8596_v34, %v7808_v41  ;;  %v7813_v36 = vadd.f32 %v11309_v54, %v16032_v0  ;;  %v16038_v8 = vld [vmem:[#allocation67_spill] sm:$0xff] }
 0x5c9   : > { %v7628_v50 = vpop.f32.mrf.mxu1  ;;  %v8609_v3 = vpop.f32.mrf.mxu0 }
 0x5ca   : > { %9204 = vst.msk [vmem:[%s14654_s30 + $0x3a0] sm:$0xff] %vm9087_vm0, %v9067_v6  ;;  %v9070_v60 = vmax.f32 %v8934_v14, 0.0  ;;  %v8932_v40 = vadd.f32 %v14928_v62, %v8789_v28  ;;  %v8794_v42 = vadd.f32 %v11461_v16, %v7813_v36  ;;  %v7811_v2 = vadd.f32 %v7628_v50, %v16033_v53 }
 0x5cb   : > { %v11310_v46 = vpop.f32.mrf.mxu1  ;;  %v11462_v51 = vpop.f32.mrf.mxu0 }
 0x5cc   : > { %9207 = vst.msk [vmem:[%s14654_s30 + $0x3b8] sm:$0xff] %vm9087_vm0, %v9070_v60  ;;  %v9068_v26 = vmax.f32 %v8932_v40, 0.0  ;;  %v8937_v11 = vadd.f32 %v14928_v62, %v8794_v42  ;;  %v8792_v48 = vadd.f32 %v8609_v3, %v7811_v2  ;;  %v7814_v52 = vadd.f32 %v11310_v46, %v16034_v43  ;;  %v11634_v46 = vld [vmem:[#allocation4] ss:$0 sm:$0xff] }
 0x5cd   : > { %v7631_v23 = vpop.f32.mrf.mxu1  ;;  %v8612_v31 = vpop.f32.mrf.mxu0 }
 0x5ce   : > { %9205 = vst.msk [vmem:[%s14654_s30 + $0x3a8] sm:$0xff] %vm9087_vm0, %v9068_v26  ;;  %v9073_v4 = vmax.f32 %v8937_v11, 0.0  ;;  %v8935_v63 = vadd.f32 %v14928_v62, %v8792_v48  ;;  %v8795_v44 = vadd.f32 %v11462_v51, %v7814_v52  ;;  %v7812_v55 = vadd.f32 %v7631_v23, %v16035_v58 }
 0x5cf   : > { %v11313_v29 = vpop.f32.mrf.mxu1  ;;  %v11465_v59 = vpop.f32.mrf.mxu0 }
 0x5d0   : > { %9210 = vst.msk [vmem:[%s14654_s30 + $0x3d0] sm:$0xff] %vm9087_vm0, %v9073_v4  ;;  %v9071_v22 = vmax.f32 %v8935_v63, 0.0  ;;  %v8938_v13 = vadd.f32 %v14928_v62, %v8795_v44  ;;  %v8793_v1 = vadd.f32 %v8612_v31, %v7812_v55  ;;  %v7817_v25 = vadd.f32 %v11313_v29, %v16036_v7 }
 0x5d1   : > { %v7644_v9 = vpop.f32.mrf.mxu1  ;;  %v8625_v56 = vpop.f32.mrf.mxu0 }
 0x5d2   : > { %9208 = vst.msk [vmem:[%s14654_s30 + $0x3c0] sm:$0xff] %vm9087_vm0, %v9071_v22  ;;  %v9074_v30 = vmax.f32 %v8938_v13, 0.0  ;;  %v8936_v32 = vadd.f32 %v14928_v62, %v8793_v1  ;;  %v8798_v21 = vadd.f32 %v11465_v59, %v7817_v25  ;;  %v7815_v15 = vadd.f32 %v7644_v9, %v14581_v39 }
 0x5d3   : > { %v11314_v20 = vpop.f32.mrf.mxu1  ;;  %v11466_v19 = vpop.f32.mrf.mxu0 }
 0x5d4   : > { %9211 = vst.msk [vmem:[%s14654_s30 + $0x3d8] sm:$0xff] %vm9087_vm0, %v9074_v30  ;;  %v9072_v61 = vmax.f32 %v8936_v32, 0.0  ;;  %v8941_v10 = vadd.f32 %v14928_v62, %v8798_v21  ;;  %v8796_v12 = vadd.f32 %v8625_v56, %v7815_v15  ;;  %v7818_v5 = vadd.f32 %v11314_v20, %v16037_v47  ;;  %v16039_v15 = vld [vmem:[#allocation69_spill] sm:$0xff] }
 0x5d5   : > { %v7647_v49 = vpop.f32.mrf.mxu1  ;;  %v8628_v34 = vpop.f32.mrf.mxu0 }
 0x5d6   : > { %9209 = vst.msk [vmem:[%s14654_s30 + $0x3c8] sm:$0xff] %vm9087_vm0, %v9072_v61  ;;  %v9077_v38 = vmax.f32 %v8941_v10, 0.0  ;;  %v8939_v45 = vadd.f32 %v14928_v62, %v8796_v12  ;;  %v8799_v39 = vadd.f32 %v11466_v19, %v7818_v5  ;;  %v7816_v27 = vadd.f32 %v7647_v49, %v16038_v8 }
 0x5d7   : > { %v11317_v41 = vpop.f32.mrf.mxu1  ;;  %v11469_v54 = vpop.f32.mrf.mxu0 }
 0x5d8   : > { %9214 = vst.msk [vmem:[%s14654_s30 + $0x3f0] sm:$0xff] %vm9087_vm0, %v9077_v38  ;;  %v9075_v16 = vmax.f32 %v8939_v45, 0.0  ;;  %v8942_v6 = vadd.f32 %v14928_v62, %v8799_v39  ;;  %v8797_v14 = vadd.f32 %v8628_v34, %v7816_v27  ;;  %v7821_v28 = vadd.f32 %v11317_v41, %v14598_v37 }
 0x5d9   : > { %v7660_v0 = vpop.f32.mrf.mxu1  ;;  %v8641_v36 = vpop.f32.mrf.mxu0 }
 0x5da   : > { %9212 = vst.msk [vmem:[%s14654_s30 + $0x3e0] sm:$0xff] %vm9087_vm0, %v9075_v16  ;;  %v9078_v50 = vmax.f32 %v8942_v6, 0.0  ;;  %v8940_v3 = vadd.f32 %v14928_v62, %v8797_v14  ;;  %v8802_v60 = vadd.f32 %v11469_v54, %v7821_v28  ;;  %v7819_v40 = vadd.f32 %v7660_v0, %v14601_v33 }
 0x5db   : > { %v11318_v42 = vpop.f32.mrf.mxu1  ;;  %v11470_v53 = vpop.f32.mrf.mxu0 }
 0x5dc   : > { %9215 = vst.msk [vmem:[%s14654_s30 + $0x3f8] sm:$0xff] %vm9087_vm0, %v9078_v50  ;;  %v9076_v2 = vmax.f32 %v8940_v3, 0.0  ;;  %v8945_v51 = vadd.f32 %v11634_v46, %v8802_v60  ;;  %v8800_v37 = vadd.f32 %v8641_v36, %v7819_v40  ;;  %v7822_v26 = vadd.f32 %v11318_v42, %v14604_v17 }
 0x5dd   : > { %v7663_v11 = vpop.f32.mrf.mxu1  ;;  %v8644_v48 = vpop.f32.mrf.mxu0 }
 0x5de   : > { %9213 = vst.msk [vmem:[%s14654_s30 + $0x3e8] sm:$0xff] %vm9087_vm0, %v9076_v2  ;;  %v9081_v62 = vmax.f32 %v8945_v51, 0.0  ;;  %v8943_v43 = vadd.f32 %v11634_v46, %v8800_v37  ;;  %v8803_v52 = vadd.f32 %v11470_v53, %v7822_v26  ;;  %v7820_v33 = vadd.f32 %v7663_v11, %v14610_v18 }
 0x5df   : > { %v11321_v23 = vpop.f32.mrf.mxu1  ;;  %v11473_v31 = vpop.f32.mrf.mxu0 }
 0x5e0   : > { %9218 = vst.msk [vmem:[%s14654_s30 + $0x410] sm:$0xff] %vm9087_vm0, %v9081_v62  ;;  %v9079_v4 = vmax.f32 %v8943_v43, 0.0  ;;  %v8946_v63 = vadd.f32 %v11634_v46, %v8803_v52  ;;  %v8801_v44 = vadd.f32 %v8644_v48, %v7820_v33  ;;  %v7825_v17 = vadd.f32 %v11321_v23, %v14619_v24 }
 0x5e1   : > { %v7676_v58 = vpop.f32.mrf.mxu1  ;;  %v8657_v55 = vpop.f32.mrf.mxu0 }
 0x5e2   : > { %9216 = vst.msk [vmem:[%s14654_s30 + $0x400] sm:$0xff] %vm9087_vm0, %v9079_v4  ;;  %v9082_v29 = vmax.f32 %v8946_v63, 0.0  ;;  %v8944_v59 = vadd.f32 %v11634_v46, %v8801_v44  ;;  %v8806_v22 = vadd.f32 %v11473_v31, %v7825_v17  ;;  %v7823_v18 = vadd.f32 %v7676_v58, %v14624_v35 }
 0x5e3   : > { %v11322_v13 = vpop.f32.mrf.mxu1  ;;  %v11474_v1 = vpop.f32.mrf.mxu0 }
 0x5e4   : > { %9219 = vst.msk [vmem:[%s14654_s30 + $0x418] sm:$0xff] %vm9087_vm0, %v9082_v29  ;;  %v9080_v7 = vmax.f32 %v8944_v59, 0.0  ;;  %v8949_v25 = vadd.f32 %v11634_v46, %v8806_v22  ;;  %v8804_v9 = vadd.f32 %v8657_v55, %v7823_v18  ;;  %v7826_v24 = vadd.f32 %v11322_v13, %v14627_v57 }
 0x5e5   : > { %v7679_v56 = vpop.f32.mrf.mxu1  ;;  %v8660_v20 = vpop.f32.mrf.mxu0 }
 0x5e6   : > { %9217 = vst.msk [vmem:[%s14654_s30 + $0x408] sm:$0xff] %vm9087_vm0, %v9080_v7  ;;  %v9085_v30 = vmax.f32 %v8949_v25, 0.0  ;;  %v8947_v32 = vadd.f32 %v11634_v46, %v8804_v9  ;;  %v8807_v21 = vadd.f32 %v11474_v1, %v7826_v24  ;;  %v7824_v35 = vadd.f32 %v7679_v56, %v16039_v15 }
 0x5e8   : > { %9222 = vst.msk [vmem:[%s14654_s30 + $0x430] sm:$0xff] %vm9087_vm0, %v9085_v30  ;;  %v9083_v19 = vmax.f32 %v8947_v32, 0.0  ;;  %v8950_v61 = vadd.f32 %v11634_v46, %v8807_v21  ;;  %v8805_v10 = vadd.f32 %v8660_v20, %v7824_v35 }
 0x5ea   : > { %9220 = vst.msk [vmem:[%s14654_s30 + $0x420] sm:$0xff] %vm9087_vm0, %v9083_v19  ;;  %v9086_v12 = vmax.f32 %v8950_v61, 0.0  ;;  %v8948_v47 = vadd.f32 %v11634_v46, %v8805_v10 }
 0x5ec   : > { %9223 = vst.msk [vmem:[%s14654_s30 + $0x438] sm:$0xff] %vm9087_vm0, %v9086_v12  ;;  %v9084_v57 = vmax.f32 %v8948_v47, 0.0 }
 0x5ee   : > { %9221 = vst.msk [vmem:[%s14654_s30 + $0x428] sm:$0xff] %vm9087_vm0, %v9084_v57 }
 0x5ef PF: > { %s17_s17 = sadd.s32 1, %s11743_s17   ;;  %s16040_s12 = smov %s11727_s13 }
 0x5f0   : > { %p14_p12 = scmp.ge.s32.totalorder %s17_s17, 4   ;;  %s16041_s13 = smov %s11731_s14 }
 0x5f1   : > { %s16042_s14 = smov %s11854_s5  ;;  %s16043_s15 = smov %s11739_s16 }
 0x5f2   : > { %s16044_s16 = smov %s16046_s4  ;;  %16 = sbr.rel (!%p14_p12) target bundleno = 5 (0x5), region = 80 }
 0x5f7   :  { %9252 = vsyncpa [#allocation3], 1 }
 0x5f8   :  { %9254 = vsyncpa [#allocation3 + $0x1], 1 }
 0x5f9   :  { %9255 = vsyncpa [#allocation5], 1 }

</bundles_post_ra>
